<compile_context>
chip_gen: v7x
topology: tpu7x:2x2x1
jax: 0.10.0
libtpu: 0.0.40
codegen_flags: <defaults>
</compile_context>

<pallas_src>
import math

import jax
import jax.numpy as jnp
from jax.experimental import pallas as pl
from jax.experimental.pallas import tpu as pltpu


# Synthetic small VGG feature config (last conv must produce 512 channels
# to feed the 512-wide classifier, as in the PyTorch module).
CFG = (16, "M", 512, "M")
IN_CH = 3
NUM_CLASSES = 10
HIDDEN = 512
BN_EPS = 1e-5

H_IN, W_IN = 16, 16            # input spatial size
C1 = 16                        # conv1 true out channels
C1P = 128                      # conv1 out channels padded lane-dense
C2 = 512                       # conv2 out channels
H1, W1 = H_IN, W_IN            # conv1 output spatial
H2, W2 = H1 // 2, W1 // 2      # after first maxpool
H3, W3 = H2 // 2, W2 // 2      # after second maxpool
NC_P = 128                     # num_classes padded to lane width


def vgg_fused_kernel(x_ref,
                     w1_ref, b1_ref, w2_ref, b2_ref,
                     fc1w_ref, fc1b_ref, fc2w_ref, fc2b_ref,
                     fc3w_ref, fc3b_ref,
                     o_ref,
                     xpad1_ref, p1s_ref, xpad2_ref, p2s_ref):
    # ---------------- conv1 (3x3, s1, p1) + folded BN + ReLU ----------------
    # Zero-pad halo in VMEM (no wrapper-side jnp.pad / extra HBM copy).
    xpad1_ref[...] = jnp.zeros_like(xpad1_ref)
    xpad1_ref[1:H1 + 1, 1:W1 + 1, :] = x_ref[0]

    # im2col: one (256, 27) patch slab -> ONE matmul on the MXU.
    t = 0
    for dy in range(3):
        for dx in range(3):
            patch = xpad1_ref[dy:dy + H1, dx:dx + W1, :].reshape(H1 * W1, IN_CH)
            p1s_ref[:, t * IN_CH:(t + 1) * IN_CH] = patch
            t += 1
    patches1 = p1s_ref[...].astype(jnp.bfloat16)                  # (256, 27)
    y1 = jnp.dot(patches1, w1_ref[...],
                 preferred_element_type=jnp.float32)              # (256, 128)
    y1 = jnp.maximum(y1 + b1_ref[...], 0.0)                       # bias + ReLU

    # ---------------- maxpool 2x2 (lane-dense, C=128) -----------------------
    y1r = y1.reshape(H2, 2, W2, 2, C1P)
    pool1 = jnp.maximum(
        jnp.maximum(y1r[:, 0, :, 0, :], y1r[:, 0, :, 1, :]),
        jnp.maximum(y1r[:, 1, :, 0, :], y1r[:, 1, :, 1, :]))      # (8, 8, 128)

    # ---------------- conv2 (3x3, s1, p1) + folded BN + ReLU ----------------
    xpad2_ref[...] = jnp.zeros_like(xpad2_ref)
    xpad2_ref[1:H2 + 1, 1:W2 + 1, :] = pool1

    # im2col: (64, 1152) slab (taps at 128-aligned lane offsets) -> one matmul.
    t = 0
    for dy in range(3):
        for dx in range(3):
            patch = xpad2_ref[dy:dy + H2, dx:dx + W2, :].reshape(H2 * W2, C1P)
            p2s_ref[:, t * C1P:(t + 1) * C1P] = patch
            t += 1
    patches2 = p2s_ref[...].astype(jnp.bfloat16)                  # (64, 1152)
    y2 = jnp.dot(patches2, w2_ref[...],
                 preferred_element_type=jnp.float32)              # (64, 512)
    y2 = jnp.maximum(y2 + b2_ref[...], 0.0)

    # -------- maxpool 2x2 + AdaptiveAvgPool2d((1,1)) + flatten --------------
    y2r = y2.reshape(H3, 2, W3, 2, C2)
    pool2 = jnp.maximum(
        jnp.maximum(y2r[:, 0, :, 0, :], y2r[:, 0, :, 1, :]),
        jnp.maximum(y2r[:, 1, :, 0, :], y2r[:, 1, :, 1, :]))      # (4, 4, 512)
    feat = jnp.sum(pool2.reshape(H3 * W3, C2), axis=0,
                   keepdims=True) * (1.0 / (H3 * W3))             # (1, 512)

    # ---------------- classifier MLP (Dropout = identity in eval) -----------
    h = jnp.dot(feat.astype(jnp.bfloat16), fc1w_ref[...],
                preferred_element_type=jnp.float32)
    h = jnp.maximum(h + fc1b_ref[...], 0.0)
    h = jnp.dot(h.astype(jnp.bfloat16), fc2w_ref[...],
                preferred_element_type=jnp.float32)
    h = jnp.maximum(h + fc2b_ref[...], 0.0)
    logits = jnp.dot(h.astype(jnp.bfloat16), fc3w_ref[...],
                     preferred_element_type=jnp.float32) + fc3b_ref[...]
    o_ref[0] = logits                                             # (1, 128)


def vgg_forward(params, x_nchw):
    # x_nchw: (N, C, H, W) float32, PyTorch convention -> NHWC once here.
    x = jnp.transpose(x_nchw, (0, 2, 3, 1)).astype(jnp.float32)
    N = x.shape[0]

    const2 = lambda n: (0, 0)   # weights/biases: VMEM-resident across grid

    out = pl.pallas_call(
        vgg_fused_kernel,
        grid=(N,),
        in_specs=[
            pl.BlockSpec((1, H_IN, W_IN, IN_CH), lambda n: (n, 0, 0, 0)),
            pl.BlockSpec((9 * IN_CH, C1P), const2),
            pl.BlockSpec((1, C1P), const2),
            pl.BlockSpec((9 * C1P, C2), const2),
            pl.BlockSpec((1, C2), const2),
            pl.BlockSpec((HIDDEN, HIDDEN), const2),
            pl.BlockSpec((1, HIDDEN), const2),
            pl.BlockSpec((HIDDEN, HIDDEN), const2),
            pl.BlockSpec((1, HIDDEN), const2),
            pl.BlockSpec((HIDDEN, NC_P), const2),
            pl.BlockSpec((1, NC_P), const2),
        ],
        out_specs=pl.BlockSpec((1, 1, NC_P), lambda n: (n, 0, 0)),
        out_shape=jax.ShapeDtypeStruct((N, 1, NC_P), jnp.float32),
        scratch_shapes=[
            pltpu.VMEM((H1 + 2, W1 + 2, IN_CH), jnp.float32),     # conv1 halo
            pltpu.VMEM((H1 * W1, 9 * IN_CH), jnp.float32),        # im2col slab 1
            pltpu.VMEM((H2 + 2, W2 + 2, C1P), jnp.float32),       # conv2 halo
            pltpu.VMEM((H2 * W2, 9 * C1P), jnp.float32),          # im2col slab 2
        ],
        # N images shard across TensorCores on v7x; for N==1, tile over output
        # rows instead to keep both cores busy.
        compiler_params=pltpu.CompilerParams(
            dimension_semantics=("parallel",)),
    )(x,
      params["w1"], params["b1"], params["w2"], params["b2"],
      params["fc1_w"], params["fc1_b"], params["fc2_w"], params["fc2_b"],
      params["fc3_w"], params["fc3_b"])

    # Drop the lane-padding of the logits (128 -> num_classes).
    return out.reshape(N, NC_P)[:, :NUM_CLASSES]


# ----------------------------------------------------------------------------
# Parameter construction (deterministic, mirrors init_model; weights are
# pre-reshaped/padded in the wrapper so the kernel sees lane-dense tiles).
# ----------------------------------------------------------------------------
def _xavier_normal_conv(key, kh, kw, cin, cout):
    fan_in = cin * kh * kw
    fan_out = cout * kh * kw
    std = math.sqrt(2.0 / (fan_in + fan_out))
    return std * jax.random.normal(key, (kh, kw, cin, cout), jnp.float32)


def init_vgg_params(key):
    # Fold eval-mode BatchNorm (gamma=1, beta=0, running_mean=0, running_var=1).
    bn_scale = 1.0 / math.sqrt(1.0 + BN_EPS)

    key, k1, k2, k3, k4, k5 = jax.random.split(key, 6)

    # conv1: (3,3,3,16) -> fold BN -> (27,16) -> pad Cout 16->128 -> bf16.
    w1 = _xavier_normal_conv(k1, 3, 3, IN_CH, C1) * bn_scale
    w1 = w1.reshape(9 * IN_CH, C1)
    w1 = jnp.pad(w1, ((0, 0), (0, C1P - C1))).astype(jnp.bfloat16)
    b1 = jnp.zeros((1, C1P), jnp.float32)          # conv bias = 0, BN beta = 0

    # conv2: (3,3,16,512) -> fold BN -> pad Cin 16->128 -> (1152,512) -> bf16.
    w2 = _xavier_normal_conv(k2, 3, 3, C1, C2) * bn_scale
    w2 = jnp.pad(w2, ((0, 0), (0, 0), (0, C1P - C1), (0, 0)))
    w2 = w2.reshape(9 * C1P, C2).astype(jnp.bfloat16)
    b2 = jnp.zeros((1, C2), jnp.float32)

    def lin(k, fin, fout):
        return 0.01 * jax.random.normal(k, (fin, fout), jnp.float32)

    fc1_w = lin(k3, HIDDEN, HIDDEN).astype(jnp.bfloat16)
    fc2_w = lin(k4, HIDDEN, HIDDEN).astype(jnp.bfloat16)
    fc3_w = jnp.pad(lin(k5, HIDDEN, NUM_CLASSES),
                    ((0, 0), (0, NC_P - NUM_CLASSES))).astype(jnp.bfloat16)

    return {
        "w1": w1, "b1": b1, "w2": w2, "b2": b2,
        "fc1_w": fc1_w, "fc1_b": jnp.zeros((1, HIDDEN), jnp.float32),
        "fc2_w": fc2_w, "fc2_b": jnp.zeros((1, HIDDEN), jnp.float32),
        "fc3_w": fc3_w, "fc3_b": jnp.zeros((1, NC_P), jnp.float32),
    }


if __name__ == "__main__":
    root = jax.random.PRNGKey(0)
    k_x, k_p = jax.random.split(root)
    x = jax.random.normal(k_x, (2, IN_CH, H_IN, W_IN), jnp.float32)   # NCHW
    params = init_vgg_params(k_p)

    out = vgg_forward(params, x)
    out = jax.block_until_ready(out)
    assert out.shape == (2, NUM_CLASSES), out.shape
    assert bool(jnp.all(jnp.isfinite(out)))
    print("KERNEL_OK")
</pallas_src>

<mosaic_0001>
module attributes {stable_mosaic.version = 11 : i64} {
  func.func @vgg_fused_kernel(%arg0: i32, %arg1: memref<1x16x16x3xf32, #tpu.memory_space<vmem>>, %arg2: memref<27x128xbf16, #tpu.memory_space<vmem>>, %arg3: memref<1x128xf32, #tpu.memory_space<vmem>>, %arg4: memref<1152x512xbf16, #tpu.memory_space<vmem>>, %arg5: memref<1x512xf32, #tpu.memory_space<vmem>>, %arg6: memref<512x512xbf16, #tpu.memory_space<vmem>>, %arg7: memref<1x512xf32, #tpu.memory_space<vmem>>, %arg8: memref<512x512xbf16, #tpu.memory_space<vmem>>, %arg9: memref<1x512xf32, #tpu.memory_space<vmem>>, %arg10: memref<512x128xbf16, #tpu.memory_space<vmem>>, %arg11: memref<1x128xf32, #tpu.memory_space<vmem>>, %arg12: memref<1x1x128xf32, #tpu.memory_space<vmem>>, %arg13: memref<18x18x3xf32, #tpu.memory_space<vmem>>, %arg14: memref<256x27xf32, #tpu.memory_space<vmem>>, %arg15: memref<10x10x128xf32, #tpu.memory_space<vmem>>, %arg16: memref<64x1152xf32, #tpu.memory_space<vmem>>) attributes {dimension_semantics = [#tpu.dimension_semantics<parallel>], iteration_bounds = array<i64: 2>, scalar_prefetch = 0 : i64, scratch_operands = 4 : i64, tpu.core_type = #tpu.core_type<tc>, window_params = [{transform_indices = @transform_0, window_bounds = array<i64: 1, 16, 16, 3>}, {pipeline_mode = #tpu.pipeline_mode<synchronous>, transform_indices = @transform_1, window_bounds = array<i64: 27, 128>}, {pipeline_mode = #tpu.pipeline_mode<synchronous>, transform_indices = @transform_2, window_bounds = array<i64: 1, 128>}, {pipeline_mode = #tpu.pipeline_mode<synchronous>, transform_indices = @transform_3, window_bounds = array<i64: 1152, 512>}, {pipeline_mode = #tpu.pipeline_mode<synchronous>, transform_indices = @transform_4, window_bounds = array<i64: 1, 512>}, {pipeline_mode = #tpu.pipeline_mode<synchronous>, transform_indices = @transform_5, window_bounds = array<i64: 512, 512>}, {pipeline_mode = #tpu.pipeline_mode<synchronous>, transform_indices = @transform_6, window_bounds = array<i64: 1, 512>}, {pipeline_mode = #tpu.pipeline_mode<synchronous>, transform_indices = @transform_7, window_bounds = array<i64: 512, 512>}, {pipeline_mode = #tpu.pipeline_mode<synchronous>, transform_indices = @transform_8, window_bounds = array<i64: 1, 512>}, {pipeline_mode = #tpu.pipeline_mode<synchronous>, transform_indices = @transform_9, window_bounds = array<i64: 512, 128>}, {pipeline_mode = #tpu.pipeline_mode<synchronous>, transform_indices = @transform_10, window_bounds = array<i64: 1, 128>}, {transform_indices = @transform_11, window_bounds = array<i64: 1, 1, 128>}]} {
    %cst = arith.constant 0.000000e+00 : f32
    %0 = vector.broadcast %cst : f32 to vector<18x18x3xf32>
    %c0 = arith.constant 0 : index
    %c0_0 = arith.constant 0 : index
    %c0_1 = arith.constant 0 : index
    %1 = vector.load %arg13[%c0, %c0_0, %c0_1] : memref<18x18x3xf32, #tpu.memory_space<vmem>>, vector<18x18x3xf32>
    tpu.vector_store %arg13[%c0, %c0_0, %c0_1], %0 {strides = array<i32>} : memref<18x18x3xf32, #tpu.memory_space<vmem>>, vector<18x18x3xf32>,
    %c0_2 = arith.constant 0 : index
    %c0_3 = arith.constant 0 : index
    %c0_4 = arith.constant 0 : index
    %c0_5 = arith.constant 0 : index
    %2 = vector.load %arg1[%c0_2, %c0_3, %c0_4, %c0_5] : memref<1x16x16x3xf32, #tpu.memory_space<vmem>>, vector<1x16x16x3xf32>
    %3 = vector.shape_cast %2 : vector<1x16x16x3xf32> to vector<16x16x3xf32>
    %c1 = arith.constant 1 : index
    %c1_6 = arith.constant 1 : index
    %c0_7 = arith.constant 0 : index
    %4 = vector.load %arg13[%c1, %c1_6, %c0_7] : memref<18x18x3xf32, #tpu.memory_space<vmem>>, vector<16x16x3xf32>
    tpu.vector_store %arg13[%c1, %c1_6, %c0_7], %3 {strides = array<i32>} : memref<18x18x3xf32, #tpu.memory_space<vmem>>, vector<16x16x3xf32>,
    %c0_8 = arith.constant 0 : index
    %c0_9 = arith.constant 0 : index
    %c0_10 = arith.constant 0 : index
    %5 = vector.load %arg13[%c0_8, %c0_9, %c0_10] : memref<18x18x3xf32, #tpu.memory_space<vmem>>, vector<16x16x3xf32>
    %6 = vector.shape_cast %5 : vector<16x16x3xf32> to vector<256x3xf32>
    %c0_11 = arith.constant 0 : index
    %c0_12 = arith.constant 0 : index
    %7 = vector.load %arg14[%c0_11, %c0_12] : memref<256x27xf32, #tpu.memory_space<vmem>>, vector<256x3xf32>
    tpu.vector_store %arg14[%c0_11, %c0_12], %6 {strides = array<i32>} : memref<256x27xf32, #tpu.memory_space<vmem>>, vector<256x3xf32>,
    %c0_13 = arith.constant 0 : index
    %c1_14 = arith.constant 1 : index
    %c0_15 = arith.constant 0 : index
    %8 = vector.load %arg13[%c0_13, %c1_14, %c0_15] : memref<18x18x3xf32, #tpu.memory_space<vmem>>, vector<16x16x3xf32>
    %9 = vector.shape_cast %8 : vector<16x16x3xf32> to vector<256x3xf32>
    %c0_16 = arith.constant 0 : index
    %c3 = arith.constant 3 : index
    %10 = vector.load %arg14[%c0_16, %c3] : memref<256x27xf32, #tpu.memory_space<vmem>>, vector<256x3xf32>
    tpu.vector_store %arg14[%c0_16, %c3], %9 {strides = array<i32>} : memref<256x27xf32, #tpu.memory_space<vmem>>, vector<256x3xf32>,
    %c0_17 = arith.constant 0 : index
    %c2 = arith.constant 2 : index
    %c0_18 = arith.constant 0 : index
    %11 = vector.load %arg13[%c0_17, %c2, %c0_18] : memref<18x18x3xf32, #tpu.memory_space<vmem>>, vector<16x16x3xf32>
    %12 = vector.shape_cast %11 : vector<16x16x3xf32> to vector<256x3xf32>
    %c0_19 = arith.constant 0 : index
    %c6 = arith.constant 6 : index
    %13 = vector.load %arg14[%c0_19, %c6] : memref<256x27xf32, #tpu.memory_space<vmem>>, vector<256x3xf32>
    tpu.vector_store %arg14[%c0_19, %c6], %12 {strides = array<i32>} : memref<256x27xf32, #tpu.memory_space<vmem>>, vector<256x3xf32>,
    %c1_20 = arith.constant 1 : index
    %c0_21 = arith.constant 0 : index
    %c0_22 = arith.constant 0 : index
    %14 = vector.load %arg13[%c1_20, %c0_21, %c0_22] : memref<18x18x3xf32, #tpu.memory_space<vmem>>, vector<16x16x3xf32>
    %15 = vector.shape_cast %14 : vector<16x16x3xf32> to vector<256x3xf32>
    %c0_23 = arith.constant 0 : index
    %c9 = arith.constant 9 : index
    %16 = vector.load %arg14[%c0_23, %c9] : memref<256x27xf32, #tpu.memory_space<vmem>>, vector<256x3xf32>
    tpu.vector_store %arg14[%c0_23, %c9], %15 {strides = array<i32>} : memref<256x27xf32, #tpu.memory_space<vmem>>, vector<256x3xf32>,
    %c1_24 = arith.constant 1 : index
    %c1_25 = arith.constant 1 : index
    %c0_26 = arith.constant 0 : index
    %17 = vector.load %arg13[%c1_24, %c1_25, %c0_26] : memref<18x18x3xf32, #tpu.memory_space<vmem>>, vector<16x16x3xf32>
    %18 = vector.shape_cast %17 : vector<16x16x3xf32> to vector<256x3xf32>
    %c0_27 = arith.constant 0 : index
    %c12 = arith.constant 12 : index
    %19 = vector.load %arg14[%c0_27, %c12] : memref<256x27xf32, #tpu.memory_space<vmem>>, vector<256x3xf32>
    tpu.vector_store %arg14[%c0_27, %c12], %18 {strides = array<i32>} : memref<256x27xf32, #tpu.memory_space<vmem>>, vector<256x3xf32>,
    %c1_28 = arith.constant 1 : index
    %c2_29 = arith.constant 2 : index
    %c0_30 = arith.constant 0 : index
    %20 = vector.load %arg13[%c1_28, %c2_29, %c0_30] : memref<18x18x3xf32, #tpu.memory_space<vmem>>, vector<16x16x3xf32>
    %21 = vector.shape_cast %20 : vector<16x16x3xf32> to vector<256x3xf32>
    %c0_31 = arith.constant 0 : index
    %c15 = arith.constant 15 : index
    %22 = vector.load %arg14[%c0_31, %c15] : memref<256x27xf32, #tpu.memory_space<vmem>>, vector<256x3xf32>
    tpu.vector_store %arg14[%c0_31, %c15], %21 {strides = array<i32>} : memref<256x27xf32, #tpu.memory_space<vmem>>, vector<256x3xf32>,
    %c2_32 = arith.constant 2 : index
    %c0_33 = arith.constant 0 : index
    %c0_34 = arith.constant 0 : index
    %23 = vector.load %arg13[%c2_32, %c0_33, %c0_34] : memref<18x18x3xf32, #tpu.memory_space<vmem>>, vector<16x16x3xf32>
    %24 = vector.shape_cast %23 : vector<16x16x3xf32> to vector<256x3xf32>
    %c0_35 = arith.constant 0 : index
    %c18 = arith.constant 18 : index
    %25 = vector.load %arg14[%c0_35, %c18] : memref<256x27xf32, #tpu.memory_space<vmem>>, vector<256x3xf32>
    tpu.vector_store %arg14[%c0_35, %c18], %24 {strides = array<i32>} : memref<256x27xf32, #tpu.memory_space<vmem>>, vector<256x3xf32>,
    %c2_36 = arith.constant 2 : index
    %c1_37 = arith.constant 1 : index
    %c0_38 = arith.constant 0 : index
    %26 = vector.load %arg13[%c2_36, %c1_37, %c0_38] : memref<18x18x3xf32, #tpu.memory_space<vmem>>, vector<16x16x3xf32>
    %27 = vector.shape_cast %26 : vector<16x16x3xf32> to vector<256x3xf32>
    %c0_39 = arith.constant 0 : index
    %c21 = arith.constant 21 : index
    %28 = vector.load %arg14[%c0_39, %c21] : memref<256x27xf32, #tpu.memory_space<vmem>>, vector<256x3xf32>
    tpu.vector_store %arg14[%c0_39, %c21], %27 {strides = array<i32>} : memref<256x27xf32, #tpu.memory_space<vmem>>, vector<256x3xf32>,
    %c2_40 = arith.constant 2 : index
    %c2_41 = arith.constant 2 : index
    %c0_42 = arith.constant 0 : index
    %29 = vector.load %arg13[%c2_40, %c2_41, %c0_42] : memref<18x18x3xf32, #tpu.memory_space<vmem>>, vector<16x16x3xf32>
    %30 = vector.shape_cast %29 : vector<16x16x3xf32> to vector<256x3xf32>
    %c0_43 = arith.constant 0 : index
    %c24 = arith.constant 24 : index
    %31 = vector.load %arg14[%c0_43, %c24] : memref<256x27xf32, #tpu.memory_space<vmem>>, vector<256x3xf32>
    tpu.vector_store %arg14[%c0_43, %c24], %30 {strides = array<i32>} : memref<256x27xf32, #tpu.memory_space<vmem>>, vector<256x3xf32>,
    %c0_44 = arith.constant 0 : index
    %c0_45 = arith.constant 0 : index
    %32 = vector.load %arg14[%c0_44, %c0_45] : memref<256x27xf32, #tpu.memory_space<vmem>>, vector<256x27xf32>
    %33 = arith.truncf %32 : vector<256x27xf32> to vector<256x27xbf16>
    %c0_46 = arith.constant 0 : index
    %c0_47 = arith.constant 0 : index
    %34 = vector.load %arg2[%c0_46, %c0_47] : memref<27x128xbf16, #tpu.memory_space<vmem>>, vector<27x128xbf16>
    %cst_48 = arith.constant dense<0.000000e+00> : vector<256x128xf32>
    %35 = tpu.matmul %33, %34, %cst_48 {dimension_numbers = #tpu.dot_dimension_numbers<[1], [0], [0], [1], [0, 0, 1, 1], [], []>} : vector<256x27xbf16>, vector<27x128xbf16>, vector<256x128xf32> -> vector<256x128xf32>
    %c0_49 = arith.constant 0 : index
    %c0_50 = arith.constant 0 : index
    %36 = vector.load %arg3[%c0_49, %c0_50] : memref<1x128xf32, #tpu.memory_space<vmem>>, vector<1x128xf32>
    %37 = vector.broadcast %36 : vector<1x128xf32> to vector<256x128xf32>
    %38 = arith.addf %35, %37 : vector<256x128xf32>
    %cst_51 = arith.constant 0.000000e+00 : f32
    %39 = vector.broadcast %cst_51 : f32 to vector<256x128xf32>
    %40 = arith.maximumf %38, %39 : vector<256x128xf32>
    %41 = vector.shape_cast %40 : vector<256x128xf32> to vector<8x2x8x2x128xf32>
    %42 = vector.extract_strided_slice %41 {offsets = [0, 0, 0, 0, 0], sizes = [8, 1, 8, 1, 128], strides = [1, 1, 1, 1, 1]} : vector<8x2x8x2x128xf32> to vector<8x1x8x1x128xf32>
    %43 = vector.shape_cast %42 : vector<8x1x8x1x128xf32> to vector<8x8x128xf32>
    %44 = vector.extract_strided_slice %41 {offsets = [0, 0, 0, 1, 0], sizes = [8, 1, 8, 1, 128], strides = [1, 1, 1, 1, 1]} : vector<8x2x8x2x128xf32> to vector<8x1x8x1x128xf32>
    %45 = vector.shape_cast %44 : vector<8x1x8x1x128xf32> to vector<8x8x128xf32>
    %46 = arith.maximumf %43, %45 : vector<8x8x128xf32>
    %47 = vector.extract_strided_slice %41 {offsets = [0, 1, 0, 0, 0], sizes = [8, 1, 8, 1, 128], strides = [1, 1, 1, 1, 1]} : vector<8x2x8x2x128xf32> to vector<8x1x8x1x128xf32>
    %48 = vector.shape_cast %47 : vector<8x1x8x1x128xf32> to vector<8x8x128xf32>
    %49 = vector.extract_strided_slice %41 {offsets = [0, 1, 0, 1, 0], sizes = [8, 1, 8, 1, 128], strides = [1, 1, 1, 1, 1]} : vector<8x2x8x2x128xf32> to vector<8x1x8x1x128xf32>
    %50 = vector.shape_cast %49 : vector<8x1x8x1x128xf32> to vector<8x8x128xf32>
    %51 = arith.maximumf %48, %50 : vector<8x8x128xf32>
    %52 = arith.maximumf %46, %51 : vector<8x8x128xf32>
    %cst_52 = arith.constant 0.000000e+00 : f32
    %53 = vector.broadcast %cst_52 : f32 to vector<10x10x128xf32>
    %c0_53 = arith.constant 0 : index
    %c0_54 = arith.constant 0 : index
    %c0_55 = arith.constant 0 : index
    %54 = vector.load %arg15[%c0_53, %c0_54, %c0_55] : memref<10x10x128xf32, #tpu.memory_space<vmem>>, vector<10x10x128xf32>
    tpu.vector_store %arg15[%c0_53, %c0_54, %c0_55], %53 {strides = array<i32>} : memref<10x10x128xf32, #tpu.memory_space<vmem>>, vector<10x10x128xf32>,
    %c1_56 = arith.constant 1 : index
    %c1_57 = arith.constant 1 : index
    %c0_58 = arith.constant 0 : index
    %55 = vector.load %arg15[%c1_56, %c1_57, %c0_58] : memref<10x10x128xf32, #tpu.memory_space<vmem>>, vector<8x8x128xf32>
    tpu.vector_store %arg15[%c1_56, %c1_57, %c0_58], %52 {strides = array<i32>} : memref<10x10x128xf32, #tpu.memory_space<vmem>>, vector<8x8x128xf32>,
    %c0_59 = arith.constant 0 : index
    %c0_60 = arith.constant 0 : index
    %c0_61 = arith.constant 0 : index
    %56 = vector.load %arg15[%c0_59, %c0_60, %c0_61] : memref<10x10x128xf32, #tpu.memory_space<vmem>>, vector<8x8x128xf32>
    %57 = vector.shape_cast %56 : vector<8x8x128xf32> to vector<64x128xf32>
    %c0_62 = arith.constant 0 : index
    %c0_63 = arith.constant 0 : index
    %58 = vector.load %arg16[%c0_62, %c0_63] : memref<64x1152xf32, #tpu.memory_space<vmem>>, vector<64x128xf32>
    tpu.vector_store %arg16[%c0_62, %c0_63], %57 {strides = array<i32>} : memref<64x1152xf32, #tpu.memory_space<vmem>>, vector<64x128xf32>,
    %c0_64 = arith.constant 0 : index
    %c1_65 = arith.constant 1 : index
    %c0_66 = arith.constant 0 : index
    %59 = vector.load %arg15[%c0_64, %c1_65, %c0_66] : memref<10x10x128xf32, #tpu.memory_space<vmem>>, vector<8x8x128xf32>
    %60 = vector.shape_cast %59 : vector<8x8x128xf32> to vector<64x128xf32>
    %c0_67 = arith.constant 0 : index
    %c128 = arith.constant 128 : index
    %61 = vector.load %arg16[%c0_67, %c128] : memref<64x1152xf32, #tpu.memory_space<vmem>>, vector<64x128xf32>
    tpu.vector_store %arg16[%c0_67, %c128], %60 {strides = array<i32>} : memref<64x1152xf32, #tpu.memory_space<vmem>>, vector<64x128xf32>,
    %c0_68 = arith.constant 0 : index
    %c2_69 = arith.constant 2 : index
    %c0_70 = arith.constant 0 : index
    %62 = vector.load %arg15[%c0_68, %c2_69, %c0_70] : memref<10x10x128xf32, #tpu.memory_space<vmem>>, vector<8x8x128xf32>
    %63 = vector.shape_cast %62 : vector<8x8x128xf32> to vector<64x128xf32>
    %c0_71 = arith.constant 0 : index
    %c256 = arith.constant 256 : index
    %64 = vector.load %arg16[%c0_71, %c256] : memref<64x1152xf32, #tpu.memory_space<vmem>>, vector<64x128xf32>
    tpu.vector_store %arg16[%c0_71, %c256], %63 {strides = array<i32>} : memref<64x1152xf32, #tpu.memory_space<vmem>>, vector<64x128xf32>,
    %c1_72 = arith.constant 1 : index
    %c0_73 = arith.constant 0 : index
    %c0_74 = arith.constant 0 : index
    %65 = vector.load %arg15[%c1_72, %c0_73, %c0_74] : memref<10x10x128xf32, #tpu.memory_space<vmem>>, vector<8x8x128xf32>
    %66 = vector.shape_cast %65 : vector<8x8x128xf32> to vector<64x128xf32>
    %c0_75 = arith.constant 0 : index
    %c384 = arith.constant 384 : index
    %67 = vector.load %arg16[%c0_75, %c384] : memref<64x1152xf32, #tpu.memory_space<vmem>>, vector<64x128xf32>
    tpu.vector_store %arg16[%c0_75, %c384], %66 {strides = array<i32>} : memref<64x1152xf32, #tpu.memory_space<vmem>>, vector<64x128xf32>,
    %c1_76 = arith.constant 1 : index
    %c1_77 = arith.constant 1 : index
    %c0_78 = arith.constant 0 : index
    %68 = vector.load %arg15[%c1_76, %c1_77, %c0_78] : memref<10x10x128xf32, #tpu.memory_space<vmem>>, vector<8x8x128xf32>
    %69 = vector.shape_cast %68 : vector<8x8x128xf32> to vector<64x128xf32>
    %c0_79 = arith.constant 0 : index
    %c512 = arith.constant 512 : index
    %70 = vector.load %arg16[%c0_79, %c512] : memref<64x1152xf32, #tpu.memory_space<vmem>>, vector<64x128xf32>
    tpu.vector_store %arg16[%c0_79, %c512], %69 {strides = array<i32>} : memref<64x1152xf32, #tpu.memory_space<vmem>>, vector<64x128xf32>,
    %c1_80 = arith.constant 1 : index
    %c2_81 = arith.constant 2 : index
    %c0_82 = arith.constant 0 : index
    %71 = vector.load %arg15[%c1_80, %c2_81, %c0_82] : memref<10x10x128xf32, #tpu.memory_space<vmem>>, vector<8x8x128xf32>
    %72 = vector.shape_cast %71 : vector<8x8x128xf32> to vector<64x128xf32>
    %c0_83 = arith.constant 0 : index
    %c640 = arith.constant 640 : index
    %73 = vector.load %arg16[%c0_83, %c640] : memref<64x1152xf32, #tpu.memory_space<vmem>>, vector<64x128xf32>
    tpu.vector_store %arg16[%c0_83, %c640], %72 {strides = array<i32>} : memref<64x1152xf32, #tpu.memory_space<vmem>>, vector<64x128xf32>,
    %c2_84 = arith.constant 2 : index
    %c0_85 = arith.constant 0 : index
    %c0_86 = arith.constant 0 : index
    %74 = vector.load %arg15[%c2_84, %c0_85, %c0_86] : memref<10x10x128xf32, #tpu.memory_space<vmem>>, vector<8x8x128xf32>
    %75 = vector.shape_cast %74 : vector<8x8x128xf32> to vector<64x128xf32>
    %c0_87 = arith.constant 0 : index
    %c768 = arith.constant 768 : index
    %76 = vector.load %arg16[%c0_87, %c768] : memref<64x1152xf32, #tpu.memory_space<vmem>>, vector<64x128xf32>
    tpu.vector_store %arg16[%c0_87, %c768], %75 {strides = array<i32>} : memref<64x1152xf32, #tpu.memory_space<vmem>>, vector<64x128xf32>,
    %c2_88 = arith.constant 2 : index
    %c1_89 = arith.constant 1 : index
    %c0_90 = arith.constant 0 : index
    %77 = vector.load %arg15[%c2_88, %c1_89, %c0_90] : memref<10x10x128xf32, #tpu.memory_space<vmem>>, vector<8x8x128xf32>
    %78 = vector.shape_cast %77 : vector<8x8x128xf32> to vector<64x128xf32>
    %c0_91 = arith.constant 0 : index
    %c896 = arith.constant 896 : index
    %79 = vector.load %arg16[%c0_91, %c896] : memref<64x1152xf32, #tpu.memory_space<vmem>>, vector<64x128xf32>
    tpu.vector_store %arg16[%c0_91, %c896], %78 {strides = array<i32>} : memref<64x1152xf32, #tpu.memory_space<vmem>>, vector<64x128xf32>,
    %c2_92 = arith.constant 2 : index
    %c2_93 = arith.constant 2 : index
    %c0_94 = arith.constant 0 : index
    %80 = vector.load %arg15[%c2_92, %c2_93, %c0_94] : memref<10x10x128xf32, #tpu.memory_space<vmem>>, vector<8x8x128xf32>
    %81 = vector.shape_cast %80 : vector<8x8x128xf32> to vector<64x128xf32>
    %c0_95 = arith.constant 0 : index
    %c1024 = arith.constant 1024 : index
    %82 = vector.load %arg16[%c0_95, %c1024] : memref<64x1152xf32, #tpu.memory_space<vmem>>, vector<64x128xf32>
    tpu.vector_store %arg16[%c0_95, %c1024], %81 {strides = array<i32>} : memref<64x1152xf32, #tpu.memory_space<vmem>>, vector<64x128xf32>,
    %c0_96 = arith.constant 0 : index
    %c0_97 = arith.constant 0 : index
    %83 = vector.load %arg16[%c0_96, %c0_97] : memref<64x1152xf32, #tpu.memory_space<vmem>>, vector<64x1152xf32>
    %84 = arith.truncf %83 : vector<64x1152xf32> to vector<64x1152xbf16>
    %c0_98 = arith.constant 0 : index
    %c0_99 = arith.constant 0 : index
    %85 = vector.load %arg4[%c0_98, %c0_99] : memref<1152x512xbf16, #tpu.memory_space<vmem>>, vector<1152x512xbf16>
    %cst_100 = arith.constant dense<0.000000e+00> : vector<64x512xf32>
    %86 = tpu.matmul %84, %85, %cst_100 {dimension_numbers = #tpu.dot_dimension_numbers<[1], [0], [0], [1], [0, 0, 1, 1], [], []>} : vector<64x1152xbf16>, vector<1152x512xbf16>, vector<64x512xf32> -> vector<64x512xf32>
    %c0_101 = arith.constant 0 : index
    %c0_102 = arith.constant 0 : index
    %87 = vector.load %arg5[%c0_101, %c0_102] : memref<1x512xf32, #tpu.memory_space<vmem>>, vector<1x512xf32>
    %88 = vector.broadcast %87 : vector<1x512xf32> to vector<64x512xf32>
    %89 = arith.addf %86, %88 : vector<64x512xf32>
    %cst_103 = arith.constant 0.000000e+00 : f32
    %90 = vector.broadcast %cst_103 : f32 to vector<64x512xf32>
    %91 = arith.maximumf %89, %90 : vector<64x512xf32>
    %92 = vector.shape_cast %91 : vector<64x512xf32> to vector<4x2x4x2x512xf32>
    %93 = vector.extract_strided_slice %92 {offsets = [0, 0, 0, 0, 0], sizes = [4, 1, 4, 1, 512], strides = [1, 1, 1, 1, 1]} : vector<4x2x4x2x512xf32> to vector<4x1x4x1x512xf32>
    %94 = vector.shape_cast %93 : vector<4x1x4x1x512xf32> to vector<4x4x512xf32>
    %95 = vector.extract_strided_slice %92 {offsets = [0, 0, 0, 1, 0], sizes = [4, 1, 4, 1, 512], strides = [1, 1, 1, 1, 1]} : vector<4x2x4x2x512xf32> to vector<4x1x4x1x512xf32>
    %96 = vector.shape_cast %95 : vector<4x1x4x1x512xf32> to vector<4x4x512xf32>
    %97 = arith.maximumf %94, %96 : vector<4x4x512xf32>
    %98 = vector.extract_strided_slice %92 {offsets = [0, 1, 0, 0, 0], sizes = [4, 1, 4, 1, 512], strides = [1, 1, 1, 1, 1]} : vector<4x2x4x2x512xf32> to vector<4x1x4x1x512xf32>
    %99 = vector.shape_cast %98 : vector<4x1x4x1x512xf32> to vector<4x4x512xf32>
    %100 = vector.extract_strided_slice %92 {offsets = [0, 1, 0, 1, 0], sizes = [4, 1, 4, 1, 512], strides = [1, 1, 1, 1, 1]} : vector<4x2x4x2x512xf32> to vector<4x1x4x1x512xf32>
    %101 = vector.shape_cast %100 : vector<4x1x4x1x512xf32> to vector<4x4x512xf32>
    %102 = arith.maximumf %99, %101 : vector<4x4x512xf32>
    %103 = arith.maximumf %97, %102 : vector<4x4x512xf32>
    %104 = vector.shape_cast %103 : vector<4x4x512xf32> to vector<16x512xf32>
    %cst_104 = arith.constant dense<0.000000e+00> : vector<512xf32>
    %105 = vector.multi_reduction <add>, %104, %cst_104 [0] : vector<16x512xf32> to vector<512xf32>
    %106 = vector.shape_cast %105 : vector<512xf32> to vector<1x512xf32>
    %cst_105 = arith.constant 6.250000e-02 : f32
    %107 = vector.broadcast %cst_105 : f32 to vector<1x512xf32>
    %108 = arith.mulf %106, %107 : vector<1x512xf32>
    %109 = arith.truncf %108 : vector<1x512xf32> to vector<1x512xbf16>
    %c0_106 = arith.constant 0 : index
    %c0_107 = arith.constant 0 : index
    %110 = vector.load %arg6[%c0_106, %c0_107] : memref<512x512xbf16, #tpu.memory_space<vmem>>, vector<512x512xbf16>
    %cst_108 = arith.constant dense<0.000000e+00> : vector<1x512xf32>
    %111 = tpu.matmul %109, %110, %cst_108 {dimension_numbers = #tpu.dot_dimension_numbers<[1], [0], [0], [1], [0, 0, 1, 1], [], []>} : vector<1x512xbf16>, vector<512x512xbf16>, vector<1x512xf32> -> vector<1x512xf32>
    %c0_109 = arith.constant 0 : index
    %c0_110 = arith.constant 0 : index
    %112 = vector.load %arg7[%c0_109, %c0_110] : memref<1x512xf32, #tpu.memory_space<vmem>>, vector<1x512xf32>
    %113 = arith.addf %111, %112 : vector<1x512xf32>
    %cst_111 = arith.constant 0.000000e+00 : f32
    %114 = vector.broadcast %cst_111 : f32 to vector<1x512xf32>
    %115 = arith.maximumf %113, %114 : vector<1x512xf32>
    %116 = arith.truncf %115 : vector<1x512xf32> to vector<1x512xbf16>
    %c0_112 = arith.constant 0 : index
    %c0_113 = arith.constant 0 : index
    %117 = vector.load %arg8[%c0_112, %c0_113] : memref<512x512xbf16, #tpu.memory_space<vmem>>, vector<512x512xbf16>
    %cst_114 = arith.constant dense<0.000000e+00> : vector<1x512xf32>
    %118 = tpu.matmul %116, %117, %cst_114 {dimension_numbers = #tpu.dot_dimension_numbers<[1], [0], [0], [1], [0, 0, 1, 1], [], []>} : vector<1x512xbf16>, vector<512x512xbf16>, vector<1x512xf32> -> vector<1x512xf32>
    %c0_115 = arith.constant 0 : index
    %c0_116 = arith.constant 0 : index
    %119 = vector.load %arg9[%c0_115, %c0_116] : memref<1x512xf32, #tpu.memory_space<vmem>>, vector<1x512xf32>
    %120 = arith.addf %118, %119 : vector<1x512xf32>
    %cst_117 = arith.constant 0.000000e+00 : f32
    %121 = vector.broadcast %cst_117 : f32 to vector<1x512xf32>
    %122 = arith.maximumf %120, %121 : vector<1x512xf32>
    %123 = arith.truncf %122 : vector<1x512xf32> to vector<1x512xbf16>
    %c0_118 = arith.constant 0 : index
    %c0_119 = arith.constant 0 : index
    %124 = vector.load %arg10[%c0_118, %c0_119] : memref<512x128xbf16, #tpu.memory_space<vmem>>, vector<512x128xbf16>
    %cst_120 = arith.constant dense<0.000000e+00> : vector<1x128xf32>
    %125 = tpu.matmul %123, %124, %cst_120 {dimension_numbers = #tpu.dot_dimension_numbers<[1], [0], [0], [1], [0, 0, 1, 1], [], []>} : vector<1x512xbf16>, vector<512x128xbf16>, vector<1x128xf32> -> vector<1x128xf32>
    %c0_121 = arith.constant 0 : index
    %c0_122 = arith.constant 0 : index
    %126 = vector.load %arg11[%c0_121, %c0_122] : memref<1x128xf32, #tpu.memory_space<vmem>>, vector<1x128xf32>
    %127 = arith.addf %125, %126 : vector<1x128xf32>
    %c0_123 = arith.constant 0 : index
    %c0_124 = arith.constant 0 : index
    %c0_125 = arith.constant 0 : index
    %128 = vector.load %arg12[%c0_123, %c0_124, %c0_125] : memref<1x1x128xf32, #tpu.memory_space<vmem>>, vector<1x1x128xf32>
    %129 = vector.shape_cast %128 : vector<1x1x128xf32> to vector<1x128xf32>
    %130 = vector.shape_cast %127 : vector<1x128xf32> to vector<1x1x128xf32>
    tpu.vector_store %arg12[%c0_123, %c0_124, %c0_125], %130 {strides = array<i32>} : memref<1x1x128xf32, #tpu.memory_space<vmem>>, vector<1x1x128xf32>,
    return
  }
  func.func @transform_0(%arg0: i32) -> (i32, i32, i32, i32) {
    %c0_i32 = arith.constant 0 : i32
    %c0_i32_0 = arith.constant 0 : i32
    %c0_i32_1 = arith.constant 0 : i32
    %c0_i32_2 = arith.constant 0 : i32
    return %arg0, %c0_i32, %c0_i32_0, %c0_i32_1 : i32, i32, i32, i32
  }
  func.func @transform_1(%arg0: i32) -> (i32, i32) {
    %c0_i32 = arith.constant 0 : i32
    %c0_i32_0 = arith.constant 0 : i32
    %c0_i32_1 = arith.constant 0 : i32
    return %c0_i32, %c0_i32_0 : i32, i32
  }
  func.func @transform_2(%arg0: i32) -> (i32, i32) {
    %c0_i32 = arith.constant 0 : i32
    %c0_i32_0 = arith.constant 0 : i32
    %c0_i32_1 = arith.constant 0 : i32
    return %c0_i32, %c0_i32_0 : i32, i32
  }
  func.func @transform_3(%arg0: i32) -> (i32, i32) {
    %c0_i32 = arith.constant 0 : i32
    %c0_i32_0 = arith.constant 0 : i32
    %c0_i32_1 = arith.constant 0 : i32
    return %c0_i32, %c0_i32_0 : i32, i32
  }
  func.func @transform_4(%arg0: i32) -> (i32, i32) {
    %c0_i32 = arith.constant 0 : i32
    %c0_i32_0 = arith.constant 0 : i32
    %c0_i32_1 = arith.constant 0 : i32
    return %c0_i32, %c0_i32_0 : i32, i32
  }
  func.func @transform_5(%arg0: i32) -> (i32, i32) {
    %c0_i32 = arith.constant 0 : i32
    %c0_i32_0 = arith.constant 0 : i32
    %c0_i32_1 = arith.constant 0 : i32
    return %c0_i32, %c0_i32_0 : i32, i32
  }
  func.func @transform_6(%arg0: i32) -> (i32, i32) {
    %c0_i32 = arith.constant 0 : i32
    %c0_i32_0 = arith.constant 0 : i32
    %c0_i32_1 = arith.constant 0 : i32
    return %c0_i32, %c0_i32_0 : i32, i32
  }
  func.func @transform_7(%arg0: i32) -> (i32, i32) {
    %c0_i32 = arith.constant 0 : i32
    %c0_i32_0 = arith.constant 0 : i32
    %c0_i32_1 = arith.constant 0 : i32
    return %c0_i32, %c0_i32_0 : i32, i32
  }
  func.func @transform_8(%arg0: i32) -> (i32, i32) {
    %c0_i32 = arith.constant 0 : i32
    %c0_i32_0 = arith.constant 0 : i32
    %c0_i32_1 = arith.constant 0 : i32
    return %c0_i32, %c0_i32_0 : i32, i32
  }
  func.func @transform_9(%arg0: i32) -> (i32, i32) {
    %c0_i32 = arith.constant 0 : i32
    %c0_i32_0 = arith.constant 0 : i32
    %c0_i32_1 = arith.constant 0 : i32
    return %c0_i32, %c0_i32_0 : i32, i32
  }
  func.func @transform_10(%arg0: i32) -> (i32, i32) {
    %c0_i32 = arith.constant 0 : i32
    %c0_i32_0 = arith.constant 0 : i32
    %c0_i32_1 = arith.constant 0 : i32
    return %c0_i32, %c0_i32_0 : i32, i32
  }
  func.func @transform_11(%arg0: i32) -> (i32, i32, i32) {
    %c0_i32 = arith.constant 0 : i32
    %c0_i32_0 = arith.constant 0 : i32
    %c0_i32_1 = arith.constant 0 : i32
    return %arg0, %c0_i32, %c0_i32_0 : i32, i32, i32
  }
}

</mosaic_0001>

<bundles_post_ra>
// kernel: tpu_custom_call.1
= control target key start
LH: loop header
LB: loop body
LE: loop exit
PB: predicated region body
PF: predicated region fallthrough
CT: control target
= control target key end

     0   :  { %s15092_s0 = inlined_call_operand.vmem [shape: f32[2,16,16,3], index: 0, kind: input, shape index: {}]   ;;  %s15093_s1 = inlined_call_operand.hbm [shape: bf16[27,128], index: 1, kind: input, shape index: {}]   ;;  %s15094_s2 = inlined_call_operand.hbm [shape: f32[1,128], index: 2, kind: input, shape index: {}]   ;;  %s15095_s3 = inlined_call_operand.hbm [shape: bf16[1152,512], index: 3, kind: input, shape index: {}]   ;;  %s15096_s4 = inlined_call_operand.hbm [shape: f32[1,512], index: 4, kind: input, shape index: {}]   ;;  %s15097_s5 = inlined_call_operand.hbm [shape: bf16[512,512], index: 5, kind: input, shape index: {}]   ;;  %s15098_s6 = inlined_call_operand.hbm [shape: f32[1,512], index: 6, kind: input, shape index: {}]   ;;  %s15099_s7 = inlined_call_operand.hbm [shape: bf16[512,512], index: 7, kind: input, shape index: {}]   ;;  %s15100_s8 = inlined_call_operand.hbm [shape: f32[1,512], index: 8, kind: input, shape index: {}]   ;;  %s15101_s9 = inlined_call_operand.hbm [shape: bf16[512,128], index: 9, kind: input, shape index: {}]   ;;  %s15102_s10 = inlined_call_operand.hbm [shape: f32[1,128], index: 10, kind: input, shape index: {}]   ;;  %s15103_s11 = inlined_call_operand.hbm [shape: f32[2,1,128], index: 11, kind: output, shape index: {}]  }
   0x1   :  { %15115 = sst [smem:[#allocation36_spill]] %s15094_s2 }
   0x2   :  { %15116 = sst [smem:[#allocation37_spill]] %s15096_s4 }
   0x3   :  { %16 = vsyncpa [#allocation7], 0 }
   0x4   :  { %17 = vsyncpa [#allocation10], 0 }
   0x5   :  { %18 = vsyncpa [#allocation13], 0 }
   0x6   :  { %19 = vsyncpa [#allocation16], 0 }
   0x7   :  { %20 = vsyncpa [#allocation19], 0 }
   0x8   :  { %21 = vsyncpa [#allocation22], 0 }
   0x9   :  { %22 = vsyncpa [#allocation8], 0 }
   0xa   :  { %24 = vsyncpa [#allocation8 + $0x1], 0  ;;  %s12861_s17 = smov 0   ;;  %s12863_s18 = smov 0  }
   0xb   :  { %s12865_s19 = smov 0   ;;  %s12867_s20 = smov 0  }
   0xc LB: > { %15117 = sst [smem:[#allocation31_spill]] %s12760_s17  ;;  %s12882_s21 = sadd.s32 4294967295, %s12772_s20   ;;  %s12772_s20 = sphi %s12867_s20, %s15167_s20   ;;  %s12768_s19 = sphi %s12865_s19, %s15169_s19   ;;  %s12764_s18 = sphi %s12863_s18, %s15171_s18   ;;  %s12760_s17 = sphi %s12861_s17, %s15170_s17  }
   0xd   : > { %15118 = sst [smem:[#allocation32_spill]] %s12768_s19  ;;  %s10331_s22 = sadd.s32 4294967294, %s12772_s20  }
   0xe   : > { %s12886_s23 = sadd.s32 1, %s12772_s20   ;;  %s273_s24 = sadd.s32 1, %s12768_s19 }
   0xf   : > { %15119 = sst [smem:[#allocation33_spill]] %s12886_s23  ;;  %s270_s25 = ssub.s32 %s12772_s20, %s12886_s23 }
  0x10   : > { %p283_p0 = scmp.ne.s32.totalorder %s12768_s19, %s12764_s18  ;;  %p271_p1 = scmp.eq.s32.totalorder %s270_s25, 0 }
  0x11   : > { %p284_p2 = scmp.eq.s32.totalorder %s12882_s21, 1  ;;  %p289_p3 = scmp.ne.s32.totalorder %s12764_s18, %s12760_s17 }
  0x12   : > { %p290_p4 = scmp.eq.s32.totalorder %s10331_s22, 1  ;;  %p10332_p7 = scmp.ge.s32.totalorder %s12772_s20, 1 }
  0x13   : > { %s12897_s26 = scalar_select %p271_p1, %s12768_s19, %s273_s24  }
  0x14   : > { %p12899_p5 = por %p284_p2, %p283_p0  ;;  %p12903_p6 = por %p290_p4, %p289_p3 }
  0x15   : > { %15120 = sst [smem:[#allocation34_spill]] %s12897_s26  ;;  %p297_p8 = scmp.lt.s32.totalorder %s12772_s20, 3 }
  0x16   : > { %s15121_s27 = scalar_select %p12899_p5, 1, 0 }
  0x17   : > { %s15122_s28 = scalar_select %p12903_p6, 1, 0 }
  0x18   : > { %p15107_p9 = scmp.eq.s32.totalorder %s12882_s21, 0  ;;  %p12910_p10 = pnand %p10332_p7, %p297_p8 }
  0x19   : > { %15123 = sst [smem:[#allocation35_spill]] %s15122_s28  ;;  %s12774_s30 = smov [#allocation9]  }
  0x1a   : > { %s15124_s29 = scalar_select %p12910_p10, 1, 0 }
  0x1b   : > { %s323_s12 = sshll.u32 %s12774_s30, 4  ;;  %p11440_p11 = pneg %p12910_p10  ;;  %s324_s12 = int_to_ptr.vmem [resolvable:$true] %s323_s12 }
  0x1c   : > { %s12775_s13 = smov [#allocation12]   ;;  %s12776_s16 = smov [#allocation15]  }
  0x1d   : > { %s347_s14 = sshll.u32 %s12775_s13, 4  ;;  %p12918_p12 = pnand %p15107_p9, %p11440_p11  ;;  %s12922_s14 = int_to_ptr.vmem [resolvable:$true] %s347_s14 }
  0x1e   : > { %s371_s22 = sshll.u32 %s12776_s16, 4  ;;  %s15126_s2 = sld [smem:[#allocation36_spill]]  ;;  %s12924_s22 = int_to_ptr.vmem [resolvable:$true] %s371_s22 }
  0x1f   : > { %p12934_p0 = pneg %p12918_p12 }
  0x24   : > { %s12406_s30 = scalar_lea.hbm %s15126_s2, 16 }
  0x25   : > { %p12407_p13 = scmp.ne.s32.totalorder %s15126_s2, %s12406_s30  ;;  %p12413_p3 = scmp.lt.u32.totalorder %s12406_s30, %s15126_s2 }
  0x27   : > { %p12409_p1 = pnand %p12934_p0, %p12407_p13 }
  0x29   : > { %p12410_p2 = pneg %p12409_p1 }
  0x2b   : > { %p12415_p4 = pnand %p12413_p3, %p12410_p2 }
  0x2d   : > { %12418 = shalt.err (!%p12415_p4)
}
  0x2e   : > { %s12419_s24 = scalar_lea.vmem %s324_s12, 16  ;;  %s12426_s19 = scalar_lea.vmem %s324_s12, 32 }
  0x2f   : > { %p12420_p7 = scmp.ne.s32.totalorder %s324_s12, %s12419_s24  ;;  %p12427_p9 = scmp.lt.s32.totalorder %s324_s12, %s324_s12 }
  0x30   : > { %p12428_p6 = scmp.lt.s32.totalorder %s12426_s19, %s12419_s24 }
  0x31   : > { %p12422_p8 = pnand %p12420_p7, %p12934_p0 }
  0x32   : > { %p12429_p5 = por %p12428_p6, %p12427_p9 }
  0x33   : > { %p12423_p11 = pneg %p12422_p8 }
  0x35   : > { %p12430_p10 = pnand %p12429_p5, %p12423_p11 }
  0x37   : > { %12433 = shalt.err (!%p12430_p10)
}
  0x38   : > { %11446 = dma.hbm_to_vmem [thread:$0]  (!%p12918_p12), %s15126_s2, 16, %s324_s12, [#allocation10]  }
  0x39   : > { %s15128_s4 = sld [smem:[#allocation37_spill]] }
  0x3f   : > { %s12434_s16 = scalar_lea.hbm %s15128_s4, 64 }
  0x40   : > { %p12435_p13 = scmp.ne.s32.totalorder %s15128_s4, %s12434_s16  ;;  %p12441_p5 = scmp.lt.u32.totalorder %s12434_s16, %s15128_s4 }
  0x42   : > { %p12437_p1 = pnand %p12435_p13, %p12934_p0 }
  0x44   : > { %p12438_p6 = pneg %p12437_p1 }
  0x46   : > { %p12443_p9 = pnand %p12441_p5, %p12438_p6 }
  0x48   : > { %12446 = shalt.err (!%p12443_p9)
}
  0x49   : > { %s12447_s12 = scalar_lea.vmem %s12922_s14, 64  ;;  %p12455_p4 = scmp.lt.s32.totalorder %s12922_s14, %s12922_s14 }
  0x4a   : > { %p12448_p10 = scmp.ne.s32.totalorder %s12922_s14, %s12447_s12  ;;  %p12456_p7 = scmp.lt.s32.totalorder %s12447_s12, %s12447_s12 }
  0x4c   : > { %p12450_p2 = pnand %p12448_p10, %p12934_p0  ;;  %p12457_p8 = por %p12456_p7, %p12455_p4 }
  0x4e   : > { %p12451_p3 = pneg %p12450_p2 }
  0x50   : > { %p12458_p11 = pnand %p12457_p8, %p12451_p3 }
  0x52   : > { %12461 = shalt.err (!%p12458_p11)
}
  0x53   : > { %11452 = dma.hbm_to_vmem [thread:$0]  (!%p12918_p12), %s15128_s4, 64, %s12922_s14, [#allocation13]  }
  0x54   : > { %s12462_s23 = scalar_lea.hbm %s15098_s6, 64 }
  0x55   : > { %p12463_p13 = scmp.ne.s32.totalorder %s15098_s6, %s12462_s23  ;;  %p12469_p5 = scmp.lt.u32.totalorder %s12462_s23, %s15098_s6 }
  0x57   : > { %p12465_p1 = pnand %p12463_p13, %p12934_p0 }
  0x59   : > { %p12466_p6 = pneg %p12465_p1 }
  0x5b   : > { %p12471_p9 = pnand %p12469_p5, %p12466_p6 }
  0x5d   : > { %12474 = shalt.err (!%p12471_p9)
}
  0x5e   : > { %s12475_s14 = scalar_lea.vmem %s12924_s22, 64  ;;  %p12483_p4 = scmp.lt.s32.totalorder %s12924_s22, %s12924_s22 }
  0x5f   : > { %p12476_p10 = scmp.ne.s32.totalorder %s12924_s22, %s12475_s14  ;;  %p12484_p7 = scmp.lt.s32.totalorder %s12475_s14, %s12475_s14 }
  0x61   : > { %p12478_p2 = pnand %p12476_p10, %p12934_p0  ;;  %p12485_p8 = por %p12484_p7, %p12483_p4 }
  0x63   : > { %p12479_p3 = pneg %p12478_p2 }
  0x65   : > { %p12486_p11 = pnand %p12485_p8, %p12479_p3 }
  0x67   : > { %12489 = shalt.err (!%p12486_p11)
}
  0x68   : > { %11458 = dma.hbm_to_vmem [thread:$0]  (!%p12918_p12), %s15098_s6, 64, %s12924_s22, [#allocation16]  }
  0x69   : > { %s12777_s28 = smov [#allocation18]   ;;  %s12778_s25 = smov [#allocation6]  }
  0x6a   : > { %s395_s26 = sshll.u32 %s12777_s28, 4  ;;  %s309_s23 = sshll.u32 %s12778_s25, 4  ;;  %s396_s26 = int_to_ptr.vmem [resolvable:$true] %s395_s26  ;;  %s310_s23 = int_to_ptr.vmem [resolvable:$true] %s309_s23 }
  0x6b   : > { %s12490_s24 = scalar_lea.hbm %s15100_s8, 64 }
  0x6c   : > { %p12491_p13 = scmp.ne.s32.totalorder %s15100_s8, %s12490_s24  ;;  %p12497_p5 = scmp.lt.u32.totalorder %s12490_s24, %s15100_s8 }
  0x6e   : > { %p12493_p1 = pnand %p12491_p13, %p12934_p0 }
  0x70   : > { %p12494_p6 = pneg %p12493_p1 }
  0x72   : > { %p12499_p9 = pnand %p12497_p5, %p12494_p6 }
  0x74   : > { %12502 = shalt.err (!%p12499_p9)
}
  0x75   : > { %s12503_s22 = scalar_lea.vmem %s396_s26, 64  ;;  %p12511_p4 = scmp.lt.s32.totalorder %s396_s26, %s396_s26 }
  0x76   : > { %p12504_p10 = scmp.ne.s32.totalorder %s396_s26, %s12503_s22  ;;  %p12512_p7 = scmp.lt.s32.totalorder %s12503_s22, %s12503_s22 }
  0x78   : > { %p12506_p2 = pnand %p12504_p10, %p12934_p0  ;;  %p12513_p8 = por %p12512_p7, %p12511_p4 }
  0x7a   : > { %p12507_p3 = pneg %p12506_p2 }
  0x7c   : > { %p12514_p11 = pnand %p12513_p8, %p12507_p3 }
  0x7e   : > { %12517 = shalt.err (!%p12514_p11)
}
  0x7f   : > { %11464 = dma.hbm_to_vmem [thread:$0]  (!%p12918_p12), %s15100_s8, 64, %s396_s26, [#allocation19]  }
  0x80   : > { %s12518_s30 = scalar_lea.hbm %s15093_s1, 256 }
  0x81   : > { %p12519_p13 = scmp.ne.s32.totalorder %s15093_s1, %s12518_s30  ;;  %p12525_p5 = scmp.lt.u32.totalorder %s12518_s30, %s15093_s1 }
  0x83   : > { %p12521_p1 = pnand %p12519_p13, %p12934_p0 }
  0x85   : > { %p12522_p6 = pneg %p12521_p1 }
  0x87   : > { %p12527_p9 = pnand %p12525_p5, %p12522_p6 }
  0x89   : > { %12530 = shalt.err (!%p12527_p9)
}
  0x8a   : > { %s12531_s12 = scalar_lea.vmem %s310_s23, 256  ;;  %p12539_p4 = scmp.lt.s32.totalorder %s310_s23, %s310_s23 }
  0x8b   : > { %p12532_p10 = scmp.ne.s32.totalorder %s310_s23, %s12531_s12  ;;  %p12540_p7 = scmp.lt.s32.totalorder %s12531_s12, %s12531_s12 }
  0x8d   : > { %p12534_p2 = pnand %p12532_p10, %p12934_p0  ;;  %p12541_p8 = por %p12540_p7, %p12539_p4 }
  0x8f   : > { %p12535_p3 = pneg %p12534_p2 }
  0x91   : > { %p12542_p11 = pnand %p12541_p8, %p12535_p3 }
  0x93   : > { %12545 = shalt.err (!%p12542_p11)
}
  0x94   : > { %s15112_s26 = smov 64   ;;  %s15113_s22 = smov 4  }
  0x95   : > { %11443 = dma.hbm_to_vmem [thread:$0]  (!%p12918_p12), %s15093_s1, 256, %s310_s23, [#allocation7], %s15112_s26, %s15112_s26, %s15113_s22  }
  0x96   : > { %s12781_s2 = smov [#allocation11]   ;;  %s12546_s24 = scalar_lea.hbm %s15095_s3, 36864 }
  0x97   : > { %s333_s25 = sshll.u32 %s12781_s2, 4  ;;  %p12547_p13 = scmp.ne.s32.totalorder %s15095_s3, %s12546_s24  ;;  %s334_s25 = int_to_ptr.vmem [resolvable:$true] %s333_s25 }
  0x98   : > { %p12553_p5 = scmp.lt.u32.totalorder %s12546_s24, %s15095_s3 }
  0x99   : > { %p12549_p1 = pnand %p12547_p13, %p12934_p0 }
  0x9b   : > { %p12550_p6 = pneg %p12549_p1 }
  0x9d   : > { %p12555_p9 = pnand %p12553_p5, %p12550_p6 }
  0x9f   : > { %12558 = shalt.err (!%p12555_p9)
}
  0xa0   : > { %s12559_s23 = scalar_lea.vmem %s334_s25, 36864  ;;  %p12567_p4 = scmp.lt.s32.totalorder %s334_s25, %s334_s25 }
  0xa1   : > { %p12560_p10 = scmp.ne.s32.totalorder %s334_s25, %s12559_s23  ;;  %p12568_p7 = scmp.lt.s32.totalorder %s12559_s23, %s12559_s23 }
  0xa3   : > { %p12562_p2 = pnand %p12560_p10, %p12934_p0  ;;  %p12569_p8 = por %p12568_p7, %p12567_p4 }
  0xa5   : > { %p12563_p3 = pneg %p12562_p2 }
  0xa7   : > { %p12570_p11 = pnand %p12569_p8, %p12563_p3 }
  0xa9   : > { %12573 = shalt.err (!%p12570_p11)
}
  0xaa   : > { %s12782_s17 = smov 256   ;;  %s12783_s28 = smov 16  }
  0xab   : > { %11449 = dma.hbm_to_vmem [thread:$0]  (!%p12918_p12), %s15095_s3, 36864, %s334_s25, [#allocation10], %s12782_s17, %s12782_s17, %s12783_s28  }
  0xac   : > { %s12784_s30 = smov [#allocation14]   ;;  %s12785_s24 = smov [#allocation17]  }
  0xad   : > { %s357_s16 = sshll.u32 %s12784_s30, 4  ;;  %s381_s19 = sshll.u32 %s12785_s24, 4  ;;  %s358_s16 = int_to_ptr.vmem [resolvable:$true] %s357_s16  ;;  %s13056_s19 = int_to_ptr.vmem [resolvable:$true] %s381_s19 }
  0xae   : > { %s12574_s23 = scalar_lea.hbm %s15097_s5, 16384 }
  0xaf   : > { %p12575_p13 = scmp.ne.s32.totalorder %s15097_s5, %s12574_s23  ;;  %p12581_p5 = scmp.lt.u32.totalorder %s12574_s23, %s15097_s5 }
  0xb1   : > { %p12577_p1 = pnand %p12575_p13, %p12934_p0 }
  0xb3   : > { %p12578_p6 = pneg %p12577_p1 }
  0xb5   : > { %p12583_p9 = pnand %p12581_p5, %p12578_p6 }
  0xb7   : > { %12586 = shalt.err (!%p12583_p9)
}
  0xb8   : > { %s12587_s2 = scalar_lea.vmem %s358_s16, 16384  ;;  %p12595_p4 = scmp.lt.s32.totalorder %s358_s16, %s358_s16 }
  0xb9   : > { %p12588_p10 = scmp.ne.s32.totalorder %s358_s16, %s12587_s2  ;;  %p12596_p7 = scmp.lt.s32.totalorder %s12587_s2, %s12587_s2 }
  0xbb   : > { %p12590_p2 = pnand %p12588_p10, %p12934_p0  ;;  %p12597_p8 = por %p12596_p7, %p12595_p4 }
  0xbd   : > { %p12591_p3 = pneg %p12590_p2 }
  0xbf   : > { %p12598_p11 = pnand %p12597_p8, %p12591_p3 }
  0xc1   : > { %12601 = shalt.err (!%p12598_p11)
}
  0xc2   : > { %11455 = dma.hbm_to_vmem [thread:$0]  (!%p12918_p12), %s15097_s5, 16384, %s358_s16, [#allocation13], %s12782_s17, %s12782_s17, %s12783_s28  }
  0xc3   : > { %s12602_s14 = scalar_lea.hbm %s15099_s7, 16384 }
  0xc4   : > { %p12603_p13 = scmp.ne.s32.totalorder %s15099_s7, %s12602_s14  ;;  %p12609_p5 = scmp.lt.u32.totalorder %s12602_s14, %s15099_s7 }
  0xc6   : > { %p12605_p1 = pnand %p12603_p13, %p12934_p0 }
  0xc8   : > { %p12606_p6 = pneg %p12605_p1 }
  0xca   : > { %p12611_p9 = pnand %p12609_p5, %p12606_p6 }
  0xcc   : > { %12614 = shalt.err (!%p12611_p9)
}
  0xcd   : > { %s12615_s16 = scalar_lea.vmem %s13056_s19, 16384  ;;  %p12623_p4 = scmp.lt.s32.totalorder %s13056_s19, %s13056_s19 }
  0xce   : > { %p12616_p10 = scmp.ne.s32.totalorder %s13056_s19, %s12615_s16  ;;  %p12624_p7 = scmp.lt.s32.totalorder %s12615_s16, %s12615_s16 }
  0xd0   : > { %p12618_p2 = pnand %p12616_p10, %p12934_p0  ;;  %p12625_p8 = por %p12624_p7, %p12623_p4 }
  0xd2   : > { %p12619_p3 = pneg %p12618_p2 }
  0xd4   : > { %p12626_p11 = pnand %p12625_p8, %p12619_p3 }
  0xd6   : > { %12629 = shalt.err (!%p12626_p11)
}
  0xd7   : > { %11461 = dma.hbm_to_vmem [thread:$0]  (!%p12918_p12), %s15099_s7, 16384, %s13056_s19, [#allocation16], %s12782_s17, %s12782_s17, %s12783_s28  }
  0xd8   : > { %s12786_s22 = smov [#allocation20]   ;;  %s12787_s24 = smov [#allocation21]  }
  0xd9   : > { %s405_s30 = sshll.u32 %s12786_s22, 4  ;;  %s419_s14 = sshll.u32 %s12787_s24, 4  ;;  %s406_s30 = int_to_ptr.vmem [resolvable:$true] %s405_s30  ;;  %s13105_s14 = int_to_ptr.vmem [resolvable:$true] %s419_s14 }
  0xda   : > { %s12630_s4 = scalar_lea.hbm %s15101_s9, 4096 }
  0xdb   : > { %p12631_p13 = scmp.ne.s32.totalorder %s15101_s9, %s12630_s4  ;;  %p12637_p5 = scmp.lt.u32.totalorder %s12630_s4, %s15101_s9 }
  0xdd   : > { %p12633_p1 = pnand %p12631_p13, %p12934_p0 }
  0xdf   : > { %p12634_p6 = pneg %p12633_p1 }
  0xe1   : > { %p12639_p9 = pnand %p12637_p5, %p12634_p6 }
  0xe3   : > { %12642 = shalt.err (!%p12639_p9)
}
  0xe4   : > { %s12643_s28 = scalar_lea.vmem %s406_s30, 4096  ;;  %p12651_p4 = scmp.lt.s32.totalorder %s406_s30, %s406_s30 }
  0xe5   : > { %p12644_p10 = scmp.ne.s32.totalorder %s406_s30, %s12643_s28  ;;  %p12652_p7 = scmp.lt.s32.totalorder %s12643_s28, %s12643_s28 }
  0xe7   : > { %p12646_p2 = pnand %p12644_p10, %p12934_p0  ;;  %p12653_p8 = por %p12652_p7, %p12651_p4 }
  0xe9   : > { %p12647_p3 = pneg %p12646_p2 }
  0xeb   : > { %p12654_p11 = pnand %p12653_p8, %p12647_p3 }
  0xed   : > { %12657 = shalt.err (!%p12654_p11)
}
  0xee   : > { %s15129_s19 = smov 4   ;;  %s15130_s26 = smov 64  }
  0xef   : > { %11467 = dma.hbm_to_vmem [thread:$0]  (!%p12918_p12), %s15101_s9, 4096, %s406_s30, [#allocation19], %s15130_s26, %s15130_s26, %s15129_s19  }
  0xf0   : > { %s12658_s4 = scalar_lea.hbm %s15102_s10, 16 }
  0xf1   : > { %p12659_p13 = scmp.ne.s32.totalorder %s15102_s10, %s12658_s4  ;;  %p12665_p5 = scmp.lt.u32.totalorder %s12658_s4, %s15102_s10 }
  0xf3   : > { %p12661_p1 = pnand %p12659_p13, %p12934_p0 }
  0xf5   : > { %p12662_p6 = pneg %p12661_p1 }
  0xf7   : > { %p12667_p9 = pnand %p12665_p5, %p12662_p6 }
  0xf9   : > { %12670 = shalt.err (!%p12667_p9)
}
  0xfa   : > { %s12671_s30 = scalar_lea.vmem %s13105_s14, 16  ;;  %s12678_s28 = scalar_lea.vmem %s13105_s14, 32 }
  0xfb   : > { %p12672_p10 = scmp.ne.s32.totalorder %s13105_s14, %s12671_s30  ;;  %p12679_p4 = scmp.lt.s32.totalorder %s13105_s14, %s13105_s14 }
  0xfc   : > { %p12680_p7 = scmp.lt.s32.totalorder %s12678_s28, %s12671_s30 }
  0xfd   : > { %p12674_p2 = pnand %p12672_p10, %p12934_p0 }
  0xfe   : > { %p12681_p8 = por %p12680_p7, %p12679_p4 }
  0xff   : > { %p12675_p3 = pneg %p12674_p2 }
 0x101   : > { %p12682_p11 = pnand %p12681_p8, %p12675_p3 }
 0x103   : > { %12685 = shalt.err (!%p12682_p11)
}
 0x104   : > { %11470 = dma.hbm_to_vmem [thread:$0]  (!%p12918_p12), %s15102_s10, 16, %s13105_s14, [#allocation22]  }
 0x105   : > { %p15131_p13 = scmp.ne.s32.totalorder %s15124_s29, 0 }
 0x106   : > { %p15132_p0 = scmp.eq.s32.totalorder (!%p15131_p13), %s12882_s21, 0 }
 0x107   : > { %440 = sbr.rel (%p15131_p13) target bundleno = 2443 (0x98b), region = 64 }
 0x10e   : > { %12731 = dma.done.wait (%p15132_p0), [#allocation7], 256   ;;  %p15133_p1 = pmov %p15132_p0 }
 0x10f   : > { %p15134_p6 = pmov %p15132_p0 }
 0x110   : > { %12733 = vsyncadd (%p15133_p1), [#allocation7], 4294967040 }
 0x111   : > { %12735 = dma.done.wait (%p15134_p6), [#allocation10], 36880   ;;  %p15135_p5 = pmov %p15132_p0 }
 0x112   : > { %p15136_p9 = pmov %p15132_p0 }
 0x113   : > { %12737 = vsyncadd (%p15135_p5), [#allocation10], 4294930416 }
 0x114   : > { %12739 = dma.done.wait (%p15136_p9), [#allocation13], 16448   ;;  %p15137_p12 = pmov %p15132_p0 }
 0x115   : > { %p15138_p10 = pmov %p15132_p0 }
 0x116   : > { %12741 = vsyncadd (%p15137_p12), [#allocation13], 4294950848 }
 0x117   : > { %12743 = dma.done.wait (%p15138_p10), [#allocation16], 16448   ;;  %p15139_p2 = pmov %p15132_p0 }
 0x118   : > { %p15140_p3 = pmov %p15132_p0 }
 0x119   : > { %12745 = vsyncadd (%p15139_p2), [#allocation16], 4294950848 }
 0x11a   : > { %12747 = dma.done.wait (%p15140_p3), [#allocation19], 4160   ;;  %p15141_p4 = pmov %p15132_p0 }
 0x11b   : > { %p15142_p7 = pmov %p15132_p0 }
 0x11c   : > { %12749 = vsyncadd (%p15141_p4), [#allocation19], 4294963136 }
 0x11d   : > { %12751 = dma.done.wait (%p15142_p7), [#allocation22], 16   ;;  %p15143_p8 = pmov %p15132_p0 }
 0x11e   : > { %vm521_vm0 = vcmask 23552   ;;  %vm524_vm1 = vcmask 17408   ;;  %v12788_v0 = vmov 0.0   ;;  %p515_p11 = scmp.lt.s32.totalorder %s12882_s21, 1  ;;  %s12789_s24 = smov 3   ;;  %v11554_v45 = vld [vmem:[#allocation6] sm:$0xff]  }
 0x11f   : > { %12753 = vsyncadd (%p15143_p8), [#allocation22], 4294967280  ;;  %522 = vst.msk [vmem:[#allocation2] sm:$0xff] %vm521_vm0, %v12788_v0  ;;  %s12790_s12 = smov 6   ;;  %s12791_s23 = smov 9   ;;  %vm2370_vm2 = vcmask 1044480   ;;  %11178 = vmatprep.subr.bf16.mxu0 %v11554_v45 }
 0x120   : > { %523 = vst.msk [vmem:[#allocation2 + $0x8] sm:$0xff] %vm521_vm0, %v12788_v0  ;;  %526 = vst.msk [vmem:[#allocation2 + $0x18] sm:$0xff] %vm521_vm0, %v12788_v0  ;;  %s516_s29 = scalar_select %p515_p11, %s12882_s21, 1  ;;  %v11555_v46 = vld [vmem:[#allocation6 + $0x8] sm:$0x3f]   ;;  %vm2371_vm3 = vcmask 1045504   ;;  %11179 = vmatpush3.bf16.msra.mxu0 %v11554_v45 }
 0x121   : > { %527 = vst.msk [vmem:[#allocation2 + $0x20] sm:$0xff] %vm521_vm0, %v12788_v0  ;;  %529 = vst.msk [vmem:[#allocation2 + $0x30] sm:$0xff] %vm521_vm0, %v12788_v0  ;;  %s12792_s4 = smov 12   ;;  %s12793_s25 = smov 15   ;;  %v12796_v47 = vmov 65535   ;;  %vm866_vm4 = vcmask 48152  }
 0x122   : > { %530 = vst.msk [vmem:[#allocation2 + $0x38] sm:$0xff] %vm521_vm0, %v12788_v0  ;;  %532 = vst.msk [vmem:[#allocation2 + $0x48] sm:$0xff] %vm521_vm0, %v12788_v0  ;;  %s11115_s15 = sshll.u32 %s516_s29, 8  ;;  %s12794_s16 = smov 18   ;;  %v2372_v48 = vsel %vm2370_vm2, 4294967295, %v12796_v47  ;;  %vm1059_vm5 = vcmask 72752  }
 0x123   : > { %533 = vst.msk [vmem:[#allocation2 + $0x50] sm:$0xff] %vm521_vm0, %v12788_v0  ;;  %535 = vst.msk [vmem:[#allocation2 + $0x60] sm:$0xff] %vm521_vm0, %v12788_v0  ;;  %s13311_s22 = scalar_lea.vmem %s15092_s0, %s11115_s15  ;;  %s12795_s2 = smov 21   ;;  %v2373_v49 = vsel %vm2371_vm3, %v2372_v48, 0  ;;  %vm1252_vm6 = vcmask 97352   ;;  %vm1445_vm7 = vcmask 121952  }
 0x124   : > { %536 = vst.msk [vmem:[#allocation2 + $0x68] sm:$0xff] %vm521_vm0, %v12788_v0  ;;  %538 = vst.msk [vmem:[#allocation2 + $0x78] sm:$0xff] %vm521_vm0, %v12788_v0  ;;  %v577_v1 = vld [vmem:[%s13311_s22] sm:$0xff]  ;;  %v578_v2 = vld [vmem:[%s13311_s22 + $0x8] sm:$0xff]  ;;  %v2375_v50 = vand.u32 %v11555_v46, %v2373_v49  ;;  %s12797_s17 = smov 24   ;;  %vm1638_vm8 = vcmask 146552  }
 0x125   : > { %539 = vst.msk [vmem:[#allocation2 + $0x80] sm:$0xff] %vm521_vm0, %v12788_v0  ;;  %541 = vst.msk [vmem:[#allocation2 + $0x90] sm:$0xff] %vm521_vm0, %v12788_v0  ;;  %v579_v3 = vld [vmem:[%s13311_s22 + $0x10] sm:$0xff]  ;;  %v580_v7 = vld [vmem:[%s13311_s22 + $0x18] sm:$0xff]  ;;  %vm1832_vm9 = vcmask 171152   ;;  %vm2025_vm10 = vcmask 195752  }
 0x126   : > { %542 = vst.msk [vmem:[#allocation2 + $0x98] sm:$0xff] %vm521_vm0, %v12788_v0  ;;  %544 = vst.msk [vmem:[#allocation2 + $0xa8] sm:$0xff] %vm521_vm0, %v12788_v0  ;;  %v581_v8 = vld [vmem:[%s13311_s22 + $0x20] sm:$0xff]  ;;  %v582_v9 = vld [vmem:[%s13311_s22 + $0x28] sm:$0xff]  ;;  %11180 = vmatprep.subr.bf16.mxu0 %v2375_v50  ;;  %vm2218_vm11 = vcmask 220352   ;;  %vm2321_vm12 = vcmask 220160  }
 0x127   : > { %545 = vst.msk [vmem:[#allocation2 + $0xb0] sm:$0xff] %vm521_vm0, %v12788_v0  ;;  %547 = vst.msk [vmem:[#allocation2 + $0xc0] sm:$0xff] %vm521_vm0, %v12788_v0  ;;  %v706_v4 = vld [vmem:[#allocation2 + $0x1] sm:$0xff]  ;;  %v583_v10 = vld [vmem:[%s13311_s22 + $0x30] sm:$0xff]  ;;  %11181 = vmatpush3.bf16.msra.mxu0 %v2375_v50  ;;  %vm4190_vm13 = vcmask 1041409   ;;  %vm4192_vm14 = vcmask 1042434  }
 0x128   : > { %548 = vst.msk [vmem:[#allocation2 + $0xc8] sm:$0xff] %vm521_vm0, %v12788_v0  ;;  %550 = vst.msk [vmem:[#allocation2 + $0xd8] sm:$0xff] %vm521_vm0, %v12788_v0  ;;  %770 = vrot.lane.b32.xlu0 %v706_v4, %s12789_s24  ;;  %v584_v11 = vld [vmem:[%s13311_s22 + $0x38] sm:$0xff]  ;;  %v585_v12 = vld [vmem:[%s13311_s22 + $0x40] sm:$0xff]  ;;  %vm15114_vm15 = vcmask 1043459   ;;  %vm4198_vm2 = vcmask 1045509  }
 0x129   : > { %551 = vst.msk [vmem:[#allocation2 + $0xe0] sm:$0xff] %vm521_vm0, %v12788_v0  ;;  %553 = vst.msk [vmem:[#allocation2 + $0xf0] sm:$0xff] %vm521_vm0, %v12788_v0  ;;  %v586_v13 = vld [vmem:[%s13311_s22 + $0x48] sm:$0xff]  ;;  %v642_v14 = vld [vmem:[#allocation2] sm:$0xff]  ;;  %vm4200_vm3 = vcmask 1046534   ;;  %s513_s30 = sand.u32 1, %s12764_s18  }
 0x12a   : > { %554 = vst.msk [vmem:[#allocation2 + $0xf8] sm:$0xff] %vm521_vm0, %v12788_v0  ;;  %556 = vst.msk [vmem:[#allocation2 + $0x108] sm:$0xff] %vm521_vm0, %v12788_v0  ;;  %v899_v15 = vld [vmem:[#allocation2 + $0x2] sm:$0xff]  ;;  %v587_v31 = vld [vmem:[%s13311_s22 + $0x50] sm:$0xff]  ;;  %s11112_s28 = sshll.u32 %s12882_s21, 4  ;;  %s514_s19 = scalar_lea.vmem [#allocation23], %s513_s30 }
 0x12b   : > { %557 = vst.msk [vmem:[#allocation2 + $0x110] sm:$0xff] %vm521_vm0, %v12788_v0  ;;  %559 = vst.msk [vmem:[#allocation2 + $0x120] sm:$0xff] %vm521_vm0, %v12788_v0  ;;  %v643_v16 = vld [vmem:[#allocation2 + $0x8] sm:$0xff]  ;;  %v588_v32 = vld [vmem:[%s13311_s22 + $0x58] sm:$0xff]  ;;  %s10178_s26 = sshll.u32 %s514_s19, 4  ;;  %s15050_s13 = scalar_lea.hbm %s15103_s11, %s11112_s28  ;;  %s15052_s26 = int_to_ptr.vmem [resolvable:$true] %s10178_s26 }
 0x12c   : > { %560 = vst.msk [vmem:[#allocation2 + $0x128] sm:$0xff] %vm521_vm0, %v12788_v0  ;;  %562 = vst.msk [vmem:[#allocation2 + $0x138] sm:$0xff] %vm521_vm0, %v12788_v0  ;;  %v589_v39 = vld [vmem:[%s13311_s22 + $0x60] sm:$0xff]  ;;  %v590_v40 = vld [vmem:[%s13311_s22 + $0x68] sm:$0xff]  ;;  %s10166_s14 = scalar_lea.sflag [#allocation8], %s513_s30  ;;  %p15163_p0 = scmp.ne.s32.totalorder %s15121_s27, 0 }
 0x12d   : > { %563 = vst.msk [vmem:[#allocation2 + $0x140] sm:$0xff] %vm521_vm0, %v12788_v0  ;;  %565 = vst.msk [vmem:[#allocation2 + $0x150] sm:$0xff] %vm521_vm0, %v12788_v0  ;;  %v591_v53 = vld [vmem:[%s13311_s22 + $0x70] sm:$0xff]  ;;  %v592_v54 = vld [vmem:[%s13311_s22 + $0x78] sm:$0xff]  ;;  %s12800_s21 = smov [#allocation23]  }
 0x12e   : > { %566 = vst.msk [vmem:[#allocation2 + $0x158] sm:$0xff] %vm521_vm0, %v12788_v0  ;;  %568 = vst.msk [vmem:[#allocation2 + $0x168] sm:$0xff] %vm521_vm0, %v12788_v0  ;;  %v593_v61 = vld [vmem:[%s13311_s22 + $0x80] sm:$0xff]  ;;  %v594_v62 = vld [vmem:[%s13311_s22 + $0x88] sm:$0xff] }
 0x12f   : > { %569 = vst.msk [vmem:[#allocation2 + $0x170] sm:$0xff] %vm521_vm0, %v12788_v0  ;;  %571 = vst.msk [vmem:[#allocation2 + $0x180] sm:$0xff] %vm521_vm0, %v12788_v0 }
 0x130   : > { %572 = vst.msk [vmem:[#allocation2 + $0x188] sm:$0xff] %vm521_vm0, %v12788_v0  ;;  %574 = vst.msk [vmem:[#allocation2 + $0x198] sm:$0xff] %vm521_vm0, %v12788_v0 }
 0x131   : > { %575 = vst.msk [vmem:[#allocation2 + $0x1a0] sm:$0xff] %vm521_vm0, %v12788_v0  ;;  %3850 = vst [vmem:[#allocation4] sm:$0xff] %v12788_v0 }
 0x132   : > { %3851 = vst [vmem:[#allocation4 + $0x8] sm:$0x3] %v12788_v0  ;;  %3852 = vst [vmem:[#allocation4 + $0x10] sm:$0xff] %v12788_v0 }
 0x133   : > { %3853 = vst [vmem:[#allocation4 + $0x18] sm:$0x3] %v12788_v0  ;;  %3854 = vst [vmem:[#allocation4 + $0x20] sm:$0xff] %v12788_v0 }
 0x134   : > { %3855 = vst [vmem:[#allocation4 + $0x28] sm:$0x3] %v12788_v0  ;;  %3856 = vst [vmem:[#allocation4 + $0x30] sm:$0xff] %v12788_v0 }
 0x135   : > { %3857 = vst [vmem:[#allocation4 + $0x38] sm:$0x3] %v12788_v0  ;;  %3858 = vst [vmem:[#allocation4 + $0x40] sm:$0xff] %v12788_v0 }
 0x136   : > { %3859 = vst [vmem:[#allocation4 + $0x48] sm:$0x3] %v12788_v0  ;;  %3860 = vst [vmem:[#allocation4 + $0x50] sm:$0xff] %v12788_v0 }
 0x137   : > { %3861 = vst [vmem:[#allocation4 + $0x58] sm:$0x3] %v12788_v0  ;;  %3862 = vst [vmem:[#allocation4 + $0x60] sm:$0xff] %v12788_v0 }
 0x138   : > { %3863 = vst [vmem:[#allocation4 + $0x68] sm:$0x3] %v12788_v0  ;;  %3864 = vst [vmem:[#allocation4 + $0x70] sm:$0xff] %v12788_v0 }
 0x139   : > { %3865 = vst [vmem:[#allocation4 + $0x78] sm:$0x3] %v12788_v0  ;;  %3866 = vst [vmem:[#allocation4 + $0x80] sm:$0xff] %v12788_v0 }
 0x13a   : > { %3867 = vst [vmem:[#allocation4 + $0x88] sm:$0x3] %v12788_v0  ;;  %3868 = vst [vmem:[#allocation4 + $0x90] sm:$0xff] %v12788_v0 }
 0x13b   : > { %3869 = vst [vmem:[#allocation4 + $0x98] sm:$0x3] %v12788_v0  ;;  %525 = vst.msk [vmem:[#allocation2 + $0x10] sm:$0x3] %vm524_vm1, %v12788_v0 }
 0x13c   : > { %528 = vst.msk [vmem:[#allocation2 + $0x28] sm:$0x3] %vm524_vm1, %v12788_v0  ;;  %531 = vst.msk [vmem:[#allocation2 + $0x40] sm:$0x3] %vm524_vm1, %v12788_v0 }
 0x13d   : > { %534 = vst.msk [vmem:[#allocation2 + $0x58] sm:$0x3] %vm524_vm1, %v12788_v0  ;;  %537 = vst.msk [vmem:[#allocation2 + $0x70] sm:$0x3] %vm524_vm1, %v12788_v0 }
 0x13e   : > { %540 = vst.msk [vmem:[#allocation2 + $0x88] sm:$0x3] %vm524_vm1, %v12788_v0  ;;  %543 = vst.msk [vmem:[#allocation2 + $0xa0] sm:$0x3] %vm524_vm1, %v12788_v0 }
 0x13f   : > { %546 = vst.msk [vmem:[#allocation2 + $0xb8] sm:$0x3] %vm524_vm1, %v12788_v0  ;;  %549 = vst.msk [vmem:[#allocation2 + $0xd0] sm:$0x3] %vm524_vm1, %v12788_v0 }
 0x140   : > { %552 = vst.msk [vmem:[#allocation2 + $0xe8] sm:$0x3] %vm524_vm1, %v12788_v0  ;;  %555 = vst.msk [vmem:[#allocation2 + $0x100] sm:$0x3] %vm524_vm1, %v12788_v0 }
 0x141   : > { %558 = vst.msk [vmem:[#allocation2 + $0x118] sm:$0x3] %vm524_vm1, %v12788_v0  ;;  %561 = vst.msk [vmem:[#allocation2 + $0x130] sm:$0x3] %vm524_vm1, %v12788_v0 }
 0x142   : > { %564 = vst.msk [vmem:[#allocation2 + $0x148] sm:$0x3] %vm524_vm1, %v12788_v0  ;;  %567 = vst.msk [vmem:[#allocation2 + $0x160] sm:$0x3] %vm524_vm1, %v12788_v0  ;;  %v900_v5 = vld [vmem:[#allocation2 + $0xa] sm:$0xff] }
 0x143   : > { %570 = vst.msk [vmem:[#allocation2 + $0x178] sm:$0x3] %vm524_vm1, %v12788_v0  ;;  %573 = vst.msk [vmem:[#allocation2 + $0x190] sm:$0x3] %vm524_vm1, %v12788_v0  ;;  %965 = vrot.lane.b32.xlu1 %v900_v5, %s12790_s12  ;;  %v707_v6 = vld [vmem:[#allocation2 + $0x9] sm:$0xff] }
 0x144   : > { %576 = vst.msk [vmem:[#allocation2 + $0x1a8] sm:$0x3] %vm524_vm1, %v12788_v0  ;;  %772 = vrot.lane.b32.xlu0 %v707_v6, %s12789_s24  ;;  %vm4196_vm1 = vcmask 1044484  }
 0x145   : > { %610 = vst.msk [vmem:[#allocation2 + $0x19] sm:$0xff] %vm521_vm0, %v577_v1  ;;  %611 = vst.msk [vmem:[#allocation2 + $0x21] sm:$0xff] %vm521_vm0, %v578_v2 }
 0x146   : > { %612 = vst.msk [vmem:[#allocation2 + $0x31] sm:$0xff] %vm521_vm0, %v579_v3  ;;  %613 = vst.msk [vmem:[#allocation2 + $0x39] sm:$0xff] %vm521_vm0, %v580_v7 }
 0x147   : > { %614 = vst.msk [vmem:[#allocation2 + $0x49] sm:$0xff] %vm521_vm0, %v581_v8  ;;  %615 = vst.msk [vmem:[#allocation2 + $0x51] sm:$0xff] %vm521_vm0, %v582_v9 }
 0x148   : > { %616 = vst.msk [vmem:[#allocation2 + $0x61] sm:$0xff] %vm521_vm0, %v583_v10  ;;  %617 = vst.msk [vmem:[#allocation2 + $0x69] sm:$0xff] %vm521_vm0, %v584_v11  ;;  %963 = vrot.lane.b32.xlu0 %v899_v15, %s12790_s12 }
 0x149   : > { %618 = vst.msk [vmem:[#allocation2 + $0x79] sm:$0xff] %vm521_vm0, %v585_v12  ;;  %619 = vst.msk [vmem:[#allocation2 + $0x81] sm:$0xff] %vm521_vm0, %v586_v13 }
 0x14a   : > { %674 = vst.msk [vmem:[#allocation3] sm:$0xff] %vm521_vm0, %v642_v14  ;;  %675 = vst.msk [vmem:[#allocation3 + $0x8] sm:$0xff] %vm521_vm0, %v643_v16 }
 0x14b   : > { %620 = vst.msk [vmem:[#allocation2 + $0x91] sm:$0xff] %vm521_vm0, %v587_v31  ;;  %621 = vst.msk [vmem:[#allocation2 + $0x99] sm:$0xff] %vm521_vm0, %v588_v32 }
 0x14c   : > { %v708_v17 = vld [vmem:[#allocation2 + $0x19] sm:$0xff]  ;;  %v709_v20 = vld [vmem:[#allocation2 + $0x21] sm:$0xff]  ;;  %622 = vst.msk [vmem:[#allocation2 + $0xa9] sm:$0xff] %vm521_vm0, %v589_v39  ;;  %623 = vst.msk [vmem:[#allocation2 + $0xb1] sm:$0xff] %vm521_vm0, %v590_v40 }
 0x14d   : > { %774 = vrot.lane.b32.xlu1 %v708_v17, %s12789_s24  ;;  %v1093_v18 = vld [vmem:[#allocation2 + $0x20] sm:$0xff]  ;;  %v1092_v19 = vld [vmem:[#allocation2 + $0x18] sm:$0xff]  ;;  %v1094_v22 = vld [vmem:[#allocation2 + $0x30] sm:$0xff]  ;;  %624 = vst.msk [vmem:[#allocation2 + $0xc1] sm:$0xff] %vm521_vm0, %v591_v53 }
 0x14e   : > { %v1095_v21 = vld [vmem:[#allocation2 + $0x38] sm:$0xff]  ;;  %676 = vst.msk [vmem:[#allocation3 + $0x10] sm:$0xff] %vm521_vm0, %v1092_v19  ;;  %677 = vst.msk [vmem:[#allocation3 + $0x18] sm:$0xff] %vm521_vm0, %v1093_v18  ;;  %v13344_v24 = vld [vmem:[#allocation2 + $0x50] sm:$0xff] }
 0x14f   : > { %v901_v23 = vld [vmem:[#allocation2 + $0x1a] sm:$0xff]  ;;  %679 = vst.msk [vmem:[#allocation3 + $0x28] sm:$0xff] %vm521_vm0, %v1095_v21  ;;  %678 = vst.msk [vmem:[#allocation3 + $0x20] sm:$0xff] %vm521_vm0, %v1094_v22  ;;  %v13346_v25 = vld [vmem:[#allocation2 + $0x48] sm:$0xff] }
 0x150   : > { %681 = vst.msk [vmem:[#allocation3 + $0x38] sm:$0xff] %vm521_vm0, %v13344_v24  ;;  %680 = vst.msk [vmem:[#allocation3 + $0x30] sm:$0xff] %vm521_vm0, %v13346_v25  ;;  %v902_v26 = vld [vmem:[#allocation2 + $0x22] sm:$0xff]  ;;  %967 = vrot.lane.b32.xlu0 %v901_v23, %s12790_s12  ;;  %v13364_v30 = vld [vmem:[#allocation2 + $0x78] sm:$0xff] }
 0x151   : > { %776 = vrot.lane.b32.xlu1 %v709_v20, %s12789_s24  ;;  %v13354_v27 = vld [vmem:[#allocation2 + $0x68] sm:$0xff]  ;;  %v13356_v28 = vld [vmem:[#allocation2 + $0x60] sm:$0xff]  ;;  %684 = vst.msk [vmem:[#allocation3 + $0x50] sm:$0xff] %vm521_vm0, %v13364_v30  ;;  %v1287_v33 = vld [vmem:[#allocation2 + $0x31] sm:$0xff] }
 0x152   : > { %683 = vst.msk [vmem:[#allocation3 + $0x48] sm:$0xff] %vm521_vm0, %v13354_v27  ;;  %682 = vst.msk [vmem:[#allocation3 + $0x40] sm:$0xff] %vm521_vm0, %v13356_v28  ;;  %v13362_v29 = vld [vmem:[#allocation2 + $0x80] sm:$0xff]  ;;  %v13380_v34 = vld [vmem:[#allocation2 + $0x98] sm:$0xff] }
 0x153   : > { %685 = vst.msk [vmem:[#allocation3 + $0x58] sm:$0xff] %vm521_vm0, %v13362_v29  ;;  %v13382_v35 = vld [vmem:[#allocation2 + $0x90] sm:$0xff]  ;;  %687 = vst.msk [vmem:[#allocation3 + $0x68] sm:$0xff] %vm521_vm0, %v13380_v34  ;;  %v1288_v36 = vld [vmem:[#allocation2 + $0x39] sm:$0xff] }
 0x154   : > { %1156 = vrot.lane.b32.xlu0 %v1092_v19, %s12791_s23  ;;  %686 = vst.msk [vmem:[#allocation3 + $0x60] sm:$0xff] %vm521_vm0, %v13382_v35  ;;  %v1480_v37 = vld [vmem:[#allocation2 + $0x32] sm:$0xff]  ;;  %v1481_v38 = vld [vmem:[#allocation2 + $0x3a] sm:$0xff]  ;;  %v13403_v41 = vld [vmem:[#allocation2 + $0xa8] sm:$0xff] }
 0x155   : > { %969 = vrot.lane.b32.xlu1 %v902_v26, %s12790_s12  ;;  %v1867_v42 = vld [vmem:[#allocation2 + $0x49] sm:$0xff]  ;;  %688 = vst.msk [vmem:[#allocation3 + $0x70] sm:$0xff] %vm521_vm0, %v13403_v41  ;;  %v1868_v44 = vld [vmem:[#allocation2 + $0x51] sm:$0xff]  ;;  %625 = vst.msk [vmem:[#allocation2 + $0xc9] sm:$0xff] %vm521_vm0, %v592_v54 }
 0x156   : > { %v13407_v43 = vld [vmem:[#allocation2 + $0xb0] sm:$0xff]  ;;  %v13441_v56 = vld [vmem:[#allocation2 + $0xc0] sm:$0xff]  ;;  %626 = vst.msk [vmem:[#allocation2 + $0xd9] sm:$0xff] %vm521_vm0, %v593_v61  ;;  %627 = vst.msk [vmem:[#allocation2 + $0xe1] sm:$0xff] %vm521_vm0, %v594_v62 }
 0x157   : > { %689 = vst.msk [vmem:[#allocation3 + $0x78] sm:$0xff] %vm521_vm0, %v13407_v43  ;;  %v2060_v51 = vld [vmem:[#allocation2 + $0x4a] sm:$0xff]  ;;  %v2061_v52 = vld [vmem:[#allocation2 + $0x52] sm:$0xff]  ;;  %v1291_v57 = vld [vmem:[#allocation2 + $0x61] sm:$0xff] }
 0x158   : > { %1160 = vrot.lane.b32.xlu0 %v1094_v22, %s12791_s23  ;;  %690 = vst.msk [vmem:[#allocation3 + $0x80] sm:$0xff] %vm521_vm0, %v13441_v56  ;;  %v1292_v58 = vld [vmem:[#allocation2 + $0x69] sm:$0xff]  ;;  %v13471_v0 = vld [vmem:[#allocation2 + $0x79] sm:$0xff]  ;;  %v13480_v3 = vld [vmem:[#allocation2 + $0x81] sm:$0xff] }
 0x159   : > { %1158 = vrot.lane.b32.xlu1 %v1093_v18, %s12791_s23  ;;  %v1484_v59 = vld [vmem:[#allocation2 + $0x62] sm:$0xff]  ;;  %v1485_v60 = vld [vmem:[#allocation2 + $0x6a] sm:$0xff]  ;;  %v13494_v8 = vld [vmem:[#allocation2 + $0x7a] sm:$0xff] }
 0x15a   : > { %v13498_v11 = vld [vmem:[#allocation2 + $0x82] sm:$0xff]  ;;  %v13556_v32 = vld [vmem:[#allocation2 + $0x92] sm:$0xff]  ;;  %v13611_v62 = vld [vmem:[#allocation2 + $0xaa] sm:$0xff] }
 0x15b   : > { %v597_v40 = vld [vmem:[%s13311_s22 + $0xa0] sm:$0xff]  ;;  %v13593_v49 = vld [vmem:[#allocation2 + $0xb1] sm:$0xff] }
 0x15c   : > { %1349 = vrot.lane.b32.xlu0 %v708_v17, %s12792_s4  ;;  %v13439_v55 = vld [vmem:[#allocation2 + $0xc8] sm:$0xff]  ;;  %630 = vst.msk [vmem:[#allocation2 + $0x109] sm:$0xff] %vm521_vm0, %v597_v40 }
 0x15d   : > { %1162 = vrot.lane.b32.xlu1 %v1095_v21, %s12791_s23  ;;  %691 = vst.msk [vmem:[#allocation3 + $0x88] sm:$0xff] %vm521_vm0, %v13439_v55  ;;  %v13467_v63 = vld [vmem:[#allocation2 + $0xd8] sm:$0xff]  ;;  %v13473_v1 = vld [vmem:[#allocation2 + $0xe0] sm:$0xff] }
 0x15e   : > { %692 = vst.msk [vmem:[#allocation3 + $0x90] sm:$0xff] %vm521_vm0, %v13467_v63  ;;  %693 = vst.msk [vmem:[#allocation3 + $0x98] sm:$0xff] %vm521_vm0, %v13473_v1  ;;  %v13713_v40 = vld [vmem:[#allocation2 + $0xe1] sm:$0xff] }
 0x160   : > { %1353 = vrot.lane.b32.xlu0 %v1287_v33, %s12792_s4 }
 0x161   : > { %1351 = vrot.lane.b32.xlu1 %v709_v20, %s12792_s4  ;;  %v595_v20 = vld [vmem:[%s13311_s22 + $0x90] sm:$0xff] }
 0x162   : > { %628 = vst.msk [vmem:[#allocation2 + $0xf1] sm:$0xff] %vm521_vm0, %v595_v20 }
 0x164   : > { %1542 = vrot.lane.b32.xlu0 %v901_v23, %s12793_s25 }
 0x165   : > { %1355 = vrot.lane.b32.xlu1 %v1288_v36, %s12792_s4 }
 0x168   : > { %1546 = vrot.lane.b32.xlu0 %v1480_v37, %s12793_s25 }
 0x169   : > { %1544 = vrot.lane.b32.xlu1 %v902_v26, %s12793_s25  ;;  %v13540_v26 = vld [vmem:[#allocation2 + $0x91] sm:$0xff] }
 0x16c   : > { %1736 = vrot.lane.b32.xlu0 %v1094_v22, %s12794_s16 }
 0x16d   : > { %1548 = vrot.lane.b32.xlu1 %v1481_v38, %s12793_s25 }
 0x170   : > { %1740 = vrot.lane.b32.xlu0 %v13346_v25, %s12794_s16 }
 0x171   : > { %1738 = vrot.lane.b32.xlu1 %v1095_v21, %s12794_s16  ;;  %v596_v21 = vld [vmem:[%s13311_s22 + $0x98] sm:$0xff] }
 0x172   : > { %629 = vst.msk [vmem:[#allocation2 + $0xf9] sm:$0xff] %vm521_vm0, %v596_v21 }
 0x174   : > { %1929 = vrot.lane.b32.xlu0 %v1287_v33, %s12795_s2 }
 0x175   : > { %1742 = vrot.lane.b32.xlu1 %v13344_v24, %s12794_s16 }
 0x178   : > { %1933 = vrot.lane.b32.xlu0 %v1867_v42, %s12795_s2 }
 0x179   : > { %1931 = vrot.lane.b32.xlu1 %v1288_v36, %s12795_s2 }
 0x17c   : > { %2122 = vrot.lane.b32.xlu0 %v1480_v37, %s12797_s17 }
 0x17d   : > { %1935 = vrot.lane.b32.xlu1 %v1868_v44, %s12795_s2 }
 0x180   : > { %2126 = vrot.lane.b32.xlu0 %v2060_v51, %s12797_s17 }
 0x181   : > { %2124 = vrot.lane.b32.xlu1 %v1481_v38, %s12797_s17 }
 0x184   : > { %778 = vrot.lane.b32.xlu0 %v1287_v33, %s12789_s24 }
 0x185   : > { %2128 = vrot.lane.b32.xlu1 %v2061_v52, %s12797_s17 }
 0x188   : > { %782 = vrot.lane.b32.xlu0 %v1867_v42, %s12789_s24 }
 0x189   : > { %780 = vrot.lane.b32.xlu1 %v1288_v36, %s12789_s24 }
 0x18c   : > { %971 = vrot.lane.b32.xlu0 %v1480_v37, %s12790_s12  ;;  %v13561_v37 = vld [vmem:[#allocation2 + $0x9a] sm:$0xff] }
 0x18d   : > { %784 = vrot.lane.b32.xlu1 %v1868_v44, %s12789_s24 }
 0x190   : > { %975 = vrot.lane.b32.xlu0 %v2060_v51, %s12790_s12 }
 0x191   : > { %973 = vrot.lane.b32.xlu1 %v1481_v38, %s12790_s12 }
 0x194   : > { %1164 = vrot.lane.b32.xlu0 %v13346_v25, %s12791_s23 }
 0x195   : > { %977 = vrot.lane.b32.xlu1 %v2061_v52, %s12790_s12 }
 0x198   : > { %1168 = vrot.lane.b32.xlu0 %v13356_v28, %s12791_s23 }
 0x199   : > { %1166 = vrot.lane.b32.xlu1 %v13344_v24, %s12791_s23 }
 0x19a   : > { %v771_v2 = vpop.permute.xlu0 %770 }
 0x19b   : > { %867 = vst.msk [vmem:[#allocation3] sm:$0xff] %vm866_vm4, %v771_v2 }
 0x19c   : > { %1357 = vrot.lane.b32.xlu0 %v1867_v42, %s12792_s4  ;;  %v598_v42 = vld [vmem:[%s13311_s22 + $0xa8] sm:$0xff] }
 0x19d   : > { %1170 = vrot.lane.b32.xlu1 %v13354_v27, %s12791_s23  ;;  %631 = vst.msk [vmem:[#allocation2 + $0x111] sm:$0xff] %vm521_vm0, %v598_v42  ;;  %v11559_v42 = vld [vmem:[#allocation11 + $0x24] ss:$16 sps:$4 sm:$0xff]  }
 0x1a0   : > { %1361 = vrot.lane.b32.xlu0 %v1291_v57, %s12792_s4 }
 0x1a1   : > { %1359 = vrot.lane.b32.xlu1 %v1868_v44, %s12792_s4 }
 0x1a4   : > { %1550 = vrot.lane.b32.xlu0 %v2060_v51, %s12793_s25 }
 0x1a5   : > { %1363 = vrot.lane.b32.xlu1 %v1292_v58, %s12792_s4 }
 0x1a8   : > { %1554 = vrot.lane.b32.xlu0 %v1484_v59, %s12793_s25 }
 0x1a9   : > { %1552 = vrot.lane.b32.xlu1 %v2061_v52, %s12793_s25 }
 0x1ac   : > { %1744 = vrot.lane.b32.xlu0 %v13356_v28, %s12794_s16 }
 0x1ad   : > { %1556 = vrot.lane.b32.xlu1 %v1485_v60, %s12793_s25 }
 0x1b0   : > { %1748 = vrot.lane.b32.xlu0 %v13364_v30, %s12794_s16 }
 0x1b1   : > { %1746 = vrot.lane.b32.xlu1 %v13354_v27, %s12794_s16 }
 0x1b4   : > { %1937 = vrot.lane.b32.xlu0 %v1291_v57, %s12795_s2 }
 0x1b5   : > { %1750 = vrot.lane.b32.xlu1 %v13362_v29, %s12794_s16  ;;  %v966_v4 = vpop.permute.xlu1 %965 }
 0x1b6   : > { %v773_v5 = vpop.permute.xlu0 %772 }
 0x1b7   : > { %868 = vst.msk [vmem:[#allocation3 + $0x8] sm:$0xff] %vm866_vm4, %v773_v5 }
 0x1b8   : > { %1941 = vrot.lane.b32.xlu0 %v13471_v0, %s12795_s2  ;;  %1061 = vst.msk [vmem:[#allocation3 + $0x8] sm:$0xff] %vm1059_vm5, %v966_v4 }
 0x1b9   : > { %1939 = vrot.lane.b32.xlu1 %v1292_v58, %s12795_s2 }
 0x1ba   : > { %v964_v7 = vpop.permute.xlu0 %963 }
 0x1bb   : > { %1060 = vst.msk [vmem:[#allocation3] sm:$0xff] %vm1059_vm5, %v964_v7 }
 0x1bc   : > { %2130 = vrot.lane.b32.xlu0 %v1484_v59, %s12797_s17 }
 0x1bd   : > { %1943 = vrot.lane.b32.xlu1 %v13480_v3, %s12795_s2 }
 0x1bf   : > { %v775_v6 = vpop.permute.xlu1 %774 }
 0x1c0   : > { %869 = vst.msk [vmem:[#allocation3 + $0x10] sm:$0xff] %vm866_vm4, %v775_v6  ;;  %786 = vrot.lane.b32.xlu0 %v1291_v57, %s12789_s24 }
 0x1c1   : > { %2132 = vrot.lane.b32.xlu1 %v1485_v60, %s12797_s17 }
 0x1c2   : > { %v968_v10 = vpop.permute.xlu0 %967 }
 0x1c3   : > { %v777_v9 = vpop.permute.xlu1 %776  ;;  %1062 = vst.msk [vmem:[#allocation3 + $0x10] sm:$0xff] %vm1059_vm5, %v968_v10 }
 0x1c4   : > { %870 = vst.msk [vmem:[#allocation3 + $0x18] sm:$0xff] %vm866_vm4, %v777_v9  ;;  %2134 = vrot.lane.b32.xlu0 %v13494_v8, %s12797_s17 }
 0x1c5   : > { %788 = vrot.lane.b32.xlu1 %v1292_v58, %s12789_s24 }
 0x1c6   : > { %v1157_v13 = vpop.permute.xlu0 %1156 }
 0x1c7   : > { %v970_v12 = vpop.permute.xlu1 %969  ;;  %1253 = vst.msk [vmem:[#allocation3] sm:$0xff] %vm1252_vm6, %v1157_v13  ;;  %v600_v13 = vld [vmem:[%s13311_s22 + $0xb8] sm:$0xff] }
 0x1c8   : > { %1063 = vst.msk [vmem:[#allocation3 + $0x18] sm:$0xff] %vm1059_vm5, %v970_v12  ;;  %790 = vrot.lane.b32.xlu0 %v13471_v0, %s12789_s24  ;;  %v599_v12 = vld [vmem:[%s13311_s22 + $0xb0] sm:$0xff] }
 0x1c9   : > { %2136 = vrot.lane.b32.xlu1 %v13498_v11, %s12797_s17  ;;  %632 = vst.msk [vmem:[#allocation2 + $0x121] sm:$0xff] %vm521_vm0, %v599_v12  ;;  %633 = vst.msk [vmem:[#allocation2 + $0x129] sm:$0xff] %vm521_vm0, %v600_v13  ;;  %v11577_v12 = vld [vmem:[#allocation11 + $0xe4] ss:$16 sps:$4 sm:$0xff]  }
 0x1ca   : > { %v1161_v15 = vpop.permute.xlu0 %1160 }
 0x1cb   : > { %v1159_v14 = vpop.permute.xlu1 %1158  ;;  %1255 = vst.msk [vmem:[#allocation3 + $0x10] sm:$0xff] %vm1252_vm6, %v1161_v15 }
 0x1cc   : > { %1254 = vst.msk [vmem:[#allocation3 + $0x8] sm:$0xff] %vm1252_vm6, %v1159_v14  ;;  %979 = vrot.lane.b32.xlu0 %v1484_v59, %s12790_s12 }
 0x1cd   : > { %792 = vrot.lane.b32.xlu1 %v13480_v3, %s12789_s24 }
 0x1ce   : > { %v1350_v17 = vpop.permute.xlu0 %1349 }
 0x1cf   : > { %v1163_v16 = vpop.permute.xlu1 %1162  ;;  %1446 = vst.msk [vmem:[#allocation3] sm:$0xff] %vm1445_vm7, %v1350_v17 }
 0x1d0   : > { %1256 = vst.msk [vmem:[#allocation3 + $0x18] sm:$0xff] %vm1252_vm6, %v1163_v16  ;;  %983 = vrot.lane.b32.xlu0 %v13494_v8, %s12790_s12 }
 0x1d1   : > { %981 = vrot.lane.b32.xlu1 %v1485_v60, %s12790_s12 }
 0x1d2   : > { %v1354_v19 = vpop.permute.xlu0 %1353 }
 0x1d3   : > { %v1352_v18 = vpop.permute.xlu1 %1351  ;;  %1448 = vst.msk [vmem:[#allocation3 + $0x10] sm:$0xff] %vm1445_vm7, %v1354_v19  ;;  %v13663_v19 = vld [vmem:[#allocation2 + $0xc9] sm:$0xff] }
 0x1d4   : > { %1447 = vst.msk [vmem:[#allocation3 + $0x8] sm:$0xff] %vm1445_vm7, %v1352_v18  ;;  %1172 = vrot.lane.b32.xlu0 %v13364_v30, %s12791_s23 }
 0x1d5   : > { %985 = vrot.lane.b32.xlu1 %v13498_v11, %s12790_s12 }
 0x1d6   : > { %v1543_v23 = vpop.permute.xlu0 %1542 }
 0x1d7   : > { %v1356_v22 = vpop.permute.xlu1 %1355  ;;  %1639 = vst.msk [vmem:[#allocation3] sm:$0xff] %vm1638_vm8, %v1543_v23 }
 0x1d8   : > { %1449 = vst.msk [vmem:[#allocation3 + $0x18] sm:$0xff] %vm1445_vm7, %v1356_v22  ;;  %1176 = vrot.lane.b32.xlu0 %v13382_v35, %s12791_s23  ;;  %v13674_v22 = vld [vmem:[#allocation2 + $0xc2] sm:$0xff] }
 0x1d9   : > { %1174 = vrot.lane.b32.xlu1 %v13362_v29, %s12791_s23  ;;  %v13545_v29 = vld [vmem:[#allocation2 + $0x99] sm:$0xff] }
 0x1da   : > { %v1547_v25 = vpop.permute.xlu0 %1546 }
 0x1db   : > { %v1545_v24 = vpop.permute.xlu1 %1544  ;;  %1641 = vst.msk [vmem:[#allocation3 + $0x10] sm:$0xff] %vm1638_vm8, %v1547_v25  ;;  %v13679_v25 = vld [vmem:[#allocation2 + $0xca] sm:$0xff] }
 0x1dc   : > { %1640 = vst.msk [vmem:[#allocation3 + $0x8] sm:$0xff] %vm1638_vm8, %v1545_v24  ;;  %1365 = vrot.lane.b32.xlu0 %v13471_v0, %s12792_s4 }
 0x1dd   : > { %1178 = vrot.lane.b32.xlu1 %v13380_v34, %s12791_s23 }
 0x1de   : > { %v1737_v28 = vpop.permute.xlu0 %1736 }
 0x1df   : > { %v1549_v27 = vpop.permute.xlu1 %1548  ;;  %1833 = vst.msk [vmem:[#allocation3] sm:$0xff] %vm1832_vm9, %v1737_v28  ;;  %v601_v28 = vld [vmem:[%s13311_s22 + $0xc0] sm:$0xff] }
 0x1e0   : > { %1642 = vst.msk [vmem:[#allocation3 + $0x18] sm:$0xff] %vm1638_vm8, %v1549_v27  ;;  %1369 = vrot.lane.b32.xlu0 %v13540_v26, %s12792_s4 }
 0x1e1   : > { %1367 = vrot.lane.b32.xlu1 %v13480_v3, %s12792_s4  ;;  %v2069_v3 = vld [vmem:[#allocation2 + $0xb2] sm:$0xff]  ;;  %634 = vst.msk [vmem:[#allocation2 + $0x139] sm:$0xff] %vm521_vm0, %v601_v28 }
 0x1e2   : > { %v1741_v31 = vpop.permute.xlu0 %1740  ;;  %v4561_v28 = vld [vmem:[#allocation11 + $0x130] sm:$0xff] }
 0x1e3   : > { %v1739_v30 = vpop.permute.xlu1 %1738  ;;  %1835 = vst.msk [vmem:[#allocation3 + $0x10] sm:$0xff] %vm1832_vm9, %v1741_v31 }
 0x1e4   : > { %1834 = vst.msk [vmem:[#allocation3 + $0x8] sm:$0xff] %vm1832_vm9, %v1739_v30  ;;  %1558 = vrot.lane.b32.xlu0 %v13494_v8, %s12793_s25 }
 0x1e5   : > { %1371 = vrot.lane.b32.xlu1 %v13545_v29, %s12792_s4 }
 0x1e6   : > { %v1930_v36 = vpop.permute.xlu0 %1929 }
 0x1e7   : > { %v1743_v33 = vpop.permute.xlu1 %1742  ;;  %2026 = vst.msk [vmem:[#allocation3] sm:$0xff] %vm2025_vm10, %v1930_v36 }
 0x1e8   : > { %1836 = vst.msk [vmem:[#allocation3 + $0x18] sm:$0xff] %vm1832_vm9, %v1743_v33  ;;  %1562 = vrot.lane.b32.xlu0 %v13556_v32, %s12793_s25 }
 0x1e9   : > { %1560 = vrot.lane.b32.xlu1 %v13498_v11, %s12793_s25 }
 0x1ea   : > { %v1934_v39 = vpop.permute.xlu0 %1933 }
 0x1eb   : > { %v1932_v38 = vpop.permute.xlu1 %1931  ;;  %2028 = vst.msk [vmem:[#allocation3 + $0x10] sm:$0xff] %vm2025_vm10, %v1934_v39 }
 0x1ec   : > { %2027 = vst.msk [vmem:[#allocation3 + $0x8] sm:$0xff] %vm2025_vm10, %v1932_v38  ;;  %1752 = vrot.lane.b32.xlu0 %v13382_v35, %s12794_s16  ;;  %v13588_v35 = vld [vmem:[#allocation2 + $0xa9] sm:$0xff] }
 0x1ed   : > { %1564 = vrot.lane.b32.xlu1 %v13561_v37, %s12793_s25 }
 0x1ee   : > { %v2123_v45 = vpop.permute.xlu0 %2122 }
 0x1ef   : > { %v1936_v44 = vpop.permute.xlu1 %1935  ;;  %2219 = vst.msk [vmem:[#allocation3] sm:$0xff] %vm2218_vm11, %v2123_v45 }
 0x1f0   : > { %2029 = vst.msk [vmem:[#allocation3 + $0x18] sm:$0xff] %vm2025_vm10, %v1936_v44  ;;  %1756 = vrot.lane.b32.xlu0 %v13403_v41, %s12794_s16 }
 0x1f1   : > { %1754 = vrot.lane.b32.xlu1 %v13380_v34, %s12794_s16 }
 0x1f2   : > { %v2127_v47 = vpop.permute.xlu0 %2126 }
 0x1f3   : > { %v2125_v46 = vpop.permute.xlu1 %2124  ;;  %2221 = vst.msk [vmem:[#allocation3 + $0x10] sm:$0xff] %vm2218_vm11, %v2127_v47 }
 0x1f4   : > { %2220 = vst.msk [vmem:[#allocation3 + $0x8] sm:$0xff] %vm2218_vm11, %v2125_v46  ;;  %1945 = vrot.lane.b32.xlu0 %v13540_v26, %s12795_s2  ;;  %v11561_v46 = vld [vmem:[#allocation11 + $0x20] ss:$16 sps:$4 sm:$0xff]  }
 0x1f5   : > { %1758 = vrot.lane.b32.xlu1 %v13407_v43, %s12794_s16 }
 0x1f6   : > { %v779_v48 = vpop.permute.xlu0 %778  ;;  %v2251_v50 = vld [vmem:[#allocation3] sm:$0xff] }
 0x1f7   : > { %v2129_v34 = vpop.permute.xlu1 %2128  ;;  %871 = vst.msk [vmem:[#allocation3 + $0x20] sm:$0xff] %vm866_vm4, %v779_v48 }
 0x1f8   : > { %2222 = vst.msk [vmem:[#allocation3 + $0x18] sm:$0xff] %vm2218_vm11, %v2129_v34  ;;  %1949 = vrot.lane.b32.xlu0 %v13588_v35, %s12795_s2  ;;  %v11562_v34 = vld [vmem:[#allocation11 + $0x44] ss:$16 sps:$4 sm:$0xff]  }
 0x1f9   : > { %1947 = vrot.lane.b32.xlu1 %v13545_v29, %s12795_s2 }
 0x1fa   : > { %v783_v54 = vpop.permute.xlu0 %782  ;;  %v2253_v57 = vld [vmem:[#allocation3 + $0x10] sm:$0xff] }
 0x1fb   : > { %v781_v51 = vpop.permute.xlu1 %780  ;;  %v2252_v52 = vld [vmem:[#allocation3 + $0x8] sm:$0xff]  ;;  %873 = vst.msk [vmem:[#allocation3 + $0x30] sm:$0xff] %vm866_vm4, %v783_v54 }
 0x1fc   : > { %872 = vst.msk [vmem:[#allocation3 + $0x28] sm:$0xff] %vm866_vm4, %v781_v51  ;;  %v2283_v53 = vpack.c.bf16 %v2252_v52, %v2251_v50  ;;  %2138 = vrot.lane.b32.xlu0 %v13556_v32, %s12797_s17  ;;  %v11565_v52 = vld [vmem:[#allocation11 + $0x64] ss:$16 sps:$4 sm:$0xff]  }
 0x1fd   : > { %1951 = vrot.lane.b32.xlu1 %v13593_v49, %s12795_s2 }
 0x1fe   : > { %11182 = vmatprep.mubr.msk.bf16.mxu0 %vm2321_vm12, %v2283_v53  ;;  %v972_v61 = vpop.permute.xlu0 %971 }
 0x1ff   : > { %v785_v58 = vpop.permute.xlu1 %784  ;;  %v2254_v59 = vld [vmem:[#allocation3 + $0x18] sm:$0xff]  ;;  %1064 = vst.msk [vmem:[#allocation3 + $0x20] sm:$0xff] %vm1059_vm5, %v972_v61 }
 0x200   : > { %874 = vst.msk [vmem:[#allocation3 + $0x38] sm:$0xff] %vm866_vm4, %v785_v58  ;;  %v2284_v60 = vpack.c.bf16 %v2254_v59, %v2253_v57  ;;  %794 = vrot.lane.b32.xlu0 %v13540_v26, %s12789_s24  ;;  %v13730_v57 = vld [vmem:[#allocation2 + $0xda] sm:$0xff]  ;;  %v11567_v58 = vld [vmem:[#allocation11 + $0x60] ss:$16 sps:$4 sm:$0xff]  }
 0x201   : > { %2140 = vrot.lane.b32.xlu1 %v13561_v37, %s12797_s17  ;;  %v13737_v61 = vld [vmem:[#allocation2 + $0xe2] sm:$0xff] }
 0x202   : > { %11183 = vmatmul.mubr.msk.bf16.vlgmr.msra.gmra.mrb[0].mxu0 %vm2321_vm12, %v2284_v60  ;;  %v976_v2 = vpop.permute.xlu0 %975 }
 0x203   : > { %v974_v0 = vpop.permute.xlu1 %973  ;;  %1066 = vst.msk [vmem:[#allocation3 + $0x30] sm:$0xff] %vm1059_vm5, %v976_v2  ;;  %v11570_v2 = vld [vmem:[#allocation11 + $0x80] ss:$16 sps:$4 sm:$0xff]  }
 0x204   : > { %1065 = vst.msk [vmem:[#allocation3 + $0x28] sm:$0xff] %vm1059_vm5, %v974_v0  ;;  %2142 = vrot.lane.b32.xlu0 %v13611_v62, %s12797_s17 }
 0x205   : > { %796 = vrot.lane.b32.xlu1 %v13545_v29, %s12789_s24  ;;  %v602_v29 = vld [vmem:[%s13311_s22 + $0xc8] sm:$0xff] }
 0x206   : > { %v1165_v5 = vpop.permute.xlu0 %1164  ;;  %635 = vst.msk [vmem:[#allocation2 + $0x141] sm:$0xff] %vm521_vm0, %v602_v29  ;;  %v11583_v29 = vld [vmem:[#allocation11 + $0x124] ss:$16 sps:$4 sm:$0xff]  }
 0x207   : > { %v978_v4 = vpop.permute.xlu1 %977  ;;  %1257 = vst.msk [vmem:[#allocation3 + $0x20] sm:$0xff] %vm1252_vm6, %v1165_v5 }
 0x208   : > { %1067 = vst.msk [vmem:[#allocation3 + $0x38] sm:$0xff] %vm1059_vm5, %v978_v4  ;;  %798 = vrot.lane.b32.xlu0 %v13588_v35, %s12789_s24  ;;  %v11571_v4 = vld [vmem:[#allocation11 + $0xa4] ss:$16 sps:$4 sm:$0xff]  }
 0x209   : > { %2144 = vrot.lane.b32.xlu1 %v2069_v3, %s12797_s17 }
 0x20a   : > { %v1169_v7 = vpop.permute.xlu0 %1168 }
 0x20b   : > { %v1167_v6 = vpop.permute.xlu1 %1166  ;;  %1259 = vst.msk [vmem:[#allocation3 + $0x30] sm:$0xff] %vm1252_vm6, %v1169_v7 }
 0x20c   : > { %1258 = vst.msk [vmem:[#allocation3 + $0x28] sm:$0xff] %vm1252_vm6, %v1167_v6  ;;  %987 = vrot.lane.b32.xlu0 %v13556_v32, %s12790_s12  ;;  %v11573_v6 = vld [vmem:[#allocation11 + $0xa0] ss:$16 sps:$4 sm:$0xff]  }
 0x20d   : > { %800 = vrot.lane.b32.xlu1 %v13593_v49, %s12789_s24 }
 0x20e   : > { %v1358_v9 = vpop.permute.xlu0 %1357 }
 0x20f   : > { %v1171_v8 = vpop.permute.xlu1 %1170  ;;  %1450 = vst.msk [vmem:[#allocation3 + $0x20] sm:$0xff] %vm1445_vm7, %v1358_v9 }
 0x210   : > { %1260 = vst.msk [vmem:[#allocation3 + $0x38] sm:$0xff] %vm1252_vm6, %v1171_v8  ;;  %991 = vrot.lane.b32.xlu0 %v13611_v62, %s12790_s12  ;;  %v11574_v8 = vld [vmem:[#allocation11 + $0xc4] ss:$16 sps:$4 sm:$0xff]  }
 0x211   : > { %989 = vrot.lane.b32.xlu1 %v13561_v37, %s12790_s12  ;;  %v11558_v37 = vld [vmem:[#allocation11] ss:$16 sps:$4 sm:$0xff]  }
 0x212   : > { %v1362_v11 = vpop.permute.xlu0 %1361 }
 0x213   : > { %v1360_v10 = vpop.permute.xlu1 %1359  ;;  %1452 = vst.msk [vmem:[#allocation3 + $0x30] sm:$0xff] %vm1445_vm7, %v1362_v11 }
 0x214   : > { %1451 = vst.msk [vmem:[#allocation3 + $0x28] sm:$0xff] %vm1445_vm7, %v1360_v10  ;;  %1180 = vrot.lane.b32.xlu0 %v13403_v41, %s12791_s23  ;;  %v13658_v41 = vld [vmem:[#allocation2 + $0xc1] sm:$0xff] }
 0x215   : > { %993 = vrot.lane.b32.xlu1 %v2069_v3, %s12790_s12  ;;  %v11576_v10 = vld [vmem:[#allocation11 + $0xc0] ss:$16 sps:$4 sm:$0xff]  }
 0x216   : > { %v1551_v15 = vpop.permute.xlu0 %1550 }
 0x217   : > { %v1364_v14 = vpop.permute.xlu1 %1363  ;;  %1643 = vst.msk [vmem:[#allocation3 + $0x20] sm:$0xff] %vm1638_vm8, %v1551_v15 }
 0x218   : > { %1453 = vst.msk [vmem:[#allocation3 + $0x38] sm:$0xff] %vm1445_vm7, %v1364_v14  ;;  %1184 = vrot.lane.b32.xlu0 %v13441_v56, %s12791_s23  ;;  %v11579_v14 = vld [vmem:[#allocation11 + $0xe0] ss:$16 sps:$4 sm:$0xff]  }
 0x219   : > { %1182 = vrot.lane.b32.xlu1 %v13407_v43, %s12791_s23 }
 0x21a   : > { %v1555_v17 = vpop.permute.xlu0 %1554 }
 0x21b   : > { %v1553_v16 = vpop.permute.xlu1 %1552  ;;  %1645 = vst.msk [vmem:[#allocation3 + $0x30] sm:$0xff] %vm1638_vm8, %v1555_v17  ;;  %v1110_v17 = vld [vmem:[#allocation2 + $0xf0] sm:$0xff] }
 0x21c   : > { %1644 = vst.msk [vmem:[#allocation3 + $0x28] sm:$0xff] %vm1638_vm8, %v1553_v16  ;;  %1373 = vrot.lane.b32.xlu0 %v13588_v35, %s12792_s4 }
 0x21d   : > { %1186 = vrot.lane.b32.xlu1 %v13439_v55, %s12791_s23 }
 0x21e   : > { %v1745_v18 = vpop.permute.xlu0 %1744 }
 0x21f   : > { %v1557_v43 = vpop.permute.xlu1 %1556  ;;  %1837 = vst.msk [vmem:[#allocation3 + $0x20] sm:$0xff] %vm1832_vm9, %v1745_v18 }
 0x220   : > { %1646 = vst.msk [vmem:[#allocation3 + $0x38] sm:$0xff] %vm1638_vm8, %v1557_v43  ;;  %1377 = vrot.lane.b32.xlu0 %v13658_v41, %s12792_s4  ;;  %v13769_v43 = vld [vmem:[#allocation2 + $0xf8] sm:$0xff] }
 0x221   : > { %1375 = vrot.lane.b32.xlu1 %v13593_v49, %s12792_s4  ;;  %v11564_v49 = vld [vmem:[#allocation11 + $0x40] ss:$16 sps:$4 sm:$0xff]  }
 0x222   : > { %v1749_v21 = vpop.permute.xlu0 %1748 }
 0x223   : > { %v1747_v20 = vpop.permute.xlu1 %1746  ;;  %1839 = vst.msk [vmem:[#allocation3 + $0x30] sm:$0xff] %vm1832_vm9, %v1749_v21  ;;  %v13782_v21 = vld [vmem:[#allocation2 + $0xf1] sm:$0xff] }
 0x224   : > { %1838 = vst.msk [vmem:[#allocation3 + $0x28] sm:$0xff] %vm1832_vm9, %v1747_v20  ;;  %1566 = vrot.lane.b32.xlu0 %v13611_v62, %s12793_s25  ;;  %v11568_v62 = vld [vmem:[#allocation11 + $0x84] ss:$16 sps:$4 sm:$0xff]  }
 0x225   : > { %1379 = vrot.lane.b32.xlu1 %v13663_v19, %s12792_s4  ;;  %v604_v20 = vld [vmem:[%s13311_s22 + $0xd8] sm:$0xff] }
 0x226   : > { %v1938_v24 = vpop.permute.xlu0 %1937  ;;  %637 = vst.msk [vmem:[#allocation2 + $0x159] sm:$0xff] %vm521_vm0, %v604_v20  ;;  %v2077_v20 = vld [vmem:[#allocation2 + $0x112] sm:$0xff] }
 0x227   : > { %v1751_v23 = vpop.permute.xlu1 %1750  ;;  %2030 = vst.msk [vmem:[#allocation3 + $0x20] sm:$0xff] %vm2025_vm10, %v1938_v24  ;;  %v11582_v24 = vld [vmem:[#allocation11 + $0x100] ss:$16 sps:$4 sm:$0xff]  }
 0x228   : > { %1840 = vst.msk [vmem:[#allocation3 + $0x38] sm:$0xff] %vm1832_vm9, %v1751_v23  ;;  %1570 = vrot.lane.b32.xlu0 %v13674_v22, %s12793_s25 }
 0x229   : > { %1568 = vrot.lane.b32.xlu1 %v2069_v3, %s12793_s25 }
 0x22a   : > { %v1942_v27 = vpop.permute.xlu0 %1941 }
 0x22b   : > { %v1940_v26 = vpop.permute.xlu1 %1939  ;;  %2032 = vst.msk [vmem:[#allocation3 + $0x30] sm:$0xff] %vm2025_vm10, %v1942_v27  ;;  %v4559_v27 = vld [vmem:[#allocation11 + $0x120] sm:$0xff] }
 0x22c   : > { %2031 = vst.msk [vmem:[#allocation3 + $0x28] sm:$0xff] %vm2025_vm10, %v1940_v26  ;;  %1760 = vrot.lane.b32.xlu0 %v13441_v56, %s12794_s16  ;;  %v11556_v56 = vld [vmem:[#allocation11 + $0x4] ss:$16 sps:$4 sm:$0xff]  }
 0x22d   : > { %1572 = vrot.lane.b32.xlu1 %v13679_v25, %s12793_s25  ;;  %6273 = vmatprep.subr.bf16.mxu1 %v11556_v56  ;;  %v11585_v56 = vld [vmem:[#allocation11 + $0x144] ss:$16 sps:$4 sm:$0xff]  }
 0x22e   : > { %v2131_v31 = vpop.permute.xlu0 %2130  ;;  %6274 = vmatpush1.bf16.msra.mxu1 %v11558_v37  ;;  %v13804_v37 = vld [vmem:[#allocation2 + $0xfa] sm:$0xff] }
 0x22f   : > { %v1944_v30 = vpop.permute.xlu1 %1943  ;;  %2223 = vst.msk [vmem:[#allocation3 + $0x20] sm:$0xff] %vm2218_vm11, %v2131_v31  ;;  %6275 = vmatprep.subr.bf16.mxu1 %v11559_v42  ;;  %v10540_v31 = vcombine.low %v4559_v27, %v4561_v28  ;;  %v11590_v42 = vld [vmem:[#allocation11 + $0x160] ss:$16 sps:$4 sm:$0xff]  }
 0x230   : > { %2033 = vst.msk [vmem:[#allocation3 + $0x38] sm:$0xff] %vm2025_vm10, %v1944_v30  ;;  %1764 = vrot.lane.b32.xlu0 %v13467_v63, %s12794_s16 }
 0x231   : > { %1762 = vrot.lane.b32.xlu1 %v13439_v55, %s12794_s16  ;;  %v13707_v55 = vld [vmem:[#allocation2 + $0xd9] sm:$0xff] }
 0x232   : > { %v787_v33 = vpop.permute.xlu0 %786  ;;  %6276 = vmatpush1.bf16.msra.mxu1 %v11561_v46  ;;  %v11591_v46 = vld [vmem:[#allocation11 + $0x184] ss:$16 sps:$4 sm:$0xff]  }
 0x233   : > { %v2133_v32 = vpop.permute.xlu1 %2132  ;;  %875 = vst.msk [vmem:[#allocation3 + $0x40] sm:$0xff] %vm866_vm4, %v787_v33  ;;  %6277 = vmatprep.subr.bf16.mxu1 %v11562_v34  ;;  %v13798_v33 = vld [vmem:[#allocation2 + $0xf2] sm:$0xff] }
 0x234   : > { %2224 = vst.msk [vmem:[#allocation3 + $0x28] sm:$0xff] %vm2218_vm11, %v2133_v32  ;;  %1953 = vrot.lane.b32.xlu0 %v13658_v41, %s12795_s2  ;;  %v13819_v34 = vld [vmem:[#allocation2 + $0x110] sm:$0xff] }
 0x235   : > { %1766 = vrot.lane.b32.xlu1 %v13473_v1, %s12794_s16 }
 0x236   : > { %v2135_v38 = vpop.permute.xlu0 %2134  ;;  %v2255_v39 = vld [vmem:[#allocation3 + $0x20] sm:$0xff]  ;;  %6278 = vmatpush1.bf16.msra.mxu1 %v11564_v49 }
 0x237   : > { %v789_v36 = vpop.permute.xlu1 %788  ;;  %2225 = vst.msk [vmem:[#allocation3 + $0x30] sm:$0xff] %vm2218_vm11, %v2135_v38  ;;  %6279 = vmatprep.subr.bf16.mxu1 %v11565_v52  ;;  %v11594_v49 = vld [vmem:[#allocation11 + $0x1a4] ss:$16 sps:$4 sm:$0xff]  }
 0x238   : > { %876 = vst.msk [vmem:[#allocation3 + $0x48] sm:$0xff] %vm866_vm4, %v789_v36  ;;  %1957 = vrot.lane.b32.xlu0 %v13707_v55, %s12795_s2  ;;  %v11597_v52 = vld [vmem:[#allocation11 + $0x1c4] ss:$16 sps:$4 sm:$0xff]  }
 0x239   : > { %1955 = vrot.lane.b32.xlu1 %v13663_v19, %s12795_s2 }
 0x23a   : > { %v791_v35 = vpop.permute.xlu0 %790  ;;  %6280 = vmatpush1.bf16.msra.mxu1 %v11567_v58 }
 0x23b   : > { %v2137_v44 = vpop.permute.xlu1 %2136  ;;  %v2256_v45 = vld [vmem:[#allocation3 + $0x28] sm:$0xff]  ;;  %877 = vst.msk [vmem:[#allocation3 + $0x50] sm:$0xff] %vm866_vm4, %v791_v35  ;;  %6281 = vmatprep.subr.bf16.mxu1 %v11568_v62  ;;  %v11593_v35 = vld [vmem:[#allocation11 + $0x180] ss:$16 sps:$4 sm:$0xff]  }
 0x23c   : > { %2226 = vst.msk [vmem:[#allocation3 + $0x38] sm:$0xff] %vm2218_vm11, %v2137_v44  ;;  %v2285_v47 = vpack.c.bf16 %v2256_v45, %v2255_v39  ;;  %2146 = vrot.lane.b32.xlu0 %v13674_v22, %s12797_s17  ;;  %v11588_v39 = vld [vmem:[#allocation11 + $0x164] ss:$16 sps:$4 sm:$0xff]  }
 0x23d   : > { %1959 = vrot.lane.b32.xlu1 %v13713_v40, %s12795_s2  ;;  %v13813_v45 = vld [vmem:[#allocation2 + $0x108] sm:$0xff] }
 0x23e   : > { %11186 = vmatprep.mubr.msk.bf16.mxu0 %vm2321_vm12, %v2285_v47  ;;  %v980_v50 = vpop.permute.xlu0 %979  ;;  %v2257_v51 = vld [vmem:[#allocation3 + $0x30] sm:$0xff]  ;;  %6282 = vmatpush1.bf16.msra.mxu1 %v11570_v2  ;;  %v663_v2 = vld [vmem:[#allocation2 + $0xf8] sm:$0xff] }
 0x23f   : > { %v793_v48 = vpop.permute.xlu1 %792  ;;  %1068 = vst.msk [vmem:[#allocation3 + $0x40] sm:$0xff] %vm1059_vm5, %v980_v50  ;;  %6283 = vmatprep.subr.bf16.mxu1 %v11571_v4 }
 0x240   : > { %878 = vst.msk [vmem:[#allocation3 + $0x58] sm:$0xff] %vm866_vm4, %v793_v48  ;;  %802 = vrot.lane.b32.xlu0 %v13658_v41, %s12789_s24 }
 0x241   : > { %2148 = vrot.lane.b32.xlu1 %v13679_v25, %s12797_s17  ;;  %695 = vst.msk [vmem:[#allocation3 + $0xa8] sm:$0xff] %vm521_vm0, %v663_v2 }
 0x242   : > { %v984_v60 = vpop.permute.xlu0 %983  ;;  %6284 = vmatpush1.bf16.msra.mxu1 %v11573_v6 }
 0x243   : > { %v982_v53 = vpop.permute.xlu1 %981  ;;  %v2258_v54 = vld [vmem:[#allocation3 + $0x38] sm:$0xff]  ;;  %1070 = vst.msk [vmem:[#allocation3 + $0x50] sm:$0xff] %vm1059_vm5, %v984_v60  ;;  %6285 = vmatprep.subr.bf16.mxu1 %v11574_v8  ;;  %v605_v60 = vld [vmem:[%s13311_s22 + $0xe0] sm:$0xff] }
 0x244   : > { %1069 = vst.msk [vmem:[#allocation3 + $0x48] sm:$0xff] %vm1059_vm5, %v982_v53  ;;  %v2286_v59 = vpack.c.bf16 %v2258_v54, %v2257_v51  ;;  %2150 = vrot.lane.b32.xlu0 %v13730_v57, %s12797_s17  ;;  %v11596_v51 = vld [vmem:[#allocation11 + $0x1a0] ss:$16 sps:$4 sm:$0xff]   ;;  %v13829_v53 = vld [vmem:[#allocation2 + $0x109] sm:$0xff] }
 0x245   : > { %804 = vrot.lane.b32.xlu1 %v13663_v19, %s12789_s24  ;;  %v11599_v54 = vld [vmem:[#allocation11 + $0x1c0] ss:$16 sps:$4 sm:$0xff]   ;;  %638 = vst.msk [vmem:[#allocation2 + $0x169] sm:$0xff] %vm521_vm0, %v605_v60  ;;  %v667_v60 = vld [vmem:[#allocation2 + $0x128] sm:$0xff] }
 0x246   : > { %11187 = vmatmul.mubr.msk.bf16.gmra.mrb[4].mxu0 %vm2321_vm12, %v2286_v59  ;;  %v1173_v3 = vpop.permute.xlu0 %1172  ;;  %6286 = vmatpush1.bf16.msra.mxu1 %v11576_v10  ;;  %v11600_v59 = vld [vmem:[#allocation11 + $0x1e4] ss:$16 sps:$4 sm:$0xff]   ;;  %699 = vst.msk [vmem:[#allocation3 + $0xc8] sm:$0xff] %vm521_vm0, %v667_v60 }
 0x247   : > { %v986_v0 = vpop.permute.xlu1 %985  ;;  %1261 = vst.msk [vmem:[#allocation3 + $0x40] sm:$0xff] %vm1252_vm6, %v1173_v3  ;;  %6287 = vmatprep.subr.bf16.mxu1 %v11577_v12  ;;  %v662_v3 = vld [vmem:[#allocation2 + $0xf0] sm:$0xff] }
 0x248   : > { %1071 = vst.msk [vmem:[#allocation3 + $0x58] sm:$0xff] %vm1059_vm5, %v986_v0  ;;  %806 = vrot.lane.b32.xlu0 %v13707_v55, %s12789_s24  ;;  %v4585_v0 = vld [vmem:[#allocation11 + $0x1f0] sm:$0xff] }
 0x249   : > { %2152 = vrot.lane.b32.xlu1 %v13737_v61, %s12797_s17  ;;  %694 = vst.msk [vmem:[#allocation3 + $0xa0] sm:$0xff] %vm521_vm0, %v662_v3 }
 0x24a   : > { %v1177_v7 = vpop.permute.xlu0 %1176  ;;  %6288 = vmatpush1.bf16.msra.mxu1 %v11579_v14 }
 0x24b   : > { %v1175_v5 = vpop.permute.xlu1 %1174  ;;  %1263 = vst.msk [vmem:[#allocation3 + $0x50] sm:$0xff] %vm1252_vm6, %v1177_v7 }
 0x24c   : > { %1262 = vst.msk [vmem:[#allocation3 + $0x48] sm:$0xff] %vm1252_vm6, %v1175_v5  ;;  %995 = vrot.lane.b32.xlu0 %v13674_v22, %s12790_s12  ;;  %v11580_v22 = vld [vmem:[#allocation11 + $0x104] ss:$16 sps:$4 sm:$0xff]  }
 0x24d   : > { %808 = vrot.lane.b32.xlu1 %v13713_v40, %s12789_s24  ;;  %6289 = vmatprep.subr.bf16.mxu1 %v11580_v22  ;;  %v13841_v5 = vld [vmem:[#allocation2 + $0x111] sm:$0xff] }
 0x24e   : > { %v1366_v11 = vpop.permute.xlu0 %1365  ;;  %6290 = vmatpush1.bf16.msra.mxu1 %v11582_v24 }
 0x24f   : > { %v1179_v9 = vpop.permute.xlu1 %1178  ;;  %1454 = vst.msk [vmem:[#allocation3 + $0x40] sm:$0xff] %vm1445_vm7, %v1366_v11  ;;  %6291 = vmatprep.subr.bf16.mxu1 %v11583_v29  ;;  %v1114_v29 = vld [vmem:[#allocation2 + $0x120] sm:$0xff] }
 0x250   : > { %1264 = vst.msk [vmem:[#allocation3 + $0x58] sm:$0xff] %vm1252_vm6, %v1179_v9  ;;  %999 = vrot.lane.b32.xlu0 %v13730_v57, %s12790_s12 }
 0x251   : > { %997 = vrot.lane.b32.xlu1 %v13679_v25, %s12790_s12  ;;  %v13788_v25 = vld [vmem:[#allocation2 + $0xf9] sm:$0xff] }
 0x252   : > { %v1370_v15 = vpop.permute.xlu0 %1369  ;;  %6292 = vmatpush1.bf16.msra.mxu1 %v10540_v31  ;;  %v1115_v31 = vld [vmem:[#allocation2 + $0x128] sm:$0xff] }
 0x253   : > { %v1368_v13 = vpop.permute.xlu1 %1367  ;;  %1456 = vst.msk [vmem:[#allocation3 + $0x50] sm:$0xff] %vm1445_vm7, %v1370_v15  ;;  %6293 = vmatprep.subr.bf16.mxu1 %v11585_v56  ;;  %v665_v15 = vld [vmem:[#allocation2 + $0x110] sm:$0xff] }
 0x254   : > { %1455 = vst.msk [vmem:[#allocation3 + $0x48] sm:$0xff] %vm1445_vm7, %v1368_v13  ;;  %1188 = vrot.lane.b32.xlu0 %v13467_v63, %s12791_s23  ;;  %v603_v63 = vld [vmem:[%s13311_s22 + $0xd0] sm:$0xff]  ;;  %v13854_v13 = vld [vmem:[#allocation2 + $0x168] sm:$0xff] }
 0x255   : > { %1001 = vrot.lane.b32.xlu1 %v13737_v61, %s12790_s12  ;;  %636 = vst.msk [vmem:[#allocation2 + $0x151] sm:$0xff] %vm521_vm0, %v603_v63  ;;  %704 = vst.msk [vmem:[#allocation3 + $0xf0] sm:$0xff] %vm521_vm0, %v13854_v13  ;;  %v607_v56 = vld [vmem:[%s13311_s22 + $0xf0] sm:$0xff] }
 0x256   : > { %v1559_v41 = vpop.permute.xlu0 %1558  ;;  %697 = vst.msk [vmem:[#allocation3 + $0xb8] sm:$0xff] %vm521_vm0, %v665_v15  ;;  %640 = vst.msk [vmem:[#allocation2 + $0x181] sm:$0xff] %vm521_vm0, %v607_v56 }
 0x257   : > { %v1372_v16 = vpop.permute.xlu1 %1371  ;;  %1647 = vst.msk [vmem:[#allocation3 + $0x40] sm:$0xff] %vm1638_vm8, %v1559_v41 }
 0x258   : > { %1457 = vst.msk [vmem:[#allocation3 + $0x58] sm:$0xff] %vm1445_vm7, %v1372_v16  ;;  %1192 = vrot.lane.b32.xlu0 %v1110_v17, %s12791_s23 }
 0x259   : > { %1190 = vrot.lane.b32.xlu1 %v13473_v1, %s12791_s23 }
 0x25a   : > { %v1563_v19 = vpop.permute.xlu0 %1562 }
 0x25b   : > { %v1561_v18 = vpop.permute.xlu1 %1560  ;;  %1649 = vst.msk [vmem:[#allocation3 + $0x50] sm:$0xff] %vm1638_vm8, %v1563_v19 }
 0x25c   : > { %1648 = vst.msk [vmem:[#allocation3 + $0x48] sm:$0xff] %vm1638_vm8, %v1561_v18  ;;  %1381 = vrot.lane.b32.xlu0 %v13707_v55, %s12792_s4  ;;  %v11587_v55 = vld [vmem:[#allocation11 + $0x140] ss:$16 sps:$4 sm:$0xff]   ;;  %v13868_v18 = vld [vmem:[#allocation2 + $0x10a] sm:$0xff] }
 0x25d   : > { %1194 = vrot.lane.b32.xlu1 %v13769_v43, %s12791_s23  ;;  %6294 = vmatpush1.bf16.msra.mxu1 %v11587_v55 }
 0x25e   : > { %v1753_v23 = vpop.permute.xlu0 %1752  ;;  %6295 = vmatprep.subr.bf16.mxu1 %v11588_v39  ;;  %v13919_v39 = vld [vmem:[#allocation2 + $0x129] sm:$0xff] }
 0x25f   : > { %v1565_v1 = vpop.permute.xlu1 %1564  ;;  %1841 = vst.msk [vmem:[#allocation3 + $0x40] sm:$0xff] %vm1832_vm9, %v1753_v23 }
 0x260   : > { %1650 = vst.msk [vmem:[#allocation3 + $0x58] sm:$0xff] %vm1638_vm8, %v1565_v1  ;;  %1385 = vrot.lane.b32.xlu0 %v13782_v21, %s12792_s4 }
 0x261   : > { %1383 = vrot.lane.b32.xlu1 %v13713_v40, %s12792_s4  ;;  %6296 = vmatpush1.bf16.msra.mxu1 %v11590_v42 }
 0x262   : > { %v1757_v30 = vpop.permute.xlu0 %1756  ;;  %6297 = vmatprep.subr.bf16.mxu1 %v11591_v46 }
 0x263   : > { %v1755_v26 = vpop.permute.xlu1 %1754  ;;  %1843 = vst.msk [vmem:[#allocation3 + $0x50] sm:$0xff] %vm1832_vm9, %v1757_v30 }
 0x264   : > { %1842 = vst.msk [vmem:[#allocation3 + $0x48] sm:$0xff] %vm1832_vm9, %v1755_v26  ;;  %1574 = vrot.lane.b32.xlu0 %v13730_v57, %s12793_s25  ;;  %v4583_v57 = vld [vmem:[#allocation11 + $0x1e0] sm:$0xff] }
 0x265   : > { %1387 = vrot.lane.b32.xlu1 %v13788_v25, %s12792_s4  ;;  %6298 = vmatpush1.bf16.msra.mxu1 %v11593_v35  ;;  %v10564_v8 = vcombine.low %v4583_v57, %v4585_v0  ;;  %v13958_v57 = vld [vmem:[#allocation2 + $0x139] sm:$0xff] }
 0x266   : > { %v1946_v36 = vpop.permute.xlu0 %1945  ;;  %6299 = vmatprep.subr.bf16.mxu1 %v11594_v49  ;;  %v13943_v49 = vld [vmem:[#allocation2 + $0x138] sm:$0xff] }
 0x267   : > { %v1759_v32 = vpop.permute.xlu1 %1758  ;;  %2034 = vst.msk [vmem:[#allocation3 + $0x40] sm:$0xff] %vm2025_vm10, %v1946_v36  ;;  %v608_v36 = vld [vmem:[%s13311_s22 + $0xf8] sm:$0xff] }
 0x268   : > { %1844 = vst.msk [vmem:[#allocation3 + $0x58] sm:$0xff] %vm1832_vm9, %v1759_v32  ;;  %1578 = vrot.lane.b32.xlu0 %v13798_v33, %s12793_s25 }
 0x269   : > { %1576 = vrot.lane.b32.xlu1 %v13737_v61, %s12793_s25  ;;  %6300 = vmatpush1.bf16.msra.mxu1 %v11596_v51  ;;  %v606_v61 = vld [vmem:[%s13311_s22 + $0xe8] sm:$0xff]  ;;  %641 = vst.msk [vmem:[#allocation2 + $0x189] sm:$0xff] %vm521_vm0, %v608_v36  ;;  %v13948_v51 = vld [vmem:[#allocation2 + $0x140] sm:$0xff]  ;;  %v14029_v36 = vld [vmem:[#allocation2 + $0x150] sm:$0xff]  ;;  %s12686_s22 = scalar_lea.vmem %s15052_s26, 16 }
 0x26a   : > { %v1950_v40 = vpop.permute.xlu0 %1949  ;;  %6301 = vmatprep.subr.bf16.mxu1 %v11597_v52  ;;  %639 = vst.msk [vmem:[#allocation2 + $0x171] sm:$0xff] %vm521_vm0, %v606_v61  ;;  %v13964_v61 = vld [vmem:[#allocation2 + $0x141] sm:$0xff]  ;;  %p12687_p13 = scmp.ne.s32.totalorder %s15052_s26, %s12686_s22 }
 0x26b   : > { %v1948_v38 = vpop.permute.xlu1 %1947  ;;  %2036 = vst.msk [vmem:[#allocation3 + $0x50] sm:$0xff] %vm2025_vm10, %v1950_v40 }
 0x26c   : > { %2035 = vst.msk [vmem:[#allocation3 + $0x48] sm:$0xff] %vm2025_vm10, %v1948_v38  ;;  %1768 = vrot.lane.b32.xlu0 %v1110_v17, %s12794_s16  ;;  %v664_v17 = vld [vmem:[#allocation2 + $0x108] sm:$0xff]  ;;  %p12688_p1 = pnand %p12687_p13, %p15163_p0 }
 0x26d   : > { %1580 = vrot.lane.b32.xlu1 %v13804_v37, %s12793_s25  ;;  %6302 = vmatpush1.bf16.msra.mxu1 %v11599_v54  ;;  %696 = vst.msk [vmem:[#allocation3 + $0xb0] sm:$0xff] %vm521_vm0, %v664_v17  ;;  %v13992_v17 = vld [vmem:[#allocation2 + $0x142] sm:$0xff] }
 0x26e   : > { %v2139_v47 = vpop.permute.xlu0 %2138  ;;  %6303 = vmatprep.subr.bf16.mxu1 %v11600_v59  ;;  %p12689_p6 = pneg %p12688_p1 }
 0x26f   : > { %v1952_v44 = vpop.permute.xlu1 %1951  ;;  %2227 = vst.msk [vmem:[#allocation3 + $0x40] sm:$0xff] %vm2218_vm11, %v2139_v47  ;;  %v13934_v47 = vld [vmem:[#allocation2 + $0x12a] sm:$0xff] }
 0x270   : > { %2037 = vst.msk [vmem:[#allocation3 + $0x58] sm:$0xff] %vm2025_vm10, %v1952_v44  ;;  %1772 = vrot.lane.b32.xlu0 %v13813_v45, %s12794_s16 }
 0x271   : > { %1770 = vrot.lane.b32.xlu1 %v13769_v43, %s12794_s16  ;;  %v13852_v12 = vld [vmem:[#allocation2 + $0x170] sm:$0xff]  ;;  %6304 = vmatpush1.bf16.msra.mxu1 %v10564_v8  ;;  %v668_v8 = vld [vmem:[#allocation2 + $0x138] sm:$0xff] }
 0x272   : > { %v795_v50 = vpop.permute.xlu0 %794  ;;  %705 = vst.msk [vmem:[#allocation3 + $0xf8] sm:$0xff] %vm521_vm0, %v13852_v12  ;;  %700 = vst.msk [vmem:[#allocation3 + $0xd0] sm:$0xff] %vm521_vm0, %v668_v8 }
 0x273   : > { %v2141_v48 = vpop.permute.xlu1 %2140  ;;  %879 = vst.msk [vmem:[#allocation3 + $0x60] sm:$0xff] %vm866_vm4, %v795_v50 }
 0x274   : > { %2228 = vst.msk [vmem:[#allocation3 + $0x48] sm:$0xff] %vm2218_vm11, %v2141_v48  ;;  %1961 = vrot.lane.b32.xlu0 %v13782_v21, %s12795_s2 }
 0x275   : > { %1774 = vrot.lane.b32.xlu1 %v13819_v34, %s12794_s16 }
 0x276   : > { %v2143_v62 = vpop.permute.xlu0 %2142  ;;  %v2259_v4 = vld [vmem:[#allocation3 + $0x40] sm:$0xff] }
 0x277   : > { %v797_v58 = vpop.permute.xlu1 %796  ;;  %2229 = vst.msk [vmem:[#allocation3 + $0x50] sm:$0xff] %vm2218_vm11, %v2143_v62  ;;  %v666_v62 = vld [vmem:[#allocation2 + $0x120] sm:$0xff] }
 0x278   : > { %880 = vst.msk [vmem:[#allocation3 + $0x68] sm:$0xff] %vm866_vm4, %v797_v58  ;;  %1965 = vrot.lane.b32.xlu0 %v13829_v53, %s12795_s2 }
 0x279   : > { %1963 = vrot.lane.b32.xlu1 %v13788_v25, %s12795_s2  ;;  %698 = vst.msk [vmem:[#allocation3 + $0xc0] sm:$0xff] %vm521_vm0, %v666_v62 }
 0x27a   : > { %v799_v10 = vpop.permute.xlu0 %798 }
 0x27b   : > { %v2145_v6 = vpop.permute.xlu1 %2144  ;;  %v2260_v7 = vld [vmem:[#allocation3 + $0x48] sm:$0xff]  ;;  %881 = vst.msk [vmem:[#allocation3 + $0x70] sm:$0xff] %vm866_vm4, %v799_v10 }
 0x27c   : > { %2230 = vst.msk [vmem:[#allocation3 + $0x58] sm:$0xff] %vm2218_vm11, %v2145_v6  ;;  %v2287_v9 = vpack.c.bf16 %v2260_v7, %v2259_v4  ;;  %2154 = vrot.lane.b32.xlu0 %v13798_v33, %s12797_s17 }
 0x27d   : > { %1967 = vrot.lane.b32.xlu1 %v13841_v5, %s12795_s2 }
 0x27e   : > { %11190 = vmatprep.mubr.msk.bf16.mxu0 %vm2321_vm12, %v2287_v9  ;;  %v988_v14 = vpop.permute.xlu0 %987  ;;  %v2261_v16 = vld [vmem:[#allocation3 + $0x50] sm:$0xff] }
 0x27f   : > { %v801_v11 = vpop.permute.xlu1 %800  ;;  %1072 = vst.msk [vmem:[#allocation3 + $0x60] sm:$0xff] %vm1059_vm5, %v988_v14  ;;  %v13985_v14 = vld [vmem:[#allocation2 + $0x13a] sm:$0xff] }
 0x280   : > { %882 = vst.msk [vmem:[#allocation3 + $0x78] sm:$0xff] %vm866_vm4, %v801_v11  ;;  %810 = vrot.lane.b32.xlu0 %v13782_v21, %s12789_s24 }
 0x281   : > { %2156 = vrot.lane.b32.xlu1 %v13804_v37, %s12797_s17 }
 0x282   : > { %v992_v63 = vpop.permute.xlu0 %991 }
 0x283   : > { %v990_v41 = vpop.permute.xlu1 %989  ;;  %v2262_v43 = vld [vmem:[#allocation3 + $0x58] sm:$0xff]  ;;  %1074 = vst.msk [vmem:[#allocation3 + $0x70] sm:$0xff] %vm1059_vm5, %v992_v63  ;;  %v12798_v63 = vmov 1983009808  }
 0x284   : > { %1073 = vst.msk [vmem:[#allocation3 + $0x68] sm:$0xff] %vm1059_vm5, %v990_v41  ;;  %v2288_v19 = vpack.c.bf16 %v2262_v43, %v2261_v16  ;;  %2158 = vrot.lane.b32.xlu0 %v13868_v18, %s12797_s17 }
 0x285   : > { %812 = vrot.lane.b32.xlu1 %v13788_v25, %s12789_s24 }
 0x286   : > { %11191 = vmatmul.mubr.msk.bf16.gmra.mrb[8].mxu0 %vm2321_vm12, %v2288_v19  ;;  %v1181_v21 = vpop.permute.xlu0 %1180 }
 0x287   : > { %v994_v1 = vpop.permute.xlu1 %993  ;;  %1265 = vst.msk [vmem:[#allocation3 + $0x60] sm:$0xff] %vm1252_vm6, %v1181_v21 }
 0x288   : > { %1075 = vst.msk [vmem:[#allocation3 + $0x78] sm:$0xff] %vm1059_vm5, %v994_v1  ;;  %814 = vrot.lane.b32.xlu0 %v13829_v53, %s12789_s24  ;;  %v2606_v1 = vlaneseq }
 0x289   : > { %2160 = vrot.lane.b32.xlu1 %v2077_v20, %s12797_s17 }
 0x28a   : > { %v1185_v23 = vpop.permute.xlu0 %1184 }
 0x28b   : > { %v1183_v22 = vpop.permute.xlu1 %1182  ;;  %1267 = vst.msk [vmem:[#allocation3 + $0x70] sm:$0xff] %vm1252_vm6, %v1185_v23 }
 0x28c   : > { %1266 = vst.msk [vmem:[#allocation3 + $0x68] sm:$0xff] %vm1252_vm6, %v1183_v22  ;;  %1003 = vrot.lane.b32.xlu0 %v13798_v33, %s12790_s12 }
 0x28d   : > { %816 = vrot.lane.b32.xlu1 %v13841_v5, %s12789_s24 }
 0x28e   : > { %v1374_v25 = vpop.permute.xlu0 %1373 }
 0x28f   : > { %v1187_v24 = vpop.permute.xlu1 %1186  ;;  %1458 = vst.msk [vmem:[#allocation3 + $0x60] sm:$0xff] %vm1445_vm7, %v1374_v25 }
 0x290   : > { %1268 = vst.msk [vmem:[#allocation3 + $0x78] sm:$0xff] %vm1252_vm6, %v1187_v24  ;;  %1007 = vrot.lane.b32.xlu0 %v13868_v18, %s12790_s12  ;;  %v14014_v24 = vshrl.u32 %v2606_v1, 7 }
 0x291   : > { %1005 = vrot.lane.b32.xlu1 %v13804_v37, %s12790_s12  ;;  %v13913_v37 = vld [vmem:[#allocation2 + $0x121] sm:$0xff] }
 0x292   : > { %v1378_v27 = vpop.permute.xlu0 %1377 }
 0x293   : > { %v1376_v26 = vpop.permute.xlu1 %1375  ;;  %1460 = vst.msk [vmem:[#allocation3 + $0x70] sm:$0xff] %vm1445_vm7, %v1378_v27 }
 0x294   : > { %1459 = vst.msk [vmem:[#allocation3 + $0x68] sm:$0xff] %vm1445_vm7, %v1376_v26  ;;  %1196 = vrot.lane.b32.xlu0 %v13813_v45, %s12791_s23  ;;  %v13929_v45 = vld [vmem:[#allocation2 + $0x122] sm:$0xff]  ;;  %v14016_v26 = vld [vmem:[#allocation9] ss:$0 sm:$0xff] }
 0x295   : > { %1009 = vrot.lane.b32.xlu1 %v2077_v20, %s12790_s12 }
 0x296   : > { %v1567_v30 = vpop.permute.xlu0 %1566 }
 0x297   : > { %v1380_v28 = vpop.permute.xlu1 %1379  ;;  %1651 = vst.msk [vmem:[#allocation3 + $0x60] sm:$0xff] %vm1638_vm8, %v1567_v30 }
 0x298   : > { %1461 = vst.msk [vmem:[#allocation3 + $0x78] sm:$0xff] %vm1445_vm7, %v1380_v28  ;;  %1200 = vrot.lane.b32.xlu0 %v1114_v29, %s12791_s23 }
 0x299   : > { %1198 = vrot.lane.b32.xlu1 %v13819_v34, %s12791_s23 }
 0x29a   : > { %v1571_v33 = vpop.permute.xlu0 %1570 }
 0x29b   : > { %v1569_v32 = vpop.permute.xlu1 %1568  ;;  %1653 = vst.msk [vmem:[#allocation3 + $0x70] sm:$0xff] %vm1638_vm8, %v1571_v33 }
 0x29c   : > { %1652 = vst.msk [vmem:[#allocation3 + $0x68] sm:$0xff] %vm1638_vm8, %v1569_v32  ;;  %1389 = vrot.lane.b32.xlu0 %v13829_v53, %s12792_s4 }
 0x29d   : > { %1202 = vrot.lane.b32.xlu1 %v1115_v31, %s12791_s23 }
 0x29e   : > { %v1761_v38 = vpop.permute.xlu0 %1760 }
 0x29f   : > { %v1573_v55 = vpop.permute.xlu1 %1572  ;;  %1845 = vst.msk [vmem:[#allocation3 + $0x60] sm:$0xff] %vm1832_vm9, %v1761_v38 }
 0x2a0   : > { %1654 = vst.msk [vmem:[#allocation3 + $0x78] sm:$0xff] %vm1638_vm8, %v1573_v55  ;;  %1393 = vrot.lane.b32.xlu0 %v13913_v37, %s12792_s4 }
 0x2a1   : > { %1391 = vrot.lane.b32.xlu1 %v13841_v5, %s12792_s4  ;;  %v669_v5 = vld [vmem:[#allocation2 + $0x140] sm:$0xff] }
 0x2a2   : > { %v1765_v42 = vpop.permute.xlu0 %1764  ;;  %701 = vst.msk [vmem:[#allocation3 + $0xd8] sm:$0xff] %vm521_vm0, %v669_v5 }
 0x2a3   : > { %v1763_v40 = vpop.permute.xlu1 %1762  ;;  %1847 = vst.msk [vmem:[#allocation3 + $0x70] sm:$0xff] %vm1832_vm9, %v1765_v42 }
 0x2a4   : > { %1846 = vst.msk [vmem:[#allocation3 + $0x68] sm:$0xff] %vm1832_vm9, %v1763_v40  ;;  %1582 = vrot.lane.b32.xlu0 %v13868_v18, %s12793_s25 }
 0x2a5   : > { %1395 = vrot.lane.b32.xlu1 %v13919_v39, %s12792_s4 }
 0x2a6   : > { %v1954_v46 = vpop.permute.xlu0 %1953 }
 0x2a7   : > { %v1767_v44 = vpop.permute.xlu1 %1766  ;;  %2038 = vst.msk [vmem:[#allocation3 + $0x60] sm:$0xff] %vm2025_vm10, %v1954_v46 }
 0x2a8   : > { %1848 = vst.msk [vmem:[#allocation3 + $0x78] sm:$0xff] %vm1832_vm9, %v1767_v44  ;;  %1586 = vrot.lane.b32.xlu0 %v13929_v45, %s12793_s25 }
 0x2a9   : > { %1584 = vrot.lane.b32.xlu1 %v2077_v20, %s12793_s25  ;;  %v2604_v20 = vunpack.c.l.s4 %v12798_v63 }
 0x2aa   : > { %v1958_v34 = vpop.permute.xlu0 %1957 }
 0x2ab   : > { %v1956_v35 = vpop.permute.xlu1 %1955  ;;  %2040 = vst.msk [vmem:[#allocation3 + $0x70] sm:$0xff] %vm2025_vm10, %v1958_v34  ;;  %v2605_v23 = vunpack.c.0.s8 %v2604_v20 }
 0x2ac   : > { %2039 = vst.msk [vmem:[#allocation3 + $0x68] sm:$0xff] %vm2025_vm10, %v1956_v35  ;;  %1776 = vrot.lane.b32.xlu0 %v1114_v29, %s12794_s16 }
 0x2ad   : > { %1588 = vrot.lane.b32.xlu1 %v13934_v47, %s12793_s25  ;;  %v14024_v30 = vsub.s32 %v2605_v23, %v14014_v24 }
 0x2ae   : > { %v2147_v50 = vpop.permute.xlu0 %2146 }
 0x2af   : > { %v1960_v48 = vpop.permute.xlu1 %1959  ;;  %2231 = vst.msk [vmem:[#allocation3 + $0x60] sm:$0xff] %vm2218_vm11, %v2147_v50 }
 0x2b0   : > { %2041 = vst.msk [vmem:[#allocation3 + $0x78] sm:$0xff] %vm2025_vm10, %v1960_v48  ;;  %1780 = vrot.lane.b32.xlu0 %v13943_v49, %s12794_s16  ;;  %v14044_v48 = vsub.s32 0, %v14014_v24 }
 0x2b1   : > { %1778 = vrot.lane.b32.xlu1 %v1115_v31, %s12794_s16 }
 0x2b2   : > { %v803_v53 = vpop.permute.xlu0 %802 }
 0x2b3   : > { %v2149_v52 = vpop.permute.xlu1 %2148  ;;  %883 = vst.msk [vmem:[#allocation3 + $0x80] sm:$0xff] %vm866_vm4, %v803_v53 }
 0x2b4   : > { %2232 = vst.msk [vmem:[#allocation3 + $0x68] sm:$0xff] %vm2218_vm11, %v2149_v52  ;;  %1969 = vrot.lane.b32.xlu0 %v13913_v37, %s12795_s2 }
 0x2b5   : > { %1782 = vrot.lane.b32.xlu1 %v13948_v51, %s12794_s16 }
 0x2b6   : > { %v2151_v58 = vpop.permute.xlu0 %2150  ;;  %v2263_v59 = vld [vmem:[#allocation3 + $0x60] sm:$0xff] }
 0x2b7   : > { %v805_v54 = vpop.permute.xlu1 %804  ;;  %2233 = vst.msk [vmem:[#allocation3 + $0x70] sm:$0xff] %vm2218_vm11, %v2151_v58 }
 0x2b8   : > { %884 = vst.msk [vmem:[#allocation3 + $0x88] sm:$0xff] %vm866_vm4, %v805_v54  ;;  %1973 = vrot.lane.b32.xlu0 %v13958_v57, %s12795_s2 }
 0x2b9   : > { %1971 = vrot.lane.b32.xlu1 %v13919_v39, %s12795_s2 }
 0x2ba   : > { %v807_v4 = vpop.permute.xlu0 %806 }
 0x2bb   : > { %v2153_v0 = vpop.permute.xlu1 %2152  ;;  %v2264_v2 = vld [vmem:[#allocation3 + $0x68] sm:$0xff]  ;;  %885 = vst.msk [vmem:[#allocation3 + $0x90] sm:$0xff] %vm866_vm4, %v807_v4 }
 0x2bc   : > { %2234 = vst.msk [vmem:[#allocation3 + $0x78] sm:$0xff] %vm2218_vm11, %v2153_v0  ;;  %v2289_v3 = vpack.c.bf16 %v2264_v2, %v2263_v59  ;;  %2162 = vrot.lane.b32.xlu0 %v13929_v45, %s12797_s17 }
 0x2bd   : > { %1975 = vrot.lane.b32.xlu1 %v13964_v61, %s12795_s2 }
 0x2be   : > { %11194 = vmatprep.mubr.msk.bf16.mxu0 %vm2321_vm12, %v2289_v3  ;;  %v996_v7 = vpop.permute.xlu0 %995  ;;  %v2265_v9 = vld [vmem:[#allocation3 + $0x70] sm:$0xff] }
 0x2bf   : > { %v809_v6 = vpop.permute.xlu1 %808  ;;  %1076 = vst.msk [vmem:[#allocation3 + $0x80] sm:$0xff] %vm1059_vm5, %v996_v7 }
 0x2c0   : > { %886 = vst.msk [vmem:[#allocation3 + $0x98] sm:$0xff] %vm866_vm4, %v809_v6  ;;  %818 = vrot.lane.b32.xlu0 %v13913_v37, %s12789_s24 }
 0x2c1   : > { %2164 = vrot.lane.b32.xlu1 %v13934_v47, %s12797_s17 }
 0x2c2   : > { %v1000_v16 = vpop.permute.xlu0 %999 }
 0x2c3   : > { %v998_v10 = vpop.permute.xlu1 %997  ;;  %v2266_v11 = vld [vmem:[#allocation3 + $0x78] sm:$0xff]  ;;  %1078 = vst.msk [vmem:[#allocation3 + $0x90] sm:$0xff] %vm1059_vm5, %v1000_v16 }
 0x2c4   : > { %1077 = vst.msk [vmem:[#allocation3 + $0x88] sm:$0xff] %vm1059_vm5, %v998_v10  ;;  %v2290_v15 = vpack.c.bf16 %v2266_v11, %v2265_v9  ;;  %2166 = vrot.lane.b32.xlu0 %v13985_v14, %s12797_s17  ;;  %v14057_v11 = vld [vmem:[#allocation2 + $0x151] sm:$0xff] }
 0x2c5   : > { %820 = vrot.lane.b32.xlu1 %v13919_v39, %s12789_s24 }
 0x2c6   : > { %11195 = vmatmul.mubr.msk.bf16.gmra.mrb[12].mxu0 %vm2321_vm12, %v2290_v15  ;;  %v1189_v43 = vpop.permute.xlu0 %1188 }
 0x2c7   : > { %v1002_v41 = vpop.permute.xlu1 %1001  ;;  %1269 = vst.msk [vmem:[#allocation3 + $0x80] sm:$0xff] %vm1252_vm6, %v1189_v43 }
 0x2c8   : > { %1079 = vst.msk [vmem:[#allocation3 + $0x98] sm:$0xff] %vm1059_vm5, %v1002_v41  ;;  %822 = vrot.lane.b32.xlu0 %v13958_v57, %s12789_s24 }
 0x2c9   : > { %2168 = vrot.lane.b32.xlu1 %v13992_v17, %s12797_s17 }
 0x2ca   : > { %v1193_v19 = vpop.permute.xlu0 %1192 }
 0x2cb   : > { %v1191_v18 = vpop.permute.xlu1 %1190  ;;  %1271 = vst.msk [vmem:[#allocation3 + $0x90] sm:$0xff] %vm1252_vm6, %v1193_v19 }
 0x2cc   : > { %1270 = vst.msk [vmem:[#allocation3 + $0x88] sm:$0xff] %vm1252_vm6, %v1191_v18  ;;  %1011 = vrot.lane.b32.xlu0 %v13929_v45, %s12790_s12 }
 0x2cd   : > { %824 = vrot.lane.b32.xlu1 %v13964_v61, %s12789_s24 }
 0x2ce   : > { %v1382_v22 = vpop.permute.xlu0 %1381 }
 0x2cf   : > { %v1195_v21 = vpop.permute.xlu1 %1194  ;;  %1462 = vst.msk [vmem:[#allocation3 + $0x80] sm:$0xff] %vm1445_vm7, %v1382_v22  ;;  %v14064_v22 = vld [vmem:[#allocation2 + $0x159] sm:$0xff] }
 0x2d0   : > { %1272 = vst.msk [vmem:[#allocation3 + $0x98] sm:$0xff] %vm1252_vm6, %v1195_v21  ;;  %1015 = vrot.lane.b32.xlu0 %v13985_v14, %s12790_s12 }
 0x2d1   : > { %1013 = vrot.lane.b32.xlu1 %v13934_v47, %s12790_s12  ;;  %v14038_v47 = vld [vmem:[#allocation2 + $0x158] sm:$0xff] }
 0x2d2   : > { %v1386_v27 = vpop.permute.xlu0 %1385 }
 0x2d3   : > { %v1384_v25 = vpop.permute.xlu1 %1383  ;;  %1464 = vst.msk [vmem:[#allocation3 + $0x90] sm:$0xff] %vm1445_vm7, %v1386_v27 }
 0x2d4   : > { %1463 = vst.msk [vmem:[#allocation3 + $0x88] sm:$0xff] %vm1445_vm7, %v1384_v25  ;;  %1204 = vrot.lane.b32.xlu0 %v13943_v49, %s12791_s23 }
 0x2d5   : > { %1017 = vrot.lane.b32.xlu1 %v13992_v17, %s12790_s12  ;;  %v11184_v28 = vpop.f32.mrb[0].mxu0 }
 0x2d6   : > { %v2420_v29 = vadd.f32 %v11184_v28, %v14016_v26  ;;  %v2411_v31 = vpop.f32.mrb[1].mxu0  ;;  %v1575_v39 = vpop.permute.xlu0 %1574 }
 0x2d7   : > { %v2412_v32 = vadd.f32 %v14016_v26, %v2411_v31  ;;  %v1388_v33 = vpop.permute.xlu1 %1387  ;;  %v11185_v56 = vpop.f32.mrb[2].mxu0  ;;  %1655 = vst.msk [vmem:[#allocation3 + $0x80] sm:$0xff] %vm1638_vm8, %v1575_v39 }
 0x2d8   : > { %v2540_v55 = vmax.f32 %v2420_v29, 0.0  ;;  %1465 = vst.msk [vmem:[#allocation3 + $0x98] sm:$0xff] %vm1445_vm7, %v1388_v33  ;;  %v2423_v37 = vadd.f32 %v11185_v56, %v14016_v26  ;;  %v2414_v38 = vpop.f32.mrb[3].mxu0  ;;  %1208 = vrot.lane.b32.xlu0 %v14029_v36, %s12791_s23 }
 0x2d9   : > { %v2538_v40 = vmax.f32 %v2412_v32, 0.0  ;;  %v2415_v42 = vadd.f32 %v14016_v26, %v2414_v38  ;;  %1206 = vrot.lane.b32.xlu1 %v13948_v51, %s12791_s23 }
 0x2da   : > { %v2636_v44 = vcombine.high %v2540_v55, %v2540_v55  ;;  %v2643_v45 = vrot.slane %v2540_v55, %v14024_v30  ;;  %v2541_v46 = vmax.f32 %v2423_v37, 0.0  ;;  %v1579_v58 = vpop.permute.xlu0 %1578 }
 0x2db   : > { %v2602_v35 = vcombine.high %v2538_v40, %v2538_v40  ;;  %v2609_v34 = vrot.slane %v2538_v40, %v14024_v30  ;;  %v14046_v49 = vmax.f32 %v2415_v42, 0.0  ;;  %v1577_v50 = vpop.permute.xlu1 %1576  ;;  %1657 = vst.msk [vmem:[#allocation3 + $0x90] sm:$0xff] %vm1638_vm8, %v1579_v58 }
 0x2dc   : > { %v2650_v51 = vrot.slane %v2636_v44, %v14024_v30  ;;  %v2651_v52 = vcombine.high %v2643_v45, %v2643_v45  ;;  %v10440_v53 = vrot.slane %v2643_v45, 9  ;;  %v2653_v54 = vcombine.high %v2541_v46, %v2541_v46  ;;  %1656 = vst.msk [vmem:[#allocation3 + $0x88] sm:$0xff] %vm1638_vm8, %v1577_v50  ;;  %1397 = vrot.lane.b32.xlu0 %v13958_v57, %s12792_s4 }
 0x2dd   : > { %v2616_v59 = vrot.slane %v2602_v35, %v14024_v30  ;;  %v2617_v60 = vcombine.high %v2609_v34, %v2609_v34  ;;  %v10376_v62 = vrot.slane %v2609_v34, 9  ;;  %v2660_v0 = vrot.slane %v2541_v46, %v14024_v30  ;;  %1210 = vrot.lane.b32.xlu1 %v14038_v47, %s12791_s23 }
 0x2de   : > { %v2652_v2 = vcombine.high %v2650_v51, %v2650_v51  ;;  %v10441_v3 = vrot.slane %v2651_v52, 9  ;;  %v10442_v4 = vrot.slane %v2650_v51, 9  ;;  %v3722_v5 = vmax.f32 %v2643_v45, %v10440_v53  ;;  %v1769_v18 = vpop.permute.xlu0 %1768 }
 0x2df   : > { %v2618_v6 = vcombine.high %v2616_v59, %v2616_v59  ;;  %v10377_v7 = vrot.slane %v2617_v60, 9  ;;  %v10378_v8 = vrot.slane %v2616_v59, 9  ;;  %v3466_v9 = vmax.f32 %v2609_v34, %v10376_v62  ;;  %v1581_v10 = vpop.permute.xlu1 %1580  ;;  %1849 = vst.msk [vmem:[#allocation3 + $0x80] sm:$0xff] %vm1832_vm9, %v1769_v18  ;;  %v14084_v34 = vld [vmem:[#allocation2 + $0x152] sm:$0xff] }
 0x2e0   : > { %v10443_v15 = vrot.slane %v2652_v2, 9  ;;  %v3723_v16 = vmax.f32 %v2651_v52, %v10441_v3  ;;  %v3724_v41 = vmax.f32 %v2650_v51, %v10442_v4  ;;  %v2667_v43 = vrot.slane %v2653_v54, %v14024_v30  ;;  %1658 = vst.msk [vmem:[#allocation3 + $0x98] sm:$0xff] %vm1638_vm8, %v1581_v10  ;;  %1401 = vrot.lane.b32.xlu0 %v14057_v11, %s12792_s4  ;;  %v14092_v3 = vld [vmem:[#allocation2 + $0x15a] sm:$0xff] }
 0x2e1   : > { %v10379_v19 = vrot.slane %v2618_v6, 9  ;;  %v3467_v63 = vmax.f32 %v2617_v60, %v10377_v7  ;;  %v3468_v20 = vmax.f32 %v2616_v59, %v10378_v8  ;;  %v3786_v1 = vmax.f32 %v3466_v9, %v3722_v5  ;;  %1399 = vrot.lane.b32.xlu1 %v13964_v61, %s12792_s4 }
 0x2e2   : > { %v3725_v57 = vmax.f32 %v2652_v2, %v10443_v15  ;;  %v2668_v21 = vcombine.high %v2660_v0, %v2660_v0  ;;  %v2669_v28 = vcombine.high %v2667_v43, %v2667_v43  ;;  %v10444_v32 = vrot.slane %v2660_v0, 9  ;;  %v1773_v33 = vpop.permute.xlu0 %1772 }
 0x2e3   : > { %v3469_v23 = vmax.f32 %v2618_v6, %v10379_v19  ;;  %v3787_v25 = vmax.f32 %v3467_v63, %v3723_v16  ;;  %v3788_v27 = vmax.f32 %v3468_v20, %v3724_v41  ;;  %v1771_v29 = vpop.permute.xlu1 %1770  ;;  %v3937_v31 = vrot.slane %v3786_v1, %v14044_v48  ;;  %1851 = vst.msk [vmem:[#allocation3 + $0x90] sm:$0xff] %vm1832_vm9, %v1773_v33  ;;  %v14131_v33 = vld [vmem:[#allocation2 + $0x171] sm:$0xff] }
 0x2e4   : > { %v10446_v61 = vrot.slane %v2667_v43, 9  ;;  %1850 = vst.msk [vmem:[#allocation3 + $0x88] sm:$0xff] %vm1832_vm9, %v1771_v29  ;;  %v2619_v38 = vcombine.high %v14046_v49, %v14046_v49  ;;  %v10445_v39 = vrot.slane %v2668_v21, 9  ;;  %v2626_v40 = vrot.slane %v14046_v49, %v14024_v30  ;;  %1590 = vrot.lane.b32.xlu0 %v13985_v14, %s12793_s25  ;;  %v14125_v29 = vld [vmem:[#allocation2 + $0x169] sm:$0xff] }
 0x2e5   : > { %v3789_v56 = vmax.f32 %v3469_v23, %v3725_v57  ;;  %v3941_v55 = vrot.slane %v3787_v25, %v14044_v48  ;;  %v3945_v37 = vrot.slane %v3788_v27, %v14044_v48  ;;  %1403 = vrot.lane.b32.xlu1 %v14064_v22, %s12792_s4  ;;  %v10447_v45 = vrot.slane %v2669_v28, 9  ;;  %v4286_v57 = vld [vmem:[#allocation4 + $0x1] sm:$0xff] }
 0x2e6   : > { %v2633_v46 = vrot.slane %v2619_v38, %v14024_v30  ;;  %v3726_v51 = vmax.f32 %v2660_v0, %v10444_v32  ;;  %v2634_v52 = vcombine.high %v2626_v40, %v2626_v40  ;;  %v10380_v53 = vrot.slane %v2626_v40, 9  ;;  %v1962_v49 = vpop.permute.xlu0 %1961 }
 0x2e7   : > { %v3949_v42 = vrot.slane %v3789_v56, %v14044_v48  ;;  %v4191_v44 = vsel %vm4190_vm13, %v3941_v55, %v3937_v31  ;;  %v1775_v35 = vpop.permute.xlu1 %1774  ;;  %v3728_v54 = vmax.f32 %v2667_v43, %v10446_v61  ;;  %2042 = vst.msk [vmem:[#allocation3 + $0x80] sm:$0xff] %vm2025_vm10, %v1962_v49  ;;  %v3727_v60 = vmax.f32 %v2668_v21, %v10445_v39  ;;  %v671_v61 = vld [vmem:[#allocation2 + $0x158] sm:$0xff] }
 0x2e8   : > { %v4193_v50 = vsel %vm4192_vm14, %v3945_v37, %v4191_v44  ;;  %1852 = vst.msk [vmem:[#allocation3 + $0x98] sm:$0xff] %vm1832_vm9, %v1775_v35  ;;  %v2635_v14 = vcombine.high %v2633_v46, %v2633_v46  ;;  %v10382_v58 = vrot.slane %v2633_v46, 9  ;;  %v10381_v62 = vrot.slane %v2634_v52, 9  ;;  %1594 = vrot.lane.b32.xlu0 %v14084_v34, %s12793_s25 }
 0x2e9   : > { %v4195_v59 = vsel %vm15114_vm15, %v3949_v42, %v4193_v50  ;;  %1592 = vrot.lane.b32.xlu1 %v13992_v17, %s12793_s25  ;;  %v3470_v2 = vmax.f32 %v2626_v40, %v10380_v53  ;;  %v3729_v0 = vmax.f32 %v2669_v28, %v10447_v45  ;;  %vm4202_vm15 = vcmask 1047559   ;;  %703 = vst.msk [vmem:[#allocation3 + $0xe8] sm:$0xff] %vm521_vm0, %v671_v61  ;;  %v670_v40 = vld [vmem:[#allocation2 + $0x150] sm:$0xff]  ;;  %v14212_v61 = vld [vmem:[#allocation2 + $0x181] sm:$0xff] }
 0x2ea   : > { %v10383_v4 = vrot.slane %v2635_v14, 9  ;;  %v3472_v5 = vmax.f32 %v2633_v46, %v10382_v58  ;;  %v3471_v7 = vmax.f32 %v2634_v52, %v10381_v62  ;;  %v1966_v9 = vpop.permute.xlu0 %1965  ;;  %v12402_v42 = vld [vmem:[#allocation4] sm:$0xff]  ;;  %702 = vst.msk [vmem:[#allocation3 + $0xe0] sm:$0xff] %vm521_vm0, %v670_v40  ;;  %vm15144_vm0 = vcmask 1043459  }
 0x2eb   : > { %v1964_v6 = vpop.permute.xlu1 %1963  ;;  %v3790_v8 = vmax.f32 %v3470_v2, %v3726_v51  ;;  %2044 = vst.msk [vmem:[#allocation3 + $0x90] sm:$0xff] %vm2025_vm10, %v1966_v9  ;;  %v14147_v46 = vld [vmem:[#allocation2 + $0x16a] sm:$0xff]  ;;  %v14153_v51 = vld [vmem:[#allocation2 + $0x172] sm:$0xff] }
 0x2ec   : > { %2043 = vst.msk [vmem:[#allocation3 + $0x88] sm:$0xff] %vm2025_vm10, %v1964_v6  ;;  %v3473_v17 = vmax.f32 %v2635_v14, %v10383_v4  ;;  %v3792_v10 = vmax.f32 %v3472_v5, %v3728_v54  ;;  %v3791_v15 = vmax.f32 %v3471_v7, %v3727_v60  ;;  %1784 = vrot.lane.b32.xlu0 %v14029_v36, %s12794_s16  ;;  %v11604_v60 = vld [vmem:[#allocation11 + $0xc] ss:$16 sps:$4 sm:$0xff]   ;;  %v11605_v2 = vld [vmem:[#allocation11 + $0x28] ss:$16 sps:$4 sm:$0xff]  }
 0x2ed   : > { %1596 = vrot.lane.b32.xlu1 %v14092_v3, %s12793_s25  ;;  %v3953_v16 = vrot.slane %v3790_v8, %v14044_v48  ;;  %6638 = vmatprep.subr.bf16.mxu0 %v11604_v60  ;;  %v11608_v5 = vld [vmem:[#allocation11 + $0x48] ss:$16 sps:$4 sm:$0xff]   ;;  %v11610_v6 = vld [vmem:[#allocation11 + $0x4c] ss:$16 sps:$4 sm:$0xff]  }
 0x2ee   : > { %v3793_v41 = vmax.f32 %v3473_v17, %v3729_v0  ;;  %v3957_v18 = vrot.slane %v3791_v15, %v14044_v48  ;;  %v2155_v63 = vpop.permute.xlu0 %2154  ;;  %v3961_v20 = vrot.slane %v3792_v10, %v14044_v48  ;;  %v11607_v0 = vld [vmem:[#allocation11 + $0x2c] ss:$16 sps:$4 sm:$0xff]   ;;  %v11611_v8 = vld [vmem:[#allocation11 + $0x68] ss:$16 sps:$4 sm:$0xff]  }
 0x2ef   : > { %v1968_v43 = vpop.permute.xlu1 %1967  ;;  %v4197_v19 = vsel %vm4196_vm1, %v3953_v16, %v4195_v59  ;;  %2235 = vst.msk [vmem:[#allocation3 + $0x80] sm:$0xff] %vm2218_vm11, %v2155_v63  ;;  %v11602_v59 = vld [vmem:[#allocation11 + $0x8] ss:$16 sps:$4 sm:$0xff]   ;;  %v11613_v9 = vld [vmem:[#allocation11 + $0x6c] ss:$16 sps:$4 sm:$0xff]  }
 0x2f0   : > { %2045 = vst.msk [vmem:[#allocation3 + $0x98] sm:$0xff] %vm2025_vm10, %v1968_v43  ;;  %v3965_v36 = vrot.slane %v3793_v41, %v14044_v48  ;;  %v4199_v1 = vsel %vm4198_vm2, %v3957_v18, %v4197_v19  ;;  %1788 = vrot.lane.b32.xlu0 %v13854_v13, %s12794_s16  ;;  %6639 = vmatpush1.bf16.msra.mxu0 %v11602_v59  ;;  %v14188_v17 = vld [vmem:[#allocation2 + $0x180] sm:$0xff]  ;;  %v14195_v43 = vld [vmem:[#allocation2 + $0x188] sm:$0xff] }
 0x2f1   : > { %1786 = vrot.lane.b32.xlu1 %v14038_v47, %s12794_s16  ;;  %v4201_v21 = vsel %vm4200_vm3, %v3961_v20, %v4199_v1  ;;  %6640 = vmatprep.subr.bf16.mxu0 %v11607_v0 }
 0x2f2   : > { %v4203_v25 = vsel %vm4202_vm15, %v3965_v36, %v4201_v21  ;;  %v811_v27 = vpop.permute.xlu0 %810 }
 0x2f3   : > { %v2157_v23 = vpop.permute.xlu1 %2156  ;;  %4262 = vst [vmem:[#allocation4 + $0x11] sm:$0xff] %v4203_v25  ;;  %887 = vst.msk [vmem:[#allocation3 + $0xa0] sm:$0xff] %vm866_vm4, %v811_v27  ;;  %v14120_v47 = vpack.c.bf16 %v4203_v25, %v4286_v57 }
 0x2f4   : > { %2236 = vst.msk [vmem:[#allocation3 + $0x88] sm:$0xff] %vm2218_vm11, %v2157_v23  ;;  %1977 = vrot.lane.b32.xlu0 %v14057_v11, %s12795_s2  ;;  %6641 = vmatpush1.bf16.msra.mxu0 %v11605_v2 }
 0x2f5   : > { %1790 = vrot.lane.b32.xlu1 %v13852_v12, %s12794_s16  ;;  %6305 = vmatprep.mubr.bf16.mxu1 %v14120_v47 }
 0x2f6   : > { %v2159_v31 = vpop.permute.xlu0 %2158  ;;  %v2267_v32 = vld [vmem:[#allocation3 + $0x80] sm:$0xff]  ;;  %6642 = vmatprep.subr.bf16.mxu0 %v11610_v6 }
 0x2f7   : > { %v813_v28 = vpop.permute.xlu1 %812  ;;  %2237 = vst.msk [vmem:[#allocation3 + $0x90] sm:$0xff] %vm2218_vm11, %v2159_v31 }
 0x2f8   : > { %888 = vst.msk [vmem:[#allocation3 + $0xa8] sm:$0xff] %vm866_vm4, %v813_v28  ;;  %1981 = vrot.lane.b32.xlu0 %v14125_v29, %s12795_s2  ;;  %6643 = vmatpush1.bf16.msra.mxu0 %v11608_v5 }
 0x2f9   : > { %1979 = vrot.lane.b32.xlu1 %v14064_v22, %s12795_s2  ;;  %6644 = vmatprep.subr.bf16.mxu0 %v11613_v9 }
 0x2fa   : > { %v4271_v37 = vld [vmem:[#allocation4 + $0x10] sm:$0xff]  ;;  %v815_v39 = vpop.permute.xlu0 %814 }
 0x2fb   : > { %v2161_v56 = vpop.permute.xlu1 %2160  ;;  %v2268_v55 = vld [vmem:[#allocation3 + $0x88] sm:$0xff]  ;;  %v14137_v44 = vpack.c.bf16 %v4271_v37, %v12402_v42  ;;  %889 = vst.msk [vmem:[#allocation3 + $0xb0] sm:$0xff] %vm866_vm4, %v815_v39 }
 0x2fc   : > { %2238 = vst.msk [vmem:[#allocation3 + $0x98] sm:$0xff] %vm2218_vm11, %v2161_v56  ;;  %v2291_v38 = vpack.c.bf16 %v2268_v55, %v2267_v32  ;;  %2170 = vrot.lane.b32.xlu0 %v14084_v34, %s12797_s17  ;;  %6645 = vmatpush1.bf16.msra.mxu0 %v11611_v8  ;;  %v11619_v8 = vld [vmem:[#allocation11 + $0xac] ss:$16 sps:$4 sm:$0xff]  }
 0x2fd   : > { %1983 = vrot.lane.b32.xlu1 %v14131_v33, %s12795_s2  ;;  %6306 = vmatmul.mubr.bf16.vlgmr.msra.gmra.mrb[0].mxu1 %v14137_v44 }
 0x2fe   : > { %11198 = vmatprep.mubr.msk.bf16.mxu0 %vm2321_vm12, %v2291_v38  ;;  %v1004_v35 = vpop.permute.xlu0 %1003  ;;  %v2269_v50 = vld [vmem:[#allocation3 + $0x90] sm:$0xff] }
 0x2ff   : > { %v817_v45 = vpop.permute.xlu1 %816  ;;  %1080 = vst.msk [vmem:[#allocation3 + $0xa0] sm:$0xff] %vm1059_vm5, %v1004_v35  ;;  %v11616_v35 = vld [vmem:[#allocation11 + $0x8c] ss:$16 sps:$4 sm:$0xff]  }
 0x300   : > { %890 = vst.msk [vmem:[#allocation3 + $0xb8] sm:$0xff] %vm866_vm4, %v817_v45  ;;  %2174 = vrot.lane.b32.xlu0 %v14147_v46, %s12797_s17  ;;  %6646 = vmatprep.subr.bf16.mxu0 %v11616_v35 }
 0x301   : > { %2172 = vrot.lane.b32.xlu1 %v14092_v3, %s12797_s17 }
 0x302   : > { %v1008_v54 = vpop.permute.xlu0 %1007 }
 0x303   : > { %v1006_v52 = vpop.permute.xlu1 %1005  ;;  %v2270_v53 = vld [vmem:[#allocation3 + $0x98] sm:$0xff]  ;;  %1082 = vst.msk [vmem:[#allocation3 + $0xb0] sm:$0xff] %vm1059_vm5, %v1008_v54 }
 0x304   : > { %1081 = vst.msk [vmem:[#allocation3 + $0xa8] sm:$0xff] %vm1059_vm5, %v1006_v52  ;;  %v2292_v49 = vpack.c.bf16 %v2270_v53, %v2269_v50  ;;  %826 = vrot.lane.b32.xlu0 %v14057_v11, %s12789_s24  ;;  %v14223_v54 = vld [vmem:[#allocation2 + $0x189] sm:$0xff] }
 0x305   : > { %2176 = vrot.lane.b32.xlu1 %v14153_v51, %s12797_s17 }
 0x306   : > { %11199 = vmatmul.mubr.msk.bf16.gmra.mrb[16].mxu0 %vm2321_vm12, %v2292_v49  ;;  %v1197_v58 = vpop.permute.xlu0 %1196 }
 0x307   : > { %v1010_v14 = vpop.permute.xlu1 %1009  ;;  %1273 = vst.msk [vmem:[#allocation3 + $0xa0] sm:$0xff] %vm1252_vm6, %v1197_v58 }
 0x308   : > { %1083 = vst.msk [vmem:[#allocation3 + $0xb8] sm:$0xff] %vm1059_vm5, %v1010_v14  ;;  %830 = vrot.lane.b32.xlu0 %v14125_v29, %s12789_s24  ;;  %v11614_v14 = vld [vmem:[#allocation11 + $0x88] ss:$16 sps:$4 sm:$0xff]  }
 0x309   : > { %828 = vrot.lane.b32.xlu1 %v14064_v22, %s12789_s24  ;;  %6647 = vmatpush1.bf16.msra.mxu0 %v11614_v14 }
 0x30a   : > { %v1201_v11 = vpop.permute.xlu0 %1200  ;;  %6648 = vmatprep.subr.bf16.mxu0 %v11619_v8  ;;  %v1703_v8 = vld [vmem:[#allocation2 + $0x1a0] sm:$0xff] }
 0x30b   : > { %v1199_v62 = vpop.permute.xlu1 %1198  ;;  %1275 = vst.msk [vmem:[#allocation3 + $0xb0] sm:$0xff] %vm1252_vm6, %v1201_v11 }
 0x30c   : > { %1274 = vst.msk [vmem:[#allocation3 + $0xa8] sm:$0xff] %vm1252_vm6, %v1199_v62  ;;  %1019 = vrot.lane.b32.xlu0 %v14084_v34, %s12790_s12 }
 0x30d   : > { %832 = vrot.lane.b32.xlu1 %v14131_v33, %s12789_s24  ;;  %s12690_s24 = sshll.u32 %s12800_s21, 4  ;;  %s12691_s24 = int_to_ptr.vmem [resolvable:$false] %s12690_s24 }
 0x30e   : > { %v1390_v4 = vpop.permute.xlu0 %1389  ;;  %p12693_p5 = scmp.lt.s32.totalorder %s15052_s26, %s12691_s24 }
 0x30f   : > { %v1203_v22 = vpop.permute.xlu1 %1202  ;;  %1466 = vst.msk [vmem:[#allocation3 + $0xa0] sm:$0xff] %vm1445_vm7, %v1390_v4 }
 0x310   : > { %1276 = vst.msk [vmem:[#allocation3 + $0xb8] sm:$0xff] %vm1252_vm6, %v1203_v22  ;;  %1023 = vrot.lane.b32.xlu0 %v14147_v46, %s12790_s12 }
 0x311   : > { %1021 = vrot.lane.b32.xlu1 %v14092_v3, %s12790_s12 }
 0x312   : > { %v1394_v34 = vpop.permute.xlu0 %1393 }
 0x313   : > { %v1392_v7 = vpop.permute.xlu1 %1391  ;;  %1468 = vst.msk [vmem:[#allocation3 + $0xb0] sm:$0xff] %vm1445_vm7, %v1394_v34 }
 0x314   : > { %1467 = vst.msk [vmem:[#allocation3 + $0xa8] sm:$0xff] %vm1445_vm7, %v1392_v7  ;;  %1212 = vrot.lane.b32.xlu0 %v13854_v13, %s12791_s23 }
 0x315   : > { %1025 = vrot.lane.b32.xlu1 %v14153_v51, %s12790_s12  ;;  %s12692_s12 = scalar_lea.vmem %s12691_s24, 32 }
 0x316   : > { %v1583_v10 = vpop.permute.xlu0 %1582  ;;  %p12694_p9 = scmp.lt.s32.totalorder %s12692_s12, %s12686_s22 }
 0x317   : > { %v1396_v3 = vpop.permute.xlu1 %1395  ;;  %1659 = vst.msk [vmem:[#allocation3 + $0xa0] sm:$0xff] %vm1638_vm8, %v1583_v10  ;;  %v11617_v10 = vld [vmem:[#allocation11 + $0xa8] ss:$16 sps:$4 sm:$0xff]  }
 0x318   : > { %1469 = vst.msk [vmem:[#allocation3 + $0xb8] sm:$0xff] %vm1445_vm7, %v1396_v3  ;;  %1216 = vrot.lane.b32.xlu0 %v14188_v17, %s12791_s23  ;;  %6649 = vmatpush1.bf16.msra.mxu0 %v11617_v10  ;;  %p12695_p12 = por %p12694_p9, %p12693_p5 }
 0x319   : > { %1214 = vrot.lane.b32.xlu1 %v13852_v12, %s12791_s23  ;;  %v11188_v15 = vpop.f32.mrb[4].mxu0 }
 0x31a   : > { %v2436_v16 = vadd.f32 %v11188_v15, %v14016_v26  ;;  %v2427_v41 = vpop.f32.mrb[5].mxu0  ;;  %v1587_v36 = vpop.permute.xlu0 %1586  ;;  %p12696_p10 = pnand %p12695_p12, %p12689_p6 }
 0x31b   : > { %v2428_v13 = vadd.f32 %v14016_v26, %v2427_v41  ;;  %v1585_v18 = vpop.permute.xlu1 %1584  ;;  %v11189_v19 = vpop.f32.mrb[6].mxu0  ;;  %1661 = vst.msk [vmem:[#allocation3 + $0xb0] sm:$0xff] %vm1638_vm8, %v1587_v36 }
 0x31c   : > { %v2544_v63 = vmax.f32 %v2436_v16, 0.0  ;;  %1660 = vst.msk [vmem:[#allocation3 + $0xa8] sm:$0xff] %vm1638_vm8, %v1585_v18  ;;  %v2439_v12 = vadd.f32 %v11189_v19, %v14016_v26  ;;  %v2430_v20 = vpop.f32.mrb[7].mxu0  ;;  %1405 = vrot.lane.b32.xlu0 %v14125_v29, %s12792_s4  ;;  %v14236_v19 = vld [vmem:[#allocation2 + $0x182] sm:$0xff] }
 0x31d   : > { %v2542_v1 = vmax.f32 %v2428_v13, 0.0  ;;  %v2431_v57 = vadd.f32 %v14016_v26, %v2430_v20  ;;  %1218 = vrot.lane.b32.xlu1 %v14195_v43, %s12791_s23 }
 0x31e   : > { %v2704_v21 = vcombine.high %v2544_v63, %v2544_v63  ;;  %v2711_v23 = vrot.slane %v2544_v63, %v14024_v30  ;;  %v2545_v25 = vmax.f32 %v2439_v12, 0.0  ;;  %v1777_v39 = vpop.permute.xlu0 %1776 }
 0x31f   : > { %v2670_v27 = vcombine.high %v2542_v1, %v2542_v1  ;;  %v2677_v28 = vrot.slane %v2542_v1, %v14024_v30  ;;  %v14210_v31 = vmax.f32 %v2431_v57, 0.0  ;;  %v1589_v32 = vpop.permute.xlu1 %1588  ;;  %1853 = vst.msk [vmem:[#allocation3 + $0xa0] sm:$0xff] %vm1832_vm9, %v1777_v39 }
 0x320   : > { %v2718_v56 = vrot.slane %v2704_v21, %v14024_v30  ;;  %v2719_v55 = vcombine.high %v2711_v23, %v2711_v23  ;;  %v10448_v37 = vrot.slane %v2711_v23, 9  ;;  %v2721_v38 = vcombine.high %v2545_v25, %v2545_v25  ;;  %1662 = vst.msk [vmem:[#allocation3 + $0xb8] sm:$0xff] %vm1638_vm8, %v1589_v32  ;;  %1409 = vrot.lane.b32.xlu0 %v14212_v61, %s12792_s4  ;;  %v11620_v32 = vld [vmem:[#allocation11 + $0xc8] ss:$16 sps:$4 sm:$0xff]  }
 0x321   : > { %v2684_v40 = vrot.slane %v2670_v27, %v14024_v30  ;;  %v2685_v42 = vcombine.high %v2677_v28, %v2677_v28  ;;  %v10384_v29 = vrot.slane %v2677_v28, 9  ;;  %v14218_v45 = vrot.slane %v2545_v25, %v14024_v30  ;;  %1407 = vrot.lane.b32.xlu1 %v14131_v33, %s12792_s4 }
 0x322   : > { %v2720_v50 = vcombine.high %v2718_v56, %v2718_v56  ;;  %v10449_v52 = vrot.slane %v2719_v55, 9  ;;  %v10450_v53 = vrot.slane %v2718_v56, 9  ;;  %v3730_v49 = vmax.f32 %v2711_v23, %v10448_v37  ;;  %v1781_v4 = vpop.permute.xlu0 %1780  ;;  %v11622_v23 = vld [vmem:[#allocation11 + $0xcc] ss:$16 sps:$4 sm:$0xff]  }
 0x323   : > { %v2686_v58 = vcombine.high %v2684_v40, %v2684_v40  ;;  %v10385_v59 = vrot.slane %v2685_v42, 9  ;;  %v10386_v60 = vrot.slane %v2684_v40, 9  ;;  %v3474_v62 = vmax.f32 %v2677_v28, %v10384_v29  ;;  %v1779_v11 = vpop.permute.xlu1 %1778  ;;  %1855 = vst.msk [vmem:[#allocation3 + $0xb0] sm:$0xff] %vm1832_vm9, %v1781_v4  ;;  %v14250_v28 = vld [vmem:[#allocation2 + $0x18a] sm:$0xff]  ;;  %6650 = vmatprep.subr.bf16.mxu0 %v11622_v23 }
 0x324   : > { %v10451_v33 = vrot.slane %v2720_v50, 9  ;;  %v3731_v2 = vmax.f32 %v2719_v55, %v10449_v52  ;;  %v3732_v0 = vmax.f32 %v2718_v56, %v10450_v53  ;;  %v2735_v22 = vrot.slane %v2721_v38, %v14024_v30  ;;  %1854 = vst.msk [vmem:[#allocation3 + $0xa8] sm:$0xff] %vm1832_vm9, %v1779_v11  ;;  %1598 = vrot.lane.b32.xlu0 %v14147_v46, %s12793_s25  ;;  %v11634_v23 = vld [vmem:[#allocation11 + $0x14c] ss:$16 sps:$4 sm:$0xff]  }
 0x325   : > { %v10387_v5 = vrot.slane %v2686_v58, 9  ;;  %v3475_v6 = vmax.f32 %v2685_v42, %v10385_v59  ;;  %v3476_v7 = vmax.f32 %v2684_v40, %v10386_v60  ;;  %v3794_v34 = vmax.f32 %v3474_v62, %v3730_v49  ;;  %1411 = vrot.lane.b32.xlu1 %v14223_v54, %s12792_s4  ;;  %6651 = vmatpush1.bf16.msra.mxu0 %v11620_v32  ;;  %v11625_v49 = vld [vmem:[#allocation11 + $0xec] ss:$16 sps:$4 sm:$0xff]   ;;  %v11623_v59 = vld [vmem:[#allocation11 + $0xe8] ss:$16 sps:$4 sm:$0xff]  }
 0x326   : > { %v3733_v9 = vmax.f32 %v2720_v50, %v10451_v33  ;;  %v2736_v3 = vcombine.high %v14218_v45, %v14218_v45  ;;  %v2737_v13 = vcombine.high %v2735_v22, %v2735_v22  ;;  %v10452_v12 = vrot.slane %v14218_v45, 9  ;;  %v1970_v36 = vpop.permute.xlu0 %1969  ;;  %6652 = vmatprep.subr.bf16.mxu0 %v11625_v49  ;;  %v11641_v49 = vld [vmem:[#allocation11 + $0x1a8] ss:$16 sps:$4 sm:$0xff]  }
 0x327   : > { %v3477_v15 = vmax.f32 %v2686_v58, %v10387_v5  ;;  %v3795_v16 = vmax.f32 %v3475_v6, %v3731_v2  ;;  %v3796_v41 = vmax.f32 %v3476_v7, %v3732_v0  ;;  %v1783_v18 = vpop.permute.xlu1 %1782  ;;  %v3969_v63 = vrot.slane %v3794_v34, %v14044_v48  ;;  %2046 = vst.msk [vmem:[#allocation3 + $0xa0] sm:$0xff] %vm2025_vm10, %v1970_v36  ;;  %v1702_v2 = vld [vmem:[#allocation2 + $0x198] sm:$0xff] }
 0x328   : > { %v10454_v20 = vrot.slane %v2735_v22, 9  ;;  %1856 = vst.msk [vmem:[#allocation3 + $0xb8] sm:$0xff] %vm1832_vm9, %v1783_v18  ;;  %v2687_v21 = vcombine.high %v14210_v31, %v14210_v31  ;;  %v10453_v25 = vrot.slane %v2736_v3, 9  ;;  %v2694_v27 = vrot.slane %v14210_v31, %v14024_v30  ;;  %1602 = vrot.lane.b32.xlu0 %v14236_v19, %s12793_s25 }
 0x329   : > { %v3797_v1 = vmax.f32 %v3477_v15, %v3733_v9  ;;  %v3973_v46 = vrot.slane %v3795_v16, %v14044_v48  ;;  %v3977_v57 = vrot.slane %v3796_v41, %v14044_v48  ;;  %1600 = vrot.lane.b32.xlu1 %v14153_v51, %s12793_s25  ;;  %v10455_v37 = vrot.slane %v2737_v13, 9  ;;  %6653 = vmatpush1.bf16.msra.mxu0 %v11623_v59  ;;  %v11626_v9 = vld [vmem:[#allocation11 + $0x108] ss:$16 sps:$4 sm:$0xff]   ;;  %v11649_v59 = vld [vmem:[#allocation11 + $0x1ec] ss:$16 sps:$4 sm:$0xff]  }
 0x32a   : > { %v2701_v51 = vrot.slane %v2687_v21, %v14024_v30  ;;  %v3734_v40 = vmax.f32 %v14218_v45, %v10452_v12  ;;  %v2702_v31 = vcombine.high %v2694_v27, %v2694_v27  ;;  %v10388_v42 = vrot.slane %v2694_v27, 9  ;;  %v1974_v29 = vpop.permute.xlu0 %1973  ;;  %v11629_v12 = vld [vmem:[#allocation11 + $0x128] ss:$16 sps:$4 sm:$0xff]  }
 0x32b   : > { %v3981_v56 = vrot.slane %v3797_v1, %v14044_v48  ;;  %v4204_v55 = vsel %vm4190_vm13, %v3973_v46, %v3969_v63  ;;  %v1972_v38 = vpop.permute.xlu1 %1971  ;;  %v3736_v35 = vmax.f32 %v2735_v22, %v10454_v20  ;;  %2048 = vst.msk [vmem:[#allocation3 + $0xb0] sm:$0xff] %vm2025_vm10, %v1974_v29  ;;  %v3735_v14 = vmax.f32 %v2736_v3, %v10453_v25  ;;  %v1895_v1 = vld [vmem:[#allocation2 + $0x199] sm:$0xff]  ;;  %v1896_v25 = vld [vmem:[#allocation2 + $0x1a1] sm:$0xff] }
 0x32c   : > { %v4205_v39 = vsel %vm4192_vm14, %v3977_v57, %v4204_v55  ;;  %2047 = vst.msk [vmem:[#allocation3 + $0xa8] sm:$0xff] %vm2025_vm10, %v1972_v38  ;;  %v2703_v50 = vcombine.high %v2701_v51, %v2701_v51  ;;  %v10390_v52 = vrot.slane %v2701_v51, 9  ;;  %v10389_v58 = vrot.slane %v2702_v31, 9  ;;  %1792 = vrot.lane.b32.xlu0 %v14188_v17, %s12794_s16  ;;  %v11628_v17 = vld [vmem:[#allocation11 + $0x10c] ss:$16 sps:$4 sm:$0xff]  }
 0x32d   : > { %v4206_v53 = vsel %vm15144_vm0, %v3981_v56, %v4205_v39  ;;  %1604 = vrot.lane.b32.xlu1 %v14250_v28, %s12793_s25  ;;  %v3478_v45 = vmax.f32 %v2694_v27, %v10388_v42  ;;  %v3737_v60 = vmax.f32 %v2737_v13, %v10455_v37  ;;  %6654 = vmatprep.subr.bf16.mxu0 %v11628_v17  ;;  %v11631_v13 = vld [vmem:[#allocation11 + $0x12c] ss:$16 sps:$4 sm:$0xff]   ;;  %v11632_v21 = vld [vmem:[#allocation11 + $0x148] ss:$16 sps:$4 sm:$0xff]  }
 0x32e   : > { %v10391_v62 = vrot.slane %v2703_v50, 9  ;;  %v3480_v11 = vmax.f32 %v2701_v51, %v10390_v52  ;;  %v3479_v0 = vmax.f32 %v2702_v31, %v10389_v58  ;;  %v2163_v4 = vpop.permute.xlu0 %2162  ;;  %6655 = vmatpush1.bf16.msra.mxu0 %v11626_v9  ;;  %v11637_v27 = vld [vmem:[#allocation11 + $0x16c] ss:$16 sps:$4 sm:$0xff]   ;;  %v11635_v51 = vld [vmem:[#allocation11 + $0x168] ss:$16 sps:$4 sm:$0xff]  }
 0x32f   : > { %v1976_v33 = vpop.permute.xlu1 %1975  ;;  %v3798_v22 = vmax.f32 %v3478_v45, %v3734_v40  ;;  %2239 = vst.msk [vmem:[#allocation3 + $0xa0] sm:$0xff] %vm2218_vm11, %v2163_v4  ;;  %6656 = vmatprep.subr.bf16.mxu0 %v11631_v13  ;;  %v2088_v39 = vld [vmem:[#allocation2 + $0x19a] sm:$0xff] }
 0x330   : > { %2049 = vst.msk [vmem:[#allocation3 + $0xb8] sm:$0xff] %vm2025_vm10, %v1976_v33  ;;  %v3481_v5 = vmax.f32 %v2703_v50, %v10391_v62  ;;  %v3800_v6 = vmax.f32 %v3480_v11, %v3736_v35  ;;  %v3799_v7 = vmax.f32 %v3479_v0, %v3735_v14  ;;  %1796 = vrot.lane.b32.xlu0 %v1702_v2, %s12794_s16  ;;  %v11638_v31 = vld [vmem:[#allocation11 + $0x188] ss:$16 sps:$4 sm:$0xff]   ;;  %v11643_v29 = vld [vmem:[#allocation11 + $0x1ac] ss:$16 sps:$4 sm:$0xff]   ;;  %v2089_v35 = vld [vmem:[#allocation2 + $0x1a2] sm:$0xff] }
 0x331   : > { %1794 = vrot.lane.b32.xlu1 %v14195_v43, %s12794_s16  ;;  %v3985_v34 = vrot.slane %v3798_v22, %v14044_v48  ;;  %v11644_v45 = vld [vmem:[#allocation11 + $0x1c8] ss:$16 sps:$4 sm:$0xff]  }
 0x332   : > { %v3801_v3 = vmax.f32 %v3481_v5, %v3737_v60  ;;  %v3989_v15 = vrot.slane %v3799_v7, %v14044_v48  ;;  %v819_v43 = vpop.permute.xlu0 %818  ;;  %v3993_v41 = vrot.slane %v3800_v6, %v14044_v48  ;;  %6657 = vmatpush1.bf16.msra.mxu0 %v11629_v12  ;;  %v11647_v11 = vld [vmem:[#allocation11 + $0x1e8] ss:$16 sps:$4 sm:$0xff]  }
 0x333   : > { %v2165_v10 = vpop.permute.xlu1 %2164  ;;  %v4207_v16 = vsel %vm4196_vm1, %v3985_v34, %v4206_v53  ;;  %891 = vst.msk [vmem:[#allocation3 + $0xc0] sm:$0xff] %vm866_vm4, %v819_v43  ;;  %6658 = vmatprep.subr.bf16.mxu0 %v11634_v23 }
 0x334   : > { %2240 = vst.msk [vmem:[#allocation3 + $0xa8] sm:$0xff] %vm2218_vm11, %v2165_v10  ;;  %v3997_v18 = vrot.slane %v3801_v3, %v14044_v48  ;;  %v4208_v63 = vsel %vm4198_vm2, %v3989_v15, %v4207_v16  ;;  %1985 = vrot.lane.b32.xlu0 %v14212_v61, %s12795_s2 }
 0x335   : > { %1798 = vrot.lane.b32.xlu1 %v1703_v8, %s12794_s16  ;;  %v4209_v20 = vsel %vm4200_vm3, %v3993_v41, %v4208_v63 }
 0x336   : > { %v14284_v46 = vsel %vm4202_vm15, %v3997_v18, %v4209_v20  ;;  %v2167_v57 = vpop.permute.xlu0 %2166  ;;  %v2271_v61 = vld [vmem:[#allocation3 + $0xa0] sm:$0xff]  ;;  %6659 = vmatpush1.bf16.msra.mxu0 %v11632_v21 }
 0x337   : > { %v821_v36 = vpop.permute.xlu1 %820  ;;  %4263 = vst [vmem:[#allocation4 + $0x21] sm:$0xff] %v14284_v46  ;;  %2241 = vst.msk [vmem:[#allocation3 + $0xb0] sm:$0xff] %vm2218_vm11, %v2167_v57  ;;  %6660 = vmatprep.subr.bf16.mxu0 %v11637_v27 }
 0x338   : > { %892 = vst.msk [vmem:[#allocation3 + $0xc8] sm:$0xff] %vm866_vm4, %v821_v36  ;;  %1989 = vrot.lane.b32.xlu0 %v1895_v1, %s12795_s2 }
 0x339   : > { %1987 = vrot.lane.b32.xlu1 %v14223_v54, %s12795_s2  ;;  %v11640_v54 = vld [vmem:[#allocation11 + $0x18c] ss:$16 sps:$4 sm:$0xff]  }
 0x33a   : > { %v823_v37 = vpop.permute.xlu0 %822  ;;  %6661 = vmatpush1.bf16.msra.mxu0 %v11635_v51 }
 0x33b   : > { %v2169_v32 = vpop.permute.xlu1 %2168  ;;  %v2272_v56 = vld [vmem:[#allocation3 + $0xa8] sm:$0xff]  ;;  %893 = vst.msk [vmem:[#allocation3 + $0xd0] sm:$0xff] %vm866_vm4, %v823_v37  ;;  %6662 = vmatprep.subr.bf16.mxu0 %v11640_v54 }
 0x33c   : > { %2242 = vst.msk [vmem:[#allocation3 + $0xb8] sm:$0xff] %vm2218_vm11, %v2169_v32  ;;  %v2293_v55 = vpack.c.bf16 %v2272_v56, %v2271_v61  ;;  %2178 = vrot.lane.b32.xlu0 %v14236_v19, %s12797_s17 }
 0x33d   : > { %1991 = vrot.lane.b32.xlu1 %v1896_v25, %s12795_s2 }
 0x33e   : > { %11202 = vmatprep.mubr.msk.bf16.mxu0 %vm2321_vm12, %v2293_v55  ;;  %v1012_v40 = vpop.permute.xlu0 %1011  ;;  %v2273_v42 = vld [vmem:[#allocation3 + $0xb0] sm:$0xff]  ;;  %6663 = vmatpush1.bf16.msra.mxu0 %v11638_v31 }
 0x33f   : > { %v825_v38 = vpop.permute.xlu1 %824  ;;  %1084 = vst.msk [vmem:[#allocation3 + $0xc0] sm:$0xff] %vm1059_vm5, %v1012_v40  ;;  %6664 = vmatprep.subr.bf16.mxu0 %v11643_v29 }
 0x340   : > { %894 = vst.msk [vmem:[#allocation3 + $0xd8] sm:$0xff] %vm866_vm4, %v825_v38  ;;  %2182 = vrot.lane.b32.xlu0 %v2088_v39, %s12797_s17 }
 0x341   : > { %2180 = vrot.lane.b32.xlu1 %v14250_v28, %s12797_s17  ;;  %v11646_v28 = vld [vmem:[#allocation11 + $0x1cc] ss:$16 sps:$4 sm:$0xff]  }
 0x342   : > { %v1016_v53 = vpop.permute.xlu0 %1015  ;;  %6665 = vmatpush1.bf16.msra.mxu0 %v11641_v49 }
 0x343   : > { %v1014_v50 = vpop.permute.xlu1 %1013  ;;  %v2274_v19 = vld [vmem:[#allocation3 + $0xb8] sm:$0xff]  ;;  %1086 = vst.msk [vmem:[#allocation3 + $0xd0] sm:$0xff] %vm1059_vm5, %v1016_v53  ;;  %6666 = vmatprep.subr.bf16.mxu0 %v11646_v28 }
 0x344   : > { %1085 = vst.msk [vmem:[#allocation3 + $0xc8] sm:$0xff] %vm1059_vm5, %v1014_v50  ;;  %v2294_v52 = vpack.c.bf16 %v2274_v19, %v2273_v42 }
 0x345   : > { %2184 = vrot.lane.b32.xlu1 %v2089_v35, %s12797_s17 }
 0x346   : > { %11203 = vmatmul.mubr.msk.bf16.gmra.mrb[20].mxu0 %vm2321_vm12, %v2294_v52  ;;  %v1205_v58 = vpop.permute.xlu0 %1204 }
 0x347   : > { %v1018_v14 = vpop.permute.xlu1 %1017  ;;  %1277 = vst.msk [vmem:[#allocation3 + $0xc0] sm:$0xff] %vm1252_vm6, %v1205_v58  ;;  %6667 = vmatpush1.bf16.msra.mxu0 %v11644_v45 }
 0x348   : > { %1087 = vst.msk [vmem:[#allocation3 + $0xd8] sm:$0xff] %vm1059_vm5, %v1018_v14  ;;  %6668 = vmatprep.subr.bf16.mxu0 %v11649_v59 }
 0x34a   : > { %v1209_v62 = vpop.permute.xlu0 %1208 }
 0x34b   : > { %v1207_v60 = vpop.permute.xlu1 %1206  ;;  %1279 = vst.msk [vmem:[#allocation3 + $0xd0] sm:$0xff] %vm1252_vm6, %v1209_v62  ;;  %6669 = vmatpush1.bf16.msra.mxu0 %v11647_v11 }
 0x34c   : > { %1278 = vst.msk [vmem:[#allocation3 + $0xc8] sm:$0xff] %vm1252_vm6, %v1207_v60 }
 0x34e   : > { %v1398_v2 = vpop.permute.xlu0 %1397 }
 0x34f   : > { %v1211_v33 = vpop.permute.xlu1 %1210  ;;  %1470 = vst.msk [vmem:[#allocation3 + $0xc0] sm:$0xff] %vm1445_vm7, %v1398_v2 }
 0x350   : > { %1280 = vst.msk [vmem:[#allocation3 + $0xd8] sm:$0xff] %vm1252_vm6, %v1211_v33 }
 0x352   : > { %v1402_v22 = vpop.permute.xlu0 %1401 }
 0x353   : > { %v1400_v0 = vpop.permute.xlu1 %1399  ;;  %1472 = vst.msk [vmem:[#allocation3 + $0xd0] sm:$0xff] %vm1445_vm7, %v1402_v22 }
 0x354   : > { %1471 = vst.msk [vmem:[#allocation3 + $0xc8] sm:$0xff] %vm1445_vm7, %v1400_v0 }
 0x356   : > { %v1591_v5 = vpop.permute.xlu0 %1590 }
 0x357   : > { %v1404_v4 = vpop.permute.xlu1 %1403  ;;  %1663 = vst.msk [vmem:[#allocation3 + $0xc0] sm:$0xff] %vm1638_vm8, %v1591_v5 }
 0x358   : > { %1473 = vst.msk [vmem:[#allocation3 + $0xd8] sm:$0xff] %vm1445_vm7, %v1404_v4 }
 0x359   : > { %v11192_v6 = vpop.f32.mrb[8].mxu0 }
 0x35a   : > { %v2452_v17 = vadd.f32 %v11192_v6, %v14016_v26  ;;  %v2443_v7 = vpop.f32.mrb[9].mxu0  ;;  %v1595_v16 = vpop.permute.xlu0 %1594 }
 0x35b   : > { %v2444_v34 = vadd.f32 %v14016_v26, %v2443_v7  ;;  %v1593_v8 = vpop.permute.xlu1 %1592  ;;  %v11193_v9 = vpop.f32.mrb[10].mxu0  ;;  %1665 = vst.msk [vmem:[#allocation3 + $0xd0] sm:$0xff] %vm1638_vm8, %v1595_v16 }
 0x35c   : > { %v2548_v3 = vmax.f32 %v2452_v17, 0.0  ;;  %1664 = vst.msk [vmem:[#allocation3 + $0xc8] sm:$0xff] %vm1638_vm8, %v1593_v8  ;;  %v2455_v10 = vadd.f32 %v11193_v9, %v14016_v26  ;;  %v2446_v15 = vpop.f32.mrb[11].mxu0 }
 0x35d   : > { %v2546_v43 = vmax.f32 %v2444_v34, 0.0  ;;  %v2447_v41 = vadd.f32 %v14016_v26, %v2446_v15 }
 0x35e   : > { %v2772_v13 = vcombine.high %v2548_v3, %v2548_v3  ;;  %v2779_v18 = vrot.slane %v2548_v3, %v14024_v30  ;;  %v2549_v63 = vmax.f32 %v2455_v10, 0.0  ;;  %v1785_v25 = vpop.permute.xlu0 %1784 }
 0x35f   : > { %v2738_v12 = vcombine.high %v2546_v43, %v2546_v43  ;;  %v2745_v20 = vrot.slane %v2546_v43, %v14024_v30  ;;  %v2547_v36 = vmax.f32 %v2447_v41, 0.0  ;;  %v1597_v1 = vpop.permute.xlu1 %1596  ;;  %1857 = vst.msk [vmem:[#allocation3 + $0xc0] sm:$0xff] %vm1832_vm9, %v1785_v25 }
 0x360   : > { %v2786_v57 = vrot.slane %v2772_v13, %v14024_v30  ;;  %v2787_v61 = vcombine.high %v2779_v18, %v2779_v18  ;;  %v10456_v21 = vrot.slane %v2779_v18, 9  ;;  %v2789_v23 = vcombine.high %v2549_v63, %v2549_v63  ;;  %1666 = vst.msk [vmem:[#allocation3 + $0xd8] sm:$0xff] %vm1638_vm8, %v1597_v1 }
 0x361   : > { %v2752_v26 = vrot.slane %v2738_v12, %v14024_v30  ;;  %v2753_v27 = vcombine.high %v2745_v20, %v2745_v20  ;;  %v10392_v32 = vrot.slane %v2745_v20, 9  ;;  %v2796_v56 = vrot.slane %v2549_v63, %v14024_v30 }
 0x362   : > { %v2788_v55 = vcombine.high %v2786_v57, %v2786_v57  ;;  %v10457_v37 = vrot.slane %v2787_v61, 9  ;;  %v10458_v51 = vrot.slane %v2786_v57, 9  ;;  %v3738_v54 = vmax.f32 %v2779_v18, %v10456_v21  ;;  %v1789_v52 = vpop.permute.xlu0 %1788 }
 0x363   : > { %v2754_v38 = vcombine.high %v2752_v26, %v2752_v26  ;;  %v10393_v39 = vrot.slane %v2753_v27, 9  ;;  %v10394_v40 = vrot.slane %v2752_v26, 9  ;;  %v3482_v31 = vmax.f32 %v2745_v20, %v10392_v32  ;;  %v1787_v42 = vpop.permute.xlu1 %1786  ;;  %1859 = vst.msk [vmem:[#allocation3 + $0xd0] sm:$0xff] %vm1832_vm9, %v1789_v52 }
 0x364   : > { %v10459_v29 = vrot.slane %v2788_v55, 9  ;;  %v3739_v35 = vmax.f32 %v2787_v61, %v10457_v37  ;;  %v3740_v50 = vmax.f32 %v2786_v57, %v10458_v51  ;;  %v2803_v19 = vrot.slane %v2789_v23, %v14024_v30  ;;  %1858 = vst.msk [vmem:[#allocation3 + $0xc8] sm:$0xff] %vm1832_vm9, %v1787_v42 }
 0x365   : > { %v10395_v53 = vrot.slane %v2754_v38, 9  ;;  %v3483_v49 = vmax.f32 %v2753_v27, %v10393_v39  ;;  %v3484_v28 = vmax.f32 %v2752_v26, %v10394_v40  ;;  %v3802_v14 = vmax.f32 %v3482_v31, %v3738_v54 }
 0x366   : > { %v3741_v58 = vmax.f32 %v2788_v55, %v10459_v29  ;;  %v2804_v45 = vcombine.high %v2796_v56, %v2796_v56  ;;  %v2805_v11 = vcombine.high %v2803_v19, %v2803_v19  ;;  %v10460_v0 = vrot.slane %v2796_v56, 9  ;;  %v1978_v4 = vpop.permute.xlu0 %1977 }
 0x367   : > { %v3485_v59 = vmax.f32 %v2754_v38, %v10395_v53  ;;  %v3803_v60 = vmax.f32 %v3483_v49, %v3739_v35  ;;  %v3804_v62 = vmax.f32 %v3484_v28, %v3740_v50  ;;  %v1791_v33 = vpop.permute.xlu1 %1790  ;;  %v4001_v2 = vrot.slane %v3802_v14, %v14044_v48  ;;  %2050 = vst.msk [vmem:[#allocation3 + $0xc0] sm:$0xff] %vm2025_vm10, %v1978_v4 }
 0x368   : > { %v10462_v22 = vrot.slane %v2803_v19, 9  ;;  %1860 = vst.msk [vmem:[#allocation3 + $0xd8] sm:$0xff] %vm1832_vm9, %v1791_v33  ;;  %v2755_v7 = vcombine.high %v2547_v36, %v2547_v36  ;;  %v10461_v34 = vrot.slane %v2804_v45, 9  ;;  %v2762_v8 = vrot.slane %v2547_v36, %v14024_v30 }
 0x369   : > { %v3805_v5 = vmax.f32 %v3485_v59, %v3741_v58  ;;  %v4005_v6 = vrot.slane %v3803_v60, %v14044_v48  ;;  %v4009_v17 = vrot.slane %v3804_v62, %v14044_v48  ;;  %v10463_v10 = vrot.slane %v2805_v11, 9 }
 0x36a   : > { %v2769_v15 = vrot.slane %v2755_v7, %v14024_v30  ;;  %v3742_v41 = vmax.f32 %v2796_v56, %v10460_v0  ;;  %v2770_v13 = vcombine.high %v2762_v8, %v2762_v8  ;;  %v10396_v18 = vrot.slane %v2762_v8, 9  ;;  %v1982_v63 = vpop.permute.xlu0 %1981  ;;  %v4272_v0 = vld [vmem:[#allocation4 + $0x20] sm:$0xff] }
 0x36b   : > { %v4013_v9 = vrot.slane %v3805_v5, %v14044_v48  ;;  %v4211_v3 = vsel %vm4190_vm13, %v4005_v6, %v4001_v2  ;;  %v1980_v16 = vpop.permute.xlu1 %1979  ;;  %v3744_v12 = vmax.f32 %v2803_v19, %v10462_v22  ;;  %2052 = vst.msk [vmem:[#allocation3 + $0xd0] sm:$0xff] %vm2025_vm10, %v1982_v63  ;;  %v3743_v57 = vmax.f32 %v2804_v45, %v10461_v34 }
 0x36c   : > { %v4212_v43 = vsel %vm4192_vm14, %v4009_v17, %v4211_v3  ;;  %2051 = vst.msk [vmem:[#allocation3 + $0xc8] sm:$0xff] %vm2025_vm10, %v1980_v16  ;;  %v2771_v20 = vcombine.high %v2769_v15, %v2769_v15  ;;  %v10398_v1 = vrot.slane %v2769_v15, 9  ;;  %v10397_v61 = vrot.slane %v2770_v13, 9 }
 0x36d   : > { %v4213_v36 = vsel %vm15144_vm0, %v4013_v9, %v4212_v43  ;;  %v3486_v21 = vmax.f32 %v2762_v8, %v10396_v18  ;;  %v3745_v23 = vmax.f32 %v2805_v11, %v10463_v10  ;;  %v14385_v18 = vld [vmem:[#allocation9] ss:$0 sm:$0xff] }
 0x36e   : > { %v10399_v25 = vrot.slane %v2771_v20, 9  ;;  %v3488_v26 = vmax.f32 %v2769_v15, %v10398_v1  ;;  %v3487_v32 = vmax.f32 %v2770_v13, %v10397_v61  ;;  %v2171_v55 = vpop.permute.xlu0 %2170 }
 0x36f   : > { %v1984_v27 = vpop.permute.xlu1 %1983  ;;  %v3806_v56 = vmax.f32 %v3486_v21, %v3742_v41  ;;  %2243 = vst.msk [vmem:[#allocation3 + $0xc0] sm:$0xff] %vm2218_vm11, %v2171_v55 }
 0x370   : > { %2053 = vst.msk [vmem:[#allocation3 + $0xd8] sm:$0xff] %vm2025_vm10, %v1984_v27  ;;  %v3489_v37 = vmax.f32 %v2771_v20, %v10399_v25  ;;  %v3808_v51 = vmax.f32 %v3488_v26, %v3744_v12  ;;  %v3807_v54 = vmax.f32 %v3487_v32, %v3743_v57 }
 0x371   : > { %v4017_v38 = vrot.slane %v3806_v56, %v14044_v48 }
 0x372   : > { %v3809_v39 = vmax.f32 %v3489_v37, %v3745_v23  ;;  %v4021_v31 = vrot.slane %v3807_v54, %v14044_v48  ;;  %v2175_v29 = vpop.permute.xlu0 %2174  ;;  %v4025_v35 = vrot.slane %v3808_v51, %v14044_v48 }
 0x373   : > { %v2173_v40 = vpop.permute.xlu1 %2172  ;;  %v4214_v42 = vsel %vm4196_vm1, %v4017_v38, %v4213_v36  ;;  %2245 = vst.msk [vmem:[#allocation3 + $0xd0] sm:$0xff] %vm2218_vm11, %v2175_v29 }
 0x374   : > { %2244 = vst.msk [vmem:[#allocation3 + $0xc8] sm:$0xff] %vm2218_vm11, %v2173_v40  ;;  %v4029_v50 = vrot.slane %v3809_v39, %v14044_v48  ;;  %v4215_v19 = vsel %vm4198_vm2, %v4021_v31, %v4214_v42 }
 0x375   : > { %v4216_v52 = vsel %vm4200_vm3, %v4025_v35, %v4215_v19 }
 0x376   : > { %v4217_v49 = vsel %vm4202_vm15, %v4029_v50, %v4216_v52  ;;  %v827_v28 = vpop.permute.xlu0 %826  ;;  %v2275_v58 = vld [vmem:[#allocation3 + $0xc0] sm:$0xff] }
 0x377   : > { %v2177_v53 = vpop.permute.xlu1 %2176  ;;  %4264 = vst [vmem:[#allocation4 + $0x31] sm:$0xff] %v4217_v49  ;;  %895 = vst.msk [vmem:[#allocation3 + $0xe0] sm:$0xff] %vm866_vm4, %v827_v28  ;;  %v14361_v14 = vpack.c.bf16 %v4217_v49, %v14284_v46 }
 0x378   : > { %2246 = vst.msk [vmem:[#allocation3 + $0xd8] sm:$0xff] %vm2218_vm11, %v2177_v53 }
 0x379   : > { %6315 = vmatprep.mubr.bf16.mxu1 %v14361_v14 }
 0x37a   : > { %v831_v62 = vpop.permute.xlu0 %830  ;;  %v2277_v11 = vld [vmem:[#allocation3 + $0xd0] sm:$0xff] }
 0x37b   : > { %v829_v45 = vpop.permute.xlu1 %828  ;;  %v2276_v59 = vld [vmem:[#allocation3 + $0xc8] sm:$0xff]  ;;  %897 = vst.msk [vmem:[#allocation3 + $0xf0] sm:$0xff] %vm866_vm4, %v831_v62 }
 0x37c   : > { %896 = vst.msk [vmem:[#allocation3 + $0xe8] sm:$0xff] %vm866_vm4, %v829_v45  ;;  %v2295_v60 = vpack.c.bf16 %v2276_v59, %v2275_v58 }
 0x37e   : > { %11206 = vmatprep.mubr.msk.bf16.mxu0 %vm2321_vm12, %v2295_v60  ;;  %v4273_v22 = vld [vmem:[#allocation4 + $0x30] sm:$0xff]  ;;  %v1020_v4 = vpop.permute.xlu0 %1019 }
 0x37f   : > { %v833_v33 = vpop.permute.xlu1 %832  ;;  %v2278_v2 = vld [vmem:[#allocation3 + $0xd8] sm:$0xff]  ;;  %v14368_v5 = vpack.c.bf16 %v4273_v22, %v4272_v0  ;;  %1088 = vst.msk [vmem:[#allocation3 + $0xe0] sm:$0xff] %vm1059_vm5, %v1020_v4 }
 0x380   : > { %898 = vst.msk [vmem:[#allocation3 + $0xf8] sm:$0xff] %vm866_vm4, %v833_v33  ;;  %v2296_v46 = vpack.c.bf16 %v2278_v2, %v2277_v11  ;;  %vm15145_vm4 = vmmov %vm15144_vm0 }
 0x381   : > { %6316 = vmatmul.mubr.bf16.gmra.mrb[4].mxu1 %v14368_v5 }
 0x382   : > { %11207 = vmatmul.mubr.msk.bf16.gmra.mrb[24].mxu0 %vm2321_vm12, %v2296_v46  ;;  %v1024_v17 = vpop.permute.xlu0 %1023 }
 0x383   : > { %v1022_v6 = vpop.permute.xlu1 %1021  ;;  %1090 = vst.msk [vmem:[#allocation3 + $0xf0] sm:$0xff] %vm1059_vm5, %v1024_v17 }
 0x384   : > { %1089 = vst.msk [vmem:[#allocation3 + $0xe8] sm:$0xff] %vm1059_vm5, %v1022_v6 }
 0x386   : > { %v1213_v34 = vpop.permute.xlu0 %1212 }
 0x387   : > { %v1026_v7 = vpop.permute.xlu1 %1025  ;;  %1281 = vst.msk [vmem:[#allocation3 + $0xe0] sm:$0xff] %vm1252_vm6, %v1213_v34 }
 0x388   : > { %1091 = vst.msk [vmem:[#allocation3 + $0xf8] sm:$0xff] %vm1059_vm5, %v1026_v7  ;;  %vm15146_vm5 = vmmov %vm15144_vm0 }
 0x38a   : > { %v1217_v9 = vpop.permute.xlu0 %1216 }
 0x38b   : > { %v1215_v8 = vpop.permute.xlu1 %1214  ;;  %1283 = vst.msk [vmem:[#allocation3 + $0xf0] sm:$0xff] %vm1252_vm6, %v1217_v9 }
 0x38c   : > { %1282 = vst.msk [vmem:[#allocation3 + $0xe8] sm:$0xff] %vm1252_vm6, %v1215_v8 }
 0x38e   : > { %v1406_v10 = vpop.permute.xlu0 %1405 }
 0x38f   : > { %v1219_v3 = vpop.permute.xlu1 %1218  ;;  %1474 = vst.msk [vmem:[#allocation3 + $0xe0] sm:$0xff] %vm1445_vm7, %v1406_v10 }
 0x390   : > { %1284 = vst.msk [vmem:[#allocation3 + $0xf8] sm:$0xff] %vm1252_vm6, %v1219_v3  ;;  %vm15147_vm6 = vmmov %vm15144_vm0 }
 0x392   : > { %v1410_v16 = vpop.permute.xlu0 %1409 }
 0x393   : > { %v1408_v15 = vpop.permute.xlu1 %1407  ;;  %1476 = vst.msk [vmem:[#allocation3 + $0xf0] sm:$0xff] %vm1445_vm7, %v1410_v16 }
 0x394   : > { %1475 = vst.msk [vmem:[#allocation3 + $0xe8] sm:$0xff] %vm1445_vm7, %v1408_v15 }
 0x396   : > { %v1599_v41 = vpop.permute.xlu0 %1598 }
 0x397   : > { %v1412_v43 = vpop.permute.xlu1 %1411  ;;  %1667 = vst.msk [vmem:[#allocation3 + $0xe0] sm:$0xff] %vm1638_vm8, %v1599_v41 }
 0x398   : > { %1477 = vst.msk [vmem:[#allocation3 + $0xf8] sm:$0xff] %vm1445_vm7, %v1412_v43  ;;  %vm15148_vm7 = vmmov %vm15144_vm0 }
 0x399   : > { %v11196_v13 = vpop.f32.mrb[12].mxu0 }
 0x39a   : > { %v2468_v63 = vadd.f32 %v14385_v18, %v11196_v13  ;;  %v2459_v12 = vpop.f32.mrb[13].mxu0  ;;  %v1603_v23 = vpop.permute.xlu0 %1602 }
 0x39b   : > { %v2460_v20 = vadd.f32 %v14385_v18, %v2459_v12  ;;  %v1601_v1 = vpop.permute.xlu1 %1600  ;;  %v11197_v36 = vpop.f32.mrb[14].mxu0  ;;  %1669 = vst.msk [vmem:[#allocation3 + $0xf0] sm:$0xff] %vm1638_vm8, %v1603_v23 }
 0x39c   : > { %v2552_v57 = vmax.f32 %v2468_v63, 0.0  ;;  %1668 = vst.msk [vmem:[#allocation3 + $0xe8] sm:$0xff] %vm1638_vm8, %v1601_v1  ;;  %v2471_v61 = vadd.f32 %v14385_v18, %v11197_v36  ;;  %v2462_v21 = vpop.f32.mrb[15].mxu0 }
 0x39d   : > { %v2550_v25 = vmax.f32 %v2460_v20, 0.0  ;;  %v2463_v26 = vadd.f32 %v14385_v18, %v2462_v21 }
 0x39e   : > { %v2840_v27 = vcombine.high %v2552_v57, %v2552_v57  ;;  %v2847_v32 = vrot.slane %v2552_v57, %v14024_v30  ;;  %v2553_v56 = vmax.f32 %v2471_v61, 0.0  ;;  %v1793_v42 = vpop.permute.xlu0 %1792 }
 0x39f   : > { %v2806_v55 = vcombine.high %v2550_v25, %v2550_v25  ;;  %v2813_v37 = vrot.slane %v2550_v25, %v14024_v30  ;;  %v2551_v51 = vmax.f32 %v2463_v26, 0.0  ;;  %v1605_v54 = vpop.permute.xlu1 %1604  ;;  %1861 = vst.msk [vmem:[#allocation3 + $0xe0] sm:$0xff] %vm1832_vm9, %v1793_v42 }
 0x3a0   : > { %v2854_v38 = vrot.slane %v2840_v27, %v14024_v30  ;;  %v2855_v39 = vcombine.high %v2847_v32, %v2847_v32  ;;  %v10464_v40 = vrot.slane %v2847_v32, 9  ;;  %v2857_v31 = vcombine.high %v2553_v56, %v2553_v56  ;;  %1670 = vst.msk [vmem:[#allocation3 + $0xf8] sm:$0xff] %vm1638_vm8, %v1605_v54  ;;  %vm15149_vm8 = vmmov %vm15144_vm0 }
 0x3a1   : > { %v2820_v29 = vrot.slane %v2806_v55, %v14024_v30  ;;  %v2821_v35 = vcombine.high %v2813_v37, %v2813_v37  ;;  %v10400_v50 = vrot.slane %v2813_v37, 9  ;;  %v2864_v19 = vrot.slane %v2553_v56, %v14024_v30 }
 0x3a2   : > { %v2856_v52 = vcombine.high %v2854_v38, %v2854_v38  ;;  %v10465_v53 = vrot.slane %v2855_v39, 9  ;;  %v10466_v49 = vrot.slane %v2854_v38, 9  ;;  %v3746_v28 = vmax.f32 %v2847_v32, %v10464_v40  ;;  %v1797_v22 = vpop.permute.xlu0 %1796 }
 0x3a3   : > { %v2822_v58 = vcombine.high %v2820_v29, %v2820_v29  ;;  %v10401_v45 = vrot.slane %v2821_v35, 9  ;;  %v10402_v59 = vrot.slane %v2820_v29, 9  ;;  %v3490_v60 = vmax.f32 %v2813_v37, %v10400_v50  ;;  %v1795_v62 = vpop.permute.xlu1 %1794  ;;  %1863 = vst.msk [vmem:[#allocation3 + $0xf0] sm:$0xff] %vm1832_vm9, %v1797_v22 }
 0x3a4   : > { %v10467_v11 = vrot.slane %v2856_v52, 9  ;;  %v3747_v33 = vmax.f32 %v2855_v39, %v10465_v53  ;;  %v3748_v2 = vmax.f32 %v2854_v38, %v10466_v49  ;;  %v2871_v0 = vrot.slane %v2857_v31, %v14024_v30  ;;  %1862 = vst.msk [vmem:[#allocation3 + $0xe8] sm:$0xff] %vm1832_vm9, %v1795_v62 }
 0x3a5   : > { %v10403_v46 = vrot.slane %v2822_v58, 9  ;;  %v3491_v4 = vmax.f32 %v2821_v35, %v10401_v45  ;;  %v3492_v6 = vmax.f32 %v2820_v29, %v10402_v59  ;;  %v3810_v17 = vmax.f32 %v3490_v60, %v3746_v28 }
 0x3a6   : > { %v3749_v7 = vmax.f32 %v2856_v52, %v10467_v11  ;;  %v2872_v34 = vcombine.high %v2864_v19, %v2864_v19  ;;  %v2873_v10 = vcombine.high %v2871_v0, %v2871_v0  ;;  %v10468_v43 = vrot.slane %v2864_v19, 9  ;;  %v1986_v13 = vpop.permute.xlu0 %1985 }
 0x3a7   : > { %v3493_v8 = vmax.f32 %v2822_v58, %v10403_v46  ;;  %v3811_v9 = vmax.f32 %v3491_v4, %v3747_v33  ;;  %v3812_v3 = vmax.f32 %v3492_v6, %v3748_v2  ;;  %v1799_v15 = vpop.permute.xlu1 %1798  ;;  %v4033_v16 = vrot.slane %v3810_v17, %v14044_v48  ;;  %2054 = vst.msk [vmem:[#allocation3 + $0xe0] sm:$0xff] %vm2025_vm10, %v1986_v13 }
 0x3a8   : > { %v10470_v41 = vrot.slane %v2871_v0, 9  ;;  %1864 = vst.msk [vmem:[#allocation3 + $0xf8] sm:$0xff] %vm1832_vm9, %v1799_v15  ;;  %v2823_v1 = vcombine.high %v2551_v51, %v2551_v51  ;;  %v10469_v36 = vrot.slane %v2872_v34, 9  ;;  %v2830_v57 = vrot.slane %v2551_v51, %v14024_v30  ;;  %vm15150_vm9 = vmmov %vm15144_vm0 }
 0x3a9   : > { %v3813_v63 = vmax.f32 %v3493_v8, %v3749_v7  ;;  %v4037_v12 = vrot.slane %v3811_v9, %v14044_v48  ;;  %v4041_v20 = vrot.slane %v3812_v3, %v14044_v48  ;;  %v10471_v23 = vrot.slane %v2873_v10, 9  ;;  %v11652_v8 = vld [vmem:[#allocation11 + $0x204] ss:$16 sps:$4 sm:$0xff]   ;;  %v11655_v9 = vld [vmem:[#allocation11 + $0x20c] ss:$16 sps:$4 sm:$0xff]  }
 0x3aa   : > { %v2837_v25 = vrot.slane %v2823_v1, %v14024_v30  ;;  %v3750_v32 = vmax.f32 %v2864_v19, %v10468_v43  ;;  %v2838_v56 = vcombine.high %v2830_v57, %v2830_v57  ;;  %v10404_v55 = vrot.slane %v2830_v57, 9  ;;  %v1990_v37 = vpop.permute.xlu0 %1989  ;;  %v11658_v3 = vld [vmem:[#allocation11 + $0x224] ss:$16 sps:$4 sm:$0xff]   ;;  %6346 = vmatprep.subr.bf16.mxu1 %v11652_v8  ;;  %6711 = vmatprep.subr.bf16.mxu0 %v11655_v9  ;;  %v11668_v1 = vld [vmem:[#allocation11 + $0x260] ss:$16 sps:$4 sm:$0xff]  }
 0x3ab   : > { %v4045_v61 = vrot.slane %v3813_v63, %v14044_v48  ;;  %v4218_v21 = vsel %vm4190_vm13, %v4037_v12, %v4033_v16  ;;  %v1988_v26 = vpop.permute.xlu1 %1987  ;;  %v3752_v54 = vmax.f32 %v2871_v0, %v10470_v41  ;;  %2056 = vst.msk [vmem:[#allocation3 + $0xf0] sm:$0xff] %vm2025_vm10, %v1990_v37  ;;  %v3751_v40 = vmax.f32 %v2872_v34, %v10469_v36  ;;  %v11650_v34 = vld [vmem:[#allocation11 + $0x200] ss:$16 sps:$4 sm:$0xff]   ;;  %v11664_v41 = vld [vmem:[#allocation11 + $0x244] ss:$16 sps:$4 sm:$0xff]  }
 0x3ac   : > { %v4219_v27 = vsel %vm4192_vm14, %v4041_v20, %v4218_v21  ;;  %2055 = vst.msk [vmem:[#allocation3 + $0xe8] sm:$0xff] %vm2025_vm10, %v1988_v26  ;;  %v2839_v38 = vcombine.high %v2837_v25, %v2837_v25  ;;  %v10406_v39 = vrot.slane %v2837_v25, 9  ;;  %v10405_v31 = vrot.slane %v2838_v56, 9  ;;  %6347 = vmatpush1.bf16.msra.mxu1 %v11650_v34  ;;  %v11656_v16 = vld [vmem:[#allocation11 + $0x220] ss:$16 sps:$4 sm:$0xff]  }
 0x3ad   : > { %v4220_v51 = vsel %vm15145_vm4, %v4045_v61, %v4219_v27  ;;  %v3494_v42 = vmax.f32 %v2830_v57, %v10404_v55  ;;  %v3753_v29 = vmax.f32 %v2873_v10, %v10471_v23  ;;  %6348 = vmatprep.subr.bf16.mxu1 %v11658_v3  ;;  %v11662_v12 = vld [vmem:[#allocation11 + $0x240] ss:$16 sps:$4 sm:$0xff]   ;;  %v11670_v20 = vld [vmem:[#allocation11 + $0x264] ss:$16 sps:$4 sm:$0xff]   ;;  %v11653_v57 = vld [vmem:[#allocation11 + $0x208] ss:$16 sps:$4 sm:$0xff]  }
 0x3ae   : > { %v10407_v35 = vrot.slane %v2839_v38, 9  ;;  %v3496_v50 = vmax.f32 %v2837_v25, %v10406_v39  ;;  %v3495_v19 = vmax.f32 %v2838_v56, %v10405_v31  ;;  %v2179_v49 = vpop.permute.xlu0 %2178  ;;  %v11676_v36 = vld [vmem:[#allocation11 + $0x284] ss:$16 sps:$4 sm:$0xff]   ;;  %v11661_v61 = vld [vmem:[#allocation11 + $0x22c] ss:$16 sps:$4 sm:$0xff]   ;;  %vm15156_vm4 = vmmov %vm15144_vm0 }
 0x3af   : > { %v1992_v52 = vpop.permute.xlu1 %1991  ;;  %v3814_v53 = vmax.f32 %v3494_v42, %v3750_v32  ;;  %2247 = vst.msk [vmem:[#allocation3 + $0xe0] sm:$0xff] %vm2218_vm11, %v2179_v49  ;;  %v11674_v21 = vld [vmem:[#allocation11 + $0x280] ss:$16 sps:$4 sm:$0xff]   ;;  %v11682_v23 = vld [vmem:[#allocation11 + $0x2a4] ss:$16 sps:$4 sm:$0xff]  }
 0x3b0   : > { %2057 = vst.msk [vmem:[#allocation3 + $0xf8] sm:$0xff] %vm2025_vm10, %v1992_v52  ;;  %v3497_v28 = vmax.f32 %v2839_v38, %v10407_v35  ;;  %v3816_v58 = vmax.f32 %v3496_v50, %v3752_v54  ;;  %v3815_v45 = vmax.f32 %v3495_v19, %v3751_v40  ;;  %6349 = vmatpush1.bf16.msra.mxu1 %v11656_v16  ;;  %v11659_v25 = vld [vmem:[#allocation11 + $0x228] ss:$16 sps:$4 sm:$0xff]   ;;  %v11667_v26 = vld [vmem:[#allocation11 + $0x24c] ss:$16 sps:$4 sm:$0xff]   ;;  %vm15151_vm10 = vmmov %vm15144_vm0 }
 0x3b1   : > { %v4049_v59 = vrot.slane %v3814_v53, %v14044_v48  ;;  %6350 = vmatprep.subr.bf16.mxu1 %v11664_v41  ;;  %v11665_v27 = vld [vmem:[#allocation11 + $0x248] ss:$16 sps:$4 sm:$0xff]   ;;  %v11673_v32 = vld [vmem:[#allocation11 + $0x26c] ss:$16 sps:$4 sm:$0xff]   ;;  %v11694_v16 = vld [vmem:[#allocation11 + $0x2e4] ss:$16 sps:$4 sm:$0xff]  }
 0x3b2   : > { %v3817_v60 = vmax.f32 %v3497_v28, %v3753_v29  ;;  %v4053_v11 = vrot.slane %v3815_v45, %v14044_v48  ;;  %v2183_v2 = vpop.permute.xlu0 %2182  ;;  %v4057_v0 = vrot.slane %v3816_v58, %v14044_v48  ;;  %v11671_v56 = vld [vmem:[#allocation11 + $0x268] ss:$16 sps:$4 sm:$0xff]   ;;  %v11685_v55 = vld [vmem:[#allocation11 + $0x2ac] ss:$16 sps:$4 sm:$0xff]   ;;  %v11688_v58 = vld [vmem:[#allocation11 + $0x2c4] ss:$16 sps:$4 sm:$0xff]  }
 0x3b3   : > { %v2181_v62 = vpop.permute.xlu1 %2180  ;;  %v4221_v33 = vsel %vm4196_vm1, %v4049_v59, %v4220_v51  ;;  %2249 = vst.msk [vmem:[#allocation3 + $0xf0] sm:$0xff] %vm2218_vm11, %v2183_v2  ;;  %v11683_v40 = vld [vmem:[#allocation11 + $0x2a8] ss:$16 sps:$4 sm:$0xff]   ;;  %v11691_v45 = vld [vmem:[#allocation11 + $0x2cc] ss:$16 sps:$4 sm:$0xff]  }
 0x3b4   : > { %2248 = vst.msk [vmem:[#allocation3 + $0xe8] sm:$0xff] %vm2218_vm11, %v2181_v62  ;;  %v4061_v22 = vrot.slane %v3817_v60, %v14044_v48  ;;  %v4222_v46 = vsel %vm4198_vm2, %v4053_v11, %v4221_v33  ;;  %6351 = vmatpush1.bf16.msra.mxu1 %v11662_v12  ;;  %v11686_v33 = vld [vmem:[#allocation11 + $0x2c0] ss:$16 sps:$4 sm:$0xff]   ;;  %v11689_v2 = vld [vmem:[#allocation11 + $0x2c8] ss:$16 sps:$4 sm:$0xff]  }
 0x3b5   : > { %v4223_v4 = vsel %vm4200_vm3, %v4057_v0, %v4222_v46  ;;  %6352 = vmatprep.subr.bf16.mxu1 %v11670_v20  ;;  %v11692_v20 = vld [vmem:[#allocation11 + $0x2e0] ss:$16 sps:$4 sm:$0xff]  }
 0x3b6   : > { %v14428_v17 = vsel %vm4202_vm15, %v4061_v22, %v4223_v4  ;;  %v2279_v7 = vld [vmem:[#allocation3 + $0xe0] sm:$0xff] }
 0x3b7   : > { %v2185_v6 = vpop.permute.xlu1 %2184  ;;  %4265 = vst [vmem:[#allocation4 + $0x41] sm:$0xff] %v14428_v17 }
 0x3b8   : > { %2250 = vst.msk [vmem:[#allocation3 + $0xf8] sm:$0xff] %vm2218_vm11, %v2185_v6  ;;  %6353 = vmatpush1.bf16.msra.mxu1 %v11668_v1  ;;  %v11695_v1 = vld [vmem:[#allocation11 + $0x2e8] ss:$16 sps:$4 sm:$0xff]   ;;  %vm15152_vm11 = vmmov %vm15144_vm0 }
 0x3b9   : > { %6354 = vmatprep.subr.bf16.mxu1 %v11676_v36 }
 0x3ba   : > { %v2281_v43 = vld [vmem:[#allocation3 + $0xf0] sm:$0xff] }
 0x3bb   : > { %v2280_v10 = vld [vmem:[#allocation3 + $0xe8] sm:$0xff] }
 0x3bc   : > { %v2297_v15 = vpack.c.bf16 %v2280_v10, %v2279_v7  ;;  %6355 = vmatpush1.bf16.msra.mxu1 %v11674_v21 }
 0x3bd   : > { %6356 = vmatprep.subr.bf16.mxu1 %v11682_v23 }
 0x3be   : > { %11210 = vmatprep.mubr.msk.bf16.mxu0 %vm2321_vm12, %v2297_v15 }
 0x3bf   : > { %v2282_v13 = vld [vmem:[#allocation3 + $0xf8] sm:$0xff] }
 0x3c0   : > { %v2298_v63 = vpack.c.bf16 %v2282_v13, %v2281_v43  ;;  %v11697_v43 = vld [vmem:[#allocation11 + $0x2ec] ss:$16 sps:$4 sm:$0xff]  }
 0x3c2   : > { %11211 = vmatmul.mubr.msk.bf16.gmra.mrb[28].mxu0 %vm2321_vm12, %v2298_v63  ;;  %vm15153_vm12 = vmmov %vm15144_vm0 }
 0x3c3   : > { %6670 = vmatprep.mubr.bf16.mxu0 %v14120_v47  ;;  %v11680_v47 = vld [vmem:[#allocation11 + $0x2a0] ss:$16 sps:$4 sm:$0xff]  }
 0x3c4   : > { %6357 = vmatpush1.bf16.msra.mxu1 %v11680_v47 }
 0x3c5   : > { %6358 = vmatprep.subr.bf16.mxu1 %v11688_v58 }
 0x3c8   : > { %6359 = vmatpush1.bf16.msra.mxu1 %v11686_v33 }
 0x3c9   : > { %6360 = vmatprep.subr.bf16.mxu1 %v11694_v16 }
 0x3ca   : > { %6671 = vmatmul.mubr.bf16.vlgmr.msra.gmra.mrb[32].mxu0 %v14137_v44  ;;  %v11679_v44 = vld [vmem:[#allocation11 + $0x28c] ss:$16 sps:$4 sm:$0xff]  }
 0x3cb   : > { %6680 = vmatprep.mubr.bf16.mxu0 %v14361_v14  ;;  %6712 = vmatpush1.bf16.msra.mxu0 %v11653_v57  ;;  %v11677_v14 = vld [vmem:[#allocation11 + $0x288] ss:$16 sps:$4 sm:$0xff]  }
 0x3cc   : > { %6713 = vmatprep.subr.bf16.mxu0 %v11661_v61  ;;  %6361 = vmatpush1.bf16.msra.mxu1 %v11692_v20  ;;  %v11721_v20 = vld [vmem:[#allocation11 + $0x36c] ss:$16 sps:$4 sm:$0xff]  }
 0x3cf   : > { %6714 = vmatpush1.bf16.msra.mxu0 %v11659_v25 }
 0x3d0   : > { %6715 = vmatprep.subr.bf16.mxu0 %v11667_v26 }
 0x3d2   : > { %6681 = vmatmul.mubr.bf16.gmra.mrb[36].mxu0 %v14368_v5 }
 0x3d3   : > { %6716 = vmatpush1.bf16.msra.mxu0 %v11665_v27 }
 0x3d4   : > { %6717 = vmatprep.subr.bf16.mxu0 %v11673_v32 }
 0x3d7   : > { %6718 = vmatpush1.bf16.msra.mxu0 %v11671_v56  ;;  %v11700_v56 = vld [vmem:[#allocation11 + $0x304] ss:$16 sps:$4 sm:$0xff]  }
 0x3d8   : > { %6719 = vmatprep.subr.bf16.mxu0 %v11679_v44  ;;  %v11703_v44 = vld [vmem:[#allocation11 + $0x30c] ss:$16 sps:$4 sm:$0xff]   ;;  %6362 = vmatprep.subr.bf16.mxu1 %v11700_v56  ;;  %v11722_v56 = vld [vmem:[#allocation11 + $0x380] ss:$16 sps:$4 sm:$0xff]  }
 0x3d9   : > { %v11200_v37 = vpop.f32.mrb[16].mxu0 }
 0x3da   : > { %v2484_v54 = vadd.f32 %v14385_v18, %v11200_v37  ;;  %v2475_v38 = vpop.f32.mrb[17].mxu0 }
 0x3db   : > { %v2476_v39 = vadd.f32 %v14385_v18, %v2475_v38  ;;  %v11201_v51 = vpop.f32.mrb[18].mxu0  ;;  %6720 = vmatpush1.bf16.msra.mxu0 %v11677_v14 }
 0x3dc   : > { %v2556_v31 = vmax.f32 %v2484_v54, 0.0  ;;  %v2487_v5 = vadd.f32 %v14385_v18, %v11201_v51  ;;  %v2478_v42 = vpop.f32.mrb[19].mxu0  ;;  %6721 = vmatprep.subr.bf16.mxu0 %v11685_v55  ;;  %v11698_v54 = vld [vmem:[#allocation11 + $0x300] ss:$16 sps:$4 sm:$0xff]  }
 0x3dd   : > { %v2554_v29 = vmax.f32 %v2476_v39, 0.0  ;;  %v2479_v35 = vadd.f32 %v14385_v18, %v2478_v42  ;;  %6363 = vmatpush1.bf16.msra.mxu1 %v11698_v54  ;;  %v11728_v54 = vld [vmem:[#allocation11 + $0x3a0] ss:$16 sps:$4 sm:$0xff]  }
 0x3de   : > { %v2908_v50 = vcombine.high %v2556_v31, %v2556_v31  ;;  %v2915_v52 = vrot.slane %v2556_v31, %v14024_v30  ;;  %v2557_v19 = vmax.f32 %v2487_v5, 0.0  ;;  %v11701_v31 = vld [vmem:[#allocation11 + $0x308] ss:$16 sps:$4 sm:$0xff]  }
 0x3df   : > { %v2874_v53 = vcombine.high %v2554_v29, %v2554_v29  ;;  %v2881_v49 = vrot.slane %v2554_v29, %v14024_v30  ;;  %v14444_v28 = vmax.f32 %v2479_v35, 0.0  ;;  %6722 = vmatpush1.bf16.msra.mxu0 %v11683_v40 }
 0x3e0   : > { %v2922_v59 = vrot.slane %v2908_v50, %v14024_v30  ;;  %v2923_v60 = vcombine.high %v2915_v52, %v2915_v52  ;;  %v10472_v62 = vrot.slane %v2915_v52, 9  ;;  %v2925_v11 = vcombine.high %v2557_v19, %v2557_v19  ;;  %6723 = vmatprep.subr.bf16.mxu0 %v11691_v45 }
 0x3e1   : > { %v2888_v0 = vrot.slane %v2874_v53, %v14024_v30  ;;  %v2889_v22 = vcombine.high %v2881_v49, %v2881_v49  ;;  %v10408_v46 = vrot.slane %v2881_v49, 9  ;;  %v2932_v4 = vrot.slane %v2557_v19, %v14024_v30  ;;  %v11706_v19 = vld [vmem:[#allocation11 + $0x324] ss:$16 sps:$4 sm:$0xff]   ;;  %v11709_v53 = vld [vmem:[#allocation11 + $0x32c] ss:$16 sps:$4 sm:$0xff]  }
 0x3e2   : > { %v2924_v6 = vcombine.high %v2922_v59, %v2922_v59  ;;  %v10473_v7 = vrot.slane %v2923_v60, 9  ;;  %v10474_v34 = vrot.slane %v2922_v59, 9  ;;  %v3754_v8 = vmax.f32 %v2915_v52, %v10472_v62  ;;  %v11707_v62 = vld [vmem:[#allocation11 + $0x328] ss:$16 sps:$4 sm:$0xff]   ;;  %6364 = vmatprep.subr.bf16.mxu1 %v11706_v19  ;;  %v11748_v19 = vld [vmem:[#allocation11 + $0x404] ss:$16 sps:$4 sm:$0xff]  }
 0x3e3   : > { %v2890_v9 = vcombine.high %v2888_v0, %v2888_v0  ;;  %v10409_v3 = vrot.slane %v2889_v22, 9  ;;  %v10410_v10 = vrot.slane %v2888_v0, 9  ;;  %v3498_v15 = vmax.f32 %v2881_v49, %v10408_v46  ;;  %6724 = vmatpush1.bf16.msra.mxu0 %v11689_v2 }
 0x3e4   : > { %v10475_v41 = vrot.slane %v2924_v6, 9  ;;  %v3755_v13 = vmax.f32 %v2923_v60, %v10473_v7  ;;  %v3756_v63 = vmax.f32 %v2922_v59, %v10474_v34  ;;  %v2939_v12 = vrot.slane %v2925_v11, %v14024_v30  ;;  %6725 = vmatprep.subr.bf16.mxu0 %v11697_v43  ;;  %v11704_v60 = vld [vmem:[#allocation11 + $0x320] ss:$16 sps:$4 sm:$0xff]  }
 0x3e5   : > { %v10411_v36 = vrot.slane %v2890_v9, 9  ;;  %v3499_v57 = vmax.f32 %v2889_v22, %v10409_v3  ;;  %v3500_v61 = vmax.f32 %v2888_v0, %v10410_v10  ;;  %v3818_v21 = vmax.f32 %v3498_v15, %v3754_v8  ;;  %6365 = vmatpush1.bf16.msra.mxu1 %v11704_v60  ;;  %v11715_v8 = vld [vmem:[#allocation11 + $0x34c] ss:$16 sps:$4 sm:$0xff]   ;;  %v11710_v10 = vld [vmem:[#allocation11 + $0x340] ss:$16 sps:$4 sm:$0xff]  }
 0x3e6   : > { %v3757_v23 = vmax.f32 %v2924_v6, %v10475_v41  ;;  %v2940_v25 = vcombine.high %v2932_v4, %v2932_v4  ;;  %v2941_v32 = vcombine.high %v2939_v12, %v2939_v12  ;;  %v10476_v55 = vrot.slane %v2932_v4, 9  ;;  %v11713_v15 = vld [vmem:[#allocation11 + $0x348] ss:$16 sps:$4 sm:$0xff]  }
 0x3e7   : > { %v3501_v26 = vmax.f32 %v2890_v9, %v10411_v36  ;;  %v3819_v47 = vmax.f32 %v3499_v57, %v3755_v13  ;;  %v3820_v27 = vmax.f32 %v3500_v61, %v3756_v63  ;;  %6726 = vmatpush1.bf16.msra.mxu0 %v11695_v1  ;;  %v4065_v14 = vrot.slane %v3818_v21, %v14044_v48  ;;  %v11716_v57 = vld [vmem:[#allocation11 + $0x360] ss:$16 sps:$4 sm:$0xff]   ;;  %v11719_v61 = vld [vmem:[#allocation11 + $0x368] ss:$16 sps:$4 sm:$0xff]  }
 0x3e8   : > { %v10478_v37 = vrot.slane %v2939_v12, 9  ;;  %v2891_v40 = vcombine.high %v14444_v28, %v14444_v28  ;;  %v10477_v5 = vrot.slane %v2940_v25, 9  ;;  %v2898_v42 = vrot.slane %v14444_v28, %v14024_v30  ;;  %6727 = vmatprep.subr.bf16.mxu0 %v11703_v44  ;;  %v11725_v44 = vld [vmem:[#allocation11 + $0x388] ss:$16 sps:$4 sm:$0xff]  }
 0x3e9   : > { %v3821_v38 = vmax.f32 %v3501_v26, %v3757_v23  ;;  %v4069_v39 = vrot.slane %v3819_v47, %v14044_v48  ;;  %v4073_v51 = vrot.slane %v3820_v27, %v14044_v48  ;;  %v10479_v50 = vrot.slane %v2941_v32, 9  ;;  %v11724_v23 = vld [vmem:[#allocation11 + $0x384] ss:$16 sps:$4 sm:$0xff]   ;;  %v11727_v47 = vld [vmem:[#allocation11 + $0x38c] ss:$16 sps:$4 sm:$0xff]  }
 0x3ea   : > { %v2905_v52 = vrot.slane %v2891_v40, %v14024_v30  ;;  %v3758_v58 = vmax.f32 %v2932_v4, %v10476_v55  ;;  %v2906_v45 = vcombine.high %v2898_v42, %v2898_v42  ;;  %v10412_v59 = vrot.slane %v2898_v42, 9  ;;  %v11712_v4 = vld [vmem:[#allocation11 + $0x344] ss:$16 sps:$4 sm:$0xff]  }
 0x3eb   : > { %v4077_v29 = vrot.slane %v3821_v38, %v14044_v48  ;;  %v4225_v35 = vsel %vm4190_vm13, %v4069_v39, %v4065_v14  ;;  %6728 = vmatpush1.bf16.msra.mxu0 %v11701_v31  ;;  %v3760_v28 = vmax.f32 %v2939_v12, %v10478_v37  ;;  %v3759_v0 = vmax.f32 %v2940_v25, %v10477_v5  ;;  %v11718_v12 = vld [vmem:[#allocation11 + $0x364] ss:$16 sps:$4 sm:$0xff]   ;;  %v11733_v37 = vld [vmem:[#allocation11 + $0x3ac] ss:$16 sps:$4 sm:$0xff]   ;;  %v11731_v38 = vld [vmem:[#allocation11 + $0x3a8] ss:$16 sps:$4 sm:$0xff]  }
 0x3ec   : > { %v4226_v49 = vsel %vm4192_vm14, %v4073_v51, %v4225_v35  ;;  %v2907_v11 = vcombine.high %v2905_v52, %v2905_v52  ;;  %v10414_v33 = vrot.slane %v2905_v52, 9  ;;  %6729 = vmatprep.subr.bf16.mxu0 %v11709_v53  ;;  %v10413_v22 = vrot.slane %v2906_v45, 9  ;;  %6366 = vmatprep.subr.bf16.mxu1 %v11712_v4  ;;  %v11730_v55 = vld [vmem:[#allocation11 + $0x3a4] ss:$16 sps:$4 sm:$0xff]   ;;  %v11739_v51 = vld [vmem:[#allocation11 + $0x3cc] ss:$16 sps:$4 sm:$0xff]  }
 0x3ed   : > { %v4227_v2 = vsel %vm15146_vm5, %v4077_v29, %v4226_v49  ;;  %v3502_v46 = vmax.f32 %v2898_v42, %v10412_v59  ;;  %v3761_v6 = vmax.f32 %v2941_v32, %v10479_v50  ;;  %6367 = vmatpush1.bf16.msra.mxu1 %v11710_v10  ;;  %v11736_v39 = vld [vmem:[#allocation11 + $0x3c4] ss:$16 sps:$4 sm:$0xff]   ;;  %v11734_v5 = vld [vmem:[#allocation11 + $0x3c0] ss:$16 sps:$4 sm:$0xff]   ;;  %v11745_v35 = vld [vmem:[#allocation11 + $0x3ec] ss:$16 sps:$4 sm:$0xff]  }
 0x3ee   : > { %v10415_v7 = vrot.slane %v2907_v11, 9  ;;  %v3504_v34 = vmax.f32 %v2905_v52, %v10414_v33  ;;  %v3503_v9 = vmax.f32 %v2906_v45, %v10413_v22  ;;  %6368 = vmatprep.subr.bf16.mxu1 %v11718_v12  ;;  %v14471_v40 = vld [vmem:[#allocation4 + $0x40] sm:$0xff]  ;;  %v11743_v52 = vld [vmem:[#allocation11 + $0x3e8] ss:$16 sps:$4 sm:$0xff]   ;;  %vm15157_vm5 = vmmov %vm15144_vm0 }
 0x3ef   : > { %6730 = vmatpush1.bf16.msra.mxu0 %v11707_v62  ;;  %v3822_v3 = vmax.f32 %v3502_v46, %v3758_v58  ;;  %v11742_v29 = vld [vmem:[#allocation11 + $0x3e4] ss:$16 sps:$4 sm:$0xff]   ;;  %v11740_v50 = vld [vmem:[#allocation11 + $0x3e0] ss:$16 sps:$4 sm:$0xff]   ;;  %v11751_v53 = vld [vmem:[#allocation11 + $0x40c] ss:$16 sps:$4 sm:$0xff]  }
 0x3f0   : > { %v3505_v16 = vmax.f32 %v2907_v11, %v10415_v7  ;;  %v3824_v43 = vmax.f32 %v3504_v34, %v3760_v28  ;;  %6731 = vmatprep.subr.bf16.mxu0 %v11715_v8  ;;  %v3823_v41 = vmax.f32 %v3503_v9, %v3759_v0 }
 0x3f1   : > { %v4081_v13 = vrot.slane %v3822_v3, %v14044_v48  ;;  %6369 = vmatpush1.bf16.msra.mxu1 %v11716_v57 }
 0x3f2   : > { %v3825_v63 = vmax.f32 %v3505_v16, %v3761_v6  ;;  %v4085_v1 = vrot.slane %v3823_v41, %v14044_v48  ;;  %v4089_v21 = vrot.slane %v3824_v43, %v14044_v48  ;;  %6370 = vmatprep.subr.bf16.mxu1 %v11724_v23 }
 0x3f3   : > { %6732 = vmatpush1.bf16.msra.mxu0 %v11713_v15  ;;  %v4228_v36 = vsel %vm4196_vm1, %v4081_v13, %v4227_v2 }
 0x3f4   : > { %6733 = vmatprep.subr.bf16.mxu0 %v11721_v20  ;;  %v4093_v25 = vrot.slane %v3825_v63, %v14044_v48  ;;  %v4229_v26 = vsel %vm4198_vm2, %v4085_v1, %v4228_v36 }
 0x3f5   : > { %v4230_v27 = vsel %vm4200_vm3, %v4089_v21, %v4229_v26  ;;  %6371 = vmatpush1.bf16.msra.mxu1 %v11722_v56 }
 0x3f6   : > { %v4231_v32 = vsel %vm4202_vm15, %v4093_v25, %v4230_v27  ;;  %6372 = vmatprep.subr.bf16.mxu1 %v11730_v55 }
 0x3f7   : > { %6734 = vmatpush1.bf16.msra.mxu0 %v11719_v61  ;;  %4266 = vst [vmem:[#allocation4 + $0x51] sm:$0xff] %v4231_v32  ;;  %v4506_v14 = vpack.c.bf16 %v4231_v32, %v14428_v17  ;;  %v11737_v17 = vld [vmem:[#allocation11 + $0x3c8] ss:$16 sps:$4 sm:$0xff]  }
 0x3f8   : > { %6735 = vmatprep.subr.bf16.mxu0 %v11727_v47 }
 0x3f9   : > { %6325 = vmatprep.mubr.bf16.mxu1 %v4506_v14  ;;  %6690 = vmatprep.mubr.bf16.mxu0 %v4506_v14 }
 0x3fa   : > { %6373 = vmatpush1.bf16.msra.mxu1 %v11728_v54 }
 0x3fb   : > { %6736 = vmatpush1.bf16.msra.mxu0 %v11725_v44  ;;  %6374 = vmatprep.subr.bf16.mxu1 %v11736_v39 }
 0x3fc   : > { %6737 = vmatprep.subr.bf16.mxu0 %v11733_v37 }
 0x3fe   : > { %v14473_v31 = vld [vmem:[#allocation4 + $0x50] sm:$0xff]  ;;  %6375 = vmatpush1.bf16.msra.mxu1 %v11734_v5 }
 0x3ff   : > { %6738 = vmatpush1.bf16.msra.mxu0 %v11731_v38  ;;  %v4505_v42 = vpack.c.bf16 %v14473_v31, %v14471_v40  ;;  %6376 = vmatprep.subr.bf16.mxu1 %v11742_v29 }
 0x400   : > { %6739 = vmatprep.subr.bf16.mxu0 %v11739_v51 }
 0x401   : > { %6326 = vmatmul.mubr.bf16.gmra.mrb[8].mxu1 %v4505_v42  ;;  %6691 = vmatmul.mubr.bf16.gmra.mrb[40].mxu0 %v4505_v42 }
 0x402   : > { %6377 = vmatpush1.bf16.msra.mxu1 %v11740_v50 }
 0x403   : > { %6740 = vmatpush1.bf16.msra.mxu0 %v11737_v17  ;;  %6419 = vmatprep.subr.bf16.mxu1 %v11748_v19 }
 0x404   : > { %6741 = vmatprep.subr.bf16.mxu0 %v11745_v35 }
 0x407   : > { %6742 = vmatpush1.bf16.msra.mxu0 %v11743_v52 }
 0x408   : > { %6784 = vmatprep.subr.bf16.mxu0 %v11751_v53 }
 0x419   : > { %v11204_v49 = vpop.f32.mrb[20].mxu0 }
 0x41a   : > { %v2500_v58 = vadd.f32 %v14385_v18, %v11204_v49  ;;  %v2491_v45 = vpop.f32.mrb[21].mxu0 }
 0x41b   : > { %v2492_v59 = vadd.f32 %v14385_v18, %v2491_v45  ;;  %v11205_v60 = vpop.f32.mrb[22].mxu0 }
 0x41c   : > { %v2560_v62 = vmax.f32 %v2500_v58, 0.0  ;;  %v2503_v28 = vadd.f32 %v14385_v18, %v11205_v60  ;;  %v2494_v11 = vpop.f32.mrb[23].mxu0 }
 0x41d   : > { %v2558_v33 = vmax.f32 %v2492_v59, 0.0  ;;  %v2495_v2 = vadd.f32 %v14385_v18, %v2494_v11 }
 0x41e   : > { %v2976_v0 = vcombine.high %v2560_v62, %v2560_v62  ;;  %v2983_v22 = vrot.slane %v2560_v62, %v14024_v30  ;;  %v2561_v46 = vmax.f32 %v2503_v28, 0.0 }
 0x41f   : > { %v2942_v6 = vcombine.high %v2558_v33, %v2558_v33  ;;  %v2949_v7 = vrot.slane %v2558_v33, %v14024_v30  ;;  %v2559_v34 = vmax.f32 %v2495_v2, 0.0 }
 0x420   : > { %v2990_v4 = vrot.slane %v2976_v0, %v14024_v30  ;;  %v2991_v8 = vcombine.high %v2983_v22, %v2983_v22  ;;  %v10480_v9 = vrot.slane %v2983_v22, 9  ;;  %v2993_v3 = vcombine.high %v2561_v46, %v2561_v46 }
 0x421   : > { %v2956_v10 = vrot.slane %v2942_v6, %v14024_v30  ;;  %v2957_v15 = vcombine.high %v2949_v7, %v2949_v7  ;;  %v10416_v16 = vrot.slane %v2949_v7, 9  ;;  %v3000_v43 = vrot.slane %v2561_v46, %v14024_v30 }
 0x422   : > { %v2992_v41 = vcombine.high %v2990_v4, %v2990_v4  ;;  %v10481_v13 = vrot.slane %v2991_v8, 9  ;;  %v10482_v63 = vrot.slane %v2990_v4, 9  ;;  %v3762_v12 = vmax.f32 %v2983_v22, %v10480_v9 }
 0x423   : > { %v2958_v20 = vcombine.high %v2956_v10, %v2956_v10  ;;  %v10417_v1 = vrot.slane %v2957_v15, 9  ;;  %v10418_v36 = vrot.slane %v2956_v10, 9  ;;  %v3506_v57 = vmax.f32 %v2949_v7, %v10416_v16 }
 0x424   : > { %v10483_v61 = vrot.slane %v2992_v41, 9  ;;  %v3763_v21 = vmax.f32 %v2991_v8, %v10481_v13  ;;  %v3764_v23 = vmax.f32 %v2990_v4, %v10482_v63  ;;  %v3007_v25 = vrot.slane %v2993_v3, %v14024_v30 }
 0x425   : > { %v10419_v26 = vrot.slane %v2958_v20, 9  ;;  %v3507_v47 = vmax.f32 %v2957_v15, %v10417_v1  ;;  %v3508_v27 = vmax.f32 %v2956_v10, %v10418_v36  ;;  %v3826_v32 = vmax.f32 %v3506_v57, %v3762_v12 }
 0x426   : > { %v3765_v56 = vmax.f32 %v2992_v41, %v10483_v61  ;;  %v3008_v44 = vcombine.high %v3000_v43, %v3000_v43  ;;  %v3009_v54 = vcombine.high %v3007_v25, %v3007_v25  ;;  %v10484_v39 = vrot.slane %v3000_v43, 9 }
 0x427   : > { %v3509_v14 = vmax.f32 %v2958_v20, %v10419_v26  ;;  %v3827_v55 = vmax.f32 %v3507_v47, %v3763_v21  ;;  %v3828_v37 = vmax.f32 %v3508_v27, %v3764_v23  ;;  %v4097_v38 = vrot.slane %v3826_v32, %v14044_v48 }
 0x428   : > { %v10486_v51 = vrot.slane %v3007_v25, 9  ;;  %v2959_v29 = vcombine.high %v2559_v34, %v2559_v34  ;;  %v10485_v35 = vrot.slane %v3008_v44, 9  ;;  %v2966_v50 = vrot.slane %v2559_v34, %v14024_v30 }
 0x429   : > { %v3829_v5 = vmax.f32 %v3509_v14, %v3765_v56  ;;  %v4101_v17 = vrot.slane %v3827_v55, %v14044_v48  ;;  %v4105_v42 = vrot.slane %v3828_v37, %v14044_v48  ;;  %v10487_v53 = vrot.slane %v3009_v54, 9 }
 0x42a   : > { %v2973_v49 = vrot.slane %v2959_v29, %v14024_v30  ;;  %v3766_v45 = vmax.f32 %v3000_v43, %v10484_v39  ;;  %v2974_v59 = vcombine.high %v2966_v50, %v2966_v50  ;;  %v10420_v60 = vrot.slane %v2966_v50, 9 }
 0x42b   : > { %v4109_v52 = vrot.slane %v3829_v5, %v14044_v48  ;;  %v4232_v19 = vsel %vm4190_vm13, %v4101_v17, %v4097_v38  ;;  %v3768_v62 = vmax.f32 %v3007_v25, %v10486_v51  ;;  %v3767_v2 = vmax.f32 %v3008_v44, %v10485_v35 }
 0x42c   : > { %v4233_v58 = vsel %vm4192_vm14, %v4105_v42, %v4232_v19  ;;  %v2975_v28 = vcombine.high %v2973_v49, %v2973_v49  ;;  %v10422_v11 = vrot.slane %v2973_v49, 9  ;;  %v10421_v0 = vrot.slane %v2974_v59, 9 }
 0x42d   : > { %v4234_v33 = vsel %vm15147_vm6, %v4109_v52, %v4233_v58  ;;  %v3510_v22 = vmax.f32 %v2966_v50, %v10420_v60  ;;  %v3769_v46 = vmax.f32 %v3009_v54, %v10487_v53 }
 0x42e   : > { %v10423_v6 = vrot.slane %v2975_v28, 9  ;;  %v3512_v7 = vmax.f32 %v2973_v49, %v10422_v11  ;;  %v3511_v34 = vmax.f32 %v2974_v59, %v10421_v0 }
 0x42f   : > { %v3830_v4 = vmax.f32 %v3510_v22, %v3766_v45 }
 0x430   : > { %v3513_v8 = vmax.f32 %v2975_v28, %v10423_v6  ;;  %v3832_v9 = vmax.f32 %v3512_v7, %v3768_v62  ;;  %v3831_v3 = vmax.f32 %v3511_v34, %v3767_v2 }
 0x431   : > { %v4113_v10 = vrot.slane %v3830_v4, %v14044_v48 }
 0x432   : > { %v3833_v15 = vmax.f32 %v3513_v8, %v3769_v46  ;;  %v4117_v16 = vrot.slane %v3831_v3, %v14044_v48  ;;  %v4121_v41 = vrot.slane %v3832_v9, %v14044_v48 }
 0x433   : > { %v4235_v43 = vsel %vm4196_vm1, %v4113_v10, %v4234_v33 }
 0x434   : > { %v4125_v13 = vrot.slane %v3833_v15, %v14044_v48  ;;  %v4236_v63 = vsel %vm4198_vm2, %v4117_v16, %v4235_v43 }
 0x435   : > { %v4237_v12 = vsel %vm4200_vm3, %v4121_v41, %v4236_v63 }
 0x436   : > { %v14504_v20 = vsel %vm4202_vm15, %v4125_v13, %v4237_v12 }
 0x437   : > { %4267 = vst [vmem:[#allocation4 + $0x61] sm:$0xff] %v14504_v20 }
 0x455   : > { %v11208_v1 = vpop.f32.mrb[24].mxu0 }
 0x456   : > { %v2516_v36 = vadd.f32 %v14385_v18, %v11208_v1  ;;  %v2507_v57 = vpop.f32.mrb[25].mxu0 }
 0x457   : > { %v2508_v61 = vadd.f32 %v14385_v18, %v2507_v57  ;;  %v11209_v21 = vpop.f32.mrb[26].mxu0 }
 0x458   : > { %v2564_v23 = vmax.f32 %v2516_v36, 0.0  ;;  %v2519_v25 = vadd.f32 %v14385_v18, %v11209_v21  ;;  %v2510_v26 = vpop.f32.mrb[27].mxu0 }
 0x459   : > { %v2562_v47 = vmax.f32 %v2508_v61, 0.0  ;;  %v2511_v27 = vadd.f32 %v14385_v18, %v2510_v26 }
 0x45a   : > { %v3044_v32 = vcombine.high %v2564_v23, %v2564_v23  ;;  %v3051_v56 = vrot.slane %v2564_v23, %v14024_v30  ;;  %v2565_v44 = vmax.f32 %v2519_v25, 0.0 }
 0x45b   : > { %v3010_v14 = vcombine.high %v2562_v47, %v2562_v47  ;;  %v3017_v55 = vrot.slane %v2562_v47, %v14024_v30  ;;  %v2563_v37 = vmax.f32 %v2511_v27, 0.0 }
 0x45c   : > { %v3058_v54 = vrot.slane %v3044_v32, %v14024_v30  ;;  %v3059_v38 = vcombine.high %v3051_v56, %v3051_v56  ;;  %v10488_v39 = vrot.slane %v3051_v56, 9  ;;  %v3061_v51 = vcombine.high %v2565_v44, %v2565_v44 }
 0x45d   : > { %v3024_v5 = vrot.slane %v3010_v14, %v14024_v30  ;;  %v3025_v17 = vcombine.high %v3017_v55, %v3017_v55  ;;  %v10424_v42 = vrot.slane %v3017_v55, 9  ;;  %v3068_v29 = vrot.slane %v2565_v44, %v14024_v30 }
 0x45e   : > { %v3060_v18 = vcombine.high %v3058_v54, %v3058_v54  ;;  %v10489_v35 = vrot.slane %v3059_v38, 9  ;;  %v10490_v50 = vrot.slane %v3058_v54, 9  ;;  %v3770_v52 = vmax.f32 %v3051_v56, %v10488_v39 }
 0x45f   : > { %v3026_v19 = vcombine.high %v3024_v5, %v3024_v5  ;;  %v10425_v53 = vrot.slane %v3025_v17, 9  ;;  %v10426_v49 = vrot.slane %v3024_v5, 9  ;;  %v3514_v58 = vmax.f32 %v3017_v55, %v10424_v42 }
 0x460   : > { %v10491_v45 = vrot.slane %v3060_v18, 9  ;;  %v3771_v59 = vmax.f32 %v3059_v38, %v10489_v35  ;;  %v3772_v60 = vmax.f32 %v3058_v54, %v10490_v50  ;;  %v3075_v62 = vrot.slane %v3061_v51, %v14024_v30 }
 0x461   : > { %v10427_v28 = vrot.slane %v3026_v19, 9  ;;  %v3515_v11 = vmax.f32 %v3025_v17, %v10425_v53  ;;  %v3516_v33 = vmax.f32 %v3024_v5, %v10426_v49  ;;  %v3834_v2 = vmax.f32 %v3514_v58, %v3770_v52  ;;  %v4319_v49 = vld [vmem:[#allocation4 + $0x20] sm:$0xff] }
 0x462   : > { %v3773_v0 = vmax.f32 %v3060_v18, %v10491_v45  ;;  %v3076_v22 = vcombine.high %v3068_v29, %v3068_v29  ;;  %v3077_v34 = vcombine.high %v3075_v62, %v3075_v62  ;;  %v10492_v8 = vrot.slane %v3068_v29, 9  ;;  %v4276_v58 = vld [vmem:[#allocation4 + $0x60] sm:$0xff] }
 0x463   : > { %v3517_v46 = vmax.f32 %v3026_v19, %v10427_v28  ;;  %v3835_v6 = vmax.f32 %v3515_v11, %v3771_v59  ;;  %v3836_v7 = vmax.f32 %v3516_v33, %v3772_v60  ;;  %v4129_v4 = vrot.slane %v3834_v2, %v14044_v48  ;;  %v4318_v60 = vld [vmem:[#allocation4 + $0x10] sm:$0xff]  ;;  %v4302_v28 = vld [vmem:[#allocation4 + $0x2] sm:$0xff]  ;;  %v11749_v2 = vld [vmem:[#allocation11 + $0x408] ss:$16 sps:$4 sm:$0xff]  }
 0x464   : > { %v10494_v9 = vrot.slane %v3075_v62, 9  ;;  %v3027_v16 = vcombine.high %v2563_v37, %v2563_v37  ;;  %v10493_v43 = vrot.slane %v3076_v22, 9  ;;  %v3034_v41 = vrot.slane %v2563_v37, %v14024_v30  ;;  %v14538_v11 = vld [vmem:[#allocation4 + $0x12] sm:$0xff] }
 0x465   : > { %v3837_v3 = vmax.f32 %v3517_v46, %v3773_v0  ;;  %v4133_v10 = vrot.slane %v3835_v6, %v14044_v48  ;;  %v4137_v15 = vrot.slane %v3836_v7, %v14044_v48  ;;  %v10495_v12 = vrot.slane %v3077_v34, 9  ;;  %v11746_v33 = vld [vmem:[#allocation11 + $0x400] ss:$16 sps:$4 sm:$0xff]   ;;  %v11757_v46 = vld [vmem:[#allocation11 + $0x42c] ss:$16 sps:$4 sm:$0xff]  }
 0x466   : > { %v3041_v1 = vrot.slane %v3027_v16, %v14024_v30  ;;  %v3774_v57 = vmax.f32 %v3068_v29, %v10492_v8  ;;  %v3042_v61 = vcombine.high %v3034_v41, %v3034_v41  ;;  %v10428_v21 = vrot.slane %v3034_v41, 9  ;;  %v4320_v0 = vld [vmem:[#allocation4 + $0x30] sm:$0xff] }
 0x467   : > { %v4141_v13 = vrot.slane %v3837_v3, %v14044_v48  ;;  %v4239_v63 = vsel %vm4190_vm13, %v4133_v10, %v4129_v4  ;;  %v3776_v23 = vmax.f32 %v3075_v62, %v10494_v9  ;;  %v3775_v27 = vmax.f32 %v3076_v22, %v10493_v43  ;;  %v11754_v22 = vld [vmem:[#allocation11 + $0x424] ss:$16 sps:$4 sm:$0xff]   ;;  %v11752_v7 = vld [vmem:[#allocation11 + $0x420] ss:$16 sps:$4 sm:$0xff]   ;;  %v11763_v8 = vld [vmem:[#allocation11 + $0x44c] ss:$16 sps:$4 sm:$0xff]  }
 0x468   : > { %v4240_v36 = vsel %vm4192_vm14, %v4137_v15, %v4239_v63  ;;  %v3043_v25 = vcombine.high %v3041_v1, %v3041_v1  ;;  %v10430_v26 = vrot.slane %v3041_v1, 9  ;;  %v10429_v32 = vrot.slane %v3042_v61, 9  ;;  %v11760_v4 = vld [vmem:[#allocation11 + $0x444] ss:$16 sps:$4 sm:$0xff]   ;;  %v11758_v3 = vld [vmem:[#allocation11 + $0x440] ss:$16 sps:$4 sm:$0xff]  }
 0x469   : > { %v4241_v47 = vsel %vm15148_vm7, %v4141_v13, %v4240_v36  ;;  %v3518_v56 = vmax.f32 %v3034_v41, %v10428_v21  ;;  %v3777_v44 = vmax.f32 %v3077_v34, %v10495_v12  ;;  %v4490_v62 = vpack.c.bf16 %v4319_v49, %v4318_v60  ;;  %v11755_v34 = vld [vmem:[#allocation11 + $0x428] ss:$16 sps:$4 sm:$0xff]   ;;  %v14542_v9 = vld [vmem:[#allocation4 + $0x32] sm:$0xff]  ;;  %v14544_v15 = vld [vmem:[#allocation4 + $0x22] sm:$0xff] }
 0x46a   : > { %v10431_v14 = vrot.slane %v3043_v25, 9  ;;  %v3520_v55 = vmax.f32 %v3041_v1, %v10430_v26  ;;  %v3519_v37 = vmax.f32 %v3042_v61, %v10429_v32  ;;  %v4499_v6 = vpack.c.bf16 %v14471_v40, %v4320_v0  ;;  %v11761_v10 = vld [vmem:[#allocation11 + $0x448] ss:$16 sps:$4 sm:$0xff]   ;;  %v11766_v16 = vld [vmem:[#allocation11 + $0x464] ss:$16 sps:$4 sm:$0xff]  }
 0x46b   : > { %v3838_v54 = vmax.f32 %v3518_v56, %v3774_v57  ;;  %v4498_v40 = vpack.c.bf16 %v14542_v9, %v14544_v15  ;;  %v11769_v43 = vld [vmem:[#allocation11 + $0x46c] ss:$16 sps:$4 sm:$0xff]   ;;  %v4508_v41 = vpack.c.bf16 %v4276_v58, %v14473_v31  ;;  %v11764_v13 = vld [vmem:[#allocation11 + $0x460] ss:$16 sps:$4 sm:$0xff]   ;;  %v11767_v63 = vld [vmem:[#allocation11 + $0x468] ss:$16 sps:$4 sm:$0xff]  }
 0x46c   : > { %v3521_v38 = vmax.f32 %v3043_v25, %v10431_v14  ;;  %v3840_v39 = vmax.f32 %v3520_v55, %v3776_v23  ;;  %v3839_v51 = vmax.f32 %v3519_v37, %v3775_v27  ;;  %v11772_v12 = vld [vmem:[#allocation11 + $0x484] ss:$16 sps:$4 sm:$0xff]   ;;  %v11775_v1 = vld [vmem:[#allocation11 + $0x48c] ss:$16 sps:$4 sm:$0xff]   ;;  %v11770_v57 = vld [vmem:[#allocation11 + $0x480] ss:$16 sps:$4 sm:$0xff]  }
 0x46d   : > { %v4145_v5 = vrot.slane %v3838_v54, %v14044_v48  ;;  %v14549_v36 = vld [vmem:[#allocation4 + $0x52] sm:$0xff]  ;;  %v11773_v61 = vld [vmem:[#allocation11 + $0x488] ss:$16 sps:$4 sm:$0xff]   ;;  %v14551_v21 = vld [vmem:[#allocation4 + $0x42] sm:$0xff] }
 0x46e   : > { %v3841_v17 = vmax.f32 %v3521_v38, %v3777_v44  ;;  %v4149_v42 = vrot.slane %v3839_v51, %v14044_v48  ;;  %v4153_v18 = vrot.slane %v3840_v39, %v14044_v48  ;;  %v4507_v31 = vpack.c.bf16 %v14549_v36, %v14551_v21  ;;  %v11778_v23 = vld [vmem:[#allocation11 + $0x4a4] ss:$16 sps:$4 sm:$0xff]   ;;  %v11781_v25 = vld [vmem:[#allocation11 + $0x4ac] ss:$16 sps:$4 sm:$0xff]   ;;  %v11776_v14 = vld [vmem:[#allocation11 + $0x4a0] ss:$16 sps:$4 sm:$0xff]  }
 0x46f   : > { %v4242_v29 = vsel %vm4196_vm1, %v4145_v5, %v4241_v47  ;;  %v12404_v47 = vld [vmem:[#allocation9] ss:$0 sm:$0xff]  ;;  %v11779_v55 = vld [vmem:[#allocation11 + $0x4a8] ss:$16 sps:$4 sm:$0xff]   ;;  %v11784_v5 = vld [vmem:[#allocation11 + $0x4c4] ss:$16 sps:$4 sm:$0xff]  }
 0x470   : > { %v4157_v35 = vrot.slane %v3841_v17, %v14044_v48  ;;  %v4243_v50 = vsel %vm4198_vm2, %v4149_v42, %v4242_v29  ;;  %v11787_v17 = vld [vmem:[#allocation11 + $0x4cc] ss:$16 sps:$4 sm:$0xff]   ;;  %v11785_v60 = vld [vmem:[#allocation11 + $0x4c8] ss:$16 sps:$4 sm:$0xff]  }
 0x471   : > { %v4244_v52 = vsel %vm4200_vm3, %v4153_v18, %v4243_v50  ;;  %v11793_v0 = vld [vmem:[#allocation11 + $0x4ec] ss:$16 sps:$4 sm:$0xff]  }
 0x472   : > { %v4245_v19 = vsel %vm4202_vm15, %v4157_v35, %v4244_v52 }
 0x473   : > { %4268 = vst [vmem:[#allocation4 + $0x71] sm:$0xff] %v4245_v19  ;;  %v4515_v53 = vpack.c.bf16 %v4245_v19, %v14504_v20  ;;  %v4489_v20 = vpack.c.bf16 %v14538_v11, %v4302_v28 }
 0x475   : > { %6335 = vmatprep.mubr.bf16.mxu1 %v4515_v53  ;;  %6700 = vmatprep.mubr.bf16.mxu0 %v4515_v53 }
 0x47a   : > { %v14535_v45 = vld [vmem:[#allocation4 + $0x70] sm:$0xff] }
 0x47b   : > { %v4514_v59 = vpack.c.bf16 %v14535_v45, %v4276_v58 }
 0x47d   : > { %6336 = vmatmul.mubr.bf16.gmra.mrb[12].mxu1 %v4514_v59  ;;  %6701 = vmatmul.mubr.bf16.gmra.mrb[44].mxu0 %v4514_v59  ;;  %v11782_v59 = vld [vmem:[#allocation11 + $0x4c0] ss:$16 sps:$4 sm:$0xff]  }
 0x47e   : > { %6378 = vmatprep.mubr.bf16.mxu1 %v4490_v62  ;;  %6743 = vmatprep.mubr.bf16.mxu0 %v4490_v62 }
 0x485   : > { %6379 = vmatmul.mubr.bf16.vlgmr.msra.gmra.mrb[0].mxu1 %v4489_v20  ;;  %6744 = vmatmul.mubr.bf16.vlgmr.msra.gmra.mrb[32].mxu0 %v4489_v20  ;;  %v11790_v20 = vld [vmem:[#allocation11 + $0x4e4] ss:$16 sps:$4 sm:$0xff]  }
 0x486   : > { %6420 = vmatpush1.bf16.msra.mxu1 %v11746_v33  ;;  %6785 = vmatpush1.bf16.msra.mxu0 %v11749_v2 }
 0x487   : > { %6388 = vmatprep.mubr.bf16.mxu1 %v4499_v6  ;;  %6753 = vmatprep.mubr.bf16.mxu0 %v4499_v6 }
 0x488   : > { %6421 = vmatprep.subr.bf16.mxu1 %v11754_v22  ;;  %6786 = vmatprep.subr.bf16.mxu0 %v11757_v46 }
 0x48a   : > { %6422 = vmatpush1.bf16.msra.mxu1 %v11752_v7  ;;  %6787 = vmatpush1.bf16.msra.mxu0 %v11755_v34 }
 0x48b   : > { %6423 = vmatprep.subr.bf16.mxu1 %v11760_v4  ;;  %6788 = vmatprep.subr.bf16.mxu0 %v11763_v8 }
 0x48d   : > { %6389 = vmatmul.mubr.bf16.gmra.mrb[4].mxu1 %v4498_v40  ;;  %6754 = vmatmul.mubr.bf16.gmra.mrb[36].mxu0 %v4498_v40 }
 0x48e   : > { %6424 = vmatpush1.bf16.msra.mxu1 %v11758_v3  ;;  %6789 = vmatpush1.bf16.msra.mxu0 %v11761_v10 }
 0x48f   : > { %6398 = vmatprep.mubr.bf16.mxu1 %v4508_v41  ;;  %6763 = vmatprep.mubr.bf16.mxu0 %v4508_v41  ;;  %v11788_v41 = vld [vmem:[#allocation11 + $0x4e0] ss:$16 sps:$4 sm:$0xff]  }
 0x490   : > { %6425 = vmatprep.subr.bf16.mxu1 %v11766_v16  ;;  %6790 = vmatprep.subr.bf16.mxu0 %v11769_v43 }
 0x492   : > { %6426 = vmatpush1.bf16.msra.mxu1 %v11764_v13  ;;  %6791 = vmatpush1.bf16.msra.mxu0 %v11767_v63  ;;  %v11791_v13 = vld [vmem:[#allocation11 + $0x4e8] ss:$16 sps:$4 sm:$0xff]  }
 0x493   : > { %6427 = vmatprep.subr.bf16.mxu1 %v11772_v12  ;;  %6792 = vmatprep.subr.bf16.mxu0 %v11775_v1 }
 0x495   : > { %v11212_v26 = vpop.f32.mrb[28].mxu0  ;;  %6399 = vmatmul.mubr.bf16.gmra.mrb[8].mxu1 %v4507_v31  ;;  %6764 = vmatmul.mubr.bf16.gmra.mrb[40].mxu0 %v4507_v31 }
 0x496   : > { %v2532_v27 = vadd.f32 %v12404_v47, %v11212_v26  ;;  %v2523_v32 = vpop.f32.mrb[29].mxu0  ;;  %6428 = vmatpush1.bf16.msra.mxu1 %v11770_v57  ;;  %6793 = vmatpush1.bf16.msra.mxu0 %v11773_v61  ;;  %v11796_v61 = vld [vmem:[#allocation11 + $0x504] ss:$16 sps:$4 sm:$0xff]  }
 0x497   : > { %v2524_v56 = vadd.f32 %v12404_v47, %v2523_v32  ;;  %v11213_v44 = vpop.f32.mrb[30].mxu0  ;;  %6429 = vmatprep.subr.bf16.mxu1 %v11778_v23  ;;  %6794 = vmatprep.subr.bf16.mxu0 %v11781_v25  ;;  %v11799_v25 = vld [vmem:[#allocation11 + $0x50c] ss:$16 sps:$4 sm:$0xff]  }
 0x498   : > { %v2568_v37 = vmax.f32 %v2532_v27, 0.0  ;;  %v2535_v54 = vadd.f32 %v12404_v47, %v11213_v44  ;;  %v2526_v38 = vpop.f32.mrb[31].mxu0 }
 0x499   : > { %v2566_v39 = vmax.f32 %v2524_v56, 0.0  ;;  %v2527_v51 = vadd.f32 %v12404_v47, %v2526_v38 }
 0x49a   : > { %v3112_v42 = vcombine.high %v2568_v37, %v2568_v37  ;;  %v3119_v29 = vrot.slane %v2568_v37, %v14024_v30  ;;  %v2569_v18 = vmax.f32 %v2535_v54, 0.0  ;;  %6430 = vmatpush1.bf16.msra.mxu1 %v11776_v14  ;;  %6795 = vmatpush1.bf16.msra.mxu0 %v11779_v55  ;;  %v11794_v55 = vld [vmem:[#allocation11 + $0x500] ss:$16 sps:$4 sm:$0xff]   ;;  %v11797_v37 = vld [vmem:[#allocation11 + $0x508] ss:$16 sps:$4 sm:$0xff]  }
 0x49b   : > { %v3078_v35 = vcombine.high %v2566_v39, %v2566_v39  ;;  %v3085_v50 = vrot.slane %v2566_v39, %v14024_v30  ;;  %v14557_v52 = vmax.f32 %v2527_v51, 0.0  ;;  %6431 = vmatprep.subr.bf16.mxu1 %v11784_v5  ;;  %6796 = vmatprep.subr.bf16.mxu0 %v11787_v17  ;;  %v11802_v5 = vld [vmem:[#allocation11 + $0x524] ss:$16 sps:$4 sm:$0xff]   ;;  %v11805_v17 = vld [vmem:[#allocation11 + $0x52c] ss:$16 sps:$4 sm:$0xff]  }
 0x49c   : > { %v3126_v19 = vrot.slane %v3112_v42, %v14024_v30  ;;  %v3127_v53 = vcombine.high %v3119_v29, %v3119_v29  ;;  %v10496_v49 = vrot.slane %v3119_v29, 9  ;;  %v3129_v58 = vcombine.high %v2569_v18, %v2569_v18 }
 0x49d   : > { %v3092_v62 = vrot.slane %v3078_v35, %v14024_v30  ;;  %v3093_v28 = vcombine.high %v3085_v50, %v3085_v50  ;;  %v10432_v33 = vrot.slane %v3085_v50, 9  ;;  %v3136_v2 = vrot.slane %v2569_v18, %v14024_v30 }
 0x49e   : > { %v3128_v22 = vcombine.high %v3126_v19, %v3126_v19  ;;  %v10497_v46 = vrot.slane %v3127_v53, 9  ;;  %v10498_v6 = vrot.slane %v3126_v19, 9  ;;  %v3778_v7 = vmax.f32 %v3119_v29, %v10496_v49  ;;  %6432 = vmatpush1.bf16.msra.mxu1 %v11782_v59  ;;  %6797 = vmatpush1.bf16.msra.mxu0 %v11785_v60  ;;  %v11800_v60 = vld [vmem:[#allocation11 + $0x520] ss:$16 sps:$4 sm:$0xff]  }
 0x49f   : > { %v3094_v34 = vcombine.high %v3092_v62, %v3092_v62  ;;  %v10433_v4 = vrot.slane %v3093_v28, 9  ;;  %v10434_v8 = vrot.slane %v3092_v62, 9  ;;  %v3522_v3 = vmax.f32 %v3085_v50, %v10432_v33  ;;  %6433 = vmatprep.subr.bf16.mxu1 %v11790_v20  ;;  %6798 = vmatprep.subr.bf16.mxu0 %v11793_v0  ;;  %v11808_v0 = vld [vmem:[#allocation11 + $0x544] ss:$16 sps:$4 sm:$0xff]  }
 0x4a0   : > { %v10499_v10 = vrot.slane %v3128_v22, 9  ;;  %v3779_v40 = vmax.f32 %v3127_v53, %v10497_v46  ;;  %v3780_v16 = vmax.f32 %v3126_v19, %v10498_v6  ;;  %v3143_v43 = vrot.slane %v3129_v58, %v14024_v30 }
 0x4a1   : > { %v10435_v63 = vrot.slane %v3094_v34, 9  ;;  %v3523_v12 = vmax.f32 %v3093_v28, %v10433_v4  ;;  %v3524_v1 = vmax.f32 %v3092_v62, %v10434_v8  ;;  %v3842_v57 = vmax.f32 %v3522_v3, %v3778_v7  ;;  %v11803_v62 = vld [vmem:[#allocation11 + $0x528] ss:$16 sps:$4 sm:$0xff]  }
 0x4a2   : > { %v3781_v31 = vmax.f32 %v3128_v22, %v10499_v10  ;;  %v3144_v23 = vcombine.high %v3136_v2, %v3136_v2  ;;  %v3145_v32 = vcombine.high %v3143_v43, %v3143_v43  ;;  %v10500_v44 = vrot.slane %v3136_v2, 9  ;;  %6434 = vmatpush1.bf16.msra.mxu1 %v11788_v41  ;;  %6799 = vmatpush1.bf16.msra.mxu0 %v11791_v13  ;;  %v11811_v22 = vld [vmem:[#allocation11 + $0x54c] ss:$16 sps:$4 sm:$0xff]   ;;  %v11806_v10 = vld [vmem:[#allocation11 + $0x540] ss:$16 sps:$4 sm:$0xff]  }
 0x4a3   : > { %v3525_v26 = vmax.f32 %v3094_v34, %v10435_v63  ;;  %v3843_v47 = vmax.f32 %v3523_v12, %v3779_v40  ;;  %v3844_v27 = vmax.f32 %v3524_v1, %v3780_v16  ;;  %v4161_v56 = vrot.slane %v3842_v57, %v14044_v48  ;;  %6435 = vmatprep.subr.bf16.mxu1 %v11796_v61  ;;  %v11809_v40 = vld [vmem:[#allocation11 + $0x548] ss:$16 sps:$4 sm:$0xff]   ;;  %v11814_v41 = vld [vmem:[#allocation11 + $0x564] ss:$16 sps:$4 sm:$0xff]   ;;  %v11817_v13 = vld [vmem:[#allocation11 + $0x56c] ss:$16 sps:$4 sm:$0xff]  }
 0x4a4   : > { %v10502_v14 = vrot.slane %v3143_v43, 9  ;;  %v3095_v51 = vcombine.high %v14557_v52, %v14557_v52  ;;  %v10501_v42 = vrot.slane %v3144_v23, 9  ;;  %v3102_v29 = vrot.slane %v14557_v52, %v14024_v30  ;;  %6800 = vmatprep.subr.bf16.mxu0 %v11799_v25 }
 0x4a5   : > { %v3845_v54 = vmax.f32 %v3525_v26, %v3781_v31  ;;  %v4165_v38 = vrot.slane %v3843_v47, %v14044_v48  ;;  %v4169_v39 = vrot.slane %v3844_v27, %v14044_v48  ;;  %v10503_v50 = vrot.slane %v3145_v32, 9  ;;  %v11812_v31 = vld [vmem:[#allocation11 + $0x560] ss:$16 sps:$4 sm:$0xff]   ;;  %v11820_v26 = vld [vmem:[#allocation11 + $0x584] ss:$16 sps:$4 sm:$0xff]  }
 0x4a6   : > { %v3109_v19 = vrot.slane %v3095_v51, %v14024_v30  ;;  %v3782_v49 = vmax.f32 %v3136_v2, %v10500_v44  ;;  %v3110_v58 = vcombine.high %v3102_v29, %v3102_v29  ;;  %v10436_v59 = vrot.slane %v3102_v29, 9  ;;  %6436 = vmatpush1.bf16.msra.mxu1 %v11794_v55  ;;  %6801 = vmatpush1.bf16.msra.mxu0 %v11797_v37  ;;  %v11823_v47 = vld [vmem:[#allocation11 + $0x58c] ss:$16 sps:$4 sm:$0xff]   ;;  %v11821_v55 = vld [vmem:[#allocation11 + $0x588] ss:$16 sps:$4 sm:$0xff]  }
 0x4a7   : > { %v4173_v18 = vrot.slane %v3845_v54, %v14044_v48  ;;  %v4246_v35 = vsel %vm4190_vm13, %v4165_v38, %v4161_v56  ;;  %v3784_v28 = vmax.f32 %v3143_v43, %v10502_v14  ;;  %6437 = vmatprep.subr.bf16.mxu1 %v11802_v5  ;;  %6802 = vmatprep.subr.bf16.mxu0 %v11805_v17  ;;  %v11818_v14 = vld [vmem:[#allocation11 + $0x580] ss:$16 sps:$4 sm:$0xff]   ;;  %v11826_v37 = vld [vmem:[#allocation11 + $0x5a4] ss:$16 sps:$4 sm:$0xff]   ;;  %v11829_v54 = vld [vmem:[#allocation11 + $0x5ac] ss:$16 sps:$4 sm:$0xff]  }
 0x4a8   : > { %v4247_v53 = vsel %vm4192_vm14, %v4169_v39, %v4246_v35  ;;  %v3111_v33 = vcombine.high %v3109_v19, %v3109_v19  ;;  %v10438_v52 = vrot.slane %v3109_v19, 9  ;;  %v3783_v46 = vmax.f32 %v3144_v23, %v10501_v42  ;;  %v11815_v23 = vld [vmem:[#allocation11 + $0x568] ss:$16 sps:$4 sm:$0xff]   ;;  %v11824_v38 = vld [vmem:[#allocation11 + $0x5a0] ss:$16 sps:$4 sm:$0xff]  }
 0x4a9   : > { %v4248_v20 = vsel %vm15149_vm8, %v4173_v18, %v4247_v53  ;;  %v10437_v6 = vrot.slane %v3110_v58, 9  ;;  %v3526_v7 = vmax.f32 %v3102_v29, %v10436_v59  ;;  %v3785_v34 = vmax.f32 %v3145_v32, %v10503_v50  ;;  %v11827_v39 = vld [vmem:[#allocation11 + $0x5a8] ss:$16 sps:$4 sm:$0xff]   ;;  %v11832_v51 = vld [vmem:[#allocation11 + $0x5c4] ss:$16 sps:$4 sm:$0xff]  }
 0x4aa   : > { %v10439_v2 = vrot.slane %v3111_v33, 9  ;;  %v3528_v4 = vmax.f32 %v3109_v19, %v10438_v52  ;;  %6438 = vmatpush1.bf16.msra.mxu1 %v11800_v60  ;;  %6803 = vmatpush1.bf16.msra.mxu0 %v11803_v62  ;;  %v11835_v5 = vld [vmem:[#allocation11 + $0x5cc] ss:$16 sps:$4 sm:$0xff]   ;;  %v14586_v17 = vld [vmem:[#allocation4 + $0x72] sm:$0xff]  ;;  %v11833_v35 = vld [vmem:[#allocation11 + $0x5c8] ss:$16 sps:$4 sm:$0xff]  }
 0x4ab   : > { %v3527_v8 = vmax.f32 %v3110_v58, %v10437_v6  ;;  %v3846_v3 = vmax.f32 %v3526_v7, %v3782_v49  ;;  %6439 = vmatprep.subr.bf16.mxu1 %v11808_v0  ;;  %6804 = vmatprep.subr.bf16.mxu0 %v11811_v22  ;;  %v11830_v18 = vld [vmem:[#allocation11 + $0x5c0] ss:$16 sps:$4 sm:$0xff]   ;;  %v11838_v53 = vld [vmem:[#allocation11 + $0x5e4] ss:$16 sps:$4 sm:$0xff]   ;;  %v11841_v49 = vld [vmem:[#allocation11 + $0x5ec] ss:$16 sps:$4 sm:$0xff]   ;;  %v4492_v58 = vpack.c.bf16 %v14544_v15, %v14538_v11 }
 0x4ac   : > { %v3529_v16 = vmax.f32 %v3111_v33, %v10439_v2  ;;  %v3848_v43 = vmax.f32 %v3528_v4, %v3784_v28  ;;  %v4308_v50 = vld [vmem:[#allocation4 + $0x62] sm:$0xff]  ;;  %v11839_v59 = vld [vmem:[#allocation11 + $0x5e8] ss:$16 sps:$4 sm:$0xff]   ;;  %v11847_v62 = vld [vmem:[#allocation11 + $0x60c] ss:$16 sps:$4 sm:$0xff]   ;;  %v4501_v22 = vpack.c.bf16 %v14551_v21, %v14542_v9 }
 0x4ad   : > { %v3847_v63 = vmax.f32 %v3527_v8, %v3783_v46  ;;  %v4177_v12 = vrot.slane %v3846_v3, %v14044_v48  ;;  %v14593_v19 = vpack.c.bf16 %v14586_v17, %v4308_v50  ;;  %v11844_v60 = vld [vmem:[#allocation11 + $0x604] ss:$16 sps:$4 sm:$0xff]   ;;  %v11842_v33 = vld [vmem:[#allocation11 + $0x600] ss:$16 sps:$4 sm:$0xff]   ;;  %v11845_v52 = vld [vmem:[#allocation11 + $0x608] ss:$16 sps:$4 sm:$0xff]  }
 0x4ae   : > { %v3849_v1 = vmax.f32 %v3529_v16, %v3785_v34  ;;  %6440 = vmatpush1.bf16.msra.mxu1 %v11806_v10  ;;  %6805 = vmatpush1.bf16.msra.mxu0 %v11809_v40  ;;  %v4185_v25 = vrot.slane %v3848_v43, %v14044_v48  ;;  %v14599_v28 = vld [vmem:[#allocation4 + $0x21] sm:$0xff]  ;;  %v11851_v6 = vld [vmem:[#allocation11 + $0x628] ss:$16 sps:$4 sm:$0xff]   ;;  %v4336_v3 = vld [vmem:[#allocation4 + $0x31] sm:$0xff]  ;;  %v4510_v40 = vpack.c.bf16 %v4308_v50, %v14549_v36 }
 0x4af   : > { %v4181_v57 = vrot.slane %v3847_v63, %v14044_v48  ;;  %v4249_v61 = vsel %vm4196_vm1, %v4177_v12, %v4248_v20  ;;  %6441 = vmatprep.subr.bf16.mxu1 %v11814_v41  ;;  %6806 = vmatprep.subr.bf16.mxu0 %v11817_v13  ;;  %v4334_v20 = vld [vmem:[#allocation4 + $0x11] sm:$0xff]  ;;  %v14604_v2 = vld [vmem:[#allocation4 + $0x41] sm:$0xff]  ;;  %v11857_v8 = vld [vmem:[#allocation11 + $0x648] ss:$16 sps:$4 sm:$0xff]  }
 0x4b0   : > { %v4189_v27 = vrot.slane %v3849_v1, %v14044_v48  ;;  %v4491_v11 = vpack.c.bf16 %v14599_v28, %v4334_v20  ;;  %v11850_v15 = vld [vmem:[#allocation11 + $0x624] ss:$16 sps:$4 sm:$0xff]   ;;  %v11853_v0 = vld [vmem:[#allocation11 + $0x62c] ss:$16 sps:$4 sm:$0xff]   ;;  %v11848_v46 = vld [vmem:[#allocation11 + $0x620] ss:$16 sps:$4 sm:$0xff]   ;;  %v4500_v9 = vpack.c.bf16 %v14604_v2, %v4336_v3 }
 0x4b1   : > { %v4250_v32 = vsel %vm4198_vm2, %v4181_v57, %v4249_v61  ;;  %v11856_v7 = vld [vmem:[#allocation11 + $0x644] ss:$16 sps:$4 sm:$0xff]   ;;  %v11859_v34 = vld [vmem:[#allocation11 + $0x64c] ss:$16 sps:$4 sm:$0xff]   ;;  %v11854_v4 = vld [vmem:[#allocation11 + $0x640] ss:$16 sps:$4 sm:$0xff]  }
 0x4b2   : > { %v4251_v56 = vsel %vm4200_vm3, %v4185_v25, %v4250_v32  ;;  %6442 = vmatpush1.bf16.msra.mxu1 %v11812_v31  ;;  %6807 = vmatpush1.bf16.msra.mxu0 %v11815_v23  ;;  %v11862_v21 = vld [vmem:[#allocation11 + $0x664] ss:$16 sps:$4 sm:$0xff]   ;;  %v11865_v10 = vld [vmem:[#allocation11 + $0x66c] ss:$16 sps:$4 sm:$0xff]   ;;  %v11860_v16 = vld [vmem:[#allocation11 + $0x660] ss:$16 sps:$4 sm:$0xff]  }
 0x4b3   : > { %v14583_v44 = vsel %vm4202_vm15, %v4189_v27, %v4251_v56  ;;  %6443 = vmatprep.subr.bf16.mxu1 %v11820_v26  ;;  %6808 = vmatprep.subr.bf16.mxu0 %v11823_v47  ;;  %v11863_v43 = vld [vmem:[#allocation11 + $0x668] ss:$16 sps:$4 sm:$0xff]   ;;  %v11868_v41 = vld [vmem:[#allocation11 + $0x684] ss:$16 sps:$4 sm:$0xff]   ;;  %v11871_v13 = vld [vmem:[#allocation11 + $0x68c] ss:$16 sps:$4 sm:$0xff]  }
 0x4b4   : > { %4269 = vst [vmem:[#allocation4 + $0x81] sm:$0xff] %v14583_v44  ;;  %v14608_v63 = vld [vmem:[#allocation4 + $0x61] sm:$0xff]  ;;  %v14610_v12 = vld [vmem:[#allocation4 + $0x51] sm:$0xff]  ;;  %v11869_v57 = vld [vmem:[#allocation11 + $0x688] ss:$16 sps:$4 sm:$0xff]  }
 0x4b5   : > { %v11866_v1 = vld [vmem:[#allocation11 + $0x680] ss:$16 sps:$4 sm:$0xff]   ;;  %v4509_v36 = vpack.c.bf16 %v14608_v63, %v14610_v12  ;;  %v11874_v31 = vld [vmem:[#allocation11 + $0x6a4] ss:$16 sps:$4 sm:$0xff]   ;;  %v11877_v23 = vld [vmem:[#allocation11 + $0x6ac] ss:$16 sps:$4 sm:$0xff]  }
 0x4b6   : > { %6444 = vmatpush1.bf16.msra.mxu1 %v11818_v14  ;;  %6809 = vmatpush1.bf16.msra.mxu0 %v11821_v55  ;;  %v11872_v26 = vld [vmem:[#allocation11 + $0x6a0] ss:$16 sps:$4 sm:$0xff]   ;;  %v11875_v47 = vld [vmem:[#allocation11 + $0x6a8] ss:$16 sps:$4 sm:$0xff]   ;;  %v11880_v27 = vld [vmem:[#allocation11 + $0x6c4] ss:$16 sps:$4 sm:$0xff]  }
 0x4b7   : > { %6445 = vmatprep.subr.bf16.mxu1 %v11826_v37  ;;  %6810 = vmatprep.subr.bf16.mxu0 %v11829_v54  ;;  %v11883_v32 = vld [vmem:[#allocation11 + $0x6cc] ss:$16 sps:$4 sm:$0xff]   ;;  %v11878_v56 = vld [vmem:[#allocation11 + $0x6c0] ss:$16 sps:$4 sm:$0xff]   ;;  %v11881_v14 = vld [vmem:[#allocation11 + $0x6c8] ss:$16 sps:$4 sm:$0xff]  }
 0x4b8   : > { %v14618_v55 = vld [vmem:[#allocation4 + $0x71] sm:$0xff]  ;;  %v11911_v20 = vld [vmem:[#allocation11 + $0x768] ss:$16 sps:$4 sm:$0xff]  }
 0x4b9   : > { %v4518_v37 = vpack.c.bf16 %v14583_v44, %v14618_v55  ;;  %v11886_v54 = vld [vmem:[#allocation11 + $0x6e4] ss:$16 sps:$4 sm:$0xff]  }
 0x4ba   : > { %6446 = vmatpush1.bf16.msra.mxu1 %v11824_v38  ;;  %6811 = vmatpush1.bf16.msra.mxu0 %v11827_v39  ;;  %v11889_v38 = vld [vmem:[#allocation11 + $0x6ec] ss:$16 sps:$4 sm:$0xff]   ;;  %v4494_v39 = vpack.c.bf16 %v4336_v3, %v14599_v28  ;;  %v11898_v50 = vld [vmem:[#allocation11 + $0x724] ss:$16 sps:$4 sm:$0xff]   ;;  %v11926_v3 = vld [vmem:[#allocation11 + $0x7c0] ss:$16 sps:$4 sm:$0xff]  }
 0x4bb   : > { %v14588_v42 = vld [vmem:[#allocation4 + $0x80] sm:$0xff]  ;;  %6447 = vmatprep.subr.bf16.mxu1 %v11832_v51  ;;  %6812 = vmatprep.subr.bf16.mxu0 %v11835_v5  ;;  %v11887_v5 = vld [vmem:[#allocation11 + $0x6e8] ss:$16 sps:$4 sm:$0xff]  }
 0x4bc   : > { %v4517_v29 = vpack.c.bf16 %v14588_v42, %v14535_v45  ;;  %v11836_v45 = vld [vmem:[#allocation11 + $0x5e0] ss:$16 sps:$4 sm:$0xff]   ;;  %v11910_v28 = vld [vmem:[#allocation11 + $0x764] ss:$16 sps:$4 sm:$0xff]  }
 0x4bd   : > { %v14612_v61 = vld [vmem:[#allocation4 + $0x82] sm:$0xff] }
 0x4be   : > { %6408 = vmatprep.mubr.bf16.mxu1 %v4517_v29  ;;  %6773 = vmatprep.mubr.bf16.mxu0 %v4517_v29  ;;  %v4519_v25 = vpack.c.bf16 %v14612_v61, %v14586_v17  ;;  %v11884_v51 = vld [vmem:[#allocation11 + $0x6e0] ss:$16 sps:$4 sm:$0xff]   ;;  %v11892_v17 = vld [vmem:[#allocation11 + $0x704] ss:$16 sps:$4 sm:$0xff]   ;;  %v11895_v29 = vld [vmem:[#allocation11 + $0x70c] ss:$16 sps:$4 sm:$0xff]  }
 0x4bf   : > { %6409 = vmatmul.mubr.bf16.gmra.mrb[12].mxu1 %v14593_v19  ;;  %6774 = vmatmul.mubr.bf16.gmra.mrb[44].mxu0 %v14593_v19 }
 0x4c0   : > { %6448 = vmatpush1.bf16.msra.mxu1 %v11830_v18  ;;  %6813 = vmatpush1.bf16.msra.mxu0 %v11833_v35  ;;  %v11890_v18 = vld [vmem:[#allocation11 + $0x700] ss:$16 sps:$4 sm:$0xff]   ;;  %v11893_v35 = vld [vmem:[#allocation11 + $0x708] ss:$16 sps:$4 sm:$0xff]  }
 0x4c1   : > { %6451 = vmatprep.mubr.bf16.mxu1 %v4492_v58  ;;  %6816 = vmatprep.mubr.bf16.mxu0 %v4492_v58  ;;  %v11899_v58 = vld [vmem:[#allocation11 + $0x728] ss:$16 sps:$4 sm:$0xff]  }
 0x4c2   : > { %6449 = vmatprep.subr.bf16.mxu1 %v11838_v53  ;;  %6814 = vmatprep.subr.bf16.mxu0 %v11841_v49  ;;  %v11901_v53 = vld [vmem:[#allocation11 + $0x72c] ss:$16 sps:$4 sm:$0xff]   ;;  %v11896_v49 = vld [vmem:[#allocation11 + $0x720] ss:$16 sps:$4 sm:$0xff]  }
 0x4c4   : > { %6450 = vmatpush1.bf16.msra.mxu1 %v11836_v45  ;;  %6815 = vmatpush1.bf16.msra.mxu0 %v11839_v59  ;;  %v11904_v45 = vld [vmem:[#allocation11 + $0x744] ss:$16 sps:$4 sm:$0xff]   ;;  %v11907_v59 = vld [vmem:[#allocation11 + $0x74c] ss:$16 sps:$4 sm:$0xff]  }
 0x4c5   : > { %6492 = vmatprep.subr.bf16.mxu1 %v11844_v60  ;;  %6857 = vmatprep.subr.bf16.mxu0 %v11847_v62  ;;  %v11902_v60 = vld [vmem:[#allocation11 + $0x740] ss:$16 sps:$4 sm:$0xff]   ;;  %v11905_v62 = vld [vmem:[#allocation11 + $0x748] ss:$16 sps:$4 sm:$0xff]  }
 0x4c7   : > { %6452 = vmatmul.mubr.bf16.vlgmr.msra.gmra.mrb[0].mxu1 %v4491_v11  ;;  %6817 = vmatmul.mubr.bf16.vlgmr.msra.gmra.mrb[32].mxu0 %v4491_v11  ;;  %v11916_v11 = vld [vmem:[#allocation11 + $0x784] ss:$16 sps:$4 sm:$0xff]  }
 0x4c8   : > { %6493 = vmatpush1.bf16.msra.mxu1 %v11842_v33  ;;  %6858 = vmatpush1.bf16.msra.mxu0 %v11845_v52  ;;  %v11913_v33 = vld [vmem:[#allocation11 + $0x76c] ss:$16 sps:$4 sm:$0xff]   ;;  %v11908_v52 = vld [vmem:[#allocation11 + $0x760] ss:$16 sps:$4 sm:$0xff]  }
 0x4c9   : > { %6461 = vmatprep.mubr.bf16.mxu1 %v4501_v22  ;;  %6826 = vmatprep.mubr.bf16.mxu0 %v4501_v22  ;;  %v11917_v22 = vld [vmem:[#allocation11 + $0x788] ss:$16 sps:$4 sm:$0xff]  }
 0x4ca   : > { %6494 = vmatprep.subr.bf16.mxu1 %v11850_v15  ;;  %6859 = vmatprep.subr.bf16.mxu0 %v11853_v0  ;;  %v11919_v15 = vld [vmem:[#allocation11 + $0x78c] ss:$16 sps:$4 sm:$0xff]   ;;  %v11914_v0 = vld [vmem:[#allocation11 + $0x780] ss:$16 sps:$4 sm:$0xff]  }
 0x4cc   : > { %6495 = vmatpush1.bf16.msra.mxu1 %v11848_v46  ;;  %6860 = vmatpush1.bf16.msra.mxu0 %v11851_v6  ;;  %v11922_v46 = vld [vmem:[#allocation11 + $0x7a4] ss:$16 sps:$4 sm:$0xff]   ;;  %v11925_v6 = vld [vmem:[#allocation11 + $0x7ac] ss:$16 sps:$4 sm:$0xff]  }
 0x4cd   : > { %6496 = vmatprep.subr.bf16.mxu1 %v11856_v7  ;;  %6861 = vmatprep.subr.bf16.mxu0 %v11859_v34  ;;  %v11920_v7 = vld [vmem:[#allocation11 + $0x7a0] ss:$16 sps:$4 sm:$0xff]   ;;  %v11923_v34 = vld [vmem:[#allocation11 + $0x7a8] ss:$16 sps:$4 sm:$0xff]  }
 0x4cf   : > { %6462 = vmatmul.mubr.bf16.gmra.mrb[4].mxu1 %v4500_v9  ;;  %6827 = vmatmul.mubr.bf16.gmra.mrb[36].mxu0 %v4500_v9  ;;  %v11929_v9 = vld [vmem:[#allocation11 + $0x7c8] ss:$16 sps:$4 sm:$0xff]  }
 0x4d0   : > { %6497 = vmatpush1.bf16.msra.mxu1 %v11854_v4  ;;  %6862 = vmatpush1.bf16.msra.mxu0 %v11857_v8  ;;  %v11928_v4 = vld [vmem:[#allocation11 + $0x7c4] ss:$16 sps:$4 sm:$0xff]   ;;  %v11931_v8 = vld [vmem:[#allocation11 + $0x7cc] ss:$16 sps:$4 sm:$0xff]  }
 0x4d1   : > { %6471 = vmatprep.mubr.bf16.mxu1 %v4510_v40  ;;  %6836 = vmatprep.mubr.bf16.mxu0 %v4510_v40  ;;  %v11932_v40 = vld [vmem:[#allocation11 + $0x7e0] ss:$16 sps:$4 sm:$0xff]  }
 0x4d2   : > { %6498 = vmatprep.subr.bf16.mxu1 %v11862_v21  ;;  %6863 = vmatprep.subr.bf16.mxu0 %v11865_v10  ;;  %v11934_v21 = vld [vmem:[#allocation11 + $0x7e4] ss:$16 sps:$4 sm:$0xff]   ;;  %v11937_v10 = vld [vmem:[#allocation11 + $0x7ec] ss:$16 sps:$4 sm:$0xff]  }
 0x4d4   : > { %6499 = vmatpush1.bf16.msra.mxu1 %v11860_v16  ;;  %6864 = vmatpush1.bf16.msra.mxu0 %v11863_v43  ;;  %v11935_v16 = vld [vmem:[#allocation11 + $0x7e8] ss:$16 sps:$4 sm:$0xff]   ;;  %v11940_v43 = vld [vmem:[#allocation11 + $0x804] ss:$16 sps:$4 sm:$0xff]  }
 0x4d5   : > { %6500 = vmatprep.subr.bf16.mxu1 %v11868_v41  ;;  %6865 = vmatprep.subr.bf16.mxu0 %v11871_v13  ;;  %v11943_v41 = vld [vmem:[#allocation11 + $0x80c] ss:$16 sps:$4 sm:$0xff]  }
 0x4d6   : > { %v4368_v13 = vld [vmem:[#allocation4 + $0x30] sm:$0xff] }
 0x4d7   : > { %6472 = vmatmul.mubr.bf16.gmra.mrb[8].mxu1 %v4509_v36  ;;  %6837 = vmatmul.mubr.bf16.gmra.mrb[40].mxu0 %v4509_v36 }
 0x4d8   : > { %6501 = vmatpush1.bf16.msra.mxu1 %v11866_v1  ;;  %6866 = vmatpush1.bf16.msra.mxu0 %v11869_v57  ;;  %v4367_v1 = vld [vmem:[#allocation4 + $0x20] sm:$0xff] }
 0x4d9   : > { %6481 = vmatprep.mubr.bf16.mxu1 %v4519_v25  ;;  %6846 = vmatprep.mubr.bf16.mxu0 %v4519_v25  ;;  %v11938_v57 = vld [vmem:[#allocation11 + $0x800] ss:$16 sps:$4 sm:$0xff]   ;;  %v4493_v36 = vpack.c.bf16 %v4368_v13, %v4367_v1  ;;  %v11946_v25 = vld [vmem:[#allocation11 + $0x824] ss:$16 sps:$4 sm:$0xff]  }
 0x4da   : > { %6502 = vmatprep.subr.bf16.mxu1 %v11874_v31  ;;  %6867 = vmatprep.subr.bf16.mxu0 %v11877_v23  ;;  %v11941_v31 = vld [vmem:[#allocation11 + $0x808] ss:$16 sps:$4 sm:$0xff]   ;;  %v4503_v23 = vpack.c.bf16 %v14610_v12, %v14604_v2  ;;  %v11997_v13 = vld [vmem:[#allocation14 + $0x2c] ss:$16 sps:$4 sm:$0xff]   ;;  %v11992_v1 = vld [vmem:[#allocation14 + $0x20] ss:$16 sps:$4 sm:$0xff]  }
 0x4db   : > { %v11953_v12 = vld [vmem:[#allocation11 + $0x848] ss:$16 sps:$4 sm:$0xff]  }
 0x4dc   : > { %6503 = vmatpush1.bf16.msra.mxu1 %v11872_v26  ;;  %6868 = vmatpush1.bf16.msra.mxu0 %v11875_v47  ;;  %v11949_v26 = vld [vmem:[#allocation11 + $0x82c] ss:$16 sps:$4 sm:$0xff]   ;;  %v11944_v47 = vld [vmem:[#allocation11 + $0x820] ss:$16 sps:$4 sm:$0xff]  }
 0x4dd   : > { %6504 = vmatprep.subr.bf16.mxu1 %v11880_v27  ;;  %6869 = vmatprep.subr.bf16.mxu0 %v11883_v32  ;;  %v11947_v27 = vld [vmem:[#allocation11 + $0x828] ss:$16 sps:$4 sm:$0xff]   ;;  %v11952_v32 = vld [vmem:[#allocation11 + $0x844] ss:$16 sps:$4 sm:$0xff]  }
 0x4df   : > { %6482 = vmatmul.mubr.bf16.gmra.mrb[12].mxu1 %v4518_v37  ;;  %6847 = vmatmul.mubr.bf16.gmra.mrb[44].mxu0 %v4518_v37  ;;  %v4369_v37 = vld [vmem:[#allocation4 + $0x40] sm:$0xff] }
 0x4e0   : > { %6505 = vmatpush1.bf16.msra.mxu1 %v11878_v56  ;;  %6870 = vmatpush1.bf16.msra.mxu0 %v11881_v14  ;;  %v4370_v56 = vld [vmem:[#allocation4 + $0x50] sm:$0xff] }
 0x4e1   : > { %6524 = vmatprep.mubr.bf16.mxu1 %v4494_v39  ;;  %6889 = vmatprep.mubr.bf16.mxu0 %v4494_v39  ;;  %v11955_v14 = vld [vmem:[#allocation11 + $0x84c] ss:$16 sps:$4 sm:$0xff]   ;;  %v4502_v2 = vpack.c.bf16 %v4370_v56, %v4369_v37  ;;  %v11958_v39 = vld [vmem:[#allocation11 + $0x864] ss:$16 sps:$4 sm:$0xff]   ;;  %v12018_v37 = vld [vmem:[#allocation14 + $0xa4] ss:$16 sps:$4 sm:$0xff]  }
 0x4e2   : > { %6506 = vmatprep.subr.bf16.mxu1 %v11886_v54  ;;  %6871 = vmatprep.subr.bf16.mxu0 %v11889_v38  ;;  %v11950_v54 = vld [vmem:[#allocation11 + $0x840] ss:$16 sps:$4 sm:$0xff]   ;;  %v4512_v38 = vpack.c.bf16 %v14618_v55, %v14608_v63  ;;  %v11965_v55 = vld [vmem:[#allocation11 + $0x888] ss:$16 sps:$4 sm:$0xff]   ;;  %v12010_v56 = vld [vmem:[#allocation14 + $0x80] ss:$16 sps:$4 sm:$0xff]  }
 0x4e4   : > { %6507 = vmatpush1.bf16.msra.mxu1 %v11884_v51  ;;  %6872 = vmatpush1.bf16.msra.mxu0 %v11887_v5  ;;  %v11961_v51 = vld [vmem:[#allocation11 + $0x86c] ss:$16 sps:$4 sm:$0xff]   ;;  %v11956_v5 = vld [vmem:[#allocation11 + $0x860] ss:$16 sps:$4 sm:$0xff]  }
 0x4e5   : > { %6508 = vmatprep.subr.bf16.mxu1 %v11892_v17  ;;  %6873 = vmatprep.subr.bf16.mxu0 %v11895_v29  ;;  %v11959_v17 = vld [vmem:[#allocation11 + $0x868] ss:$16 sps:$4 sm:$0xff]   ;;  %v11964_v29 = vld [vmem:[#allocation11 + $0x884] ss:$16 sps:$4 sm:$0xff]  }
 0x4e8   : > { %6509 = vmatpush1.bf16.msra.mxu1 %v11890_v18  ;;  %6874 = vmatpush1.bf16.msra.mxu0 %v11893_v35  ;;  %v4372_v18 = vld [vmem:[#allocation4 + $0x70] sm:$0xff] }
 0x4e9   : > { %6510 = vmatprep.subr.bf16.mxu1 %v11898_v50  ;;  %6875 = vmatprep.subr.bf16.mxu0 %v11901_v53  ;;  %v11967_v35 = vld [vmem:[#allocation11 + $0x88c] ss:$16 sps:$4 sm:$0xff]  }
 0x4ea   : > { %v4390_v50 = vld [vmem:[#allocation4 + $0x91] sm:$0xff]  ;;  %v4371_v53 = vld [vmem:[#allocation4 + $0x60] sm:$0xff] }
 0x4eb   : > { %v4511_v63 = vpack.c.bf16 %v4372_v18, %v4371_v53  ;;  %v12028_v18 = vld [vmem:[#allocation14 + $0xe0] ss:$16 sps:$4 sm:$0xff]   ;;  %v12039_v53 = vld [vmem:[#allocation14 + $0x10c] ss:$16 sps:$4 sm:$0xff]  }
 0x4ec   : > { %6511 = vmatpush1.bf16.msra.mxu1 %v11896_v49  ;;  %6876 = vmatpush1.bf16.msra.mxu0 %v11899_v58  ;;  %v11962_v49 = vld [vmem:[#allocation11 + $0x880] ss:$16 sps:$4 sm:$0xff]   ;;  %v4521_v58 = vpack.c.bf16 %v4390_v50, %v14583_v44  ;;  %v12036_v50 = vld [vmem:[#allocation14 + $0x104] ss:$16 sps:$4 sm:$0xff]  }
 0x4ed   : > { %6512 = vmatprep.subr.bf16.mxu1 %v11904_v45  ;;  %6877 = vmatprep.subr.bf16.mxu0 %v11907_v59  ;;  %v11970_v45 = vld [vmem:[#allocation11 + $0x8a4] ss:$16 sps:$4 sm:$0xff]   ;;  %v11973_v59 = vld [vmem:[#allocation11 + $0x8ac] ss:$16 sps:$4 sm:$0xff]  }
 0x4f0   : > { %6513 = vmatpush1.bf16.msra.mxu1 %v11902_v60  ;;  %6878 = vmatpush1.bf16.msra.mxu0 %v11905_v62  ;;  %v11968_v60 = vld [vmem:[#allocation11 + $0x8a0] ss:$16 sps:$4 sm:$0xff]   ;;  %v11971_v62 = vld [vmem:[#allocation11 + $0x8a8] ss:$16 sps:$4 sm:$0xff]  }
 0x4f1   : > { %6514 = vmatprep.subr.bf16.mxu1 %v11910_v28  ;;  %6879 = vmatprep.subr.bf16.mxu0 %v11913_v33  ;;  %v11976_v28 = vld [vmem:[#allocation11 + $0x8c4] ss:$16 sps:$4 sm:$0xff]   ;;  %v11979_v33 = vld [vmem:[#allocation11 + $0x8cc] ss:$16 sps:$4 sm:$0xff]  }
 0x4f4   : > { %6515 = vmatpush1.bf16.msra.mxu1 %v11908_v52  ;;  %6880 = vmatpush1.bf16.msra.mxu0 %v11911_v20  ;;  %v11974_v52 = vld [vmem:[#allocation11 + $0x8c0] ss:$16 sps:$4 sm:$0xff]  }
 0x4f5   : > { %6516 = vmatprep.subr.bf16.mxu1 %v11916_v11  ;;  %6881 = vmatprep.subr.bf16.mxu0 %v11919_v15  ;;  %v12405_v20 = vld [vmem:[#allocation4] sm:$0xff]  ;;  %v11977_v11 = vld [vmem:[#allocation11 + $0x8c8] ss:$16 sps:$4 sm:$0xff]  }
 0x4f6   : > { %v4520_v44 = vpack.c.bf16 %v12405_v20, %v14588_v42  ;;  %v11982_v15 = vld [vmem:[#allocation11 + $0x8e4] ss:$16 sps:$4 sm:$0xff]   ;;  %v12054_v20 = vld [vmem:[#allocation14 + $0x164] ss:$16 sps:$4 sm:$0xff]  }
 0x4f8   : > { %6517 = vmatpush1.bf16.msra.mxu1 %v11914_v0  ;;  %6882 = vmatpush1.bf16.msra.mxu0 %v11917_v22  ;;  %v11985_v0 = vld [vmem:[#allocation11 + $0x8ec] ss:$16 sps:$4 sm:$0xff]   ;;  %v11980_v22 = vld [vmem:[#allocation11 + $0x8e0] ss:$16 sps:$4 sm:$0xff]  }
 0x4f9   : > { %6518 = vmatprep.subr.bf16.mxu1 %v11922_v46  ;;  %6883 = vmatprep.subr.bf16.mxu0 %v11925_v6  ;;  %v12799_v46 = vmov 0   ;;  %v11983_v6 = vld [vmem:[#allocation11 + $0x8e8] ss:$16 sps:$4 sm:$0xff]  }
 0x4fc   : > { %6519 = vmatpush1.bf16.msra.mxu1 %v11920_v7  ;;  %6884 = vmatpush1.bf16.msra.mxu0 %v11923_v34  ;;  %v4400_v7 = vld [vmem:[#allocation4 + $0x32] sm:$0xff]  ;;  %v4399_v34 = vld [vmem:[#allocation4 + $0x22] sm:$0xff] }
 0x4fd   : > { %6520 = vmatprep.subr.bf16.mxu1 %v11928_v4  ;;  %6885 = vmatprep.subr.bf16.mxu0 %v11931_v8  ;;  %v4495_v42 = vpack.c.bf16 %v4400_v7, %v4399_v34  ;;  %v4402_v4 = vld [vmem:[#allocation4 + $0x52] sm:$0xff]  ;;  %v4401_v8 = vld [vmem:[#allocation4 + $0x42] sm:$0xff] }
 0x4fe   : > { %v12069_v7 = vld [vmem:[#allocation14 + $0x1ac] ss:$16 sps:$4 sm:$0xff]   ;;  %v12064_v34 = vld [vmem:[#allocation14 + $0x1a0] ss:$16 sps:$4 sm:$0xff]  }
 0x500   : > { %6521 = vmatpush1.bf16.msra.mxu1 %v11926_v3  ;;  %6886 = vmatpush1.bf16.msra.mxu0 %v11929_v9  ;;  %v4504_v3 = vpack.c.bf16 %v4402_v4, %v4401_v8  ;;  %v4406_v9 = vld [vmem:[#allocation4 + $0x92] sm:$0xff]  ;;  %v12072_v4 = vld [vmem:[#allocation14 + $0x1c4] ss:$16 sps:$4 sm:$0xff]  }
 0x501   : > { %6522 = vmatprep.subr.bf16.mxu1 %v11934_v21  ;;  %6887 = vmatprep.subr.bf16.mxu0 %v11937_v10  ;;  %v4522_v21 = vpack.c.bf16 %v4406_v9, %v14612_v61  ;;  %v11988_v10 = vld [vmem:[#allocation14 + $0x4] ss:$16 sps:$4 sm:$0xff]   ;;  %v12003_v61 = vld [vmem:[#allocation14 + $0x4c] ss:$16 sps:$4 sm:$0xff]   ;;  %v12073_v9 = vld [vmem:[#allocation14 + $0x1c8] ss:$16 sps:$4 sm:$0xff]  }
 0x502   : > { %v12075_v8 = vld [vmem:[#allocation14 + $0x1cc] ss:$16 sps:$4 sm:$0xff]  }
 0x504   : > { %6523 = vmatpush1.bf16.msra.mxu1 %v11932_v40  ;;  %6888 = vmatpush1.bf16.msra.mxu0 %v11935_v16  ;;  %v11991_v40 = vld [vmem:[#allocation14 + $0xc] ss:$16 sps:$4 sm:$0xff]   ;;  %v11986_v16 = vld [vmem:[#allocation14] ss:$16 sps:$4 sm:$0xff]  }
 0x505   : > { %6565 = vmatprep.subr.bf16.mxu1 %v11940_v43  ;;  %6930 = vmatprep.subr.bf16.mxu0 %v11943_v41  ;;  %v11989_v43 = vld [vmem:[#allocation14 + $0x8] ss:$16 sps:$4 sm:$0xff]   ;;  %v11994_v41 = vld [vmem:[#allocation14 + $0x24] ss:$16 sps:$4 sm:$0xff]  }
 0x507   : > { %6525 = vmatmul.mubr.bf16.vlgmr.msra.gmra.mrb[0].mxu1 %v4493_v36  ;;  %6890 = vmatmul.mubr.bf16.vlgmr.msra.gmra.mrb[32].mxu0 %v4493_v36  ;;  %v11998_v36 = vld [vmem:[#allocation14 + $0x40] ss:$16 sps:$4 sm:$0xff]  }
 0x508   : > { %6534 = vmatprep.mubr.bf16.mxu1 %v4503_v23  ;;  %6566 = vmatpush1.bf16.msra.mxu1 %v11938_v57  ;;  %v11995_v57 = vld [vmem:[#allocation14 + $0x28] ss:$16 sps:$4 sm:$0xff]  }
 0x509   : > { %6899 = vmatprep.mubr.bf16.mxu0 %v4503_v23  ;;  %6931 = vmatpush1.bf16.msra.mxu0 %v11941_v31  ;;  %v12001_v31 = vld [vmem:[#allocation14 + $0x48] ss:$16 sps:$4 sm:$0xff]   ;;  %v12006_v23 = vld [vmem:[#allocation14 + $0x64] ss:$16 sps:$4 sm:$0xff]  }
 0x50a   : > { %6567 = vmatprep.subr.bf16.mxu1 %v11946_v25  ;;  %6932 = vmatprep.subr.bf16.mxu0 %v11949_v26  ;;  %v12009_v25 = vld [vmem:[#allocation14 + $0x6c] ss:$16 sps:$4 sm:$0xff]   ;;  %v12004_v26 = vld [vmem:[#allocation14 + $0x60] ss:$16 sps:$4 sm:$0xff]  }
 0x50c   : > { %6568 = vmatpush1.bf16.msra.mxu1 %v11944_v47  ;;  %v12007_v47 = vld [vmem:[#allocation14 + $0x68] ss:$16 sps:$4 sm:$0xff]  }
 0x50d   : > { %6933 = vmatpush1.bf16.msra.mxu0 %v11947_v27  ;;  %6569 = vmatprep.subr.bf16.mxu1 %v11952_v32  ;;  %v12012_v27 = vld [vmem:[#allocation14 + $0x84] ss:$16 sps:$4 sm:$0xff]   ;;  %v12015_v32 = vld [vmem:[#allocation14 + $0x8c] ss:$16 sps:$4 sm:$0xff]  }
 0x50e   : > { %6934 = vmatprep.subr.bf16.mxu0 %v11955_v14  ;;  %v12013_v14 = vld [vmem:[#allocation14 + $0x88] ss:$16 sps:$4 sm:$0xff]  }
 0x50f   : > { %6535 = vmatmul.mubr.bf16.gmra.mrb[4].mxu1 %v4502_v2  ;;  %6900 = vmatmul.mubr.bf16.gmra.mrb[36].mxu0 %v4502_v2  ;;  %v12016_v2 = vld [vmem:[#allocation14 + $0xa0] ss:$16 sps:$4 sm:$0xff]  }
 0x510   : > { %6544 = vmatprep.mubr.bf16.mxu1 %v4512_v38  ;;  %6570 = vmatpush1.bf16.msra.mxu1 %v11950_v54  ;;  %v12021_v54 = vld [vmem:[#allocation14 + $0xac] ss:$16 sps:$4 sm:$0xff]  }
 0x511   : > { %6909 = vmatprep.mubr.bf16.mxu0 %v4512_v38  ;;  %6935 = vmatpush1.bf16.msra.mxu0 %v11953_v12  ;;  %v12019_v12 = vld [vmem:[#allocation14 + $0xa8] ss:$16 sps:$4 sm:$0xff]   ;;  %v12024_v38 = vld [vmem:[#allocation14 + $0xc4] ss:$16 sps:$4 sm:$0xff]  }
 0x512   : > { %6571 = vmatprep.subr.bf16.mxu1 %v11958_v39  ;;  %6936 = vmatprep.subr.bf16.mxu0 %v11961_v51  ;;  %v12027_v39 = vld [vmem:[#allocation14 + $0xcc] ss:$16 sps:$4 sm:$0xff]   ;;  %v12022_v51 = vld [vmem:[#allocation14 + $0xc0] ss:$16 sps:$4 sm:$0xff]  }
 0x514   : > { %6572 = vmatpush1.bf16.msra.mxu1 %v11956_v5  ;;  %v12025_v5 = vld [vmem:[#allocation14 + $0xc8] ss:$16 sps:$4 sm:$0xff]  }
 0x515   : > { %6937 = vmatpush1.bf16.msra.mxu0 %v11959_v17  ;;  %6573 = vmatprep.subr.bf16.mxu1 %v11964_v29  ;;  %v12030_v17 = vld [vmem:[#allocation14 + $0xe4] ss:$16 sps:$4 sm:$0xff]   ;;  %v12033_v29 = vld [vmem:[#allocation14 + $0xec] ss:$16 sps:$4 sm:$0xff]  }
 0x516   : > { %6938 = vmatprep.subr.bf16.mxu0 %v11967_v35  ;;  %v12031_v35 = vld [vmem:[#allocation14 + $0xe8] ss:$16 sps:$4 sm:$0xff]  }
 0x517   : > { %6545 = vmatmul.mubr.bf16.gmra.mrb[8].mxu1 %v4511_v63  ;;  %6910 = vmatmul.mubr.bf16.gmra.mrb[40].mxu0 %v4511_v63  ;;  %v12037_v63 = vld [vmem:[#allocation14 + $0x108] ss:$16 sps:$4 sm:$0xff]  }
 0x518   : > { %6554 = vmatprep.mubr.bf16.mxu1 %v4521_v58  ;;  %6574 = vmatpush1.bf16.msra.mxu1 %v11962_v49  ;;  %v12034_v49 = vld [vmem:[#allocation14 + $0x100] ss:$16 sps:$4 sm:$0xff]  }
 0x519   : > { %6919 = vmatprep.mubr.bf16.mxu0 %v4521_v58  ;;  %6939 = vmatpush1.bf16.msra.mxu0 %v11965_v55  ;;  %v12042_v55 = vld [vmem:[#allocation14 + $0x124] ss:$16 sps:$4 sm:$0xff]   ;;  %v12045_v58 = vld [vmem:[#allocation14 + $0x12c] ss:$16 sps:$4 sm:$0xff]  }
 0x51a   : > { %6575 = vmatprep.subr.bf16.mxu1 %v11970_v45  ;;  %6940 = vmatprep.subr.bf16.mxu0 %v11973_v59  ;;  %v12040_v45 = vld [vmem:[#allocation14 + $0x120] ss:$16 sps:$4 sm:$0xff]   ;;  %v12043_v59 = vld [vmem:[#allocation14 + $0x128] ss:$16 sps:$4 sm:$0xff]  }
 0x51c   : > { %6576 = vmatpush1.bf16.msra.mxu1 %v11968_v60  ;;  %v12048_v60 = vld [vmem:[#allocation14 + $0x144] ss:$16 sps:$4 sm:$0xff]  }
 0x51d   : > { %6941 = vmatpush1.bf16.msra.mxu0 %v11971_v62  ;;  %6577 = vmatprep.subr.bf16.mxu1 %v11976_v28  ;;  %v12051_v62 = vld [vmem:[#allocation14 + $0x14c] ss:$16 sps:$4 sm:$0xff]   ;;  %v12046_v28 = vld [vmem:[#allocation14 + $0x140] ss:$16 sps:$4 sm:$0xff]  }
 0x51e   : > { %6942 = vmatprep.subr.bf16.mxu0 %v11979_v33  ;;  %v12049_v33 = vld [vmem:[#allocation14 + $0x148] ss:$16 sps:$4 sm:$0xff]  }
 0x51f   : > { %6555 = vmatmul.mubr.bf16.gmra.mrb[12].mxu1 %v4520_v44  ;;  %6920 = vmatmul.mubr.bf16.gmra.mrb[44].mxu0 %v4520_v44  ;;  %v12055_v44 = vld [vmem:[#allocation14 + $0x168] ss:$16 sps:$4 sm:$0xff]  }
 0x520   : > { %6578 = vmatpush1.bf16.msra.mxu1 %v11974_v52  ;;  %6597 = vmatprep.mubr.bf16.mxu1 %v12799_v46  ;;  %v12052_v52 = vld [vmem:[#allocation14 + $0x160] ss:$16 sps:$4 sm:$0xff]  }
 0x521   : > { %6943 = vmatpush1.bf16.msra.mxu0 %v11977_v11  ;;  %6579 = vmatprep.subr.bf16.mxu1 %v11982_v15  ;;  %v12057_v11 = vld [vmem:[#allocation14 + $0x16c] ss:$16 sps:$4 sm:$0xff]   ;;  %v12060_v15 = vld [vmem:[#allocation14 + $0x184] ss:$16 sps:$4 sm:$0xff]  }
 0x522   : > { %6944 = vmatprep.subr.bf16.mxu0 %v11985_v0  ;;  %6962 = vmatprep.mubr.bf16.mxu0 %v12799_v46  ;;  %v12063_v0 = vld [vmem:[#allocation14 + $0x18c] ss:$16 sps:$4 sm:$0xff]  }
 0x524   : > { %6580 = vmatpush1.bf16.msra.mxu1 %v11980_v22  ;;  %v12058_v22 = vld [vmem:[#allocation14 + $0x180] ss:$16 sps:$4 sm:$0xff]  }
 0x525   : > { %6945 = vmatpush1.bf16.msra.mxu0 %v11983_v6  ;;  %8693 = vmatprep.subr.bf16.mxu1 %v11988_v10  ;;  %v12066_v6 = vld [vmem:[#allocation14 + $0x1a4] ss:$16 sps:$4 sm:$0xff]   ;;  %v12081_v10 = vld [vmem:[#allocation14 + $0x1ec] ss:$16 sps:$4 sm:$0xff]  }
 0x526   : > { %8775 = vmatprep.subr.bf16.mxu0 %v11991_v40  ;;  %v12076_v40 = vld [vmem:[#allocation14 + $0x1e0] ss:$16 sps:$4 sm:$0xff]  }
 0x527   : > { %6598 = vmatmul.mubr.bf16.vlgmr.msra.gmra.mrb[0].mxu1 %v4495_v42 }
 0x528   : > { %6963 = vmatmul.mubr.bf16.vlgmr.msra.gmra.mrb[32].mxu0 %v4495_v42  ;;  %6607 = vmatprep.mubr.bf16.mxu1 %v12799_v46  ;;  %v12067_v42 = vld [vmem:[#allocation14 + $0x1a8] ss:$16 sps:$4 sm:$0xff]  }
 0x529   : > { %6972 = vmatprep.mubr.bf16.mxu0 %v12799_v46  ;;  %8694 = vmatpush1.bf16.msra.mxu1 %v11986_v16  ;;  %v12079_v16 = vld [vmem:[#allocation14 + $0x1e8] ss:$16 sps:$4 sm:$0xff]  }
 0x52a   : > { %8776 = vmatpush1.bf16.msra.mxu0 %v11989_v43  ;;  %8695 = vmatprep.subr.bf16.mxu1 %v11994_v41  ;;  %v12084_v43 = vld [vmem:[#allocation14 + $0x204] ss:$16 sps:$4 sm:$0xff]   ;;  %v12087_v41 = vld [vmem:[#allocation14 + $0x20c] ss:$16 sps:$4 sm:$0xff]  }
 0x52b   : > { %8777 = vmatprep.subr.bf16.mxu0 %v11997_v13  ;;  %v4811_v13 = vld [vmem:[#allocation12] sm:$0xf] }
 0x52d   : > { %8696 = vmatpush1.bf16.msra.mxu1 %v11992_v1  ;;  %v14633_v1 = vsub.s32 2, %v14014_v24 }
 0x52e   : > { %8778 = vmatpush1.bf16.msra.mxu0 %v11995_v57  ;;  %v14636_v57 = vsub.s32 1, %v14014_v24 }
 0x52f   : > { %6608 = vmatmul.mubr.bf16.gmra.mrb[4].mxu1 %v4504_v3  ;;  %8779 = vmatprep.subr.bf16.mxu0 %v12003_v61  ;;  %v14642_v61 = vrot.slane %v4811_v13, %v14044_v48 }
 0x530   : > { %6973 = vmatmul.mubr.bf16.gmra.mrb[36].mxu0 %v4504_v3  ;;  %6617 = vmatprep.mubr.bf16.mxu1 %v12799_v46  ;;  %v12070_v3 = vld [vmem:[#allocation14 + $0x1c0] ss:$16 sps:$4 sm:$0xff]  }
 0x531   : > { %6982 = vmatprep.mubr.bf16.mxu0 %v12799_v46 }
 0x532   : > { %8780 = vmatpush1.bf16.msra.mxu0 %v12001_v31  ;;  %v14648_v31 = vrot.slane %v4811_v13, %v14636_v57 }
 0x533   : > { %8781 = vmatprep.subr.bf16.mxu0 %v12009_v25 }
 0x536   : > { %8782 = vmatpush1.bf16.msra.mxu0 %v12007_v47 }
 0x537   : > { %6618 = vmatmul.mubr.bf16.gmra.mrb[8].mxu1 %v14593_v19  ;;  %8783 = vmatprep.subr.bf16.mxu0 %v12015_v32 }
 0x538   : > { %6983 = vmatmul.mubr.bf16.gmra.mrb[40].mxu0 %v14593_v19  ;;  %6627 = vmatprep.mubr.bf16.mxu1 %v12799_v46  ;;  %v12000_v19 = vld [vmem:[#allocation14 + $0x44] ss:$16 sps:$4 sm:$0xff]  }
 0x539   : > { %6992 = vmatprep.mubr.bf16.mxu0 %v12799_v46  ;;  %8697 = vmatprep.subr.bf16.mxu1 %v12000_v19  ;;  %v12061_v46 = vld [vmem:[#allocation14 + $0x188] ss:$16 sps:$4 sm:$0xff]   ;;  %v14639_v19 = vsub.s32 3, %v14014_v24 }
 0x53a   : > { %8698 = vmatpush1.bf16.msra.mxu1 %v11998_v36  ;;  %8784 = vmatpush1.bf16.msra.mxu0 %v12013_v14  ;;  %v14645_v36 = vrot.slane %v4811_v13, %v14633_v1 }
 0x53b   : > { %8699 = vmatprep.subr.bf16.mxu1 %v12006_v23  ;;  %8785 = vmatprep.subr.bf16.mxu0 %v12021_v54  ;;  %v14651_v23 = vrot.slane %v4811_v13, %v14639_v19  ;;  %v14674_v13 = vsub.s32 4, %v14014_v24 }
 0x53e   : > { %8700 = vmatpush1.bf16.msra.mxu1 %v12004_v26  ;;  %8786 = vmatpush1.bf16.msra.mxu0 %v12019_v12 }
 0x53f   : > { %6628 = vmatmul.mubr.bf16.gmra.mrb[12].mxu1 %v4522_v21  ;;  %8701 = vmatprep.subr.bf16.mxu1 %v12012_v27 }
 0x540   : > { %6993 = vmatmul.mubr.bf16.gmra.mrb[44].mxu0 %v4522_v21  ;;  %8787 = vmatprep.subr.bf16.mxu0 %v12027_v39  ;;  %v12078_v21 = vld [vmem:[#allocation14 + $0x1e4] ss:$16 sps:$4 sm:$0xff]  }
 0x542   : > { %8702 = vmatpush1.bf16.msra.mxu1 %v12010_v56  ;;  %8788 = vmatpush1.bf16.msra.mxu0 %v12025_v5 }
 0x543   : > { %8703 = vmatprep.subr.bf16.mxu1 %v12018_v37  ;;  %8789 = vmatprep.subr.bf16.mxu0 %v12033_v29 }
 0x546   : > { %8704 = vmatpush1.bf16.msra.mxu1 %v12016_v2  ;;  %8790 = vmatpush1.bf16.msra.mxu0 %v12031_v35 }
 0x547   : > { %8705 = vmatprep.subr.bf16.mxu1 %v12024_v38  ;;  %8791 = vmatprep.subr.bf16.mxu0 %v12039_v53 }
 0x54a   : > { %8706 = vmatpush1.bf16.msra.mxu1 %v12022_v51  ;;  %8792 = vmatpush1.bf16.msra.mxu0 %v12037_v63 }
 0x54b   : > { %8707 = vmatprep.subr.bf16.mxu1 %v12030_v17  ;;  %8793 = vmatprep.subr.bf16.mxu0 %v12045_v58 }
 0x54e   : > { %8708 = vmatpush1.bf16.msra.mxu1 %v12028_v18  ;;  %8794 = vmatpush1.bf16.msra.mxu0 %v12043_v59 }
 0x54f   : > { %8709 = vmatprep.subr.bf16.mxu1 %v12036_v50  ;;  %8795 = vmatprep.subr.bf16.mxu0 %v12051_v62 }
 0x552   : > { %8710 = vmatpush1.bf16.msra.mxu1 %v12034_v49  ;;  %8796 = vmatpush1.bf16.msra.mxu0 %v12049_v33 }
 0x553   : > { %8711 = vmatprep.subr.bf16.mxu1 %v12042_v55  ;;  %8797 = vmatprep.subr.bf16.mxu0 %v12057_v11 }
 0x556   : > { %8712 = vmatpush1.bf16.msra.mxu1 %v12040_v45  ;;  %8798 = vmatpush1.bf16.msra.mxu0 %v12055_v44 }
 0x557   : > { %8713 = vmatprep.subr.bf16.mxu1 %v12048_v60  ;;  %8799 = vmatprep.subr.bf16.mxu0 %v12063_v0 }
 0x55a   : > { %8714 = vmatpush1.bf16.msra.mxu1 %v12046_v28  ;;  %8800 = vmatpush1.bf16.msra.mxu0 %v12061_v46 }
 0x55b   : > { %8715 = vmatprep.subr.bf16.mxu1 %v12054_v20  ;;  %8801 = vmatprep.subr.bf16.mxu0 %v12069_v7 }
 0x55e   : > { %8716 = vmatpush1.bf16.msra.mxu1 %v12052_v52  ;;  %8802 = vmatpush1.bf16.msra.mxu0 %v12067_v42 }
 0x55f   : > { %8717 = vmatprep.subr.bf16.mxu1 %v12060_v15  ;;  %8803 = vmatprep.subr.bf16.mxu0 %v12075_v8 }
 0x562   : > { %8718 = vmatpush1.bf16.msra.mxu1 %v12058_v22  ;;  %8804 = vmatpush1.bf16.msra.mxu0 %v12073_v9 }
 0x563   : > { %8719 = vmatprep.subr.bf16.mxu1 %v12066_v6  ;;  %8805 = vmatprep.subr.bf16.mxu0 %v12081_v10 }
 0x566   : > { %8720 = vmatpush1.bf16.msra.mxu1 %v12064_v34  ;;  %8806 = vmatpush1.bf16.msra.mxu0 %v12079_v16 }
 0x567   : > { %8721 = vmatprep.subr.bf16.mxu1 %v12072_v4  ;;  %8816 = vmatprep.subr.bf16.mxu0 %v12087_v41 }
 0x56a   : > { %8722 = vmatpush1.bf16.msra.mxu1 %v12070_v3 }
 0x56b   : > { %8723 = vmatprep.subr.bf16.mxu1 %v12078_v21 }
 0x56e   : > { %8724 = vmatpush1.bf16.msra.mxu1 %v12076_v40 }
 0x56f   : > { %8734 = vmatprep.subr.bf16.mxu1 %v12084_v43 }
 0x5fa   : > { %v6599_v25 = vpop.f32.mrb[0].mxu1 }
 0x5fb   : > { %v11214_v26 = vadd.f32 %v6599_v25, %v14642_v61  ;;  %v6964_v47 = vpop.f32.mrb[32].mxu0  ;;  %v6601_v27 = vpop.f32.mrb[1].mxu1  ;;  %v14677_v25 = vsub.s32 6, %v14014_v24 }
 0x5fc   : > { %v11230_v32 = vadd.f32 %v6964_v47, %v14645_v36  ;;  %v11215_v56 = vadd.f32 %v6601_v27, %v14648_v31  ;;  %v6966_v14 = vpop.f32.mrb[33].mxu0  ;;  %v6603_v37 = vpop.f32.mrb[2].mxu1 }
 0x5fd   : > { %v7003_v54 = vmax.f32 %v11214_v26, 0.0  ;;  %v11231_v2 = vadd.f32 %v6966_v14, %v14651_v23  ;;  %v11216_v12 = vadd.f32 %v6603_v37, %v14642_v61  ;;  %v6968_v38 = vpop.f32.mrb[34].mxu0  ;;  %v6605_v39 = vpop.f32.mrb[3].mxu1 }
 0x5fe   : > { %v7005_v51 = vmax.f32 %v11230_v32, 0.0  ;;  %v7004_v5 = vmax.f32 %v11215_v56, 0.0  ;;  %v11232_v17 = vadd.f32 %v6968_v38, %v14645_v36  ;;  %v11217_v29 = vadd.f32 %v6605_v39, %v14648_v31  ;;  %v6970_v18 = vpop.f32.mrb[35].mxu0 }
 0x5ff   : > { %v7006_v35 = vmax.f32 %v11231_v2, 0.0  ;;  %v7007_v50 = vmax.f32 %v11216_v12, 0.0  ;;  %v11233_v53 = vadd.f32 %v6970_v18, %v14651_v23 }
 0x600   : > { %v7067_v49 = vcombine.low %v7003_v54, %v7004_v5  ;;  %v7068_v63 = vcombine.high %v7003_v54, %v7004_v5  ;;  %v7009_v55 = vmax.f32 %v11232_v17, 0.0  ;;  %v7008_v58 = vmax.f32 %v11217_v29, 0.0 }
 0x601   : > { %v7069_v45 = vcombine.low %v7005_v51, %v7006_v35  ;;  %v7070_v59 = vcombine.high %v7005_v51, %v7006_v35  ;;  %v7010_v60 = vmax.f32 %v11233_v53, 0.0 }
 0x602   : > { %v7077_v62 = vrot.slane %v7067_v49, %v14024_v30  ;;  %v7084_v28 = vrot.slane %v7068_v63, %v14024_v30  ;;  %v7103_v33 = vcombine.low %v7007_v50, %v7008_v58  ;;  %v7104_v52 = vcombine.high %v7007_v50, %v7008_v58  ;;  %v6609_v20 = vpop.f32.mrb[4].mxu1 }
 0x603   : > { %v7091_v44 = vrot.slane %v7069_v45, %v14024_v30  ;;  %v7098_v11 = vrot.slane %v7070_v59, %v14024_v30  ;;  %v7105_v15 = vcombine.low %v7009_v55, %v7010_v60  ;;  %v7106_v0 = vcombine.high %v7009_v55, %v7010_v60  ;;  %v6974_v22 = vpop.f32.mrb[36].mxu0  ;;  %v6611_v46 = vpop.f32.mrb[5].mxu1 }
 0x604   : > { %v7113_v6 = vrot.slane %v7103_v33, %v14024_v30  ;;  %v7120_v7 = vrot.slane %v7104_v52, %v14024_v30  ;;  %v11218_v34 = vadd.f32 %v6609_v20, %v14642_v61  ;;  %v11234_v42 = vadd.f32 %v6974_v22, %v14645_v36  ;;  %v6976_v4 = vpop.f32.mrb[37].mxu0  ;;  %v6613_v8 = vpop.f32.mrb[6].mxu1 }
 0x605   : > { %v7099_v3 = vcombine.low %v7077_v62, %v7091_v44  ;;  %v7100_v9 = vcombine.high %v7077_v62, %v7091_v44  ;;  %v7101_v21 = vcombine.low %v7084_v28, %v7098_v11  ;;  %v7102_v10 = vcombine.high %v7084_v28, %v7098_v11  ;;  %v6978_v40 = vpop.f32.mrb[38].mxu0  ;;  %v14669_v16 = vpop.f32.mrb[7].mxu1 }
 0x606   : > { %v7127_v43 = vrot.slane %v7105_v15, %v14024_v30  ;;  %v7134_v41 = vrot.slane %v7106_v0, %v14024_v30  ;;  %v14679_v26 = vpop.f32.mrb[39].mxu0  ;;  %v7011_v39 = vmax.f32 %v11218_v34, 0.0  ;;  %v7013_v51 = vmax.f32 %v11234_v42, 0.0 }
 0x607   : > { %v10792_v47 = vrot.slane %v7099_v3, 9  ;;  %v10793_v27 = vrot.slane %v7100_v9, 9  ;;  %v10794_v32 = vrot.slane %v7101_v21, 9  ;;  %v10795_v56 = vrot.slane %v7102_v10, 9 }
 0x608   : > { %v7135_v14 = vcombine.low %v7113_v6, %v7127_v43  ;;  %v7136_v37 = vcombine.high %v7113_v6, %v7127_v43  ;;  %v7137_v54 = vcombine.low %v7120_v7, %v7134_v41  ;;  %v7138_v2 = vcombine.high %v7120_v7, %v7134_v41 }
 0x609   : > { %v7435_v12 = vmax.f32 %v7099_v3, %v10792_v47  ;;  %v7436_v38 = vmax.f32 %v7100_v9, %v10793_v27  ;;  %v7437_v35 = vmax.f32 %v7101_v21, %v10794_v32  ;;  %v7438_v50 = vmax.f32 %v7102_v10, %v10795_v56 }
 0x60a   : > { %v10808_v5 = vrot.slane %v7135_v14, 9  ;;  %v10809_v17 = vrot.slane %v7136_v37, 9  ;;  %v10810_v29 = vrot.slane %v7137_v54, 9  ;;  %v10811_v18 = vrot.slane %v7138_v2, 9  ;;  %v14681_v24 = vpop.f32.mrb[8].mxu1 }
 0x60b   : > { %v11219_v53 = vadd.f32 %v6611_v46, %v14648_v31  ;;  %v11235_v49 = vadd.f32 %v6976_v4, %v14651_v23  ;;  %v6984_v63 = vpop.f32.mrb[40].mxu0  ;;  %v14685_v55 = vpop.f32.mrb[9].mxu1  ;;  %v14692_v20 = vadd.f32 %v6613_v8, %v14642_v61  ;;  %v14695_v44 = vadd.f32 %v6978_v40, %v14645_v36 }
 0x60c   : > { %v7499_v58 = vmax.f32 %v7135_v14, %v10808_v5  ;;  %v7500_v45 = vmax.f32 %v7136_v37, %v10809_v17  ;;  %v7501_v59 = vmax.f32 %v7137_v54, %v10810_v29  ;;  %v7502_v60 = vmax.f32 %v7138_v2, %v10811_v18  ;;  %v14687_v62 = vpop.f32.mrb[41].mxu0  ;;  %v14689_v28 = vpop.f32.mrb[10].mxu1 }
 0x60d   : > { %v7012_v33 = vmax.f32 %v11219_v53, 0.0  ;;  %v7014_v52 = vmax.f32 %v11235_v49, 0.0  ;;  %v14697_v11 = vpop.f32.mrb[42].mxu0  ;;  %v14699_v15 = vpop.f32.mrb[11].mxu1  ;;  %v7015_v54 = vmax.f32 %v14692_v20, 0.0  ;;  %v7017_v2 = vmax.f32 %v14695_v44, 0.0 }
 0x60e   : > { %v7515_v0 = vmax.f32 %v7435_v12, %v7499_v58  ;;  %v7516_v22 = vmax.f32 %v7436_v38, %v7500_v45  ;;  %v14701_v46 = vmax.f32 %v7437_v35, %v7501_v59  ;;  %v14703_v6 = vmax.f32 %v7438_v50, %v7502_v60  ;;  %v14705_v7 = vpop.f32.mrb[43].mxu0 }
 0x60f   : > { %v7139_v34 = vcombine.low %v7011_v39, %v7012_v33  ;;  %v7140_v42 = vcombine.high %v7011_v39, %v7012_v33  ;;  %v7141_v4 = vcombine.low %v7013_v51, %v7014_v52  ;;  %v7142_v8 = vcombine.high %v7013_v51, %v7014_v52 }
 0x610   : > { %v7550_v3 = vrot.slane %v7515_v0, %v14044_v48  ;;  %v7554_v9 = vrot.slane %v7515_v0, %v14633_v1  ;;  %v7558_v21 = vrot.slane %v7515_v0, %v14674_v13  ;;  %v7562_v10 = vrot.slane %v7515_v0, %v14677_v25 }
 0x611   : > { %v7566_v40 = vrot.slane %v7516_v22, %v14044_v48  ;;  %v7570_v43 = vrot.slane %v7516_v22, %v14633_v1  ;;  %v7574_v41 = vrot.slane %v7516_v22, %v14674_v13  ;;  %v7578_v47 = vrot.slane %v7516_v22, %v14677_v25 }
 0x612   : > { %v7582_v27 = vrot.slane %v14701_v46, %v14044_v48  ;;  %v7590_v32 = vrot.slane %v14701_v46, %v14674_v13  ;;  %v14719_v56 = vpop.f32.mrb[12].mxu1  ;;  %v7598_v14 = vrot.slane %v14703_v6, %v14044_v48  ;;  %v7606_v37 = vrot.slane %v14703_v6, %v14674_v13 }
 0x613   : > { %v14727_v12 = vpop.f32.mrb[44].mxu0  ;;  %v14729_v38 = vpop.f32.mrb[13].mxu1  ;;  %v7803_v39 = vsel %vm4190_vm13, %v7566_v40, %v7550_v3  ;;  %v14733_v51 = vsel %vm4190_vm13, %v7570_v43, %v7554_v9  ;;  %v7817_v5 = vsel %vm4190_vm13, %v7574_v41, %v7558_v21  ;;  %v14737_v17 = vsel %vm4190_vm13, %v7578_v47, %v7562_v10 }
 0x614   : > { %v14739_v29 = vpop.f32.mrb[45].mxu0  ;;  %v14741_v18 = vpop.f32.mrb[14].mxu1  ;;  %v7804_v35 = vsel %vm4192_vm14, %v7582_v27, %v7803_v39  ;;  %v7818_v50 = vsel %vm4192_vm14, %v7590_v32, %v7817_v5  ;;  %v7149_v53 = vrot.slane %v7139_v34, %v14024_v30  ;;  %v7156_v49 = vrot.slane %v7140_v42, %v14024_v30 }
 0x615   : > { %v14747_v58 = vpop.f32.mrb[46].mxu0  ;;  %v14749_v45 = vpop.f32.mrb[15].mxu1  ;;  %v14752_v59 = vsel %vm15150_vm9, %v7598_v14, %v7804_v35  ;;  %v14755_v60 = vsel %vm15151_vm10, %v7606_v37, %v7818_v50  ;;  %v7163_v33 = vrot.slane %v7141_v4, %v14024_v30  ;;  %v7170_v52 = vrot.slane %v7142_v8, %v14024_v30 }
 0x616   : > { %v14759_v20 = vpop.f32.mrb[47].mxu0  ;;  %v11221_v44 = vadd.f32 %v14669_v16, %v14648_v31  ;;  %v11237_v0 = vadd.f32 %v14679_v26, %v14651_v23  ;;  %v11222_v22 = vadd.f32 %v14681_v24, %v14642_v61  ;;  %v11238_v34 = vadd.f32 %v6984_v63, %v14645_v36 }
 0x617   : > { %v7171_v42 = vcombine.low %v7149_v53, %v7163_v33  ;;  %v7172_v3 = vcombine.high %v7149_v53, %v7163_v33  ;;  %v7173_v9 = vcombine.low %v7156_v49, %v7170_v52  ;;  %v7174_v21 = vcombine.high %v7156_v49, %v7170_v52 }
 0x618   : > { %v7016_v4 = vmax.f32 %v11221_v44, 0.0  ;;  %v7018_v10 = vmax.f32 %v11237_v0, 0.0  ;;  %v7019_v37 = vmax.f32 %v11222_v22, 0.0  ;;  %v7021_v24 = vmax.f32 %v11238_v34, 0.0 }
 0x619   : > { %v10796_v8 = vrot.slane %v7171_v42, 9  ;;  %v10797_v40 = vrot.slane %v7172_v3, 9  ;;  %v10798_v43 = vrot.slane %v7173_v9, 9  ;;  %v10799_v41 = vrot.slane %v7174_v21, 9 }
 0x61a   : > { %v7175_v47 = vcombine.low %v7015_v54, %v7016_v4  ;;  %v7176_v16 = vcombine.high %v7015_v54, %v7016_v4  ;;  %v7177_v27 = vcombine.low %v7017_v2, %v7018_v10  ;;  %v7178_v32 = vcombine.high %v7017_v2, %v7018_v10 }
 0x61b   : > { %v7439_v26 = vmax.f32 %v7171_v42, %v10796_v8  ;;  %v7440_v14 = vmax.f32 %v7172_v3, %v10797_v40  ;;  %v7441_v50 = vmax.f32 %v7173_v9, %v10798_v43  ;;  %v7442_v53 = vmax.f32 %v7174_v21, %v10799_v41 }
 0x61c   : > { %v7185_v63 = vrot.slane %v7175_v47, %v14024_v30  ;;  %v7192_v39 = vrot.slane %v7176_v16, %v14024_v30  ;;  %v7199_v5 = vrot.slane %v7177_v27, %v14024_v30  ;;  %v7206_v35 = vrot.slane %v7178_v32, %v14024_v30 }
 0x61d   : > { %v11223_v49 = vadd.f32 %v14685_v55, %v14648_v31  ;;  %v11239_v54 = vadd.f32 %v14687_v62, %v14651_v23  ;;  %v11224_v34 = vadd.f32 %v14689_v28, %v14642_v61  ;;  %v11240_v42 = vadd.f32 %v14697_v11, %v14645_v36 }
 0x61e   : > { %v7207_v2 = vcombine.low %v7185_v63, %v7199_v5  ;;  %v7208_v33 = vcombine.high %v7185_v63, %v7199_v5  ;;  %v7209_v52 = vcombine.low %v7192_v39, %v7206_v35  ;;  %v7210_v44 = vcombine.high %v7192_v39, %v7206_v35 }
 0x61f   : > { %v7020_v0 = vmax.f32 %v11223_v49, 0.0  ;;  %v7022_v22 = vmax.f32 %v11239_v54, 0.0  ;;  %v7586_v54 = vrot.slane %v14701_v46, %v14633_v1 }
 0x620   : > { %v10812_v3 = vrot.slane %v7207_v2, 9  ;;  %v10813_v9 = vrot.slane %v7208_v33, 9  ;;  %v10814_v21 = vrot.slane %v7209_v52, 9  ;;  %v10815_v4 = vrot.slane %v7210_v44, 9 }
 0x621   : > { %v7211_v55 = vcombine.low %v7019_v37, %v7020_v0  ;;  %v7212_v10 = vcombine.high %v7019_v37, %v7020_v0  ;;  %v7213_v8 = vcombine.low %v7021_v24, %v7022_v22  ;;  %v7214_v62 = vcombine.high %v7021_v24, %v7022_v22 }
 0x622   : > { %v7503_v40 = vmax.f32 %v7207_v2, %v10812_v3  ;;  %v7504_v43 = vmax.f32 %v7208_v33, %v10813_v9  ;;  %v7505_v41 = vmax.f32 %v7209_v52, %v10814_v21  ;;  %v7506_v47 = vmax.f32 %v7210_v44, %v10815_v4 }
 0x623   : > { %v7221_v16 = vrot.slane %v7211_v55, %v14024_v30  ;;  %v7228_v27 = vrot.slane %v7212_v10, %v14024_v30  ;;  %v7235_v28 = vrot.slane %v7213_v8, %v14024_v30  ;;  %v7242_v11 = vrot.slane %v7214_v62, %v14024_v30 }
 0x624   : > { %v14784_v32 = vmax.f32 %v7439_v26, %v7503_v40  ;;  %v14786_v63 = vmax.f32 %v7440_v14, %v7504_v43  ;;  %v14788_v39 = vmax.f32 %v7441_v50, %v7505_v41  ;;  %v14790_v37 = vmax.f32 %v7442_v53, %v7506_v47 }
 0x625   : > { %v7243_v24 = vcombine.low %v7221_v16, %v7235_v28  ;;  %v7244_v5 = vcombine.high %v7221_v16, %v7235_v28  ;;  %v7245_v35 = vcombine.low %v7228_v27, %v7242_v11  ;;  %v7246_v49 = vcombine.high %v7228_v27, %v7242_v11 }
 0x626   : > { %v7594_v2 = vrot.slane %v14701_v46, %v14677_v25  ;;  %v7602_v26 = vrot.slane %v14703_v6, %v14633_v1  ;;  %v7614_v14 = vrot.slane %v14784_v32, %v14044_v48  ;;  %v7630_v53 = vrot.slane %v14786_v63, %v14044_v48 }
 0x627   : > { %v7023_v33 = vmax.f32 %v11224_v34, 0.0  ;;  %v7025_v52 = vmax.f32 %v11240_v42, 0.0  ;;  %v7618_v44 = vrot.slane %v14784_v32, %v14633_v1  ;;  %v7622_v0 = vrot.slane %v14784_v32, %v14674_v13 }
 0x628   : > { %v7634_v3 = vrot.slane %v14786_v63, %v14633_v1  ;;  %v7806_v9 = vsel %vm4196_vm1, %v7614_v14, %v14752_v59  ;;  %v10800_v21 = vrot.slane %v7243_v24, 9  ;;  %v10801_v4 = vrot.slane %v7244_v5, 9 }
 0x629   : > { %v10802_v55 = vrot.slane %v7245_v35, 9  ;;  %v14815_v34 = vsel %vm4198_vm2, %v7630_v53, %v7806_v9  ;;  %v10803_v42 = vrot.slane %v7246_v49, 9  ;;  %v11225_v10 = vadd.f32 %v14699_v15, %v14648_v31 }
 0x62a   : > { %v11241_v8 = vadd.f32 %v14705_v7, %v14651_v23  ;;  %v7443_v40 = vmax.f32 %v7243_v24, %v10800_v21  ;;  %v7444_v43 = vmax.f32 %v7244_v5, %v10801_v4  ;;  %v11226_v59 = vadd.f32 %v14719_v56, %v14642_v61 }
 0x62b   : > { %v7445_v41 = vmax.f32 %v7245_v35, %v10802_v55  ;;  %v7024_v47 = vmax.f32 %v11225_v10, 0.0  ;;  %v11242_v27 = vadd.f32 %v14727_v12, %v14645_v36  ;;  %v7446_v28 = vmax.f32 %v7246_v49, %v10803_v42 }
 0x62c   : > { %v7026_v16 = vmax.f32 %v11241_v8, 0.0  ;;  %v7027_v11 = vmax.f32 %v11226_v59, 0.0  ;;  %v11227_v15 = vadd.f32 %v14729_v38, %v14648_v31  ;;  %v11243_v7 = vadd.f32 %v14739_v29, %v14651_v23 }
 0x62d   : > { %v7247_v14 = vcombine.low %v7023_v33, %v7024_v47  ;;  %v7248_v24 = vcombine.high %v7023_v33, %v7024_v47  ;;  %v7029_v9 = vmax.f32 %v11242_v27, 0.0  ;;  %v14833_v21 = vadd.f32 %v14741_v18, %v14642_v61 }
 0x62e   : > { %v7249_v5 = vcombine.low %v7025_v52, %v7026_v16  ;;  %v7250_v53 = vcombine.high %v7025_v52, %v7026_v16  ;;  %v7028_v56 = vmax.f32 %v11227_v15, 0.0  ;;  %v7030_v35 = vmax.f32 %v11243_v7, 0.0 }
 0x62f   : > { %v7257_v12 = vrot.slane %v7247_v14, %v14024_v30  ;;  %v7264_v49 = vrot.slane %v7248_v24, %v14024_v30  ;;  %v11244_v22 = vadd.f32 %v14747_v58, %v14645_v36  ;;  %v11229_v62 = vadd.f32 %v14749_v45, %v14648_v31 }
 0x630   : > { %v7271_v38 = vrot.slane %v7249_v5, %v14024_v30  ;;  %v7278_v4 = vrot.slane %v7250_v53, %v14024_v30  ;;  %v7283_v29 = vcombine.low %v7027_v11, %v7028_v56  ;;  %v7284_v55 = vcombine.high %v7027_v11, %v7028_v56 }
 0x631   : > { %v7285_v33 = vcombine.low %v7029_v9, %v7030_v35  ;;  %v7286_v42 = vcombine.high %v7029_v9, %v7030_v35  ;;  %v7666_v36 = vrot.slane %v14790_v37, %v14633_v1  ;;  %v7811_v31 = vsel %vm4192_vm14, %v7586_v54, %v14733_v51 }
 0x632   : > { %v7279_v52 = vcombine.low %v7257_v12, %v7271_v38  ;;  %v7280_v10 = vcombine.high %v7257_v12, %v7271_v38  ;;  %v7281_v8 = vcombine.low %v7264_v49, %v7278_v4  ;;  %v7282_v59 = vcombine.high %v7264_v49, %v7278_v4 }
 0x633   : > { %v7293_v47 = vrot.slane %v7283_v29, %v14024_v30  ;;  %v7300_v61 = vrot.slane %v7284_v55, %v14024_v30  ;;  %v7307_v18 = vrot.slane %v7285_v33, %v14024_v30  ;;  %v7314_v16 = vrot.slane %v7286_v42, %v14024_v30 }
 0x634   : > { %v10816_v27 = vrot.slane %v7279_v52, 9  ;;  %v10817_v15 = vrot.slane %v7280_v10, 9  ;;  %v10818_v7 = vrot.slane %v7281_v8, 9  ;;  %v10819_v14 = vrot.slane %v7282_v59, 9 }
 0x635   : > { %v14843_v24 = vcombine.low %v7293_v47, %v7307_v18  ;;  %v14845_v11 = vcombine.high %v7293_v47, %v7307_v18  ;;  %v14847_v5 = vcombine.low %v7300_v61, %v7314_v16  ;;  %v14849_v53 = vcombine.high %v7300_v61, %v7314_v16 }
 0x636   : > { %v7507_v9 = vmax.f32 %v7279_v52, %v10816_v27  ;;  %v7508_v56 = vmax.f32 %v7280_v10, %v10817_v15  ;;  %v7509_v35 = vmax.f32 %v7281_v8, %v10818_v7  ;;  %v7510_v12 = vmax.f32 %v7282_v59, %v10819_v14 }
 0x637   : > { %v7646_v38 = vrot.slane %v14788_v39, %v14044_v48  ;;  %v7662_v29 = vrot.slane %v14790_v37, %v14044_v48  ;;  %v10804_v10 = vrot.slane %v14843_v24, 9  ;;  %v10805_v8 = vrot.slane %v14845_v11, 9 }
 0x638   : > { %v7523_v55 = vmax.f32 %v7443_v40, %v7507_v9  ;;  %v7524_v33 = vmax.f32 %v7444_v43, %v7508_v56  ;;  %v7525_v42 = vmax.f32 %v7445_v41, %v7509_v35  ;;  %v14859_v47 = vmax.f32 %v7446_v28, %v7510_v12 }
 0x639   : > { %v7031_v59 = vmax.f32 %v14833_v21, 0.0  ;;  %v10806_v14 = vrot.slane %v14847_v5, 9 }
 0x63a   : > { %v7678_v61 = vrot.slane %v7523_v55, %v14044_v48  ;;  %v7682_v18 = vrot.slane %v7523_v55, %v14633_v1  ;;  %v7686_v16 = vrot.slane %v7523_v55, %v14674_v13  ;;  %v7690_v40 = vrot.slane %v7523_v55, %v14677_v25 }
 0x63b   : > { %v7694_v43 = vrot.slane %v7524_v33, %v14044_v48  ;;  %v7698_v41 = vrot.slane %v7524_v33, %v14633_v1  ;;  %v7702_v28 = vrot.slane %v7524_v33, %v14674_v13  ;;  %v7706_v27 = vrot.slane %v7524_v33, %v14677_v25 }
 0x63c   : > { %v7710_v15 = vrot.slane %v7525_v42, %v14044_v48  ;;  %v7714_v21 = vrot.slane %v7525_v42, %v14633_v1  ;;  %v7718_v7 = vrot.slane %v7525_v42, %v14674_v13  ;;  %v7722_v9 = vrot.slane %v7525_v42, %v14677_v25 }
 0x63d   : > { %v7726_v56 = vrot.slane %v14859_v47, %v14044_v48  ;;  %v7730_v35 = vrot.slane %v14859_v47, %v14633_v1  ;;  %v7734_v12 = vrot.slane %v14859_v47, %v14674_v13  ;;  %v7831_v55 = vsel %vm4190_vm13, %v7694_v43, %v7678_v61 }
 0x63e   : > { %v7838_v33 = vsel %vm4190_vm13, %v7698_v41, %v7682_v18  ;;  %v7845_v52 = vsel %vm4190_vm13, %v7702_v28, %v7686_v16  ;;  %v7852_v49 = vsel %vm4190_vm13, %v7706_v27, %v7690_v40  ;;  %v7832_v4 = vsel %vm4192_vm14, %v7710_v15, %v7831_v55  ;;  %vm15154_vm13 = vmmov %vm15144_vm0 }
 0x63f   : > { %v7846_v42 = vsel %vm4192_vm14, %v7718_v7, %v7845_v52  ;;  %v14896_v50 = vsel %vm15152_vm11, %v7726_v56, %v7832_v4  ;;  %v11245_v18 = vadd.f32 %v14759_v20, %v14651_v23  ;;  %v7650_v16 = vrot.slane %v14788_v39, %v14633_v1 }
 0x640   : > { %v14899_v61 = vsel %vm15153_vm12, %v7734_v12, %v7846_v42  ;;  %v7033_v40 = vmax.f32 %v11244_v22, 0.0  ;;  %v7032_v52 = vmax.f32 %v11229_v62, 0.0  ;;  %v7812_v23 = vsel %vm15154_vm13, %v7602_v26, %v7811_v31 }
 0x641   : > { %v7034_v58 = vmax.f32 %v11245_v18, 0.0  ;;  %v7839_v45 = vsel %vm4192_vm14, %v7714_v21, %v7838_v33  ;;  %v7808_v20 = vsel %vm4200_vm3, %v7646_v38, %v14815_v34  ;;  %v7813_v4 = vsel %vm4196_vm1, %v7618_v44, %v7812_v23 }
 0x642   : > { %v7319_v22 = vcombine.low %v7031_v59, %v7032_v52  ;;  %v7320_v62 = vcombine.high %v7031_v59, %v7032_v52  ;;  %v7840_v51 = vsel %vm15144_vm0, %v7730_v35, %v7839_v45  ;;  %v7814_v26 = vsel %vm4198_vm2, %v7634_v3, %v7813_v4 }
 0x643   : > { %v7321_v54 = vcombine.low %v7033_v40, %v7034_v58  ;;  %v7322_v43 = vcombine.high %v7033_v40, %v7034_v58  ;;  %v14929_v41 = vsel %vm4202_vm15, %v7662_v29, %v7808_v20  ;;  %v10807_v34 = vrot.slane %v14849_v53, 9 }
 0x644   : > { %v7329_v38 = vrot.slane %v7319_v22, %v14024_v30  ;;  %v7336_v59 = vrot.slane %v7320_v62, %v14024_v30  ;;  %v7815_v44 = vsel %vm4200_vm3, %v7650_v16, %v7814_v26  ;;  %v7447_v28 = vmax.f32 %v14843_v24, %v10804_v10 }
 0x645   : > { %v7343_v27 = vrot.slane %v7321_v54, %v14024_v30  ;;  %v7350_v15 = vrot.slane %v7322_v43, %v14024_v30  ;;  %v14939_v21 = vsel %vm4202_vm15, %v7666_v36, %v7815_v44  ;;  %v7738_v3 = vrot.slane %v14859_v47, %v14677_v25 }
 0x646   : > { %v7825_v29 = vsel %vm4192_vm14, %v7594_v2, %v14737_v17  ;;  %v7853_v7 = vsel %vm4192_vm14, %v7722_v9, %v7852_v49  ;;  %v7820_v30 = vsel %vm4196_vm1, %v7622_v0, %v14755_v60  ;;  %v7448_v47 = vmax.f32 %v14845_v11, %v10805_v8 }
 0x647   : > { %v7351_v24 = vcombine.low %v7329_v38, %v7343_v27  ;;  %v7352_v10 = vcombine.high %v7329_v38, %v7343_v27  ;;  %v7353_v56 = vcombine.low %v7336_v59, %v7350_v15  ;;  %v7354_v35 = vcombine.high %v7336_v59, %v7350_v15 }
 0x648   : > { %v15155_v12 = vrot.slane %v14703_v6, %v14677_v25  ;;  %v7854_v17 = vsel %vm15157_vm5, %v7738_v3, %v7853_v7  ;;  %v15158_v2 = vrot.slane %v14786_v63, %v14674_v13  ;;  %v7449_v33 = vmax.f32 %v14847_v5, %v10806_v14 }
 0x649   : > { %v10820_v9 = vrot.slane %v7351_v24, 9  ;;  %v10821_v60 = vrot.slane %v7352_v10, 9  ;;  %v10822_v0 = vrot.slane %v7353_v56, 9  ;;  %v10823_v55 = vrot.slane %v7354_v35, 9 }
 0x64a   : > { %v7826_v46 = vsel %vm15156_vm4, %v15155_v12, %v7825_v29  ;;  %v7821_v49 = vsel %vm4198_vm2, %v15158_v2, %v7820_v30  ;;  %v7450_v11 = vmax.f32 %v14849_v53, %v10807_v34  ;;  %v15159_v6 = vrot.slane %v14784_v32, %v14677_v25 }
 0x64b   : > { %v15160_v42 = vrot.slane %v14788_v39, %v14674_v13  ;;  %v7511_v16 = vmax.f32 %v7351_v24, %v10820_v9  ;;  %v7512_v40 = vmax.f32 %v7352_v10, %v10821_v60  ;;  %v7513_v52 = vmax.f32 %v7353_v56, %v10822_v0 }
 0x64c   : > { %v7827_v8 = vsel %vm4196_vm1, %v15159_v6, %v7826_v46  ;;  %v7514_v36 = vmax.f32 %v7354_v35, %v10823_v55  ;;  %v7658_v31 = vrot.slane %v14788_v39, %v14677_v25  ;;  %v15161_v5 = vrot.slane %v14786_v63, %v14677_v25 }
 0x64d   : > { %v7822_v18 = vsel %vm4200_vm3, %v15160_v42, %v7821_v49  ;;  %v15162_v32 = vrot.slane %v14790_v37, %v14674_v13  ;;  %v7527_v58 = vmax.f32 %v7447_v28, %v7511_v16  ;;  %v7528_v23 = vmax.f32 %v7448_v47, %v7512_v40 }
 0x64e   : > { %v7828_v53 = vsel %vm4198_vm2, %v15161_v5, %v7827_v8  ;;  %v7529_v45 = vmax.f32 %v7449_v33, %v7513_v52  ;;  %v7530_v20 = vmax.f32 %v7450_v11, %v7514_v36  ;;  %v7674_v22 = vrot.slane %v14790_v37, %v14677_v25 }
 0x64f   : > { %v7823_v14 = vsel %vm4202_vm15, %v15162_v32, %v7822_v18  ;;  %v7829_v62 = vsel %vm4200_vm3, %v7658_v31, %v7828_v53  ;;  %v7742_v39 = vrot.slane %v7527_v58, %v14044_v48  ;;  %v7746_v63 = vrot.slane %v7527_v58, %v14633_v1 }
 0x650   : > { %v7750_v4 = vrot.slane %v7527_v58, %v14674_v13  ;;  %v7754_v54 = vrot.slane %v7527_v58, %v14677_v25  ;;  %v7758_v43 = vrot.slane %v7528_v23, %v14044_v48  ;;  %v7762_v26 = vrot.slane %v7528_v23, %v14633_v1 }
 0x651   : > { %v7766_v34 = vrot.slane %v7528_v23, %v14674_v13  ;;  %v7770_v38 = vrot.slane %v7528_v23, %v14677_v25  ;;  %v7774_v37 = vrot.slane %v7529_v45, %v14044_v48  ;;  %v7782_v59 = vrot.slane %v7529_v45, %v14674_v13 }
 0x652   : > { %v7790_v44 = vrot.slane %v7530_v20, %v14044_v48  ;;  %v7798_v28 = vrot.slane %v7530_v20, %v14674_v13  ;;  %v7834_v27 = vsel %vm4196_vm1, %v7742_v39, %v14896_v50  ;;  %v7778_v15 = vrot.slane %v7529_v45, %v14633_v1 }
 0x653   : > { %v7794_v3 = vrot.slane %v7530_v20, %v14633_v1  ;;  %v7841_v29 = vsel %vm4196_vm1, %v7746_v63, %v7840_v51  ;;  %v7835_v7 = vsel %vm4198_vm2, %v7758_v43, %v7834_v27  ;;  %v7786_v24 = vrot.slane %v7529_v45, %v14677_v25  ;;  %v12105_v27 = vld [vmem:[#allocation14 + $0x26c] ss:$16 sps:$4 sm:$0xff]  }
 0x654   : > { %v7842_v30 = vsel %vm4198_vm2, %v7762_v26, %v7841_v29  ;;  %v7802_v10 = vrot.slane %v7530_v20, %v14677_v25  ;;  %v7836_v13 = vsel %vm4200_vm3, %v7774_v37, %v7835_v7  ;;  %v7830_v50 = vsel %vm4202_vm15, %v7674_v22, %v7829_v62  ;;  %v12082_v22 = vld [vmem:[#allocation14 + $0x200] ss:$16 sps:$4 sm:$0xff]   ;;  %v12085_v62 = vld [vmem:[#allocation14 + $0x208] ss:$16 sps:$4 sm:$0xff]   ;;  %v12099_v37 = vld [vmem:[#allocation14 + $0x24c] ss:$16 sps:$4 sm:$0xff]  }
 0x655   : > { %v7843_v56 = vsel %vm4200_vm3, %v7778_v15, %v7842_v30  ;;  %v7855_v35 = vsel %vm4196_vm1, %v7754_v54, %v7854_v17  ;;  %v7837_v51 = vsel %vm4202_vm15, %v7790_v44, %v7836_v13  ;;  %v7848_v46 = vsel %vm4196_vm1, %v7750_v4, %v14899_v61  ;;  %v12090_v4 = vld [vmem:[#allocation14 + $0x224] ss:$16 sps:$4 sm:$0xff]   ;;  %v12093_v54 = vld [vmem:[#allocation14 + $0x22c] ss:$16 sps:$4 sm:$0xff]   ;;  %v12088_v26 = vld [vmem:[#allocation14 + $0x220] ss:$16 sps:$4 sm:$0xff]  }
 0x656   : > { %v7844_v47 = vsel %vm4202_vm15, %v7794_v3, %v7843_v56  ;;  %v7856_v12 = vsel %vm4198_vm2, %v7770_v38, %v7855_v35  ;;  %v7867_v25 = vadd.f32 %v7837_v51, %v14929_v41  ;;  %v7849_v9 = vsel %vm4198_vm2, %v7766_v34, %v7848_v46  ;;  %v12091_v34 = vld [vmem:[#allocation14 + $0x228] ss:$16 sps:$4 sm:$0xff]   ;;  %v12096_v38 = vld [vmem:[#allocation14 + $0x244] ss:$16 sps:$4 sm:$0xff]   ;;  %v12100_v15 = vld [vmem:[#allocation14 + $0x260] ss:$16 sps:$4 sm:$0xff]  }
 0x657   : > { %v7874_v2 = vadd.f32 %v7844_v47, %v14939_v21  ;;  %v7857_v49 = vsel %vm4200_vm3, %v7786_v24, %v7856_v12  ;;  %v7850_v17 = vsel %vm4200_vm3, %v7782_v59, %v7849_v9  ;;  %v12094_v59 = vld [vmem:[#allocation14 + $0x240] ss:$16 sps:$4 sm:$0xff]   ;;  %v12097_v44 = vld [vmem:[#allocation14 + $0x248] ss:$16 sps:$4 sm:$0xff]   ;;  %v12108_v29 = vld [vmem:[#allocation14 + $0x284] ss:$16 sps:$4 sm:$0xff]  }
 0x658   : > { %v7858_v60 = vsel %vm4202_vm15, %v7802_v10, %v7857_v49  ;;  %v7868_v55 = vrot.slane %v7867_v25, 4  ;;  %v7851_v11 = vsel %vm4202_vm15, %v7798_v28, %v7850_v17  ;;  %v12102_v28 = vld [vmem:[#allocation14 + $0x264] ss:$16 sps:$4 sm:$0xff]   ;;  %v12103_v3 = vld [vmem:[#allocation14 + $0x268] ss:$16 sps:$4 sm:$0xff]  }
 0x659   : > { %v7875_v0 = vrot.slane %v7874_v2, 4  ;;  %v7888_v33 = vadd.f32 %v7858_v60, %v7830_v50  ;;  %v15024_v6 = vadd.f32 %v7851_v11, %v7823_v14  ;;  %v12111_v7 = vld [vmem:[#allocation14 + $0x28c] ss:$16 sps:$4 sm:$0xff]   ;;  %v12106_v30 = vld [vmem:[#allocation14 + $0x280] ss:$16 sps:$4 sm:$0xff]  }
 0x65a   : > { %v7869_v8 = vadd.f32 %v7868_v55, %v7867_v25  ;;  %v12109_v24 = vld [vmem:[#allocation14 + $0x288] ss:$16 sps:$4 sm:$0xff]   ;;  %v12114_v10 = vld [vmem:[#allocation14 + $0x2a4] ss:$16 sps:$4 sm:$0xff]   ;;  %v12117_v56 = vld [vmem:[#allocation14 + $0x2ac] ss:$16 sps:$4 sm:$0xff]  }
 0x65b   : > { %v7876_v61 = vadd.f32 %v7875_v0, %v7874_v2  ;;  %v7889_v21 = vrot.slane %v7888_v33, 4  ;;  %v12112_v13 = vld [vmem:[#allocation14 + $0x2a0] ss:$16 sps:$4 sm:$0xff]   ;;  %v12115_v50 = vld [vmem:[#allocation14 + $0x2a8] ss:$16 sps:$4 sm:$0xff]  }
 0x65c   : > { %v7870_v41 = vrot.slane %v7869_v8, 2  ;;  %v12120_v35 = vld [vmem:[#allocation14 + $0x2c4] ss:$16 sps:$4 sm:$0xff]   ;;  %v12123_v47 = vld [vmem:[#allocation14 + $0x2cc] ss:$16 sps:$4 sm:$0xff]  }
 0x65d   : > { %v7877_v42 = vrot.slane %v7876_v61, 2  ;;  %v7890_v18 = vadd.f32 %v7889_v21, %v7888_v33  ;;  %v12118_v51 = vld [vmem:[#allocation14 + $0x2c0] ss:$16 sps:$4 sm:$0xff]   ;;  %v12121_v12 = vld [vmem:[#allocation14 + $0x2c8] ss:$16 sps:$4 sm:$0xff]  }
 0x65e   : > { %v7871_v40 = vadd.f32 %v7870_v41, %v7869_v8  ;;  %v12126_v46 = vld [vmem:[#allocation14 + $0x2e4] ss:$16 sps:$4 sm:$0xff]   ;;  %v12129_v2 = vld [vmem:[#allocation14 + $0x2ec] ss:$16 sps:$4 sm:$0xff]   ;;  %v12124_v25 = vld [vmem:[#allocation14 + $0x2e0] ss:$16 sps:$4 sm:$0xff]  }
 0x65f   : > { %v7878_v16 = vadd.f32 %v7877_v42, %v7876_v61  ;;  %v7891_v52 = vrot.slane %v7890_v18, 2  ;;  %v12127_v49 = vld [vmem:[#allocation14 + $0x2e8] ss:$16 sps:$4 sm:$0xff]   ;;  %v12132_v9 = vld [vmem:[#allocation14 + $0x304] ss:$16 sps:$4 sm:$0xff]   ;;  %v7882_v42 = vrot.slane %v15024_v6, 4 }
 0x660   : > { %v7872_v31 = vrot.slane %v7871_v40, 1  ;;  %v12135_v60 = vld [vmem:[#allocation14 + $0x30c] ss:$16 sps:$4 sm:$0xff]   ;;  %v12130_v17 = vld [vmem:[#allocation14 + $0x300] ss:$16 sps:$4 sm:$0xff]  }
 0x661   : > { %v7879_v36 = vrot.slane %v7878_v16, 1  ;;  %v7892_v5 = vadd.f32 %v7891_v52, %v7890_v18  ;;  %v12133_v0 = vld [vmem:[#allocation14 + $0x308] ss:$16 sps:$4 sm:$0xff]   ;;  %v12138_v55 = vld [vmem:[#allocation14 + $0x324] ss:$16 sps:$4 sm:$0xff]   ;;  %v7883_v52 = vadd.f32 %v7882_v42, %v15024_v6 }
 0x662   : > { %v7873_v32 = vadd.f32 %v7872_v31, %v7871_v40  ;;  %v12141_v33 = vld [vmem:[#allocation14 + $0x32c] ss:$16 sps:$4 sm:$0xff]   ;;  %v12136_v11 = vld [vmem:[#allocation14 + $0x320] ss:$16 sps:$4 sm:$0xff]   ;;  %v12139_v61 = vld [vmem:[#allocation14 + $0x328] ss:$16 sps:$4 sm:$0xff]  }
 0x663   : > { %v7880_v53 = vadd.f32 %v7879_v36, %v7878_v16  ;;  %v7893_v58 = vrot.slane %v7892_v5, 1  ;;  %v12144_v8 = vld [vmem:[#allocation14 + $0x344] ss:$16 sps:$4 sm:$0xff]   ;;  %v12147_v21 = vld [vmem:[#allocation14 + $0x34c] ss:$16 sps:$4 sm:$0xff]  }
 0x664   : > { %v7895_v45 = vmul.f32 0.0625, %v7873_v32  ;;  %v12142_v41 = vld [vmem:[#allocation14 + $0x340] ss:$16 sps:$4 sm:$0xff]   ;;  %v12145_v18 = vld [vmem:[#allocation14 + $0x348] ss:$16 sps:$4 sm:$0xff]   ;;  %v7884_v32 = vrot.slane %v7883_v52, 2 }
 0x665   : > { %v7896_v23 = vmul.f32 0.0625, %v7880_v53  ;;  %v7894_v20 = vadd.f32 %v7893_v58, %v7892_v5  ;;  %v12150_v16 = vld [vmem:[#allocation14 + $0x364] ss:$16 sps:$4 sm:$0xff]   ;;  %v12153_v40 = vld [vmem:[#allocation14 + $0x36c] ss:$16 sps:$4 sm:$0xff]  }
 0x666   : > { %v7899_v39 = vpack.c.bf16 %v7895_v45, %v7895_v45  ;;  %v12148_v36 = vld [vmem:[#allocation14 + $0x360] ss:$16 sps:$4 sm:$0xff]   ;;  %v12151_v31 = vld [vmem:[#allocation14 + $0x368] ss:$16 sps:$4 sm:$0xff]   ;;  %v12156_v5 = vld [vmem:[#allocation14 + $0x384] ss:$16 sps:$4 sm:$0xff]  }
 0x667   : > { %v7900_v14 = vpack.c.bf16 %v7896_v23, %v7896_v23  ;;  %v7898_v63 = vmul.f32 0.0625, %v7894_v20  ;;  %v12159_v53 = vld [vmem:[#allocation14 + $0x38c] ss:$16 sps:$4 sm:$0xff]   ;;  %v12154_v58 = vld [vmem:[#allocation14 + $0x380] ss:$16 sps:$4 sm:$0xff]  }
 0x668   : > { %v12157_v23 = vld [vmem:[#allocation14 + $0x388] ss:$16 sps:$4 sm:$0xff]   ;;  %v12162_v45 = vld [vmem:[#allocation14 + $0x3a4] ss:$16 sps:$4 sm:$0xff]   ;;  %v12165_v20 = vld [vmem:[#allocation14 + $0x3ac] ss:$16 sps:$4 sm:$0xff]  }
 0x669   : > { %8725 = vmatprep.mubr.bf16.mxu1 %v7900_v14  ;;  %8807 = vmatprep.mubr.bf16.mxu0 %v7900_v14  ;;  %v7902_v43 = vpack.c.bf16 %v7898_v63, %v7898_v63  ;;  %v7885_v14 = vadd.f32 %v7884_v32, %v7883_v52  ;;  %v12160_v6 = vld [vmem:[#allocation14 + $0x3a0] ss:$16 sps:$4 sm:$0xff]   ;;  %v12220_v42 = vld [vmem:[#allocation17 + $0xe0] ss:$16 sps:$4 sm:$0xff]   ;;  %v12229_v52 = vld [vmem:[#allocation17 + $0x108] ss:$16 sps:$4 sm:$0xff]  }
 0x66a   : > { %8726 = vmatmul.mubr.bf16.vlgmr.msra.gmra.mrb[16].mxu1 %v7899_v39  ;;  %8808 = vmatmul.mubr.bf16.vlgmr.msra.gmra.mrb[48].mxu0 %v7899_v39  ;;  %v12171_v39 = vld [vmem:[#allocation14 + $0x3cc] ss:$16 sps:$4 sm:$0xff]   ;;  %v12240_v32 = vld [vmem:[#allocation17 + $0x144] ss:$16 sps:$4 sm:$0xff]  }
 0x66b   : > { %8735 = vmatpush1.bf16.msra.mxu1 %v12082_v22  ;;  %8817 = vmatpush1.bf16.msra.mxu0 %v12085_v62  ;;  %v12163_v22 = vld [vmem:[#allocation14 + $0x3a8] ss:$16 sps:$4 sm:$0xff]   ;;  %v12168_v62 = vld [vmem:[#allocation14 + $0x3c4] ss:$16 sps:$4 sm:$0xff]   ;;  %v7886_v63 = vrot.slane %v7885_v14, 1 }
 0x66c   : > { %8766 = vmatprep.mubr.bf16.mxu1 %v7902_v43  ;;  %8848 = vmatprep.mubr.bf16.mxu0 %v7902_v43  ;;  %v12174_v43 = vld [vmem:[#allocation14 + $0x3e4] ss:$16 sps:$4 sm:$0xff]  }
 0x66d   : > { %8736 = vmatprep.subr.bf16.mxu1 %v12090_v4  ;;  %8818 = vmatprep.subr.bf16.mxu0 %v12093_v54  ;;  %v12166_v4 = vld [vmem:[#allocation14 + $0x3c0] ss:$16 sps:$4 sm:$0xff]   ;;  %v12169_v54 = vld [vmem:[#allocation14 + $0x3c8] ss:$16 sps:$4 sm:$0xff]  }
 0x66f   : > { %8737 = vmatpush1.bf16.msra.mxu1 %v12088_v26  ;;  %8819 = vmatpush1.bf16.msra.mxu0 %v12091_v34  ;;  %v12177_v26 = vld [vmem:[#allocation14 + $0x3ec] ss:$16 sps:$4 sm:$0xff]   ;;  %v7887_v34 = vadd.f32 %v7886_v63, %v7885_v14  ;;  %v12249_v14 = vld [vmem:[#allocation17 + $0x16c] ss:$16 sps:$4 sm:$0xff]   ;;  %v12250_v63 = vld [vmem:[#allocation17 + $0x180] ss:$16 sps:$4 sm:$0xff]  }
 0x670   : > { %8738 = vmatprep.subr.bf16.mxu1 %v12096_v38  ;;  %8820 = vmatprep.subr.bf16.mxu0 %v12099_v37  ;;  %v12172_v38 = vld [vmem:[#allocation14 + $0x3e0] ss:$16 sps:$4 sm:$0xff]   ;;  %v12175_v37 = vld [vmem:[#allocation14 + $0x3e8] ss:$16 sps:$4 sm:$0xff]  }
 0x673   : > { %8739 = vmatpush1.bf16.msra.mxu1 %v12094_v59  ;;  %8821 = vmatpush1.bf16.msra.mxu0 %v12097_v44  ;;  %v7897_v59 = vmul.f32 0.0625, %v7887_v34  ;;  %v12180_v44 = vld [vmem:[#allocation17 + $0x4] ss:$16 sps:$4 sm:$0xff]   ;;  %v12259_v34 = vld [vmem:[#allocation17 + $0x1a8] ss:$16 sps:$4 sm:$0xff]  }
 0x674   : > { %8740 = vmatprep.subr.bf16.mxu1 %v12102_v28  ;;  %8822 = vmatprep.subr.bf16.mxu0 %v12105_v27  ;;  %v12183_v28 = vld [vmem:[#allocation17 + $0xc] ss:$16 sps:$4 sm:$0xff]   ;;  %v12178_v27 = vld [vmem:[#allocation17] ss:$16 sps:$4 sm:$0xff]  }
 0x677   : > { %8741 = vmatpush1.bf16.msra.mxu1 %v12100_v15  ;;  %8823 = vmatpush1.bf16.msra.mxu0 %v12103_v3  ;;  %v12181_v15 = vld [vmem:[#allocation17 + $0x8] ss:$16 sps:$4 sm:$0xff]   ;;  %v7901_v3 = vpack.c.bf16 %v7897_v59, %v7897_v59 }
 0x678   : > { %8742 = vmatprep.subr.bf16.mxu1 %v12108_v29  ;;  %8824 = vmatprep.subr.bf16.mxu0 %v12111_v7  ;;  %v12186_v29 = vld [vmem:[#allocation17 + $0x24] ss:$16 sps:$4 sm:$0xff]   ;;  %v12189_v7 = vld [vmem:[#allocation17 + $0x2c] ss:$16 sps:$4 sm:$0xff]   ;;  %v12265_v59 = vld [vmem:[#allocation17 + $0x1c8] ss:$16 sps:$4 sm:$0xff]  }
 0x67b   : > { %8743 = vmatpush1.bf16.msra.mxu1 %v12106_v30  ;;  %8825 = vmatpush1.bf16.msra.mxu0 %v12109_v24  ;;  %v12184_v30 = vld [vmem:[#allocation17 + $0x20] ss:$16 sps:$4 sm:$0xff]   ;;  %v12187_v24 = vld [vmem:[#allocation17 + $0x28] ss:$16 sps:$4 sm:$0xff]  }
 0x67c   : > { %8744 = vmatprep.subr.bf16.mxu1 %v12114_v10  ;;  %8826 = vmatprep.subr.bf16.mxu0 %v12117_v56  ;;  %v12192_v10 = vld [vmem:[#allocation17 + $0x44] ss:$16 sps:$4 sm:$0xff]   ;;  %v12195_v56 = vld [vmem:[#allocation17 + $0x4c] ss:$16 sps:$4 sm:$0xff]  }
 0x67f   : > { %8745 = vmatpush1.bf16.msra.mxu1 %v12112_v13  ;;  %8827 = vmatpush1.bf16.msra.mxu0 %v12115_v50  ;;  %v12190_v13 = vld [vmem:[#allocation17 + $0x40] ss:$16 sps:$4 sm:$0xff]   ;;  %v12193_v50 = vld [vmem:[#allocation17 + $0x48] ss:$16 sps:$4 sm:$0xff]  }
 0x680   : > { %8746 = vmatprep.subr.bf16.mxu1 %v12120_v35  ;;  %8828 = vmatprep.subr.bf16.mxu0 %v12123_v47  ;;  %v12198_v35 = vld [vmem:[#allocation17 + $0x64] ss:$16 sps:$4 sm:$0xff]   ;;  %v12201_v47 = vld [vmem:[#allocation17 + $0x6c] ss:$16 sps:$4 sm:$0xff]  }
 0x683   : > { %8747 = vmatpush1.bf16.msra.mxu1 %v12118_v51  ;;  %8829 = vmatpush1.bf16.msra.mxu0 %v12121_v12  ;;  %v12196_v51 = vld [vmem:[#allocation17 + $0x60] ss:$16 sps:$4 sm:$0xff]   ;;  %v12199_v12 = vld [vmem:[#allocation17 + $0x68] ss:$16 sps:$4 sm:$0xff]  }
 0x684   : > { %8748 = vmatprep.subr.bf16.mxu1 %v12126_v46  ;;  %8830 = vmatprep.subr.bf16.mxu0 %v12129_v2  ;;  %v12204_v46 = vld [vmem:[#allocation17 + $0x84] ss:$16 sps:$4 sm:$0xff]   ;;  %v12207_v2 = vld [vmem:[#allocation17 + $0x8c] ss:$16 sps:$4 sm:$0xff]  }
 0x687   : > { %8749 = vmatpush1.bf16.msra.mxu1 %v12124_v25  ;;  %8831 = vmatpush1.bf16.msra.mxu0 %v12127_v49  ;;  %v12202_v25 = vld [vmem:[#allocation17 + $0x80] ss:$16 sps:$4 sm:$0xff]   ;;  %v12205_v49 = vld [vmem:[#allocation17 + $0x88] ss:$16 sps:$4 sm:$0xff]  }
 0x688   : > { %8750 = vmatprep.subr.bf16.mxu1 %v12132_v9  ;;  %8832 = vmatprep.subr.bf16.mxu0 %v12135_v60  ;;  %v12210_v9 = vld [vmem:[#allocation17 + $0xa4] ss:$16 sps:$4 sm:$0xff]   ;;  %v12213_v60 = vld [vmem:[#allocation17 + $0xac] ss:$16 sps:$4 sm:$0xff]  }
 0x68b   : > { %8751 = vmatpush1.bf16.msra.mxu1 %v12130_v17  ;;  %8833 = vmatpush1.bf16.msra.mxu0 %v12133_v0  ;;  %v12208_v17 = vld [vmem:[#allocation17 + $0xa0] ss:$16 sps:$4 sm:$0xff]   ;;  %v12211_v0 = vld [vmem:[#allocation17 + $0xa8] ss:$16 sps:$4 sm:$0xff]  }
 0x68c   : > { %8752 = vmatprep.subr.bf16.mxu1 %v12138_v55  ;;  %8834 = vmatprep.subr.bf16.mxu0 %v12141_v33  ;;  %v12216_v55 = vld [vmem:[#allocation17 + $0xc4] ss:$16 sps:$4 sm:$0xff]   ;;  %v12219_v33 = vld [vmem:[#allocation17 + $0xcc] ss:$16 sps:$4 sm:$0xff]  }
 0x68f   : > { %8753 = vmatpush1.bf16.msra.mxu1 %v12136_v11  ;;  %8835 = vmatpush1.bf16.msra.mxu0 %v12139_v61  ;;  %v12214_v11 = vld [vmem:[#allocation17 + $0xc0] ss:$16 sps:$4 sm:$0xff]   ;;  %v12217_v61 = vld [vmem:[#allocation17 + $0xc8] ss:$16 sps:$4 sm:$0xff]  }
 0x690   : > { %8754 = vmatprep.subr.bf16.mxu1 %v12144_v8  ;;  %8836 = vmatprep.subr.bf16.mxu0 %v12147_v21  ;;  %v12222_v8 = vld [vmem:[#allocation17 + $0xe4] ss:$16 sps:$4 sm:$0xff]   ;;  %v12225_v21 = vld [vmem:[#allocation17 + $0xec] ss:$16 sps:$4 sm:$0xff]  }
 0x693   : > { %8755 = vmatpush1.bf16.msra.mxu1 %v12142_v41  ;;  %8837 = vmatpush1.bf16.msra.mxu0 %v12145_v18  ;;  %v12223_v41 = vld [vmem:[#allocation17 + $0xe8] ss:$16 sps:$4 sm:$0xff]   ;;  %v12228_v18 = vld [vmem:[#allocation17 + $0x104] ss:$16 sps:$4 sm:$0xff]  }
 0x694   : > { %8756 = vmatprep.subr.bf16.mxu1 %v12150_v16  ;;  %8838 = vmatprep.subr.bf16.mxu0 %v12153_v40  ;;  %v12231_v16 = vld [vmem:[#allocation17 + $0x10c] ss:$16 sps:$4 sm:$0xff]   ;;  %v12226_v40 = vld [vmem:[#allocation17 + $0x100] ss:$16 sps:$4 sm:$0xff]  }
 0x697   : > { %8757 = vmatpush1.bf16.msra.mxu1 %v12148_v36  ;;  %8839 = vmatpush1.bf16.msra.mxu0 %v12151_v31  ;;  %v12234_v36 = vld [vmem:[#allocation17 + $0x124] ss:$16 sps:$4 sm:$0xff]   ;;  %v12237_v31 = vld [vmem:[#allocation17 + $0x12c] ss:$16 sps:$4 sm:$0xff]  }
 0x698   : > { %8758 = vmatprep.subr.bf16.mxu1 %v12156_v5  ;;  %8840 = vmatprep.subr.bf16.mxu0 %v12159_v53  ;;  %v12232_v5 = vld [vmem:[#allocation17 + $0x120] ss:$16 sps:$4 sm:$0xff]   ;;  %v12235_v53 = vld [vmem:[#allocation17 + $0x128] ss:$16 sps:$4 sm:$0xff]  }
 0x69b   : > { %8759 = vmatpush1.bf16.msra.mxu1 %v12154_v58  ;;  %8841 = vmatpush1.bf16.msra.mxu0 %v12157_v23  ;;  %v12243_v58 = vld [vmem:[#allocation17 + $0x14c] ss:$16 sps:$4 sm:$0xff]   ;;  %v12238_v23 = vld [vmem:[#allocation17 + $0x140] ss:$16 sps:$4 sm:$0xff]  }
 0x69c   : > { %8760 = vmatprep.subr.bf16.mxu1 %v12162_v45  ;;  %8842 = vmatprep.subr.bf16.mxu0 %v12165_v20  ;;  %v12241_v45 = vld [vmem:[#allocation17 + $0x148] ss:$16 sps:$4 sm:$0xff]   ;;  %v12246_v20 = vld [vmem:[#allocation17 + $0x164] ss:$16 sps:$4 sm:$0xff]  }
 0x69f   : > { %8761 = vmatpush1.bf16.msra.mxu1 %v12160_v6  ;;  %8843 = vmatpush1.bf16.msra.mxu0 %v12163_v22  ;;  %v12244_v6 = vld [vmem:[#allocation17 + $0x160] ss:$16 sps:$4 sm:$0xff]   ;;  %v12247_v22 = vld [vmem:[#allocation17 + $0x168] ss:$16 sps:$4 sm:$0xff]  }
 0x6a0   : > { %8762 = vmatprep.subr.bf16.mxu1 %v12168_v62  ;;  %8844 = vmatprep.subr.bf16.mxu0 %v12171_v39  ;;  %v12252_v62 = vld [vmem:[#allocation17 + $0x184] ss:$16 sps:$4 sm:$0xff]   ;;  %v12255_v39 = vld [vmem:[#allocation17 + $0x18c] ss:$16 sps:$4 sm:$0xff]  }
 0x6a3   : > { %8763 = vmatpush1.bf16.msra.mxu1 %v12166_v4  ;;  %8845 = vmatpush1.bf16.msra.mxu0 %v12169_v54  ;;  %v12253_v4 = vld [vmem:[#allocation17 + $0x188] ss:$16 sps:$4 sm:$0xff]   ;;  %v12258_v54 = vld [vmem:[#allocation17 + $0x1a4] ss:$16 sps:$4 sm:$0xff]  }
 0x6a4   : > { %8764 = vmatprep.subr.bf16.mxu1 %v12174_v43  ;;  %8846 = vmatprep.subr.bf16.mxu0 %v12177_v26  ;;  %v12261_v43 = vld [vmem:[#allocation17 + $0x1ac] ss:$16 sps:$4 sm:$0xff]   ;;  %v12256_v26 = vld [vmem:[#allocation17 + $0x1a0] ss:$16 sps:$4 sm:$0xff]  }
 0x6a7   : > { %8765 = vmatpush1.bf16.msra.mxu1 %v12172_v38  ;;  %8847 = vmatpush1.bf16.msra.mxu0 %v12175_v37  ;;  %v12262_v38 = vld [vmem:[#allocation17 + $0x1c0] ss:$16 sps:$4 sm:$0xff]   ;;  %v12264_v37 = vld [vmem:[#allocation17 + $0x1c4] ss:$16 sps:$4 sm:$0xff]  }
 0x6a8   : > { %9655 = vmatprep.subr.bf16.mxu1 %v12180_v44  ;;  %9737 = vmatprep.subr.bf16.mxu0 %v12183_v28  ;;  %v12267_v44 = vld [vmem:[#allocation17 + $0x1cc] ss:$16 sps:$4 sm:$0xff]   ;;  %v12270_v28 = vld [vmem:[#allocation17 + $0x1e4] ss:$16 sps:$4 sm:$0xff]  }
 0x6aa   : > { %8767 = vmatmul.mubr.bf16.vlgmr.msra.gmra.mrb[16].mxu1 %v7901_v3  ;;  %8849 = vmatmul.mubr.bf16.vlgmr.msra.gmra.mrb[48].mxu0 %v7901_v3  ;;  %v12271_v3 = vld [vmem:[#allocation17 + $0x1e8] ss:$16 sps:$4 sm:$0xff]  }
 0x6ab   : > { %9656 = vmatpush1.bf16.msra.mxu1 %v12178_v27  ;;  %9738 = vmatpush1.bf16.msra.mxu0 %v12181_v15  ;;  %v12273_v27 = vld [vmem:[#allocation17 + $0x1ec] ss:$16 sps:$4 sm:$0xff]   ;;  %v12268_v15 = vld [vmem:[#allocation17 + $0x1e0] ss:$16 sps:$4 sm:$0xff]  }
 0x6ac   : > { %9657 = vmatprep.subr.bf16.mxu1 %v12186_v29  ;;  %9739 = vmatprep.subr.bf16.mxu0 %v12189_v7  ;;  %v12276_v29 = vld [vmem:[#allocation17 + $0x204] ss:$16 sps:$4 sm:$0xff]   ;;  %v12279_v7 = vld [vmem:[#allocation17 + $0x20c] ss:$16 sps:$4 sm:$0xff]  }
 0x6af   : > { %9658 = vmatpush1.bf16.msra.mxu1 %v12184_v30  ;;  %9740 = vmatpush1.bf16.msra.mxu0 %v12187_v24  ;;  %v15028_v30 = vld [vmem:[#allocation15] sm:$0xf] }
 0x6b0   : > { %9659 = vmatprep.subr.bf16.mxu1 %v12192_v10  ;;  %9741 = vmatprep.subr.bf16.mxu0 %v12195_v56  ;;  %v8676_v24 = vrot.slane %v15028_v30, %v14044_v48  ;;  %v8680_v10 = vrot.slane %v15028_v30, %v14636_v57  ;;  %v8688_v56 = vrot.slane %v15028_v30, %v14639_v19 }
 0x6b3   : > { %9660 = vmatpush1.bf16.msra.mxu1 %v12190_v13  ;;  %9742 = vmatpush1.bf16.msra.mxu0 %v12193_v50 }
 0x6b4   : > { %9661 = vmatprep.subr.bf16.mxu1 %v12198_v35  ;;  %9743 = vmatprep.subr.bf16.mxu0 %v12201_v47 }
 0x6b7   : > { %9662 = vmatpush1.bf16.msra.mxu1 %v12196_v51  ;;  %9744 = vmatpush1.bf16.msra.mxu0 %v12199_v12 }
 0x6b8   : > { %9663 = vmatprep.subr.bf16.mxu1 %v12204_v46  ;;  %9745 = vmatprep.subr.bf16.mxu0 %v12207_v2 }
 0x6bb   : > { %9664 = vmatpush1.bf16.msra.mxu1 %v12202_v25  ;;  %9746 = vmatpush1.bf16.msra.mxu0 %v12205_v49 }
 0x6bc   : > { %9665 = vmatprep.subr.bf16.mxu1 %v12210_v9  ;;  %9747 = vmatprep.subr.bf16.mxu0 %v12213_v60 }
 0x6bf   : > { %9666 = vmatpush1.bf16.msra.mxu1 %v12208_v17  ;;  %9748 = vmatpush1.bf16.msra.mxu0 %v12211_v0 }
 0x6c0   : > { %9667 = vmatprep.subr.bf16.mxu1 %v12216_v55  ;;  %9749 = vmatprep.subr.bf16.mxu0 %v12219_v33  ;;  %v12274_v33 = vld [vmem:[#allocation17 + $0x200] ss:$16 sps:$4 sm:$0xff]  }
 0x6c3   : > { %9668 = vmatpush1.bf16.msra.mxu1 %v12214_v11  ;;  %9750 = vmatpush1.bf16.msra.mxu0 %v12217_v61  ;;  %v12277_v11 = vld [vmem:[#allocation17 + $0x208] ss:$16 sps:$4 sm:$0xff]  }
 0x6c4   : > { %9669 = vmatprep.subr.bf16.mxu1 %v12222_v8  ;;  %9751 = vmatprep.subr.bf16.mxu0 %v12225_v21  ;;  %v12282_v8 = vld [vmem:[#allocation17 + $0x224] ss:$16 sps:$4 sm:$0xff]   ;;  %v12285_v21 = vld [vmem:[#allocation17 + $0x22c] ss:$16 sps:$4 sm:$0xff]  }
 0x6c7   : > { %9670 = vmatpush1.bf16.msra.mxu1 %v12220_v42  ;;  %9752 = vmatpush1.bf16.msra.mxu0 %v12223_v41  ;;  %v12280_v41 = vld [vmem:[#allocation17 + $0x220] ss:$16 sps:$4 sm:$0xff]  }
 0x6c8   : > { %9671 = vmatprep.subr.bf16.mxu1 %v12228_v18  ;;  %9753 = vmatprep.subr.bf16.mxu0 %v12231_v16  ;;  %v12283_v18 = vld [vmem:[#allocation17 + $0x228] ss:$16 sps:$4 sm:$0xff]   ;;  %v12288_v16 = vld [vmem:[#allocation17 + $0x244] ss:$16 sps:$4 sm:$0xff]  }
 0x6cb   : > { %9672 = vmatpush1.bf16.msra.mxu1 %v12226_v40  ;;  %9754 = vmatpush1.bf16.msra.mxu0 %v12229_v52  ;;  %v12291_v40 = vld [vmem:[#allocation17 + $0x24c] ss:$16 sps:$4 sm:$0xff]   ;;  %v12286_v52 = vld [vmem:[#allocation17 + $0x240] ss:$16 sps:$4 sm:$0xff]  }
 0x6cc   : > { %9673 = vmatprep.subr.bf16.mxu1 %v12234_v36  ;;  %9755 = vmatprep.subr.bf16.mxu0 %v12237_v31  ;;  %v12289_v36 = vld [vmem:[#allocation17 + $0x248] ss:$16 sps:$4 sm:$0xff]   ;;  %v12294_v31 = vld [vmem:[#allocation17 + $0x264] ss:$16 sps:$4 sm:$0xff]  }
 0x6cf   : > { %9674 = vmatpush1.bf16.msra.mxu1 %v12232_v5  ;;  %9756 = vmatpush1.bf16.msra.mxu0 %v12235_v53  ;;  %v12297_v5 = vld [vmem:[#allocation17 + $0x26c] ss:$16 sps:$4 sm:$0xff]   ;;  %v12292_v53 = vld [vmem:[#allocation17 + $0x260] ss:$16 sps:$4 sm:$0xff]  }
 0x6d0   : > { %9675 = vmatprep.subr.bf16.mxu1 %v12240_v32  ;;  %9757 = vmatprep.subr.bf16.mxu0 %v12243_v58  ;;  %v12295_v32 = vld [vmem:[#allocation17 + $0x268] ss:$16 sps:$4 sm:$0xff]   ;;  %v12300_v58 = vld [vmem:[#allocation17 + $0x284] ss:$16 sps:$4 sm:$0xff]  }
 0x6d3   : > { %9676 = vmatpush1.bf16.msra.mxu1 %v12238_v23  ;;  %9758 = vmatpush1.bf16.msra.mxu0 %v12241_v45  ;;  %v12303_v23 = vld [vmem:[#allocation17 + $0x28c] ss:$16 sps:$4 sm:$0xff]   ;;  %v12298_v45 = vld [vmem:[#allocation17 + $0x280] ss:$16 sps:$4 sm:$0xff]  }
 0x6d4   : > { %9677 = vmatprep.subr.bf16.mxu1 %v12246_v20  ;;  %9759 = vmatprep.subr.bf16.mxu0 %v12249_v14  ;;  %v12301_v20 = vld [vmem:[#allocation17 + $0x288] ss:$16 sps:$4 sm:$0xff]   ;;  %v12306_v14 = vld [vmem:[#allocation17 + $0x2a4] ss:$16 sps:$4 sm:$0xff]  }
 0x6d7   : > { %9678 = vmatpush1.bf16.msra.mxu1 %v12244_v6  ;;  %9760 = vmatpush1.bf16.msra.mxu0 %v12247_v22  ;;  %v12309_v6 = vld [vmem:[#allocation17 + $0x2ac] ss:$16 sps:$4 sm:$0xff]   ;;  %v12304_v22 = vld [vmem:[#allocation17 + $0x2a0] ss:$16 sps:$4 sm:$0xff]  }
 0x6d8   : > { %9679 = vmatprep.subr.bf16.mxu1 %v12252_v62  ;;  %9761 = vmatprep.subr.bf16.mxu0 %v12255_v39  ;;  %v12307_v62 = vld [vmem:[#allocation17 + $0x2a8] ss:$16 sps:$4 sm:$0xff]   ;;  %v12312_v39 = vld [vmem:[#allocation17 + $0x2c4] ss:$16 sps:$4 sm:$0xff]  }
 0x6db   : > { %9680 = vmatpush1.bf16.msra.mxu1 %v12250_v63  ;;  %9762 = vmatpush1.bf16.msra.mxu0 %v12253_v4  ;;  %v12315_v63 = vld [vmem:[#allocation17 + $0x2cc] ss:$16 sps:$4 sm:$0xff]   ;;  %v12310_v4 = vld [vmem:[#allocation17 + $0x2c0] ss:$16 sps:$4 sm:$0xff]  }
 0x6dc   : > { %9681 = vmatprep.subr.bf16.mxu1 %v12258_v54  ;;  %9763 = vmatprep.subr.bf16.mxu0 %v12261_v43  ;;  %v12313_v54 = vld [vmem:[#allocation17 + $0x2c8] ss:$16 sps:$4 sm:$0xff]   ;;  %v12318_v43 = vld [vmem:[#allocation17 + $0x2e4] ss:$16 sps:$4 sm:$0xff]  }
 0x6df   : > { %9682 = vmatpush1.bf16.msra.mxu1 %v12256_v26  ;;  %9764 = vmatpush1.bf16.msra.mxu0 %v12259_v34  ;;  %v12321_v26 = vld [vmem:[#allocation17 + $0x2ec] ss:$16 sps:$4 sm:$0xff]   ;;  %v12316_v34 = vld [vmem:[#allocation17 + $0x2e0] ss:$16 sps:$4 sm:$0xff]  }
 0x6e0   : > { %9683 = vmatprep.subr.bf16.mxu1 %v12264_v37  ;;  %9765 = vmatprep.subr.bf16.mxu0 %v12267_v44  ;;  %v12324_v37 = vld [vmem:[#allocation17 + $0x304] ss:$16 sps:$4 sm:$0xff]   ;;  %v12322_v44 = vld [vmem:[#allocation17 + $0x300] ss:$16 sps:$4 sm:$0xff]  }
 0x6e3   : > { %9684 = vmatpush1.bf16.msra.mxu1 %v12262_v38  ;;  %9766 = vmatpush1.bf16.msra.mxu0 %v12265_v59  ;;  %v12319_v38 = vld [vmem:[#allocation17 + $0x2e8] ss:$16 sps:$4 sm:$0xff]   ;;  %v12327_v59 = vld [vmem:[#allocation17 + $0x30c] ss:$16 sps:$4 sm:$0xff]  }
 0x6e4   : > { %9685 = vmatprep.subr.bf16.mxu1 %v12270_v28  ;;  %9767 = vmatprep.subr.bf16.mxu0 %v12273_v27  ;;  %v12325_v28 = vld [vmem:[#allocation17 + $0x308] ss:$16 sps:$4 sm:$0xff]   ;;  %v12330_v27 = vld [vmem:[#allocation17 + $0x324] ss:$16 sps:$4 sm:$0xff]  }
 0x6e7   : > { %9686 = vmatpush1.bf16.msra.mxu1 %v12268_v15  ;;  %9768 = vmatpush1.bf16.msra.mxu0 %v12271_v3  ;;  %v12333_v15 = vld [vmem:[#allocation17 + $0x32c] ss:$16 sps:$4 sm:$0xff]   ;;  %v12328_v3 = vld [vmem:[#allocation17 + $0x320] ss:$16 sps:$4 sm:$0xff]  }
 0x6e8   : > { %9696 = vmatprep.subr.bf16.mxu1 %v12276_v29  ;;  %9778 = vmatprep.subr.bf16.mxu0 %v12279_v7  ;;  %v12331_v29 = vld [vmem:[#allocation17 + $0x328] ss:$16 sps:$4 sm:$0xff]   ;;  %v12336_v7 = vld [vmem:[#allocation17 + $0x344] ss:$16 sps:$4 sm:$0xff]  }
 0x77d   : > { %v8768_v13 = vpop.f32.mrb[16].mxu1  ;;  %v15036_v50 = vpop.f32.mrb[48].mxu0 }
 0x77e   : > { %v11246_v35 = vadd.f32 %v8768_v13, %v8676_v24  ;;  %v8770_v47 = vpop.f32.mrb[17].mxu1  ;;  %v8852_v51 = vpop.f32.mrb[49].mxu0  ;;  %v12339_v24 = vld [vmem:[#allocation17 + $0x34c] ss:$16 sps:$4 sm:$0xff]   ;;  %v12342_v13 = vld [vmem:[#allocation17 + $0x364] ss:$16 sps:$4 sm:$0xff]  }
 0x77f   : > { %v11247_v12 = vadd.f32 %v8770_v47, %v8680_v10  ;;  %v11249_v46 = vadd.f32 %v8852_v51, %v8688_v56  ;;  %v8772_v2 = vpop.f32.mrb[18].mxu1  ;;  %v8854_v25 = vpop.f32.mrb[50].mxu0  ;;  %v12334_v10 = vld [vmem:[#allocation17 + $0x340] ss:$16 sps:$4 sm:$0xff]   ;;  %v12337_v56 = vld [vmem:[#allocation17 + $0x348] ss:$16 sps:$4 sm:$0xff]  }
 0x780   : > { %v8857_v49 = vmax.f32 %v11246_v35, 0.0  ;;  %v8773_v9 = vpop.f32.mrb[19].mxu1  ;;  %v8855_v60 = vpop.f32.mrb[51].mxu0  ;;  %v12345_v35 = vld [vmem:[#allocation17 + $0x36c] ss:$16 sps:$4 sm:$0xff]  }
 0x781   : > { %v8858_v17 = vmax.f32 %v11247_v12, 0.0  ;;  %v8860_v0 = vmax.f32 %v11249_v46, 0.0  ;;  %v12340_v47 = vld [vmem:[#allocation17 + $0x360] ss:$16 sps:$4 sm:$0xff]   ;;  %v12343_v51 = vld [vmem:[#allocation17 + $0x368] ss:$16 sps:$4 sm:$0xff]  }
 0x782   : > { %v8861_v61 = vpack.c.bf16 %v8857_v49, %v8857_v49  ;;  %v12348_v12 = vld [vmem:[#allocation17 + $0x384] ss:$16 sps:$4 sm:$0xff]   ;;  %v12351_v46 = vld [vmem:[#allocation17 + $0x38c] ss:$16 sps:$4 sm:$0xff]   ;;  %v12346_v2 = vld [vmem:[#allocation17 + $0x380] ss:$16 sps:$4 sm:$0xff]  }
 0x783   : > { %v8862_v55 = vpack.c.bf16 %v8858_v17, %v8858_v17  ;;  %v8864_v42 = vpack.c.bf16 %v8860_v0, %v8860_v0  ;;  %v12349_v25 = vld [vmem:[#allocation17 + $0x388] ss:$16 sps:$4 sm:$0xff]   ;;  %v12354_v49 = vld [vmem:[#allocation17 + $0x3a4] ss:$16 sps:$4 sm:$0xff]   ;;  %v12357_v9 = vld [vmem:[#allocation17 + $0x3ac] ss:$16 sps:$4 sm:$0xff]   ;;  %v8684_v0 = vrot.slane %v15028_v30, %v14633_v1 }
 0x784   : > { %v12352_v60 = vld [vmem:[#allocation17 + $0x3a0] ss:$16 sps:$4 sm:$0xff]   ;;  %v12355_v17 = vld [vmem:[#allocation17 + $0x3a8] ss:$16 sps:$4 sm:$0xff]  }
 0x785   : > { %9687 = vmatprep.mubr.bf16.mxu1 %v8862_v55  ;;  %9769 = vmatprep.mubr.bf16.mxu0 %v8862_v55  ;;  %v12360_v55 = vld [vmem:[#allocation17 + $0x3c4] ss:$16 sps:$4 sm:$0xff]  }
 0x786   : > { %9688 = vmatmul.mubr.bf16.vlgmr.msra.gmra.mrb[20].mxu1 %v8861_v61  ;;  %9770 = vmatmul.mubr.bf16.vlgmr.msra.gmra.mrb[52].mxu0 %v8861_v61  ;;  %v12361_v61 = vld [vmem:[#allocation17 + $0x3c8] ss:$16 sps:$4 sm:$0xff]  }
 0x787   : > { %9697 = vmatpush1.bf16.msra.mxu1 %v12274_v33  ;;  %9779 = vmatpush1.bf16.msra.mxu0 %v12277_v11  ;;  %v12363_v33 = vld [vmem:[#allocation17 + $0x3cc] ss:$16 sps:$4 sm:$0xff]   ;;  %v12358_v11 = vld [vmem:[#allocation17 + $0x3c0] ss:$16 sps:$4 sm:$0xff]   ;;  %v12370_v30 = vld [vmem:[#allocation20 + $0x40] sm:$0xff]  }
 0x788   : > { %9728 = vmatprep.mubr.bf16.mxu1 %v8864_v42  ;;  %9810 = vmatprep.mubr.bf16.mxu0 %v8864_v42  ;;  %v12369_v42 = vld [vmem:[#allocation17 + $0x3ec] ss:$16 sps:$4 sm:$0xff]  }
 0x789   : > { %9698 = vmatprep.subr.bf16.mxu1 %v12282_v8  ;;  %9780 = vmatprep.subr.bf16.mxu0 %v12285_v21  ;;  %v11248_v8 = vadd.f32 %v15036_v50, %v8684_v0  ;;  %v12366_v21 = vld [vmem:[#allocation17 + $0x3e4] ss:$16 sps:$4 sm:$0xff]   ;;  %v12374_v50 = vld [vmem:[#allocation20 + $0x48] sm:$0xff]  }
 0x78b   : > { %9699 = vmatpush1.bf16.msra.mxu1 %v12280_v41  ;;  %9781 = vmatpush1.bf16.msra.mxu0 %v12283_v18  ;;  %v12364_v41 = vld [vmem:[#allocation17 + $0x3e0] ss:$16 sps:$4 sm:$0xff]   ;;  %v12367_v18 = vld [vmem:[#allocation17 + $0x3e8] ss:$16 sps:$4 sm:$0xff]  }
 0x78c   : > { %9700 = vmatprep.subr.bf16.mxu1 %v12288_v16  ;;  %9782 = vmatprep.subr.bf16.mxu0 %v12291_v40  ;;  %v8859_v16 = vmax.f32 %v11248_v8, 0.0  ;;  %v12371_v40 = vld [vmem:[#allocation20 + $0xc0] sm:$0xff]  }
 0x78f   : > { %9701 = vmatpush1.bf16.msra.mxu1 %v12286_v52  ;;  %9783 = vmatpush1.bf16.msra.mxu0 %v12289_v36  ;;  %v12372_v52 = vld [vmem:[#allocation20] sm:$0xff]  }
 0x790   : > { %9702 = vmatprep.subr.bf16.mxu1 %v12294_v31  ;;  %9784 = vmatprep.subr.bf16.mxu0 %v12297_v5  ;;  %v12373_v36 = vld [vmem:[#allocation20 + $0x80] sm:$0xff]   ;;  %v8863_v31 = vpack.c.bf16 %v8859_v16, %v8859_v16  ;;  %v12375_v5 = vld [vmem:[#allocation20 + $0xc8] sm:$0xff]  }
 0x793   : > { %9703 = vmatpush1.bf16.msra.mxu1 %v12292_v53  ;;  %9785 = vmatpush1.bf16.msra.mxu0 %v12295_v32  ;;  %v12376_v53 = vld [vmem:[#allocation20 + $0x8] sm:$0xff]  }
 0x794   : > { %9704 = vmatprep.subr.bf16.mxu1 %v12300_v58  ;;  %9786 = vmatprep.subr.bf16.mxu0 %v12303_v23  ;;  %v12377_v32 = vld [vmem:[#allocation20 + $0x88] sm:$0xff]   ;;  %v12378_v58 = vld [vmem:[#allocation20 + $0x50] sm:$0xff]  }
 0x795   : > { %v12379_v23 = vld [vmem:[#allocation20 + $0xd0] sm:$0xff]  }
 0x797   : > { %9705 = vmatpush1.bf16.msra.mxu1 %v12298_v45  ;;  %9787 = vmatpush1.bf16.msra.mxu0 %v12301_v20  ;;  %v12380_v45 = vld [vmem:[#allocation20 + $0x10] sm:$0xff]  }
 0x798   : > { %9706 = vmatprep.subr.bf16.mxu1 %v12306_v14  ;;  %9788 = vmatprep.subr.bf16.mxu0 %v12309_v6  ;;  %v12381_v20 = vld [vmem:[#allocation20 + $0x90] sm:$0xff]   ;;  %v12382_v14 = vld [vmem:[#allocation20 + $0x58] sm:$0xff]  }
 0x799   : > { %v12383_v6 = vld [vmem:[#allocation20 + $0xd8] sm:$0xff]  }
 0x79b   : > { %9707 = vmatpush1.bf16.msra.mxu1 %v12304_v22  ;;  %9789 = vmatpush1.bf16.msra.mxu0 %v12307_v62  ;;  %v12384_v22 = vld [vmem:[#allocation20 + $0x18] sm:$0xff]  }
 0x79c   : > { %9708 = vmatprep.subr.bf16.mxu1 %v12312_v39  ;;  %9790 = vmatprep.subr.bf16.mxu0 %v12315_v63  ;;  %v12385_v62 = vld [vmem:[#allocation20 + $0x98] sm:$0xff]   ;;  %v12386_v39 = vld [vmem:[#allocation20 + $0x60] sm:$0xff]  }
 0x79d   : > { %v12387_v63 = vld [vmem:[#allocation20 + $0xe0] sm:$0xff]  }
 0x79f   : > { %9709 = vmatpush1.bf16.msra.mxu1 %v12310_v4  ;;  %9791 = vmatpush1.bf16.msra.mxu0 %v12313_v54  ;;  %v12388_v4 = vld [vmem:[#allocation20 + $0x20] sm:$0xff]  }
 0x7a0   : > { %9710 = vmatprep.subr.bf16.mxu1 %v12318_v43  ;;  %9792 = vmatprep.subr.bf16.mxu0 %v12321_v26  ;;  %v12389_v54 = vld [vmem:[#allocation20 + $0xa0] sm:$0xff]   ;;  %v12390_v43 = vld [vmem:[#allocation20 + $0x68] sm:$0xff]  }
 0x7a1   : > { %v12391_v26 = vld [vmem:[#allocation20 + $0xe8] sm:$0xff]  }
 0x7a3   : > { %9711 = vmatpush1.bf16.msra.mxu1 %v12316_v34  ;;  %9793 = vmatpush1.bf16.msra.mxu0 %v12319_v38  ;;  %v12392_v34 = vld [vmem:[#allocation20 + $0x28] sm:$0xff]  }
 0x7a4   : > { %9712 = vmatprep.subr.bf16.mxu1 %v12324_v37  ;;  %9794 = vmatprep.subr.bf16.mxu0 %v12327_v59  ;;  %v12393_v38 = vld [vmem:[#allocation20 + $0xa8] sm:$0xff]   ;;  %v12394_v37 = vld [vmem:[#allocation20 + $0x70] sm:$0xff]  }
 0x7a5   : > { %v12395_v59 = vld [vmem:[#allocation20 + $0xf0] sm:$0xff]  }
 0x7a7   : > { %9713 = vmatpush1.bf16.msra.mxu1 %v12322_v44  ;;  %9795 = vmatpush1.bf16.msra.mxu0 %v12325_v28  ;;  %v12396_v44 = vld [vmem:[#allocation20 + $0x30] sm:$0xff]  }
 0x7a8   : > { %9714 = vmatprep.subr.bf16.mxu1 %v12330_v27  ;;  %9796 = vmatprep.subr.bf16.mxu0 %v12333_v15  ;;  %v12397_v28 = vld [vmem:[#allocation20 + $0xb0] sm:$0xff]   ;;  %v12398_v27 = vld [vmem:[#allocation20 + $0x78] sm:$0xff]  }
 0x7a9   : > { %v12399_v15 = vld [vmem:[#allocation20 + $0xf8] sm:$0xff]  }
 0x7ab   : > { %9715 = vmatpush1.bf16.msra.mxu1 %v12328_v3  ;;  %9797 = vmatpush1.bf16.msra.mxu0 %v12331_v29  ;;  %v12400_v3 = vld [vmem:[#allocation20 + $0x38] sm:$0xff]  }
 0x7ac   : > { %9716 = vmatprep.subr.bf16.mxu1 %v12336_v7  ;;  %9798 = vmatprep.subr.bf16.mxu0 %v12339_v24  ;;  %v12401_v29 = vld [vmem:[#allocation20 + $0xb8] sm:$0xff]  }
 0x7ad   : > { %v8993_v7 = vld [vmem:[#allocation18] sm:$0xf] }
 0x7ae   : > { %v9638_v24 = vrot.slane %v8993_v7, %v14044_v48 }
 0x7af   : > { %9717 = vmatpush1.bf16.msra.mxu1 %v12334_v10  ;;  %9799 = vmatpush1.bf16.msra.mxu0 %v12337_v56  ;;  %v9646_v10 = vrot.slane %v8993_v7, %v14633_v1  ;;  %v9642_v56 = vrot.slane %v8993_v7, %v14636_v57 }
 0x7b0   : > { %9718 = vmatprep.subr.bf16.mxu1 %v12342_v13  ;;  %9800 = vmatprep.subr.bf16.mxu0 %v12345_v35  ;;  %v9650_v13 = vrot.slane %v8993_v7, %v14639_v19 }
 0x7b3   : > { %9719 = vmatpush1.bf16.msra.mxu1 %v12340_v47  ;;  %9801 = vmatpush1.bf16.msra.mxu0 %v12343_v51 }
 0x7b4   : > { %9720 = vmatprep.subr.bf16.mxu1 %v12348_v12  ;;  %9802 = vmatprep.subr.bf16.mxu0 %v12351_v46 }
 0x7b7   : > { %9721 = vmatpush1.bf16.msra.mxu1 %v12346_v2  ;;  %9803 = vmatpush1.bf16.msra.mxu0 %v12349_v25 }
 0x7b8   : > { %9722 = vmatprep.subr.bf16.mxu1 %v12354_v49  ;;  %9804 = vmatprep.subr.bf16.mxu0 %v12357_v9 }
 0x7bb   : > { %9723 = vmatpush1.bf16.msra.mxu1 %v12352_v60  ;;  %9805 = vmatpush1.bf16.msra.mxu0 %v12355_v17 }
 0x7bc   : > { %9724 = vmatprep.subr.bf16.mxu1 %v12360_v55  ;;  %9806 = vmatprep.subr.bf16.mxu0 %v12363_v33 }
 0x7bf   : > { %9725 = vmatpush1.bf16.msra.mxu1 %v12358_v11  ;;  %9807 = vmatpush1.bf16.msra.mxu0 %v12361_v61 }
 0x7c0   : > { %9726 = vmatprep.subr.bf16.mxu1 %v12366_v21  ;;  %9808 = vmatprep.subr.bf16.mxu0 %v12369_v42  ;;  %v9891_v42 = vld [vmem:[#allocation21] sm:$0x1] }
 0x7c3   : > { %9727 = vmatpush1.bf16.msra.mxu1 %v12364_v41  ;;  %9809 = vmatpush1.bf16.msra.mxu0 %v12367_v18 }
 0x7c4   : > { %11134 = vmatprep.subr.bf16.mxu1 %v12370_v30  ;;  %11156 = vmatprep.subr.bf16.mxu0 %v12371_v40 }
 0x7c6   : > { %9729 = vmatmul.mubr.bf16.vlgmr.msra.gmra.mrb[20].mxu1 %v8863_v31  ;;  %9811 = vmatmul.mubr.bf16.vlgmr.msra.gmra.mrb[52].mxu0 %v8863_v31 }
 0x7c7   : > { %11135 = vmatpush3.bf16.msra.mxu1 %v12372_v52  ;;  %11157 = vmatpush3.bf16.msra.mxu0 %v12373_v36 }
 0x7c8   : > { %11136 = vmatprep.subr.bf16.mxu1 %v12374_v50  ;;  %11158 = vmatprep.subr.bf16.mxu0 %v12375_v5 }
 0x7cb   : > { %11137 = vmatpush3.bf16.msra.mxu1 %v12376_v53  ;;  %11159 = vmatpush3.bf16.msra.mxu0 %v12377_v32 }
 0x7cc   : > { %11138 = vmatprep.subr.bf16.mxu1 %v12378_v58  ;;  %11160 = vmatprep.subr.bf16.mxu0 %v12379_v23 }
 0x7cf   : > { %11139 = vmatpush3.bf16.msra.mxu1 %v12380_v45  ;;  %11161 = vmatpush3.bf16.msra.mxu0 %v12381_v20 }
 0x7d0   : > { %11140 = vmatprep.subr.bf16.mxu1 %v12382_v14  ;;  %11162 = vmatprep.subr.bf16.mxu0 %v12383_v6 }
 0x7d3   : > { %11141 = vmatpush3.bf16.msra.mxu1 %v12384_v22  ;;  %11163 = vmatpush3.bf16.msra.mxu0 %v12385_v62 }
 0x7d4   : > { %11142 = vmatprep.subr.bf16.mxu1 %v12386_v39  ;;  %11164 = vmatprep.subr.bf16.mxu0 %v12387_v63 }
 0x7d7   : > { %11143 = vmatpush3.bf16.msra.mxu1 %v12388_v4  ;;  %11165 = vmatpush3.bf16.msra.mxu0 %v12389_v54 }
 0x7d8   : > { %11144 = vmatprep.subr.bf16.mxu1 %v12390_v43  ;;  %11166 = vmatprep.subr.bf16.mxu0 %v12391_v26 }
 0x7db   : > { %11145 = vmatpush3.bf16.msra.mxu1 %v12392_v34  ;;  %11167 = vmatpush3.bf16.msra.mxu0 %v12393_v38 }
 0x7dc   : > { %11146 = vmatprep.subr.bf16.mxu1 %v12394_v37  ;;  %11168 = vmatprep.subr.bf16.mxu0 %v12395_v59 }
 0x7df   : > { %11147 = vmatpush3.bf16.msra.mxu1 %v12396_v44  ;;  %11169 = vmatpush3.bf16.msra.mxu0 %v12397_v28 }
 0x7e0   : > { %11148 = vmatprep.subr.bf16.mxu1 %v12398_v27  ;;  %11170 = vmatprep.subr.bf16.mxu0 %v12399_v15 }
 0x7e3   : > { %11149 = vmatpush3.bf16.msra.mxu1 %v12400_v3  ;;  %11171 = vmatpush3.bf16.msra.mxu0 %v12401_v29 }
 0x899   : > { %v9730_v35 = vpop.f32.mrb[20].mxu1  ;;  %v9812_v47 = vpop.f32.mrb[52].mxu0 }
 0x89a   : > { %v11250_v51 = vadd.f32 %v9730_v35, %v9638_v24  ;;  %v11252_v12 = vadd.f32 %v9812_v47, %v9646_v10  ;;  %v9732_v46 = vpop.f32.mrb[21].mxu1  ;;  %v9814_v2 = vpop.f32.mrb[53].mxu0 }
 0x89b   : > { %v11251_v25 = vadd.f32 %v9732_v46, %v9642_v56  ;;  %v11253_v49 = vadd.f32 %v9814_v2, %v9650_v13  ;;  %v9734_v9 = vpop.f32.mrb[22].mxu1  ;;  %v9816_v60 = vpop.f32.mrb[54].mxu0 }
 0x89c   : > { %v9819_v17 = vmax.f32 %v11250_v51, 0.0  ;;  %v9821_v0 = vmax.f32 %v11252_v12, 0.0  ;;  %v9735_v48 = vpop.f32.mrb[23].mxu1  ;;  %v9817_v55 = vpop.f32.mrb[55].mxu0 }
 0x89d   : > { %v9820_v1 = vmax.f32 %v11251_v25, 0.0  ;;  %v9822_v33 = vmax.f32 %v11253_v49, 0.0 }
 0x89e   : > { %v9823_v19 = vpack.c.bf16 %v9819_v17, %v9819_v17  ;;  %v9825_v61 = vpack.c.bf16 %v9821_v0, %v9821_v0 }
 0x89f   : > { %v9824_v57 = vpack.c.bf16 %v9820_v1, %v9820_v1  ;;  %v9826_v11 = vpack.c.bf16 %v9822_v33, %v9822_v33 }
 0x8a1   : > { %10116 = vmatprep.mubr.bf16.mxu1 %v9824_v57  ;;  %10156 = vmatprep.mubr.bf16.mxu0 %v9826_v11 }
 0x8a2   : > { %10117 = vmatmul.mubr.bf16.vlgmr.msra.gmra.mrb[24].mxu1 %v9823_v19  ;;  %10157 = vmatmul.mubr.bf16.vlgmr.msra.gmra.mrb[56].mxu0 %v9825_v61 }
 0x975   : > { %v11150_v8 = vpop.f32.mrb[24].mxu1  ;;  %v11172_v21 = vpop.f32.mrb[56].mxu0 }
 0x976   : > { %v11151_v41 = vpop.f32.mrb[25].mxu1  ;;  %v11173_v18 = vpop.f32.mrb[57].mxu0 }
 0x977   : > { %v11152_v16 = vadd.f32 %v11151_v41, %v11150_v8  ;;  %v11174_v30 = vadd.f32 %v11173_v18, %v11172_v21  ;;  %v11153_v40 = vpop.f32.mrb[26].mxu1  ;;  %v11175_v52 = vpop.f32.mrb[58].mxu0 }
 0x978   : > { %v11154_v36 = vpop.f32.mrb[27].mxu1  ;;  %v11176_v31 = vpop.f32.mrb[59].mxu0 }
 0x979   : > { %v10119_v50 = vadd.f32 %v11152_v16, %v9891_v42 }
 0x97b   : > { %v10159_v5 = vadd.f32 %v11174_v30, %v10119_v50 }
 0x97d   : > { %10164 = vst [vmem:[%s514_s19] sm:$0x1] %v10159_v5 }
 0x97e   : > { %12699 = shalt.err (!%p12696_p10)
}
 0x97f   : > { %s12700_s23 = scalar_lea.hbm %s15050_s13, 16  ;;  %s12704_s16 = scalar_lea.hbm %s15103_s11, 32 }
 0x980   : > { %p12701_p2 = scmp.ne.s32.totalorder %s15050_s13, %s12700_s23  ;;  %p12705_p7 = scmp.lt.u32.totalorder %s15050_s13, %s15103_s11 }
 0x981   : > { %p12706_p8 = scmp.lt.u32.totalorder %s12704_s16, %s12700_s23  ;;  %p12708_p13 = scmp.lt.u32.totalorder %s12700_s23, %s15050_s13 }
 0x982   : > { %p12702_p3 = pnand %p12701_p2, %p15163_p0 }
 0x983   : > { %p12707_p11 = por %p12706_p8, %p12705_p7 }
 0x984   : > { %p12703_p4 = pneg %p12702_p3 }
 0x985   : > { %p12709_p1 = por %p12708_p13, %p12707_p11 }
 0x987   : > { %p12710_p6 = pnand %p12709_p1, %p12703_p4 }
 0x989   : > { %12713 = shalt.err (!%p12710_p6)
}
 0x98a   : > { %11438 = dma.vmem_to_hbm [thread:$0]  (%p15163_p0), %s15052_s26, 16, %s15050_s13, %s10166_s14  }
 0x98b PF: > { %s15164_s30 = sld [smem:[#allocation31_spill]]  ;;  %s15165_s28 = sld [smem:[#allocation35_spill]] }
 0x98c   : > { %p11495_p5 = scmp.ge.s32.totalorder %s12772_s20, 2 }
 0x991   : > { %s10190_s19 = sand.u32 1, %s15164_s30   ;;  %p15166_p9 = scmp.ne.s32.totalorder %s15165_s28, 0 }
 0x992   : > { %s10191_s29 = scalar_lea.sflag [#allocation8], %s10190_s19 }
 0x993   : > { %p11472_p12 = pnand %p11495_p5, %p15166_p9 }
 0x995   : > { %12755 = dma.done.wait (!%p11472_p12), %s10191_s29, 16  }
 0x996   : > { %12757 = vsyncadd (!%p11472_p12), %s10191_s29, 4294967280  ;;  %s15167_s20 = sld [smem:[#allocation33_spill]]  ;;  %s15168_s15 = sld [smem:[#allocation32_spill]] }
 0x997   : > { %s15169_s19 = sld [smem:[#allocation34_spill]]  ;;  %s15170_s17 = smov %s12764_s18 }
 0x99c   : > { %p27_p10 = scmp.ge.s32.totalorder %s15167_s20, 4   ;;  %s15171_s18 = smov %s15168_s15 }
 0x99e   :  { %29 = sbr.rel (!%p27_p10) target bundleno = 12 (0xc), region = 144 }
 0x9a5   :  { %10195 = vsyncpa [#allocation7], 1 }
 0x9a6   :  { %10197 = vsyncpa [#allocation7 + $0x1], 1 }
 0x9a7   :  { %10198 = vsyncpa [#allocation10], 1 }
 0x9a8   :  { %10199 = vsyncpa [#allocation13], 1 }
 0x9a9   :  { %10200 = vsyncpa [#allocation16], 1 }
 0x9aa   :  { %10201 = vsyncpa [#allocation19], 1 }
 0x9ab   :  { %10202 = vsyncpa [#allocation22], 1 }
 0x9ac   :  { %10203 = vsyncpa [#allocation8], 1 }
 0x9ad   :  { %10205 = vsyncpa [#allocation8 + $0x1], 1 }

</bundles_post_ra>
